<compile_context>
chip_gen: v7x
topology: tpu7x:2x2x1
jax: 0.10.0
libtpu: 0.0.40
codegen_flags: <defaults>
</compile_context>

<pallas_src>
import jax
import jax.numpy as jnp
from jax.experimental import pallas as pl
from jax.experimental.pallas import tpu as pltpu


def _pick_row_tile(rows):
    for t in (512, 256, 128, 64, 32, 16, 8):
        if rows % t == 0:
            return t
    return rows  # single full block (still legal: block == full dim)


# --------------- fused q/k/v 1x1 conv (bf16 matmul) + bias ------------------
def _matmul_bias_kernel(x_ref, w_ref, b_ref, o_ref):
    o_ref[...] = (
        jnp.dot(x_ref[...].astype(jnp.bfloat16), w_ref[...],
                preferred_element_type=jnp.float32)
        + b_ref[...]
    )


def conv1x1_bias(x_rows, w_bf16, b):
    n, k = x_rows.shape
    cout = w_bf16.shape[1]
    tr = _pick_row_tile(n)
    return pl.pallas_call(
        _matmul_bias_kernel,
        grid=(n // tr,),
        in_specs=[
            pl.BlockSpec((tr, k), lambda i: (i, 0)),
            pl.BlockSpec((k, cout), lambda i: (0, 0)),
            pl.BlockSpec((1, cout), lambda i: (0, 0)),
        ],
        out_specs=pl.BlockSpec((tr, cout), lambda i: (i, 0)),
        out_shape=jax.ShapeDtypeStruct((n, cout), jnp.float32),
        compiler_params=pltpu.CompilerParams(dimension_semantics=("parallel",)),
    )(x_rows, w_bf16, b.reshape(1, cout))


# -------- 1x1 conv (no bias) + BatchNorm (batch stats) + PReLU --------------
# Pass 1: row-tiled matmul, accumulating global sum / sum-of-squares.
def _mm_stats_kernel(x_ref, w_ref, y_ref, sum_ref, ssq_ref):
    y = jnp.dot(x_ref[...].astype(jnp.bfloat16), w_ref[...],
                preferred_element_type=jnp.float32)
    y_ref[...] = y

    @pl.when(pl.program_id(0) == 0)
    def _():
        sum_ref[...] = jnp.zeros_like(sum_ref)
        ssq_ref[...] = jnp.zeros_like(ssq_ref)

    sum_ref[...] += jnp.sum(y, axis=0, keepdims=True)
    ssq_ref[...] += jnp.sum(y * y, axis=0, keepdims=True)


# Pass 2: row-tiled normalize (global stats) + affine + PReLU.
def _make_bn_prelu_kernel(inv_n):
    def kernel(y_ref, sum_ref, ssq_ref, g_ref, b_ref, a_ref, o_ref):
        mean = sum_ref[...] * inv_n
        var = ssq_ref[...] * inv_n - mean * mean      # biased var (torch train BN)
        scale = jax.lax.rsqrt(var + 1e-3) * g_ref[...]
        y = (y_ref[...] - mean) * scale + b_ref[...]
        o_ref[...] = jnp.where(y >= 0.0, y, a_ref[...] * y)   # PReLU
    return kernel


def conv1x1_bn_prelu(x_rows, w_bf16, bn_w, bn_b, alpha):
    n, k = x_rows.shape
    cmid = w_bf16.shape[1]
    tr = _pick_row_tile(n)
    grid = (n // tr,)

    y, s, ss = pl.pallas_call(
        _mm_stats_kernel,
        grid=grid,
        in_specs=[
            pl.BlockSpec((tr, k), lambda i: (i, 0)),
            pl.BlockSpec((k, cmid), lambda i: (0, 0)),
        ],
        out_specs=[
            pl.BlockSpec((tr, cmid), lambda i: (i, 0)),
            pl.BlockSpec((1, cmid), lambda i: (0, 0)),
            pl.BlockSpec((1, cmid), lambda i: (0, 0)),
        ],
        out_shape=[
            jax.ShapeDtypeStruct((n, cmid), jnp.float32),
            jax.ShapeDtypeStruct((1, cmid), jnp.float32),
            jax.ShapeDtypeStruct((1, cmid), jnp.float32),
        ],
        # stats accumulator is resident across the row axis -> "arbitrary"
        compiler_params=pltpu.CompilerParams(dimension_semantics=("arbitrary",)),
    )(x_rows, w_bf16)

    return pl.pallas_call(
        _make_bn_prelu_kernel(1.0 / float(n)),
        grid=grid,
        in_specs=[pl.BlockSpec((tr, cmid), lambda i: (i, 0))]
        + [pl.BlockSpec((1, cmid), lambda i: (0, 0))] * 5,
        out_specs=pl.BlockSpec((tr, cmid), lambda i: (i, 0)),
        out_shape=jax.ShapeDtypeStruct((n, cmid), jnp.float32),
        compiler_params=pltpu.CompilerParams(dimension_semantics=("parallel",)),
    )(y, s, ss, bn_w.reshape(1, cmid), bn_b.reshape(1, cmid),
      alpha.reshape(1, cmid))


# ------- fused depthwise (grouped) 3x3 convs for all dilations --------------
def _make_dw_fused_kernel(H, W, dilations, pad):
    def kernel(x_ref, w_ref, o_ref):
        x = x_ref[0]                   # (H+2p, W+2p, C) f32
        wts = w_ref[...]               # (n_dil, 3, 3, C)
        C = x_ref.shape[3]
        for di, d in enumerate(dilations):
            base = pad - d
            acc = None
            for ky in range(3):
                for kx in range(3):
                    patch = x[base + ky * d: base + ky * d + H,
                              base + kx * d: base + kx * d + W, :]
                    term = patch * wts[di, ky, kx, :]
                    acc = term if acc is None else acc + term
            # lane-dense, 128-aligned channel slice of the fused output
            o_ref[0, :, :, di * C:(di + 1) * C] = acc
    return kernel


def depthwise_conv3x3_multi(x_bhwc, w_stack, dilations):
    B, H, W, C = x_bhwc.shape
    pad = max(dilations)
    xp = jnp.pad(x_bhwc, ((0, 0), (pad, pad), (pad, pad), (0, 0)))
    Hp, Wp = H + 2 * pad, W + 2 * pad
    nd = len(dilations)
    return pl.pallas_call(
        _make_dw_fused_kernel(H, W, dilations, pad),
        grid=(B,),
        in_specs=[
            pl.BlockSpec((1, Hp, Wp, C), lambda b: (b, 0, 0, 0)),
            pl.BlockSpec((nd, 3, 3, C), lambda b: (0, 0, 0, 0)),
        ],
        out_specs=pl.BlockSpec((1, H, W, nd * C), lambda b: (b, 0, 0, 0)),
        out_shape=jax.ShapeDtypeStruct((B, H, W, nd * C), jnp.float32),
        compiler_params=pltpu.CompilerParams(dimension_semantics=("parallel",)),
    )(xp, w_stack)


# ---------------------- criss-cross attention core --------------------------
def _cc_attention_kernel(gamma_ref, q_ref, k_ref, v_ref, r_ref, o_ref):
    H = q_ref.shape[1]
    W = q_ref.shape[2]

    q = q_ref[0].astype(jnp.bfloat16)      # (H, W, Cq)
    k = k_ref[0].astype(jnp.bfloat16)
    v = v_ref[0].astype(jnp.bfloat16)      # (H, W, C)
    r = r_ref[0]                           # (H, W, C) f32

    qT = jnp.transpose(q, (1, 0, 2))       # (W, H, Cq)
    kT = jnp.transpose(k, (1, 0, 2))
    vT = jnp.transpose(v, (1, 0, 2))       # (W, H, C)

    # height-direction energies, kept in (W, H, H) layout (no big transpose)
    e_h = jnp.einsum("whc,wkc->whk", qT, kT,
                     preferred_element_type=jnp.float32)          # (W, H, H)
    row = jax.lax.broadcasted_iota(jnp.int32, (H, H), 0)
    col = jax.lax.broadcasted_iota(jnp.int32, (H, H), 1)
    diag_bias = jnp.where(row == col, -jnp.inf, 0.0).astype(jnp.float32)
    e_h = e_h + diag_bias[None, :, :]

    # width-direction energies in (H, W, W)
    e_w = jnp.einsum("hwc,hvc->hwv", q, k,
                     preferred_element_type=jnp.float32)          # (H, W, W)

    # joint softmax over the (H + W) keys: only the (·,·,1) stats move layouts
    m_h = jnp.max(e_h, axis=-1, keepdims=True)                    # (W, H, 1)
    m_w = jnp.max(e_w, axis=-1, keepdims=True)                    # (H, W, 1)
    m = jnp.maximum(jnp.transpose(m_h, (1, 0, 2)), m_w)           # (H, W, 1)
    m_t = jnp.transpose(m, (1, 0, 2))                             # (W, H, 1)

    p_h = jnp.exp(e_h - m_t)                                      # (W, H, H)
    p_w = jnp.exp(e_w - m)                                        # (H, W, W)
    denom = (jnp.transpose(jnp.sum(p_h, axis=-1, keepdims=True), (1, 0, 2))
             + jnp.sum(p_w, axis=-1, keepdims=True))              # (H, W, 1)
    inv = pl.reciprocal(denom, approx=True)                       # (H, W, 1)
    inv_t = jnp.transpose(inv, (1, 0, 2))                         # (W, H, 1)

    a_h = (p_h * inv_t).astype(jnp.bfloat16)                      # (W, H, H)
    a_w = (p_w * inv).astype(jnp.bfloat16)                        # (H, W, W)

    # aggregate values along the two criss-cross paths
    o_h = jnp.einsum("whk,wkc->whc", a_h, vT,
                     preferred_element_type=jnp.float32)          # (W, H, C)
    o_w = jnp.einsum("hwv,hvc->hwc", a_w, v,
                     preferred_element_type=jnp.float32)          # (H, W, C)

    gamma = gamma_ref[0]
    o_ref[0] = gamma * (jnp.transpose(o_h, (1, 0, 2)) + o_w) + r


def cc_attention(q, k, v, residual, gamma):
    # NOTE: per-batch whole-image blocks; for large H,W (esp. v7x 64 MiB VMEM)
    # this would need a spatial grid axis — fine at the small sizes used here.
    B, H, W, Cq = q.shape
    C = v.shape[-1]
    return pl.pallas_call(
        _cc_attention_kernel,
        grid=(B,),
        in_specs=[
            pl.BlockSpec(memory_space=pltpu.MemorySpace.SMEM),      # gamma scalar
            pl.BlockSpec((1, H, W, Cq), lambda b: (b, 0, 0, 0)),    # q
            pl.BlockSpec((1, H, W, Cq), lambda b: (b, 0, 0, 0)),    # k
            pl.BlockSpec((1, H, W, C), lambda b: (b, 0, 0, 0)),     # v
            pl.BlockSpec((1, H, W, C), lambda b: (b, 0, 0, 0)),     # residual
        ],
        out_specs=pl.BlockSpec((1, H, W, C), lambda b: (b, 0, 0, 0)),
        out_shape=jax.ShapeDtypeStruct((B, H, W, C), jnp.float32),
        compiler_params=pltpu.CompilerParams(dimension_semantics=("parallel",)),
    )(gamma, q, k, v, residual)


# ----------------------------- full forward ---------------------------------
@jax.jit
def criss_cross_forward(x_nchw, p):
    B, C, H, W = x_nchw.shape
    x_hwc = jnp.transpose(x_nchw, (0, 2, 3, 1))            # [B,H,W,512]
    rows = x_hwc.reshape(B * H * W, C)

    # ContextBlock: 1x1 conv + BN + PReLU, then fused dilated depthwise convs.
    y = conv1x1_bn_prelu(rows, p["w_cb1"].astype(jnp.bfloat16),
                         p["bn_w"], p["bn_b"], p["alpha"])
    y_img = y.reshape(B, H, W, -1)                         # [B,H,W,128]
    w_dw = jnp.stack([p["w_loc"], p["w_sur1"], p["w_sur2"], p["w_sur3"]], 0)
    joi = depthwise_conv3x3_multi(y_img, w_dw, (1, 2, 4, 6))   # [B,H,W,512]

    # fused query / key / value 1x1 conv (single lane-dense 640-wide matmul).
    jrows = joi.reshape(B * H * W, -1)
    w_qkv = jnp.concatenate([p["w_q"], p["w_k"], p["w_v"]], axis=1).astype(jnp.bfloat16)
    b_qkv = jnp.concatenate([p["b_q"], p["b_k"], p["b_v"]], axis=0)
    qkv = conv1x1_bias(jrows, w_qkv, b_qkv).reshape(B, H, W, -1)
    Cq = p["w_q"].shape[1]
    q = qkv[..., :Cq]
    k = qkv[..., Cq:2 * Cq]
    v = qkv[..., 2 * Cq:]

    out_hwc = cc_attention(q, k, v, x_hwc, p["gamma"])
    return jnp.transpose(out_hwc, (0, 3, 1, 2))            # back to NCHW


# -------------------------- pure-JAX reference ------------------------------
@jax.jit
def reference_forward(x_nchw, p):
    B, C, H, W = x_nchw.shape
    x_hwc = jnp.transpose(x_nchw, (0, 2, 3, 1))
    rows = x_hwc.reshape(-1, C)

    w1 = p["w_cb1"].astype(jnp.bfloat16)
    y = jnp.dot(rows.astype(jnp.bfloat16), w1, preferred_element_type=jnp.float32)
    n = y.shape[0]
    mean = jnp.sum(y, 0, keepdims=True) / n
    var = jnp.sum(y * y, 0, keepdims=True) / n - mean * mean
    y = (y - mean) * (jax.lax.rsqrt(var + 1e-3) * p["bn_w"]) + p["bn_b"]
    y = jnp.where(y >= 0.0, y, p["alpha"] * y)
    y_img = y.reshape(B, H, W, -1)

    def dw(xi, wt, d):
        xp = jnp.pad(xi, ((0, 0), (d, d), (d, d), (0, 0)))
        acc = 0.0
        for ky in range(3):
            for kx in range(3):
                acc = acc + xp[:, ky * d: ky * d + H, kx * d: kx * d + W, :] * wt[ky, kx, :]
        return acc

    joi = jnp.concatenate([dw(y_img, p["w_loc"], 1), dw(y_img, p["w_sur1"], 2),
                           dw(y_img, p["w_sur2"], 4), dw(y_img, p["w_sur3"], 6)], -1)
    jr = joi.reshape(-1, joi.shape[-1])
    w_qkv = jnp.concatenate([p["w_q"], p["w_k"], p["w_v"]], 1).astype(jnp.bfloat16)
    b_qkv = jnp.concatenate([p["b_q"], p["b_k"], p["b_v"]], 0)
    qkv = (jnp.dot(jr.astype(jnp.bfloat16), w_qkv, preferred_element_type=jnp.float32)
           + b_qkv).reshape(B, H, W, -1)
    Cq = p["w_q"].shape[1]
    proj_q, proj_k, proj_v = qkv[..., :Cq], qkv[..., Cq:2 * Cq], qkv[..., 2 * Cq:]

    qb = proj_q.astype(jnp.bfloat16)
    kb = proj_k.astype(jnp.bfloat16)
    vb = proj_v.astype(jnp.bfloat16)
    e_h = jnp.einsum("bhwc,bkwc->bhwk", qb, kb, preferred_element_type=jnp.float32)
    ii = jnp.arange(H)
    mask = (ii[:, None] == ii[None, :])[None, :, None, :]
    e_h = jnp.where(mask, -jnp.inf, e_h)
    e_w = jnp.einsum("bhwc,bhvc->bhwv", qb, kb, preferred_element_type=jnp.float32)
    att = jax.nn.softmax(jnp.concatenate([e_h, e_w], -1), axis=-1)
    a_h = att[..., :H].astype(jnp.bfloat16)
    a_w = att[..., H:].astype(jnp.bfloat16)
    o_h = jnp.einsum("bhwk,bkwc->bhwc", a_h, vb, preferred_element_type=jnp.float32)
    o_w = jnp.einsum("bhwv,bhvc->bhwc", a_w, vb, preferred_element_type=jnp.float32)
    out = p["gamma"][0] * (o_h + o_w) + x_hwc
    return jnp.transpose(out, (0, 3, 1, 2))


# ------------------------- deterministic params -----------------------------
def init_params(key):
    ks = jax.random.split(key, 11)

    def w_init(k, shape, fan_in):
        return jax.random.normal(k, shape, jnp.float32) / jnp.sqrt(float(fan_in))

    p = {}
    p["w_cb1"] = w_init(ks[0], (512, 128), 512)        # ConvBNPReLU 1x1 (no bias)
    p["bn_w"] = jnp.ones((128,), jnp.float32)          # BatchNorm2d weight
    p["bn_b"] = jnp.zeros((128,), jnp.float32)         # BatchNorm2d bias
    p["alpha"] = jnp.full((128,), 0.25, jnp.float32)   # PReLU default init
    p["w_loc"] = w_init(ks[1], (3, 3, 128), 9)         # depthwise 3x3 (d=1)
    p["w_sur1"] = w_init(ks[2], (3, 3, 128), 9)        # depthwise 3x3 (d=2)
    p["w_sur2"] = w_init(ks[3], (3, 3, 128), 9)        # depthwise 3x3 (d=4)
    p["w_sur3"] = w_init(ks[4], (3, 3, 128), 9)        # depthwise 3x3 (d=6)
    p["w_q"] = w_init(ks[5], (512, 64), 512)           # query_conv (512 -> 512//8)
    p["b_q"] = w_init(ks[6], (64,), 512)
    p["w_k"] = w_init(ks[7], (512, 64), 512)           # key_conv
    p["b_k"] = w_init(ks[8], (64,), 512)
    p["w_v"] = w_init(ks[9], (512, 512), 512)          # value_conv
    p["b_v"] = w_init(ks[10], (512,), 512)
    # torch __init__ would set gamma = 0 (output == residual); use nonzero here.
    p["gamma"] = jnp.array([0.1], jnp.float32)
    return p


if __name__ == "__main__":
    key = jax.random.PRNGKey(0)
    pkey, xkey = jax.random.split(key)
    params = init_params(pkey)
    # in_dim is fixed to 512 by the hard-coded ContextBlock(512, 512).
    x = jax.random.normal(xkey, (2, 512, 8, 8), jnp.float32)

    out = jax.block_until_ready(criss_cross_forward(x, params))
    ref = jax.block_until_ready(reference_forward(x, params))

    assert out.shape == x.shape
    assert bool(jnp.all(jnp.isfinite(out)))
    max_err = float(jnp.max(jnp.abs(out - ref)))
    assert max_err < 1e-2, f"max abs err {max_err}"
    print("KERNEL_OK")
</pallas_src>

<mosaic_0001>
module attributes {stable_mosaic.version = 11 : i64} {
  func.func @_mm_stats_kernel(%arg0: i32, %arg1: memref<128x512xf32, #tpu.memory_space<vmem>>, %arg2: memref<512x128xbf16, #tpu.memory_space<vmem>>, %arg3: memref<128x128xf32, #tpu.memory_space<vmem>>, %arg4: memref<1x128xf32, #tpu.memory_space<vmem>>, %arg5: memref<1x128xf32, #tpu.memory_space<vmem>>) attributes {dimension_semantics = [#tpu.dimension_semantics<arbitrary>], iteration_bounds = array<i64: 1>, scalar_prefetch = 0 : i64, scratch_operands = 0 : i64, tpu.core_type = #tpu.core_type<tc>, window_params = [{transform_indices = @transform_0, window_bounds = array<i64: 128, 512>}, {pipeline_mode = #tpu.pipeline_mode<synchronous>, transform_indices = @transform_1, window_bounds = array<i64: 512, 128>}, {transform_indices = @transform_2, window_bounds = array<i64: 128, 128>}, {pipeline_mode = #tpu.pipeline_mode<synchronous>, transform_indices = @transform_3, window_bounds = array<i64: 1, 128>}, {pipeline_mode = #tpu.pipeline_mode<synchronous>, transform_indices = @transform_4, window_bounds = array<i64: 1, 128>}]} {
    %c0 = arith.constant 0 : index
    %c0_0 = arith.constant 0 : index
    %0 = vector.load %arg1[%c0, %c0_0] : memref<128x512xf32, #tpu.memory_space<vmem>>, vector<128x512xf32>
    %1 = arith.truncf %0 : vector<128x512xf32> to vector<128x512xbf16>
    %c0_1 = arith.constant 0 : index
    %c0_2 = arith.constant 0 : index
    %2 = vector.load %arg2[%c0_1, %c0_2] : memref<512x128xbf16, #tpu.memory_space<vmem>>, vector<512x128xbf16>
    %cst = arith.constant dense<0.000000e+00> : vector<128x128xf32>
    %3 = tpu.matmul %1, %2, %cst {dimension_numbers = #tpu.dot_dimension_numbers<[1], [0], [0], [1], [0, 0, 1, 1], [], []>} : vector<128x512xbf16>, vector<512x128xbf16>, vector<128x128xf32> -> vector<128x128xf32>
    %c0_3 = arith.constant 0 : index
    %c0_4 = arith.constant 0 : index
    %4 = vector.load %arg3[%c0_3, %c0_4] : memref<128x128xf32, #tpu.memory_space<vmem>>, vector<128x128xf32>
    tpu.vector_store %arg3[%c0_3, %c0_4], %3 {strides = array<i32>} : memref<128x128xf32, #tpu.memory_space<vmem>>, vector<128x128xf32>,
    %c0_i32 = arith.constant 0 : i32
    %5 = arith.cmpi eq, %arg0, %c0_i32 : i32
    %6 = arith.extui %5 : i1 to i32
    %c0_i32_5 = arith.constant 0 : i32
    %7 = arith.cmpi ne, %6, %c0_i32_5 : i32
    scf.if %7 {
      %cst_16 = arith.constant 0.000000e+00 : f32
      %19 = vector.broadcast %cst_16 : f32 to vector<1x128xf32>
      %c0_17 = arith.constant 0 : index
      %c0_18 = arith.constant 0 : index
      %20 = vector.load %arg4[%c0_17, %c0_18] : memref<1x128xf32, #tpu.memory_space<vmem>>, vector<1x128xf32>
      tpu.vector_store %arg4[%c0_17, %c0_18], %19 {strides = array<i32>} : memref<1x128xf32, #tpu.memory_space<vmem>>, vector<1x128xf32>,
      %cst_19 = arith.constant 0.000000e+00 : f32
      %21 = vector.broadcast %cst_19 : f32 to vector<1x128xf32>
      %c0_20 = arith.constant 0 : index
      %c0_21 = arith.constant 0 : index
      %22 = vector.load %arg5[%c0_20, %c0_21] : memref<1x128xf32, #tpu.memory_space<vmem>>, vector<1x128xf32>
      tpu.vector_store %arg5[%c0_20, %c0_21], %21 {strides = array<i32>} : memref<1x128xf32, #tpu.memory_space<vmem>>, vector<1x128xf32>,
    } else {
    }
    %c0_6 = arith.constant 0 : index
    %c0_7 = arith.constant 0 : index
    %8 = vector.load %arg4[%c0_6, %c0_7] : memref<1x128xf32, #tpu.memory_space<vmem>>, vector<1x128xf32>
    %cst_8 = arith.constant dense<0.000000e+00> : vector<128xf32>
    %9 = vector.multi_reduction <add>, %3, %cst_8 [0] : vector<128x128xf32> to vector<128xf32>
    %10 = vector.shape_cast %9 : vector<128xf32> to vector<1x128xf32>
    %11 = arith.addf %8, %10 : vector<1x128xf32>
    %c0_9 = arith.constant 0 : index
    %c0_10 = arith.constant 0 : index
    %12 = vector.load %arg4[%c0_9, %c0_10] : memref<1x128xf32, #tpu.memory_space<vmem>>, vector<1x128xf32>
    tpu.vector_store %arg4[%c0_9, %c0_10], %11 {strides = array<i32>} : memref<1x128xf32, #tpu.memory_space<vmem>>, vector<1x128xf32>,
    %c0_11 = arith.constant 0 : index
    %c0_12 = arith.constant 0 : index
    %13 = vector.load %arg5[%c0_11, %c0_12] : memref<1x128xf32, #tpu.memory_space<vmem>>, vector<1x128xf32>
    %14 = arith.mulf %3, %3 : vector<128x128xf32>
    %cst_13 = arith.constant dense<0.000000e+00> : vector<128xf32>
    %15 = vector.multi_reduction <add>, %14, %cst_13 [0] : vector<128x128xf32> to vector<128xf32>
    %16 = vector.shape_cast %15 : vector<128xf32> to vector<1x128xf32>
    %17 = arith.addf %13, %16 : vector<1x128xf32>
    %c0_14 = arith.constant 0 : index
    %c0_15 = arith.constant 0 : index
    %18 = vector.load %arg5[%c0_14, %c0_15] : memref<1x128xf32, #tpu.memory_space<vmem>>, vector<1x128xf32>
    tpu.vector_store %arg5[%c0_14, %c0_15], %17 {strides = array<i32>} : memref<1x128xf32, #tpu.memory_space<vmem>>, vector<1x128xf32>,
    return
  }
  func.func @transform_0(%arg0: i32) -> (i32, i32) {
    %c0_i32 = arith.constant 0 : i32
    %c0_i32_0 = arith.constant 0 : i32
    return %arg0, %c0_i32 : i32, i32
  }
  func.func @transform_1(%arg0: i32) -> (i32, i32) {
    %c0_i32 = arith.constant 0 : i32
    %c0_i32_0 = arith.constant 0 : i32
    %c0_i32_1 = arith.constant 0 : i32
    return %c0_i32, %c0_i32_0 : i32, i32
  }
  func.func @transform_2(%arg0: i32) -> (i32, i32) {
    %c0_i32 = arith.constant 0 : i32
    %c0_i32_0 = arith.constant 0 : i32
    return %arg0, %c0_i32 : i32, i32
  }
  func.func @transform_3(%arg0: i32) -> (i32, i32) {
    %c0_i32 = arith.constant 0 : i32
    %c0_i32_0 = arith.constant 0 : i32
    %c0_i32_1 = arith.constant 0 : i32
    return %c0_i32, %c0_i32_0 : i32, i32
  }
  func.func @transform_4(%arg0: i32) -> (i32, i32) {
    %c0_i32 = arith.constant 0 : i32
    %c0_i32_0 = arith.constant 0 : i32
    %c0_i32_1 = arith.constant 0 : i32
    return %c0_i32, %c0_i32_0 : i32, i32
  }
}

module attributes {stable_mosaic.version = 11 : i64} {
  func.func @kernel(%arg0: i32, %arg1: memref<128x128xf32, #tpu.memory_space<vmem>>, %arg2: memref<1x128xf32, #tpu.memory_space<vmem>>, %arg3: memref<1x128xf32, #tpu.memory_space<vmem>>, %arg4: memref<1x128xf32, #tpu.memory_space<vmem>>, %arg5: memref<1x128xf32, #tpu.memory_space<vmem>>, %arg6: memref<1x128xf32, #tpu.memory_space<vmem>>, %arg7: memref<128x128xf32, #tpu.memory_space<vmem>>) attributes {dimension_semantics = [#tpu.dimension_semantics<parallel>], iteration_bounds = array<i64: 1>, scalar_prefetch = 0 : i64, scratch_operands = 0 : i64, tpu.core_type = #tpu.core_type<tc>, window_params = [{transform_indices = @transform_0, window_bounds = array<i64: 128, 128>}, {pipeline_mode = #tpu.pipeline_mode<synchronous>, transform_indices = @transform_1, window_bounds = array<i64: 1, 128>}, {pipeline_mode = #tpu.pipeline_mode<synchronous>, transform_indices = @transform_2, window_bounds = array<i64: 1, 128>}, {pipeline_mode = #tpu.pipeline_mode<synchronous>, transform_indices = @transform_3, window_bounds = array<i64: 1, 128>}, {pipeline_mode = #tpu.pipeline_mode<synchronous>, transform_indices = @transform_4, window_bounds = array<i64: 1, 128>}, {pipeline_mode = #tpu.pipeline_mode<synchronous>, transform_indices = @transform_5, window_bounds = array<i64: 1, 128>}, {transform_indices = @transform_6, window_bounds = array<i64: 128, 128>}]} {
    %c0 = arith.constant 0 : index
    %c0_0 = arith.constant 0 : index
    %0 = vector.load %arg2[%c0, %c0_0] : memref<1x128xf32, #tpu.memory_space<vmem>>, vector<1x128xf32>
    %cst = arith.constant 7.812500e-03 : f32
    %1 = vector.broadcast %cst : f32 to vector<1x128xf32>
    %2 = arith.mulf %0, %1 : vector<1x128xf32>
    %c0_1 = arith.constant 0 : index
    %c0_2 = arith.constant 0 : index
    %3 = vector.load %arg3[%c0_1, %c0_2] : memref<1x128xf32, #tpu.memory_space<vmem>>, vector<1x128xf32>
    %cst_3 = arith.constant 7.812500e-03 : f32
    %4 = vector.broadcast %cst_3 : f32 to vector<1x128xf32>
    %5 = arith.mulf %3, %4 : vector<1x128xf32>
    %6 = arith.mulf %2, %2 : vector<1x128xf32>
    %7 = arith.subf %5, %6 : vector<1x128xf32>
    %cst_4 = arith.constant 1.000000e-03 : f32
    %8 = vector.broadcast %cst_4 : f32 to vector<1x128xf32>
    %9 = arith.addf %7, %8 : vector<1x128xf32>
    %10 = math.rsqrt %9 : vector<1x128xf32>
    %c0_5 = arith.constant 0 : index
    %c0_6 = arith.constant 0 : index
    %11 = vector.load %arg4[%c0_5, %c0_6] : memref<1x128xf32, #tpu.memory_space<vmem>>, vector<1x128xf32>
    %12 = arith.mulf %10, %11 : vector<1x128xf32>
    %c0_7 = arith.constant 0 : index
    %c0_8 = arith.constant 0 : index
    %13 = vector.load %arg1[%c0_7, %c0_8] : memref<128x128xf32, #tpu.memory_space<vmem>>, vector<128x128xf32>
    %14 = vector.broadcast %2 : vector<1x128xf32> to vector<128x128xf32>
    %15 = arith.subf %13, %14 : vector<128x128xf32>
    %16 = vector.broadcast %12 : vector<1x128xf32> to vector<128x128xf32>
    %17 = arith.mulf %15, %16 : vector<128x128xf32>
    %c0_9 = arith.constant 0 : index
    %c0_10 = arith.constant 0 : index
    %18 = vector.load %arg5[%c0_9, %c0_10] : memref<1x128xf32, #tpu.memory_space<vmem>>, vector<1x128xf32>
    %19 = vector.broadcast %18 : vector<1x128xf32> to vector<128x128xf32>
    %20 = arith.addf %17, %19 : vector<128x128xf32>
    %cst_11 = arith.constant 0.000000e+00 : f32
    %21 = vector.broadcast %cst_11 : f32 to vector<128x128xf32>
    %22 = arith.cmpf oge, %20, %21 : vector<128x128xf32>
    %c0_12 = arith.constant 0 : index
    %c0_13 = arith.constant 0 : index
    %23 = vector.load %arg6[%c0_12, %c0_13] : memref<1x128xf32, #tpu.memory_space<vmem>>, vector<1x128xf32>
    %24 = vector.broadcast %23 : vector<1x128xf32> to vector<128x128xf32>
    %25 = arith.mulf %24, %20 : vector<128x128xf32>
    %26 = arith.select %22, %20, %25 : vector<128x128xi1>, vector<128x128xf32>
    %c0_14 = arith.constant 0 : index
    %c0_15 = arith.constant 0 : index
    %27 = vector.load %arg7[%c0_14, %c0_15] : memref<128x128xf32, #tpu.memory_space<vmem>>, vector<128x128xf32>
    tpu.vector_store %arg7[%c0_14, %c0_15], %26 {strides = array<i32>} : memref<128x128xf32, #tpu.memory_space<vmem>>, vector<128x128xf32>,
    return
  }
  func.func @transform_0(%arg0: i32) -> (i32, i32) {
    %c0_i32 = arith.constant 0 : i32
    %c0_i32_0 = arith.constant 0 : i32
    return %arg0, %c0_i32 : i32, i32
  }
  func.func @transform_1(%arg0: i32) -> (i32, i32) {
    %c0_i32 = arith.constant 0 : i32
    %c0_i32_0 = arith.constant 0 : i32
    %c0_i32_1 = arith.constant 0 : i32
    return %c0_i32, %c0_i32_0 : i32, i32
  }
  func.func @transform_2(%arg0: i32) -> (i32, i32) {
    %c0_i32 = arith.constant 0 : i32
    %c0_i32_0 = arith.constant 0 : i32
    %c0_i32_1 = arith.constant 0 : i32
    return %c0_i32, %c0_i32_0 : i32, i32
  }
  func.func @transform_3(%arg0: i32) -> (i32, i32) {
    %c0_i32 = arith.constant 0 : i32
    %c0_i32_0 = arith.constant 0 : i32
    %c0_i32_1 = arith.constant 0 : i32
    return %c0_i32, %c0_i32_0 : i32, i32
  }
  func.func @transform_4(%arg0: i32) -> (i32, i32) {
    %c0_i32 = arith.constant 0 : i32
    %c0_i32_0 = arith.constant 0 : i32
    %c0_i32_1 = arith.constant 0 : i32
    return %c0_i32, %c0_i32_0 : i32, i32
  }
  func.func @transform_5(%arg0: i32) -> (i32, i32) {
    %c0_i32 = arith.constant 0 : i32
    %c0_i32_0 = arith.constant 0 : i32
    %c0_i32_1 = arith.constant 0 : i32
    return %c0_i32, %c0_i32_0 : i32, i32
  }
  func.func @transform_6(%arg0: i32) -> (i32, i32) {
    %c0_i32 = arith.constant 0 : i32
    %c0_i32_0 = arith.constant 0 : i32
    return %arg0, %c0_i32 : i32, i32
  }
}

module attributes {stable_mosaic.version = 11 : i64} {
  func.func @kernel(%arg0: i32, %arg1: memref<1x20x20x128xf32, #tpu.memory_space<vmem>>, %arg2: memref<4x3x3x128xf32, #tpu.memory_space<vmem>>, %arg3: memref<1x8x8x512xf32, #tpu.memory_space<vmem>>) attributes {dimension_semantics = [#tpu.dimension_semantics<parallel>], iteration_bounds = array<i64: 2>, scalar_prefetch = 0 : i64, scratch_operands = 0 : i64, tpu.core_type = #tpu.core_type<tc>, window_params = [{transform_indices = @transform_0, window_bounds = array<i64: 1, 20, 20, 128>}, {pipeline_mode = #tpu.pipeline_mode<synchronous>, transform_indices = @transform_1, window_bounds = array<i64: 4, 3, 3, 128>}, {transform_indices = @transform_2, window_bounds = array<i64: 1, 8, 8, 512>}]} {
    %c0 = arith.constant 0 : index
    %c0_0 = arith.constant 0 : index
    %c0_1 = arith.constant 0 : index
    %c0_2 = arith.constant 0 : index
    %0 = vector.load %arg1[%c0, %c0_0, %c0_1, %c0_2] : memref<1x20x20x128xf32, #tpu.memory_space<vmem>>, vector<1x20x20x128xf32>
    %1 = vector.shape_cast %0 : vector<1x20x20x128xf32> to vector<20x20x128xf32>
    %c0_3 = arith.constant 0 : index
    %c0_4 = arith.constant 0 : index
    %c0_5 = arith.constant 0 : index
    %c0_6 = arith.constant 0 : index
    %2 = vector.load %arg2[%c0_3, %c0_4, %c0_5, %c0_6] : memref<4x3x3x128xf32, #tpu.memory_space<vmem>>, vector<4x3x3x128xf32>
    %3 = vector.extract_strided_slice %1 {offsets = [5, 5, 0], sizes = [8, 8, 128], strides = [1, 1, 1]} : vector<20x20x128xf32> to vector<8x8x128xf32>
    %4 = vector.extract_strided_slice %2 {offsets = [0, 0, 0, 0], sizes = [1, 1, 1, 128], strides = [1, 1, 1, 1]} : vector<4x3x3x128xf32> to vector<1x1x1x128xf32>
    %5 = vector.shape_cast %4 : vector<1x1x1x128xf32> to vector<128xf32>
    %6 = vector.shape_cast %5 : vector<128xf32> to vector<1x1x128xf32>
    %7 = vector.broadcast %6 : vector<1x1x128xf32> to vector<8x8x128xf32>
    %8 = arith.mulf %3, %7 : vector<8x8x128xf32>
    %9 = vector.extract_strided_slice %1 {offsets = [5, 6, 0], sizes = [8, 8, 128], strides = [1, 1, 1]} : vector<20x20x128xf32> to vector<8x8x128xf32>
    %10 = vector.extract_strided_slice %2 {offsets = [0, 0, 1, 0], sizes = [1, 1, 1, 128], strides = [1, 1, 1, 1]} : vector<4x3x3x128xf32> to vector<1x1x1x128xf32>
    %11 = vector.shape_cast %10 : vector<1x1x1x128xf32> to vector<128xf32>
    %12 = vector.shape_cast %11 : vector<128xf32> to vector<1x1x128xf32>
    %13 = vector.broadcast %12 : vector<1x1x128xf32> to vector<8x8x128xf32>
    %14 = arith.mulf %9, %13 : vector<8x8x128xf32>
    %15 = arith.addf %8, %14 : vector<8x8x128xf32>
    %16 = vector.extract_strided_slice %1 {offsets = [5, 7, 0], sizes = [8, 8, 128], strides = [1, 1, 1]} : vector<20x20x128xf32> to vector<8x8x128xf32>
    %17 = vector.extract_strided_slice %2 {offsets = [0, 0, 2, 0], sizes = [1, 1, 1, 128], strides = [1, 1, 1, 1]} : vector<4x3x3x128xf32> to vector<1x1x1x128xf32>
    %18 = vector.shape_cast %17 : vector<1x1x1x128xf32> to vector<128xf32>
    %19 = vector.shape_cast %18 : vector<128xf32> to vector<1x1x128xf32>
    %20 = vector.broadcast %19 : vector<1x1x128xf32> to vector<8x8x128xf32>
    %21 = arith.mulf %16, %20 : vector<8x8x128xf32>
    %22 = arith.addf %15, %21 : vector<8x8x128xf32>
    %23 = vector.extract_strided_slice %1 {offsets = [6, 5, 0], sizes = [8, 8, 128], strides = [1, 1, 1]} : vector<20x20x128xf32> to vector<8x8x128xf32>
    %24 = vector.extract_strided_slice %2 {offsets = [0, 1, 0, 0], sizes = [1, 1, 1, 128], strides = [1, 1, 1, 1]} : vector<4x3x3x128xf32> to vector<1x1x1x128xf32>
    %25 = vector.shape_cast %24 : vector<1x1x1x128xf32> to vector<128xf32>
    %26 = vector.shape_cast %25 : vector<128xf32> to vector<1x1x128xf32>
    %27 = vector.broadcast %26 : vector<1x1x128xf32> to vector<8x8x128xf32>
    %28 = arith.mulf %23, %27 : vector<8x8x128xf32>
    %29 = arith.addf %22, %28 : vector<8x8x128xf32>
    %30 = vector.extract_strided_slice %1 {offsets = [6, 6, 0], sizes = [8, 8, 128], strides = [1, 1, 1]} : vector<20x20x128xf32> to vector<8x8x128xf32>
    %31 = vector.extract_strided_slice %2 {offsets = [0, 1, 1, 0], sizes = [1, 1, 1, 128], strides = [1, 1, 1, 1]} : vector<4x3x3x128xf32> to vector<1x1x1x128xf32>
    %32 = vector.shape_cast %31 : vector<1x1x1x128xf32> to vector<128xf32>
    %33 = vector.shape_cast %32 : vector<128xf32> to vector<1x1x128xf32>
    %34 = vector.broadcast %33 : vector<1x1x128xf32> to vector<8x8x128xf32>
    %35 = arith.mulf %30, %34 : vector<8x8x128xf32>
    %36 = arith.addf %29, %35 : vector<8x8x128xf32>
    %37 = vector.extract_strided_slice %1 {offsets = [6, 7, 0], sizes = [8, 8, 128], strides = [1, 1, 1]} : vector<20x20x128xf32> to vector<8x8x128xf32>
    %38 = vector.extract_strided_slice %2 {offsets = [0, 1, 2, 0], sizes = [1, 1, 1, 128], strides = [1, 1, 1, 1]} : vector<4x3x3x128xf32> to vector<1x1x1x128xf32>
    %39 = vector.shape_cast %38 : vector<1x1x1x128xf32> to vector<128xf32>
    %40 = vector.shape_cast %39 : vector<128xf32> to vector<1x1x128xf32>
    %41 = vector.broadcast %40 : vector<1x1x128xf32> to vector<8x8x128xf32>
    %42 = arith.mulf %37, %41 : vector<8x8x128xf32>
    %43 = arith.addf %36, %42 : vector<8x8x128xf32>
    %44 = vector.extract_strided_slice %1 {offsets = [7, 5, 0], sizes = [8, 8, 128], strides = [1, 1, 1]} : vector<20x20x128xf32> to vector<8x8x128xf32>
    %45 = vector.extract_strided_slice %2 {offsets = [0, 2, 0, 0], sizes = [1, 1, 1, 128], strides = [1, 1, 1, 1]} : vector<4x3x3x128xf32> to vector<1x1x1x128xf32>
    %46 = vector.shape_cast %45 : vector<1x1x1x128xf32> to vector<128xf32>
    %47 = vector.shape_cast %46 : vector<128xf32> to vector<1x1x128xf32>
    %48 = vector.broadcast %47 : vector<1x1x128xf32> to vector<8x8x128xf32>
    %49 = arith.mulf %44, %48 : vector<8x8x128xf32>
    %50 = arith.addf %43, %49 : vector<8x8x128xf32>
    %51 = vector.extract_strided_slice %1 {offsets = [7, 6, 0], sizes = [8, 8, 128], strides = [1, 1, 1]} : vector<20x20x128xf32> to vector<8x8x128xf32>
    %52 = vector.extract_strided_slice %2 {offsets = [0, 2, 1, 0], sizes = [1, 1, 1, 128], strides = [1, 1, 1, 1]} : vector<4x3x3x128xf32> to vector<1x1x1x128xf32>
    %53 = vector.shape_cast %52 : vector<1x1x1x128xf32> to vector<128xf32>
    %54 = vector.shape_cast %53 : vector<128xf32> to vector<1x1x128xf32>
    %55 = vector.broadcast %54 : vector<1x1x128xf32> to vector<8x8x128xf32>
    %56 = arith.mulf %51, %55 : vector<8x8x128xf32>
    %57 = arith.addf %50, %56 : vector<8x8x128xf32>
    %58 = vector.extract_strided_slice %1 {offsets = [7, 7, 0], sizes = [8, 8, 128], strides = [1, 1, 1]} : vector<20x20x128xf32> to vector<8x8x128xf32>
    %59 = vector.extract_strided_slice %2 {offsets = [0, 2, 2, 0], sizes = [1, 1, 1, 128], strides = [1, 1, 1, 1]} : vector<4x3x3x128xf32> to vector<1x1x1x128xf32>
    %60 = vector.shape_cast %59 : vector<1x1x1x128xf32> to vector<128xf32>
    %61 = vector.shape_cast %60 : vector<128xf32> to vector<1x1x128xf32>
    %62 = vector.broadcast %61 : vector<1x1x128xf32> to vector<8x8x128xf32>
    %63 = arith.mulf %58, %62 : vector<8x8x128xf32>
    %64 = arith.addf %57, %63 : vector<8x8x128xf32>
    %c0_7 = arith.constant 0 : index
    %c0_8 = arith.constant 0 : index
    %c0_9 = arith.constant 0 : index
    %c0_10 = arith.constant 0 : index
    %65 = vector.load %arg3[%c0_7, %c0_8, %c0_9, %c0_10] : memref<1x8x8x512xf32, #tpu.memory_space<vmem>>, vector<1x8x8x128xf32>
    %66 = vector.shape_cast %65 : vector<1x8x8x128xf32> to vector<8x8x128xf32>
    %67 = vector.shape_cast %64 : vector<8x8x128xf32> to vector<1x8x8x128xf32>
    tpu.vector_store %arg3[%c0_7, %c0_8, %c0_9, %c0_10], %67 {strides = array<i32>} : memref<1x8x8x512xf32, #tpu.memory_space<vmem>>, vector<1x8x8x128xf32>,
    %68 = vector.extract_strided_slice %1 {offsets = [4, 4, 0], sizes = [8, 8, 128], strides = [1, 1, 1]} : vector<20x20x128xf32> to vector<8x8x128xf32>
    %69 = vector.extract_strided_slice %2 {offsets = [1, 0, 0, 0], sizes = [1, 1, 1, 128], strides = [1, 1, 1, 1]} : vector<4x3x3x128xf32> to vector<1x1x1x128xf32>
    %70 = vector.shape_cast %69 : vector<1x1x1x128xf32> to vector<128xf32>
    %71 = vector.shape_cast %70 : vector<128xf32> to vector<1x1x128xf32>
    %72 = vector.broadcast %71 : vector<1x1x128xf32> to vector<8x8x128xf32>
    %73 = arith.mulf %68, %72 : vector<8x8x128xf32>
    %74 = vector.extract_strided_slice %1 {offsets = [4, 6, 0], sizes = [8, 8, 128], strides = [1, 1, 1]} : vector<20x20x128xf32> to vector<8x8x128xf32>
    %75 = vector.extract_strided_slice %2 {offsets = [1, 0, 1, 0], sizes = [1, 1, 1, 128], strides = [1, 1, 1, 1]} : vector<4x3x3x128xf32> to vector<1x1x1x128xf32>
    %76 = vector.shape_cast %75 : vector<1x1x1x128xf32> to vector<128xf32>
    %77 = vector.shape_cast %76 : vector<128xf32> to vector<1x1x128xf32>
    %78 = vector.broadcast %77 : vector<1x1x128xf32> to vector<8x8x128xf32>
    %79 = arith.mulf %74, %78 : vector<8x8x128xf32>
    %80 = arith.addf %73, %79 : vector<8x8x128xf32>
    %81 = vector.extract_strided_slice %1 {offsets = [4, 8, 0], sizes = [8, 8, 128], strides = [1, 1, 1]} : vector<20x20x128xf32> to vector<8x8x128xf32>
    %82 = vector.extract_strided_slice %2 {offsets = [1, 0, 2, 0], sizes = [1, 1, 1, 128], strides = [1, 1, 1, 1]} : vector<4x3x3x128xf32> to vector<1x1x1x128xf32>
    %83 = vector.shape_cast %82 : vector<1x1x1x128xf32> to vector<128xf32>
    %84 = vector.shape_cast %83 : vector<128xf32> to vector<1x1x128xf32>
    %85 = vector.broadcast %84 : vector<1x1x128xf32> to vector<8x8x128xf32>
    %86 = arith.mulf %81, %85 : vector<8x8x128xf32>
    %87 = arith.addf %80, %86 : vector<8x8x128xf32>
    %88 = vector.extract_strided_slice %1 {offsets = [6, 4, 0], sizes = [8, 8, 128], strides = [1, 1, 1]} : vector<20x20x128xf32> to vector<8x8x128xf32>
    %89 = vector.extract_strided_slice %2 {offsets = [1, 1, 0, 0], sizes = [1, 1, 1, 128], strides = [1, 1, 1, 1]} : vector<4x3x3x128xf32> to vector<1x1x1x128xf32>
    %90 = vector.shape_cast %89 : vector<1x1x1x128xf32> to vector<128xf32>
    %91 = vector.shape_cast %90 : vector<128xf32> to vector<1x1x128xf32>
    %92 = vector.broadcast %91 : vector<1x1x128xf32> to vector<8x8x128xf32>
    %93 = arith.mulf %88, %92 : vector<8x8x128xf32>
    %94 = arith.addf %87, %93 : vector<8x8x128xf32>
    %95 = vector.extract_strided_slice %1 {offsets = [6, 6, 0], sizes = [8, 8, 128], strides = [1, 1, 1]} : vector<20x20x128xf32> to vector<8x8x128xf32>
    %96 = vector.extract_strided_slice %2 {offsets = [1, 1, 1, 0], sizes = [1, 1, 1, 128], strides = [1, 1, 1, 1]} : vector<4x3x3x128xf32> to vector<1x1x1x128xf32>
    %97 = vector.shape_cast %96 : vector<1x1x1x128xf32> to vector<128xf32>
    %98 = vector.shape_cast %97 : vector<128xf32> to vector<1x1x128xf32>
    %99 = vector.broadcast %98 : vector<1x1x128xf32> to vector<8x8x128xf32>
    %100 = arith.mulf %95, %99 : vector<8x8x128xf32>
    %101 = arith.addf %94, %100 : vector<8x8x128xf32>
    %102 = vector.extract_strided_slice %1 {offsets = [6, 8, 0], sizes = [8, 8, 128], strides = [1, 1, 1]} : vector<20x20x128xf32> to vector<8x8x128xf32>
    %103 = vector.extract_strided_slice %2 {offsets = [1, 1, 2, 0], sizes = [1, 1, 1, 128], strides = [1, 1, 1, 1]} : vector<4x3x3x128xf32> to vector<1x1x1x128xf32>
    %104 = vector.shape_cast %103 : vector<1x1x1x128xf32> to vector<128xf32>
    %105 = vector.shape_cast %104 : vector<128xf32> to vector<1x1x128xf32>
    %106 = vector.broadcast %105 : vector<1x1x128xf32> to vector<8x8x128xf32>
    %107 = arith.mulf %102, %106 : vector<8x8x128xf32>
    %108 = arith.addf %101, %107 : vector<8x8x128xf32>
    %109 = vector.extract_strided_slice %1 {offsets = [8, 4, 0], sizes = [8, 8, 128], strides = [1, 1, 1]} : vector<20x20x128xf32> to vector<8x8x128xf32>
    %110 = vector.extract_strided_slice %2 {offsets = [1, 2, 0, 0], sizes = [1, 1, 1, 128], strides = [1, 1, 1, 1]} : vector<4x3x3x128xf32> to vector<1x1x1x128xf32>
    %111 = vector.shape_cast %110 : vector<1x1x1x128xf32> to vector<128xf32>
    %112 = vector.shape_cast %111 : vector<128xf32> to vector<1x1x128xf32>
    %113 = vector.broadcast %112 : vector<1x1x128xf32> to vector<8x8x128xf32>
    %114 = arith.mulf %109, %113 : vector<8x8x128xf32>
    %115 = arith.addf %108, %114 : vector<8x8x128xf32>
    %116 = vector.extract_strided_slice %1 {offsets = [8, 6, 0], sizes = [8, 8, 128], strides = [1, 1, 1]} : vector<20x20x128xf32> to vector<8x8x128xf32>
    %117 = vector.extract_strided_slice %2 {offsets = [1, 2, 1, 0], sizes = [1, 1, 1, 128], strides = [1, 1, 1, 1]} : vector<4x3x3x128xf32> to vector<1x1x1x128xf32>
    %118 = vector.shape_cast %117 : vector<1x1x1x128xf32> to vector<128xf32>
    %119 = vector.shape_cast %118 : vector<128xf32> to vector<1x1x128xf32>
    %120 = vector.broadcast %119 : vector<1x1x128xf32> to vector<8x8x128xf32>
    %121 = arith.mulf %116, %120 : vector<8x8x128xf32>
    %122 = arith.addf %115, %121 : vector<8x8x128xf32>
    %123 = vector.extract_strided_slice %1 {offsets = [8, 8, 0], sizes = [8, 8, 128], strides = [1, 1, 1]} : vector<20x20x128xf32> to vector<8x8x128xf32>
    %124 = vector.extract_strided_slice %2 {offsets = [1, 2, 2, 0], sizes = [1, 1, 1, 128], strides = [1, 1, 1, 1]} : vector<4x3x3x128xf32> to vector<1x1x1x128xf32>
    %125 = vector.shape_cast %124 : vector<1x1x1x128xf32> to vector<128xf32>
    %126 = vector.shape_cast %125 : vector<128xf32> to vector<1x1x128xf32>
    %127 = vector.broadcast %126 : vector<1x1x128xf32> to vector<8x8x128xf32>
    %128 = arith.mulf %123, %127 : vector<8x8x128xf32>
    %129 = arith.addf %122, %128 : vector<8x8x128xf32>
    %c0_11 = arith.constant 0 : index
    %c0_12 = arith.constant 0 : index
    %c0_13 = arith.constant 0 : index
    %c128 = arith.constant 128 : index
    %130 = vector.load %arg3[%c0_11, %c0_12, %c0_13, %c128] : memref<1x8x8x512xf32, #tpu.memory_space<vmem>>, vector<1x8x8x128xf32>
    %131 = vector.shape_cast %130 : vector<1x8x8x128xf32> to vector<8x8x128xf32>
    %132 = vector.shape_cast %129 : vector<8x8x128xf32> to vector<1x8x8x128xf32>
    tpu.vector_store %arg3[%c0_11, %c0_12, %c0_13, %c128], %132 {strides = array<i32>} : memref<1x8x8x512xf32, #tpu.memory_space<vmem>>, vector<1x8x8x128xf32>,
    %133 = vector.extract_strided_slice %1 {offsets = [2, 2, 0], sizes = [8, 8, 128], strides = [1, 1, 1]} : vector<20x20x128xf32> to vector<8x8x128xf32>
    %134 = vector.extract_strided_slice %2 {offsets = [2, 0, 0, 0], sizes = [1, 1, 1, 128], strides = [1, 1, 1, 1]} : vector<4x3x3x128xf32> to vector<1x1x1x128xf32>
    %135 = vector.shape_cast %134 : vector<1x1x1x128xf32> to vector<128xf32>
    %136 = vector.shape_cast %135 : vector<128xf32> to vector<1x1x128xf32>
    %137 = vector.broadcast %136 : vector<1x1x128xf32> to vector<8x8x128xf32>
    %138 = arith.mulf %133, %137 : vector<8x8x128xf32>
    %139 = vector.extract_strided_slice %1 {offsets = [2, 6, 0], sizes = [8, 8, 128], strides = [1, 1, 1]} : vector<20x20x128xf32> to vector<8x8x128xf32>
    %140 = vector.extract_strided_slice %2 {offsets = [2, 0, 1, 0], sizes = [1, 1, 1, 128], strides = [1, 1, 1, 1]} : vector<4x3x3x128xf32> to vector<1x1x1x128xf32>
    %141 = vector.shape_cast %140 : vector<1x1x1x128xf32> to vector<128xf32>
    %142 = vector.shape_cast %141 : vector<128xf32> to vector<1x1x128xf32>
    %143 = vector.broadcast %142 : vector<1x1x128xf32> to vector<8x8x128xf32>
    %144 = arith.mulf %139, %143 : vector<8x8x128xf32>
    %145 = arith.addf %138, %144 : vector<8x8x128xf32>
    %146 = vector.extract_strided_slice %1 {offsets = [2, 10, 0], sizes = [8, 8, 128], strides = [1, 1, 1]} : vector<20x20x128xf32> to vector<8x8x128xf32>
    %147 = vector.extract_strided_slice %2 {offsets = [2, 0, 2, 0], sizes = [1, 1, 1, 128], strides = [1, 1, 1, 1]} : vector<4x3x3x128xf32> to vector<1x1x1x128xf32>
    %148 = vector.shape_cast %147 : vector<1x1x1x128xf32> to vector<128xf32>
    %149 = vector.shape_cast %148 : vector<128xf32> to vector<1x1x128xf32>
    %150 = vector.broadcast %149 : vector<1x1x128xf32> to vector<8x8x128xf32>
    %151 = arith.mulf %146, %150 : vector<8x8x128xf32>
    %152 = arith.addf %145, %151 : vector<8x8x128xf32>
    %153 = vector.extract_strided_slice %1 {offsets = [6, 2, 0], sizes = [8, 8, 128], strides = [1, 1, 1]} : vector<20x20x128xf32> to vector<8x8x128xf32>
    %154 = vector.extract_strided_slice %2 {offsets = [2, 1, 0, 0], sizes = [1, 1, 1, 128], strides = [1, 1, 1, 1]} : vector<4x3x3x128xf32> to vector<1x1x1x128xf32>
    %155 = vector.shape_cast %154 : vector<1x1x1x128xf32> to vector<128xf32>
    %156 = vector.shape_cast %155 : vector<128xf32> to vector<1x1x128xf32>
    %157 = vector.broadcast %156 : vector<1x1x128xf32> to vector<8x8x128xf32>
    %158 = arith.mulf %153, %157 : vector<8x8x128xf32>
    %159 = arith.addf %152, %158 : vector<8x8x128xf32>
    %160 = vector.extract_strided_slice %1 {offsets = [6, 6, 0], sizes = [8, 8, 128], strides = [1, 1, 1]} : vector<20x20x128xf32> to vector<8x8x128xf32>
    %161 = vector.extract_strided_slice %2 {offsets = [2, 1, 1, 0], sizes = [1, 1, 1, 128], strides = [1, 1, 1, 1]} : vector<4x3x3x128xf32> to vector<1x1x1x128xf32>
    %162 = vector.shape_cast %161 : vector<1x1x1x128xf32> to vector<128xf32>
    %163 = vector.shape_cast %162 : vector<128xf32> to vector<1x1x128xf32>
    %164 = vector.broadcast %163 : vector<1x1x128xf32> to vector<8x8x128xf32>
    %165 = arith.mulf %160, %164 : vector<8x8x128xf32>
    %166 = arith.addf %159, %165 : vector<8x8x128xf32>
    %167 = vector.extract_strided_slice %1 {offsets = [6, 10, 0], sizes = [8, 8, 128], strides = [1, 1, 1]} : vector<20x20x128xf32> to vector<8x8x128xf32>
    %168 = vector.extract_strided_slice %2 {offsets = [2, 1, 2, 0], sizes = [1, 1, 1, 128], strides = [1, 1, 1, 1]} : vector<4x3x3x128xf32> to vector<1x1x1x128xf32>
    %169 = vector.shape_cast %168 : vector<1x1x1x128xf32> to vector<128xf32>
    %170 = vector.shape_cast %169 : vector<128xf32> to vector<1x1x128xf32>
    %171 = vector.broadcast %170 : vector<1x1x128xf32> to vector<8x8x128xf32>
    %172 = arith.mulf %167, %171 : vector<8x8x128xf32>
    %173 = arith.addf %166, %172 : vector<8x8x128xf32>
    %174 = vector.extract_strided_slice %1 {offsets = [10, 2, 0], sizes = [8, 8, 128], strides = [1, 1, 1]} : vector<20x20x128xf32> to vector<8x8x128xf32>
    %175 = vector.extract_strided_slice %2 {offsets = [2, 2, 0, 0], sizes = [1, 1, 1, 128], strides = [1, 1, 1, 1]} : vector<4x3x3x128xf32> to vector<1x1x1x128xf32>
    %176 = vector.shape_cast %175 : vector<1x1x1x128xf32> to vector<128xf32>
    %177 = vector.shape_cast %176 : vector<128xf32> to vector<1x1x128xf32>
    %178 = vector.broadcast %177 : vector<1x1x128xf32> to vector<8x8x128xf32>
    %179 = arith.mulf %174, %178 : vector<8x8x128xf32>
    %180 = arith.addf %173, %179 : vector<8x8x128xf32>
    %181 = vector.extract_strided_slice %1 {offsets = [10, 6, 0], sizes = [8, 8, 128], strides = [1, 1, 1]} : vector<20x20x128xf32> to vector<8x8x128xf32>
    %182 = vector.extract_strided_slice %2 {offsets = [2, 2, 1, 0], sizes = [1, 1, 1, 128], strides = [1, 1, 1, 1]} : vector<4x3x3x128xf32> to vector<1x1x1x128xf32>
    %183 = vector.shape_cast %182 : vector<1x1x1x128xf32> to vector<128xf32>
    %184 = vector.shape_cast %183 : vector<128xf32> to vector<1x1x128xf32>
    %185 = vector.broadcast %184 : vector<1x1x128xf32> to vector<8x8x128xf32>
    %186 = arith.mulf %181, %185 : vector<8x8x128xf32>
    %187 = arith.addf %180, %186 : vector<8x8x128xf32>
    %188 = vector.extract_strided_slice %1 {offsets = [10, 10, 0], sizes = [8, 8, 128], strides = [1, 1, 1]} : vector<20x20x128xf32> to vector<8x8x128xf32>
    %189 = vector.extract_strided_slice %2 {offsets = [2, 2, 2, 0], sizes = [1, 1, 1, 128], strides = [1, 1, 1, 1]} : vector<4x3x3x128xf32> to vector<1x1x1x128xf32>
    %190 = vector.shape_cast %189 : vector<1x1x1x128xf32> to vector<128xf32>
    %191 = vector.shape_cast %190 : vector<128xf32> to vector<1x1x128xf32>
    %192 = vector.broadcast %191 : vector<1x1x128xf32> to vector<8x8x128xf32>
    %193 = arith.mulf %188, %192 : vector<8x8x128xf32>
    %194 = arith.addf %187, %193 : vector<8x8x128xf32>
    %c0_14 = arith.constant 0 : index
    %c0_15 = arith.constant 0 : index
    %c0_16 = arith.constant 0 : index
    %c256 = arith.constant 256 : index
    %195 = vector.load %arg3[%c0_14, %c0_15, %c0_16, %c256] : memref<1x8x8x512xf32, #tpu.memory_space<vmem>>, vector<1x8x8x128xf32>
    %196 = vector.shape_cast %195 : vector<1x8x8x128xf32> to vector<8x8x128xf32>
    %197 = vector.shape_cast %194 : vector<8x8x128xf32> to vector<1x8x8x128xf32>
    tpu.vector_store %arg3[%c0_14, %c0_15, %c0_16, %c256], %197 {strides = array<i32>} : memref<1x8x8x512xf32, #tpu.memory_space<vmem>>, vector<1x8x8x128xf32>,
    %198 = vector.extract_strided_slice %1 {offsets = [0, 0, 0], sizes = [8, 8, 128], strides = [1, 1, 1]} : vector<20x20x128xf32> to vector<8x8x128xf32>
    %199 = vector.extract_strided_slice %2 {offsets = [3, 0, 0, 0], sizes = [1, 1, 1, 128], strides = [1, 1, 1, 1]} : vector<4x3x3x128xf32> to vector<1x1x1x128xf32>
    %200 = vector.shape_cast %199 : vector<1x1x1x128xf32> to vector<128xf32>
    %201 = vector.shape_cast %200 : vector<128xf32> to vector<1x1x128xf32>
    %202 = vector.broadcast %201 : vector<1x1x128xf32> to vector<8x8x128xf32>
    %203 = arith.mulf %198, %202 : vector<8x8x128xf32>
    %204 = vector.extract_strided_slice %1 {offsets = [0, 6, 0], sizes = [8, 8, 128], strides = [1, 1, 1]} : vector<20x20x128xf32> to vector<8x8x128xf32>
    %205 = vector.extract_strided_slice %2 {offsets = [3, 0, 1, 0], sizes = [1, 1, 1, 128], strides = [1, 1, 1, 1]} : vector<4x3x3x128xf32> to vector<1x1x1x128xf32>
    %206 = vector.shape_cast %205 : vector<1x1x1x128xf32> to vector<128xf32>
    %207 = vector.shape_cast %206 : vector<128xf32> to vector<1x1x128xf32>
    %208 = vector.broadcast %207 : vector<1x1x128xf32> to vector<8x8x128xf32>
    %209 = arith.mulf %204, %208 : vector<8x8x128xf32>
    %210 = arith.addf %203, %209 : vector<8x8x128xf32>
    %211 = vector.extract_strided_slice %1 {offsets = [0, 12, 0], sizes = [8, 8, 128], strides = [1, 1, 1]} : vector<20x20x128xf32> to vector<8x8x128xf32>
    %212 = vector.extract_strided_slice %2 {offsets = [3, 0, 2, 0], sizes = [1, 1, 1, 128], strides = [1, 1, 1, 1]} : vector<4x3x3x128xf32> to vector<1x1x1x128xf32>
    %213 = vector.shape_cast %212 : vector<1x1x1x128xf32> to vector<128xf32>
    %214 = vector.shape_cast %213 : vector<128xf32> to vector<1x1x128xf32>
    %215 = vector.broadcast %214 : vector<1x1x128xf32> to vector<8x8x128xf32>
    %216 = arith.mulf %211, %215 : vector<8x8x128xf32>
    %217 = arith.addf %210, %216 : vector<8x8x128xf32>
    %218 = vector.extract_strided_slice %1 {offsets = [6, 0, 0], sizes = [8, 8, 128], strides = [1, 1, 1]} : vector<20x20x128xf32> to vector<8x8x128xf32>
    %219 = vector.extract_strided_slice %2 {offsets = [3, 1, 0, 0], sizes = [1, 1, 1, 128], strides = [1, 1, 1, 1]} : vector<4x3x3x128xf32> to vector<1x1x1x128xf32>
    %220 = vector.shape_cast %219 : vector<1x1x1x128xf32> to vector<128xf32>
    %221 = vector.shape_cast %220 : vector<128xf32> to vector<1x1x128xf32>
    %222 = vector.broadcast %221 : vector<1x1x128xf32> to vector<8x8x128xf32>
    %223 = arith.mulf %218, %222 : vector<8x8x128xf32>
    %224 = arith.addf %217, %223 : vector<8x8x128xf32>
    %225 = vector.extract_strided_slice %1 {offsets = [6, 6, 0], sizes = [8, 8, 128], strides = [1, 1, 1]} : vector<20x20x128xf32> to vector<8x8x128xf32>
    %226 = vector.extract_strided_slice %2 {offsets = [3, 1, 1, 0], sizes = [1, 1, 1, 128], strides = [1, 1, 1, 1]} : vector<4x3x3x128xf32> to vector<1x1x1x128xf32>
    %227 = vector.shape_cast %226 : vector<1x1x1x128xf32> to vector<128xf32>
    %228 = vector.shape_cast %227 : vector<128xf32> to vector<1x1x128xf32>
    %229 = vector.broadcast %228 : vector<1x1x128xf32> to vector<8x8x128xf32>
    %230 = arith.mulf %225, %229 : vector<8x8x128xf32>
    %231 = arith.addf %224, %230 : vector<8x8x128xf32>
    %232 = vector.extract_strided_slice %1 {offsets = [6, 12, 0], sizes = [8, 8, 128], strides = [1, 1, 1]} : vector<20x20x128xf32> to vector<8x8x128xf32>
    %233 = vector.extract_strided_slice %2 {offsets = [3, 1, 2, 0], sizes = [1, 1, 1, 128], strides = [1, 1, 1, 1]} : vector<4x3x3x128xf32> to vector<1x1x1x128xf32>
    %234 = vector.shape_cast %233 : vector<1x1x1x128xf32> to vector<128xf32>
    %235 = vector.shape_cast %234 : vector<128xf32> to vector<1x1x128xf32>
    %236 = vector.broadcast %235 : vector<1x1x128xf32> to vector<8x8x128xf32>
    %237 = arith.mulf %232, %236 : vector<8x8x128xf32>
    %238 = arith.addf %231, %237 : vector<8x8x128xf32>
    %239 = vector.extract_strided_slice %1 {offsets = [12, 0, 0], sizes = [8, 8, 128], strides = [1, 1, 1]} : vector<20x20x128xf32> to vector<8x8x128xf32>
    %240 = vector.extract_strided_slice %2 {offsets = [3, 2, 0, 0], sizes = [1, 1, 1, 128], strides = [1, 1, 1, 1]} : vector<4x3x3x128xf32> to vector<1x1x1x128xf32>
    %241 = vector.shape_cast %240 : vector<1x1x1x128xf32> to vector<128xf32>
    %242 = vector.shape_cast %241 : vector<128xf32> to vector<1x1x128xf32>
    %243 = vector.broadcast %242 : vector<1x1x128xf32> to vector<8x8x128xf32>
    %244 = arith.mulf %239, %243 : vector<8x8x128xf32>
    %245 = arith.addf %238, %244 : vector<8x8x128xf32>
    %246 = vector.extract_strided_slice %1 {offsets = [12, 6, 0], sizes = [8, 8, 128], strides = [1, 1, 1]} : vector<20x20x128xf32> to vector<8x8x128xf32>
    %247 = vector.extract_strided_slice %2 {offsets = [3, 2, 1, 0], sizes = [1, 1, 1, 128], strides = [1, 1, 1, 1]} : vector<4x3x3x128xf32> to vector<1x1x1x128xf32>
    %248 = vector.shape_cast %247 : vector<1x1x1x128xf32> to vector<128xf32>
    %249 = vector.shape_cast %248 : vector<128xf32> to vector<1x1x128xf32>
    %250 = vector.broadcast %249 : vector<1x1x128xf32> to vector<8x8x128xf32>
    %251 = arith.mulf %246, %250 : vector<8x8x128xf32>
    %252 = arith.addf %245, %251 : vector<8x8x128xf32>
    %253 = vector.extract_strided_slice %1 {offsets = [12, 12, 0], sizes = [8, 8, 128], strides = [1, 1, 1]} : vector<20x20x128xf32> to vector<8x8x128xf32>
    %254 = vector.extract_strided_slice %2 {offsets = [3, 2, 2, 0], sizes = [1, 1, 1, 128], strides = [1, 1, 1, 1]} : vector<4x3x3x128xf32> to vector<1x1x1x128xf32>
    %255 = vector.shape_cast %254 : vector<1x1x1x128xf32> to vector<128xf32>
    %256 = vector.shape_cast %255 : vector<128xf32> to vector<1x1x128xf32>
    %257 = vector.broadcast %256 : vector<1x1x128xf32> to vector<8x8x128xf32>
    %258 = arith.mulf %253, %257 : vector<8x8x128xf32>
    %259 = arith.addf %252, %258 : vector<8x8x128xf32>
    %c0_17 = arith.constant 0 : index
    %c0_18 = arith.constant 0 : index
    %c0_19 = arith.constant 0 : index
    %c384 = arith.constant 384 : index
    %260 = vector.load %arg3[%c0_17, %c0_18, %c0_19, %c384] : memref<1x8x8x512xf32, #tpu.memory_space<vmem>>, vector<1x8x8x128xf32>
    %261 = vector.shape_cast %260 : vector<1x8x8x128xf32> to vector<8x8x128xf32>
    %262 = vector.shape_cast %259 : vector<8x8x128xf32> to vector<1x8x8x128xf32>
    tpu.vector_store %arg3[%c0_17, %c0_18, %c0_19, %c384], %262 {strides = array<i32>} : memref<1x8x8x512xf32, #tpu.memory_space<vmem>>, vector<1x8x8x128xf32>,
    return
  }
  func.func @transform_0(%arg0: i32) -> (i32, i32, i32, i32) {
    %c0_i32 = arith.constant 0 : i32
    %c0_i32_0 = arith.constant 0 : i32
    %c0_i32_1 = arith.constant 0 : i32
    %c0_i32_2 = arith.constant 0 : i32
    return %arg0, %c0_i32, %c0_i32_0, %c0_i32_1 : i32, i32, i32, i32
  }
  func.func @transform_1(%arg0: i32) -> (i32, i32, i32, i32) {
    %c0_i32 = arith.constant 0 : i32
    %c0_i32_0 = arith.constant 0 : i32
    %c0_i32_1 = arith.constant 0 : i32
    %c0_i32_2 = arith.constant 0 : i32
    %c0_i32_3 = arith.constant 0 : i32
    return %c0_i32, %c0_i32_0, %c0_i32_1, %c0_i32_2 : i32, i32, i32, i32
  }
  func.func @transform_2(%arg0: i32) -> (i32, i32, i32, i32) {
    %c0_i32 = arith.constant 0 : i32
    %c0_i32_0 = arith.constant 0 : i32
    %c0_i32_1 = arith.constant 0 : i32
    %c0_i32_2 = arith.constant 0 : i32
    return %arg0, %c0_i32, %c0_i32_0, %c0_i32_1 : i32, i32, i32, i32
  }
}

module attributes {stable_mosaic.version = 11 : i64} {
  func.func @_matmul_bias_kernel(%arg0: i32, %arg1: memref<128x512xf32, #tpu.memory_space<vmem>>, %arg2: memref<512x640xbf16, #tpu.memory_space<vmem>>, %arg3: memref<1x640xf32, #tpu.memory_space<vmem>>, %arg4: memref<128x640xf32, #tpu.memory_space<vmem>>) attributes {dimension_semantics = [#tpu.dimension_semantics<parallel>], iteration_bounds = array<i64: 1>, scalar_prefetch = 0 : i64, scratch_operands = 0 : i64, tpu.core_type = #tpu.core_type<tc>, window_params = [{transform_indices = @transform_0, window_bounds = array<i64: 128, 512>}, {pipeline_mode = #tpu.pipeline_mode<synchronous>, transform_indices = @transform_1, window_bounds = array<i64: 512, 640>}, {pipeline_mode = #tpu.pipeline_mode<synchronous>, transform_indices = @transform_2, window_bounds = array<i64: 1, 640>}, {transform_indices = @transform_3, window_bounds = array<i64: 128, 640>}]} {
    %c0 = arith.constant 0 : index
    %c0_0 = arith.constant 0 : index
    %0 = vector.load %arg1[%c0, %c0_0] : memref<128x512xf32, #tpu.memory_space<vmem>>, vector<128x512xf32>
    %1 = arith.truncf %0 : vector<128x512xf32> to vector<128x512xbf16>
    %c0_1 = arith.constant 0 : index
    %c0_2 = arith.constant 0 : index
    %2 = vector.load %arg2[%c0_1, %c0_2] : memref<512x640xbf16, #tpu.memory_space<vmem>>, vector<512x640xbf16>
    %cst = arith.constant dense<0.000000e+00> : vector<128x640xf32>
    %3 = tpu.matmul %1, %2, %cst {dimension_numbers = #tpu.dot_dimension_numbers<[1], [0], [0], [1], [0, 0, 1, 1], [], []>} : vector<128x512xbf16>, vector<512x640xbf16>, vector<128x640xf32> -> vector<128x640xf32>
    %c0_3 = arith.constant 0 : index
    %c0_4 = arith.constant 0 : index
    %4 = vector.load %arg3[%c0_3, %c0_4] : memref<1x640xf32, #tpu.memory_space<vmem>>, vector<1x640xf32>
    %5 = vector.broadcast %4 : vector<1x640xf32> to vector<128x640xf32>
    %6 = arith.addf %3, %5 : vector<128x640xf32>
    %c0_5 = arith.constant 0 : index
    %c0_6 = arith.constant 0 : index
    %7 = vector.load %arg4[%c0_5, %c0_6] : memref<128x640xf32, #tpu.memory_space<vmem>>, vector<128x640xf32>
    tpu.vector_store %arg4[%c0_5, %c0_6], %6 {strides = array<i32>} : memref<128x640xf32, #tpu.memory_space<vmem>>, vector<128x640xf32>,
    return
  }
  func.func @transform_0(%arg0: i32) -> (i32, i32) {
    %c0_i32 = arith.constant 0 : i32
    %c0_i32_0 = arith.constant 0 : i32
    return %arg0, %c0_i32 : i32, i32
  }
  func.func @transform_1(%arg0: i32) -> (i32, i32) {
    %c0_i32 = arith.constant 0 : i32
    %c0_i32_0 = arith.constant 0 : i32
    %c0_i32_1 = arith.constant 0 : i32
    return %c0_i32, %c0_i32_0 : i32, i32
  }
  func.func @transform_2(%arg0: i32) -> (i32, i32) {
    %c0_i32 = arith.constant 0 : i32
    %c0_i32_0 = arith.constant 0 : i32
    %c0_i32_1 = arith.constant 0 : i32
    return %c0_i32, %c0_i32_0 : i32, i32
  }
  func.func @transform_3(%arg0: i32) -> (i32, i32) {
    %c0_i32 = arith.constant 0 : i32
    %c0_i32_0 = arith.constant 0 : i32
    return %arg0, %c0_i32 : i32, i32
  }
}

module attributes {stable_mosaic.version = 11 : i64} {
  func.func @_cc_attention_kernel(%arg0: i32, %arg1: memref<1xf32, #tpu.memory_space<smem>>, %arg2: memref<1x8x8x64xf32, #tpu.memory_space<vmem>>, %arg3: memref<1x8x8x64xf32, #tpu.memory_space<vmem>>, %arg4: memref<1x8x8x512xf32, #tpu.memory_space<vmem>>, %arg5: memref<1x8x8x512xf32, #tpu.memory_space<vmem>>, %arg6: memref<1x8x8x512xf32, #tpu.memory_space<vmem>>) attributes {dimension_semantics = [#tpu.dimension_semantics<parallel>], iteration_bounds = array<i64: 2>, scalar_prefetch = 0 : i64, scratch_operands = 0 : i64, tpu.core_type = #tpu.core_type<tc>, window_params = [{transform_indices = @transform_0, window_bounds = array<i64: 1>}, {transform_indices = @transform_1, window_bounds = array<i64: 1, 8, 8, 64>}, {transform_indices = @transform_2, window_bounds = array<i64: 1, 8, 8, 64>}, {transform_indices = @transform_3, window_bounds = array<i64: 1, 8, 8, 512>}, {transform_indices = @transform_4, window_bounds = array<i64: 1, 8, 8, 512>}, {transform_indices = @transform_5, window_bounds = array<i64: 1, 8, 8, 512>}]} {
    %c0 = arith.constant 0 : index
    %c0_0 = arith.constant 0 : index
    %c0_1 = arith.constant 0 : index
    %c0_2 = arith.constant 0 : index
    %0 = vector.load %arg2[%c0, %c0_0, %c0_1, %c0_2] : memref<1x8x8x64xf32, #tpu.memory_space<vmem>>, vector<1x8x8x64xf32>
    %1 = vector.shape_cast %0 : vector<1x8x8x64xf32> to vector<8x8x64xf32>
    %2 = arith.truncf %1 : vector<8x8x64xf32> to vector<8x8x64xbf16>
    %c0_3 = arith.constant 0 : index
    %c0_4 = arith.constant 0 : index
    %c0_5 = arith.constant 0 : index
    %c0_6 = arith.constant 0 : index
    %3 = vector.load %arg3[%c0_3, %c0_4, %c0_5, %c0_6] : memref<1x8x8x64xf32, #tpu.memory_space<vmem>>, vector<1x8x8x64xf32>
    %4 = vector.shape_cast %3 : vector<1x8x8x64xf32> to vector<8x8x64xf32>
    %5 = arith.truncf %4 : vector<8x8x64xf32> to vector<8x8x64xbf16>
    %c0_7 = arith.constant 0 : index
    %c0_8 = arith.constant 0 : index
    %c0_9 = arith.constant 0 : index
    %c0_10 = arith.constant 0 : index
    %6 = vector.load %arg4[%c0_7, %c0_8, %c0_9, %c0_10] : memref<1x8x8x512xf32, #tpu.memory_space<vmem>>, vector<1x8x8x512xf32>
    %7 = vector.shape_cast %6 : vector<1x8x8x512xf32> to vector<8x8x512xf32>
    %8 = arith.truncf %7 : vector<8x8x512xf32> to vector<8x8x512xbf16>
    %c0_11 = arith.constant 0 : index
    %c0_12 = arith.constant 0 : index
    %c0_13 = arith.constant 0 : index
    %c0_14 = arith.constant 0 : index
    %9 = vector.load %arg5[%c0_11, %c0_12, %c0_13, %c0_14] : memref<1x8x8x512xf32, #tpu.memory_space<vmem>>, vector<1x8x8x512xf32>
    %10 = vector.shape_cast %9 : vector<1x8x8x512xf32> to vector<8x8x512xf32>
    %11 = tpu.transpose %2, [1, 0, 2] : vector<8x8x64xbf16> -> vector<8x8x64xbf16>
    %12 = tpu.transpose %5, [1, 0, 2] : vector<8x8x64xbf16> -> vector<8x8x64xbf16>
    %13 = tpu.transpose %8, [1, 0, 2] : vector<8x8x512xbf16> -> vector<8x8x512xbf16>
    "tpu.trace_start"() <{level = 10 : i32, message = "whc,wkc->whk"}> : () -> ()
    %cst = arith.constant dense<0.000000e+00> : vector<8x8x8xf32>
    %14 = tpu.matmul %11, %12, %cst {dimension_numbers = #tpu.dot_dimension_numbers<[2], [2], [1], [1], [0, 0, 0, 1, 1, 1], [0], [0]>} : vector<8x8x64xbf16>, vector<8x8x64xbf16>, vector<8x8x8xf32> -> vector<8x8x8xf32>
    "tpu.trace_stop"() : () -> ()
    %15 = tpu.iota {dimensions = array<i32: 0>} : vector<8x8xi32>
    %16 = tpu.iota {dimensions = array<i32: 1>} : vector<8x8xi32>
    %17 = arith.cmpi eq, %15, %16 : vector<8x8xi32>
    %cst_15 = arith.constant 0xFF800000 : f32
    %cst_16 = arith.constant 0.000000e+00 : f32
    %18 = vector.broadcast %cst_15 : f32 to vector<8x8xf32>
    %19 = vector.broadcast %cst_16 : f32 to vector<8x8xf32>
    %20 = arith.select %17, %18, %19 : vector<8x8xi1>, vector<8x8xf32>
    %21 = vector.shape_cast %20 : vector<8x8xf32> to vector<1x8x8xf32>
    %22 = vector.broadcast %21 : vector<1x8x8xf32> to vector<8x8x8xf32>
    %23 = arith.addf %14, %22 : vector<8x8x8xf32>
    "tpu.trace_start"() <{level = 10 : i32, message = "hwc,hvc->hwv"}> : () -> ()
    %cst_17 = arith.constant dense<0.000000e+00> : vector<8x8x8xf32>
    %24 = tpu.matmul %2, %5, %cst_17 {dimension_numbers = #tpu.dot_dimension_numbers<[2], [2], [1], [1], [0, 0, 0, 1, 1, 1], [0], [0]>} : vector<8x8x64xbf16>, vector<8x8x64xbf16>, vector<8x8x8xf32> -> vector<8x8x8xf32>
    "tpu.trace_stop"() : () -> ()
    %cst_18 = arith.constant dense<0xFF800000> : vector<8x8xf32>
    %25 = vector.multi_reduction <maximumf>, %23, %cst_18 [2] : vector<8x8x8xf32> to vector<8x8xf32>
    %26 = vector.shape_cast %25 : vector<8x8xf32> to vector<8x8x1xf32>
    %cst_19 = arith.constant dense<0xFF800000> : vector<8x8xf32>
    %27 = vector.multi_reduction <maximumf>, %24, %cst_19 [2] : vector<8x8x8xf32> to vector<8x8xf32>
    %28 = vector.shape_cast %27 : vector<8x8xf32> to vector<8x8x1xf32>
    %29 = tpu.transpose %26, [1, 0, 2] : vector<8x8x1xf32> -> vector<8x8x1xf32>
    %30 = arith.maximumf %29, %28 : vector<8x8x1xf32>
    %31 = tpu.transpose %30, [1, 0, 2] : vector<8x8x1xf32> -> vector<8x8x1xf32>
    %32 = vector.broadcast %31 : vector<8x8x1xf32> to vector<8x8x8xf32>
    %33 = arith.subf %23, %32 : vector<8x8x8xf32>
    %34 = math.exp %33 : vector<8x8x8xf32>
    %35 = vector.broadcast %30 : vector<8x8x1xf32> to vector<8x8x8xf32>
    %36 = arith.subf %24, %35 : vector<8x8x8xf32>
    %37 = math.exp %36 : vector<8x8x8xf32>
    %cst_20 = arith.constant dense<0.000000e+00> : vector<8x8xf32>
    %38 = vector.multi_reduction <add>, %34, %cst_20 [2] : vector<8x8x8xf32> to vector<8x8xf32>
    %39 = vector.shape_cast %38 : vector<8x8xf32> to vector<8x8x1xf32>
    %40 = tpu.transpose %39, [1, 0, 2] : vector<8x8x1xf32> -> vector<8x8x1xf32>
    %cst_21 = arith.constant dense<0.000000e+00> : vector<8x8xf32>
    %41 = vector.multi_reduction <add>, %37, %cst_21 [2] : vector<8x8x8xf32> to vector<8x8xf32>
    %42 = vector.shape_cast %41 : vector<8x8xf32> to vector<8x8x1xf32>
    %43 = arith.addf %40, %42 : vector<8x8x1xf32>
    %44 = tpu.reciprocal %43 {approx = true} : vector<8x8x1xf32> -> vector<8x8x1xf32>
    %45 = tpu.transpose %44, [1, 0, 2] : vector<8x8x1xf32> -> vector<8x8x1xf32>
    %46 = vector.broadcast %45 : vector<8x8x1xf32> to vector<8x8x8xf32>
    %47 = arith.mulf %34, %46 : vector<8x8x8xf32>
    %48 = arith.truncf %47 : vector<8x8x8xf32> to vector<8x8x8xbf16>
    %49 = vector.broadcast %44 : vector<8x8x1xf32> to vector<8x8x8xf32>
    %50 = arith.mulf %37, %49 : vector<8x8x8xf32>
    %51 = arith.truncf %50 : vector<8x8x8xf32> to vector<8x8x8xbf16>
    "tpu.trace_start"() <{level = 10 : i32, message = "whk,wkc->whc"}> : () -> ()
    %cst_22 = arith.constant dense<0.000000e+00> : vector<8x8x512xf32>
    %52 = tpu.matmul %48, %13, %cst_22 {dimension_numbers = #tpu.dot_dimension_numbers<[2], [1], [1], [2], [0, 0, 0, 1, 1, 2], [0], [0]>} : vector<8x8x8xbf16>, vector<8x8x512xbf16>, vector<8x8x512xf32> -> vector<8x8x512xf32>
    "tpu.trace_stop"() : () -> ()
    "tpu.trace_start"() <{level = 10 : i32, message = "hwv,hvc->hwc"}> : () -> ()
    %cst_23 = arith.constant dense<0.000000e+00> : vector<8x8x512xf32>
    %53 = tpu.matmul %51, %8, %cst_23 {dimension_numbers = #tpu.dot_dimension_numbers<[2], [1], [1], [2], [0, 0, 0, 1, 1, 2], [0], [0]>} : vector<8x8x8xbf16>, vector<8x8x512xbf16>, vector<8x8x512xf32> -> vector<8x8x512xf32>
    "tpu.trace_stop"() : () -> ()
    %c0_24 = arith.constant 0 : index
    %54 = memref.load %arg1[%c0_24] : memref<1xf32, #tpu.memory_space<smem>>
    %55 = tpu.transpose %52, [1, 0, 2] : vector<8x8x512xf32> -> vector<8x8x512xf32>
    %56 = arith.addf %55, %53 : vector<8x8x512xf32>
    %57 = vector.broadcast %54 : f32 to vector<8x8x512xf32>
    %58 = arith.mulf %57, %56 : vector<8x8x512xf32>
    %59 = arith.addf %58, %10 : vector<8x8x512xf32>
    %c0_25 = arith.constant 0 : index
    %c0_26 = arith.constant 0 : index
    %c0_27 = arith.constant 0 : index
    %c0_28 = arith.constant 0 : index
    %60 = vector.load %arg6[%c0_25, %c0_26, %c0_27, %c0_28] : memref<1x8x8x512xf32, #tpu.memory_space<vmem>>, vector<1x8x8x512xf32>
    %61 = vector.shape_cast %60 : vector<1x8x8x512xf32> to vector<8x8x512xf32>
    %62 = vector.shape_cast %59 : vector<8x8x512xf32> to vector<1x8x8x512xf32>
    tpu.vector_store %arg6[%c0_25, %c0_26, %c0_27, %c0_28], %62 {strides = array<i32>} : memref<1x8x8x512xf32, #tpu.memory_space<vmem>>, vector<1x8x8x512xf32>,
    return
  }
  func.func @transform_0(%arg0: i32) -> i32 {
    %c0_i32 = arith.constant 0 : i32
    %c0_i32_0 = arith.constant 0 : i32
    return %c0_i32 : i32
  }
  func.func @transform_1(%arg0: i32) -> (i32, i32, i32, i32) {
    %c0_i32 = arith.constant 0 : i32
    %c0_i32_0 = arith.constant 0 : i32
    %c0_i32_1 = arith.constant 0 : i32
    %c0_i32_2 = arith.constant 0 : i32
    return %arg0, %c0_i32, %c0_i32_0, %c0_i32_1 : i32, i32, i32, i32
  }
  func.func @transform_2(%arg0: i32) -> (i32, i32, i32, i32) {
    %c0_i32 = arith.constant 0 : i32
    %c0_i32_0 = arith.constant 0 : i32
    %c0_i32_1 = arith.constant 0 : i32
    %c0_i32_2 = arith.constant 0 : i32
    return %arg0, %c0_i32, %c0_i32_0, %c0_i32_1 : i32, i32, i32, i32
  }
  func.func @transform_3(%arg0: i32) -> (i32, i32, i32, i32) {
    %c0_i32 = arith.constant 0 : i32
    %c0_i32_0 = arith.constant 0 : i32
    %c0_i32_1 = arith.constant 0 : i32
    %c0_i32_2 = arith.constant 0 : i32
    return %arg0, %c0_i32, %c0_i32_0, %c0_i32_1 : i32, i32, i32, i32
  }
  func.func @transform_4(%arg0: i32) -> (i32, i32, i32, i32) {
    %c0_i32 = arith.constant 0 : i32
    %c0_i32_0 = arith.constant 0 : i32
    %c0_i32_1 = arith.constant 0 : i32
    %c0_i32_2 = arith.constant 0 : i32
    return %arg0, %c0_i32, %c0_i32_0, %c0_i32_1 : i32, i32, i32, i32
  }
  func.func @transform_5(%arg0: i32) -> (i32, i32, i32, i32) {
    %c0_i32 = arith.constant 0 : i32
    %c0_i32_0 = arith.constant 0 : i32
    %c0_i32_1 = arith.constant 0 : i32
    %c0_i32_2 = arith.constant 0 : i32
    return %arg0, %c0_i32, %c0_i32_0, %c0_i32_1 : i32, i32, i32, i32
  }
}

</mosaic_0001>

<bundles_post_ra>
// kernel: criss_cross_forward.6
= control target key start
LH: loop header
LB: loop body
LE: loop exit
PB: predicated region body
PF: predicated region fallthrough
CT: control target
= control target key end

     0   :  { %v50_v5 = vlaneseq  ;;  %s443_s1 = inlined_call_operand.vmem [shape: f32[1,128], index: 1, kind: input, shape index: {}]   ;;  %s444_s2 = inlined_call_operand.vmem [shape: f32[1,128], index: 2, kind: input, shape index: {}]   ;;  %s445_s0 = inlined_call_operand.vmem [shape: f32[128,128], index: 0, kind: input, shape index: {}]   ;;  %s446_s3 = inlined_call_operand.vmem [shape: f32[1,128], index: 3, kind: input, shape index: {}]   ;;  %s447_s4 = inlined_call_operand.vmem [shape: f32[1,128], index: 4, kind: input, shape index: {}]   ;;  %s448_s5 = inlined_call_operand.vmem [shape: f32[1,128], index: 5, kind: input, shape index: {}]   ;;  %s449_s6 = inlined_call_operand.vmem [shape: f32[128,128], index: 6, kind: output, shape index: {}]  }
   0x1   :  { %v23_v0 = vld [vmem:[%s443_s1] sm:$0x1]  ;;  %v34_v13 = vld [vmem:[%s445_s0 + $0x8] sm:$0xff]  ;;  %v35_v14 = vld [vmem:[%s445_s0 + $0x10] sm:$0xff] }
   0x2   :  { %v25_v1 = vld [vmem:[%s444_s2] sm:$0x1]  ;;  %v24_v2 = vmul.f32 0.0078125, %v23_v0  ;;  %v51_v8 = vshrl.u32 %v50_v5, 7  ;;  %v36_v15 = vld [vmem:[%s445_s0 + $0x18] sm:$0xff]  ;;  %v38_v17 = vld [vmem:[%s445_s0 + $0x28] sm:$0xff] }
   0x3   :  { %v26_v3 = vmul.f32 0.0078125, %v25_v1  ;;  %v31_v10 = vld [vmem:[%s446_s3] sm:$0x1]  ;;  %v39_v18 = vld [vmem:[%s445_s0 + $0x30] sm:$0xff]  ;;  %v40_v19 = vld [vmem:[%s445_s0 + $0x38] sm:$0xff] }
   0x4   :  { %v27_v4 = vmul.f32 %v24_v2, %v24_v2  ;;  %v52_v9 = vsub.s32 0, %v51_v8  ;;  %v33_v11 = vld [vmem:[%s445_s0] sm:$0xff]  ;;  %v273_v21 = vld [vmem:[%s445_s0 + $0x48] sm:$0xff]  ;;  %v280_v25 = vld [vmem:[%s445_s0 + $0x50] sm:$0xff] }
   0x5   :  { %v37_v16 = vld [vmem:[%s445_s0 + $0x20] sm:$0xff]  ;;  %v285_v26 = vld [vmem:[%s445_s0 + $0x58] sm:$0xff]  ;;  %v298_v32 = vld [vmem:[%s445_s0 + $0x68] sm:$0xff] }
   0x6   :  { %v28_v6 = vsub.f32 %v26_v3, %v27_v4  ;;  %v242_v12 = vrot.slane %v24_v2, %v52_v9  ;;  %v268_v20 = vld [vmem:[%s445_s0 + $0x40] sm:$0xff]  ;;  %v303_v33 = vld [vmem:[%s445_s0 + $0x70] sm:$0xff]  ;;  %v308_v34 = vld [vmem:[%s445_s0 + $0x78] sm:$0xff] }
   0x7   :  { %v290_v27 = vld [vmem:[%s445_s0 + $0x60] sm:$0xff] }
   0x8   :  { %v29_v7 = vadd.f32 0.001, %v28_v6  ;;  %v55_v23 = vsub.f32 %v33_v11, %v242_v12  ;;  %v56_v24 = vsub.f32 %v34_v13, %v242_v12  ;;  %v57_v29 = vsub.f32 %v35_v14, %v242_v12  ;;  %v326_v43 = vld [vmem:[%s447_s4] ss:$0 sm:$0xff] }
   0x9   :  { %v58_v30 = vsub.f32 %v36_v15, %v242_v12  ;;  %v59_v31 = vsub.f32 %v37_v16, %v242_v12  ;;  %v60_v35 = vsub.f32 %v38_v17, %v242_v12  ;;  %v61_v36 = vsub.f32 %v39_v18, %v242_v12  ;;  %v343_v52 = vld [vmem:[%s448_s5] ss:$0 sm:$0xff] }
   0xa   :  { %193 = vrsqrt.f32 %v29_v7  ;;  %v62_v37 = vsub.f32 %v40_v19, %v242_v12  ;;  %v63_v38 = vsub.f32 %v268_v20, %v242_v12  ;;  %v64_v40 = vsub.f32 %v273_v21, %v242_v12 }
   0xb   :  { %v65_v41 = vsub.f32 %v280_v25, %v242_v12  ;;  %v66_v42 = vsub.f32 %v285_v26, %v242_v12  ;;  %v67_v44 = vsub.f32 %v290_v27, %v242_v12  ;;  %v68_v45 = vsub.f32 %v298_v32, %v242_v12 }
   0xc   :  { %v69_v46 = vsub.f32 %v303_v33, %v242_v12  ;;  %v70_v47 = vsub.f32 %v308_v34, %v242_v12 }
  0x14   :  { %v194_v22 = vpop.eup %193 }
  0x15   :  { %v32_v28 = vmul.f32 %v194_v22, %v31_v10 }
  0x17   :  { %v315_v39 = vrot.slane %v32_v28, %v52_v9 }
  0x19   :  { %v77_v48 = vmul.f32 %v315_v39, %v55_v23  ;;  %v78_v49 = vmul.f32 %v315_v39, %v56_v24  ;;  %v79_v50 = vmul.f32 %v315_v39, %v57_v29  ;;  %v80_v51 = vmul.f32 %v315_v39, %v58_v30 }
  0x1a   :  { %v81_v53 = vmul.f32 %v315_v39, %v59_v31  ;;  %v82_v54 = vmul.f32 %v315_v39, %v60_v35  ;;  %v83_v55 = vmul.f32 %v315_v39, %v61_v36  ;;  %v84_v56 = vmul.f32 %v315_v39, %v62_v37 }
  0x1b   :  { %v100_v57 = vadd.f32 %v326_v43, %v77_v48  ;;  %v101_v58 = vadd.f32 %v326_v43, %v78_v49  ;;  %v102_v59 = vadd.f32 %v326_v43, %v79_v50  ;;  %v103_v60 = vadd.f32 %v326_v43, %v80_v51 }
  0x1c   :  { %v104_v61 = vadd.f32 %v326_v43, %v81_v53  ;;  %v105_v62 = vadd.f32 %v326_v43, %v82_v54  ;;  %v106_v63 = vadd.f32 %v326_v43, %v83_v55  ;;  %v107_v0 = vadd.f32 %v326_v43, %v84_v56 }
  0x1d   :  { %vm116_vm0 = vcmp.ge.f32.partialorder %v100_v57, 0.0  ;;  %v139_v1 = vmul.f32 %v343_v52, %v100_v57  ;;  %vm117_vm1 = vcmp.ge.f32.partialorder %v101_v58, 0.0  ;;  %v140_v2 = vmul.f32 %v343_v52, %v101_v58 }
  0x1e   :  { %vm118_vm2 = vcmp.ge.f32.partialorder %v102_v59, 0.0  ;;  %v141_v3 = vmul.f32 %v343_v52, %v102_v59  ;;  %vm119_vm3 = vcmp.ge.f32.partialorder %v103_v60, 0.0  ;;  %v142_v4 = vmul.f32 %v343_v52, %v103_v60 }
  0x1f   :  { %v155_v5 = vsel %vm116_vm0, %v100_v57, %v139_v1  ;;  %v156_v6 = vsel %vm117_vm1, %v101_v58, %v140_v2  ;;  %vm120_vm4 = vcmp.ge.f32.partialorder %v104_v61, 0.0  ;;  %v143_v7 = vmul.f32 %v343_v52, %v104_v61 }
  0x20   :  { %171 = vst [vmem:[%s449_s6] sm:$0xff] %v155_v5  ;;  %172 = vst [vmem:[%s449_s6 + $0x8] sm:$0xff] %v156_v6  ;;  %v157_v8 = vsel %vm118_vm2, %v102_v59, %v141_v3  ;;  %v158_v9 = vsel %vm119_vm3, %v103_v60, %v142_v4  ;;  %vm121_vm5 = vcmp.ge.f32.partialorder %v105_v62, 0.0  ;;  %v144_v10 = vmul.f32 %v343_v52, %v105_v62 }
  0x21   :  { %173 = vst [vmem:[%s449_s6 + $0x10] sm:$0xff] %v157_v8  ;;  %174 = vst [vmem:[%s449_s6 + $0x18] sm:$0xff] %v158_v9  ;;  %v159_v11 = vsel %vm120_vm4, %v104_v61, %v143_v7  ;;  %vm122_vm6 = vcmp.ge.f32.partialorder %v106_v63, 0.0  ;;  %v145_v13 = vmul.f32 %v343_v52, %v106_v63  ;;  %vm123_vm7 = vcmp.ge.f32.partialorder %v107_v0, 0.0 }
  0x22   :  { %175 = vst [vmem:[%s449_s6 + $0x20] sm:$0xff] %v159_v11  ;;  %v160_v14 = vsel %vm121_vm5, %v105_v62, %v144_v10  ;;  %v146_v15 = vmul.f32 %v343_v52, %v107_v0  ;;  %v85_v16 = vmul.f32 %v315_v39, %v63_v38  ;;  %v86_v17 = vmul.f32 %v315_v39, %v64_v40 }
  0x23   :  { %176 = vst [vmem:[%s449_s6 + $0x28] sm:$0xff] %v160_v14  ;;  %v161_v18 = vsel %vm122_vm6, %v106_v63, %v145_v13  ;;  %v87_v19 = vmul.f32 %v315_v39, %v65_v41  ;;  %v88_v20 = vmul.f32 %v315_v39, %v66_v42  ;;  %v89_v21 = vmul.f32 %v315_v39, %v67_v44 }
  0x24   :  { %177 = vst [vmem:[%s449_s6 + $0x30] sm:$0xff] %v161_v18  ;;  %v162_v22 = vsel %vm123_vm7, %v107_v0, %v146_v15  ;;  %v108_v23 = vadd.f32 %v326_v43, %v85_v16  ;;  %v109_v24 = vadd.f32 %v326_v43, %v86_v17  ;;  %v90_v25 = vmul.f32 %v315_v39, %v68_v45 }
  0x25   :  { %178 = vst [vmem:[%s449_s6 + $0x38] sm:$0xff] %v162_v22  ;;  %v110_v26 = vadd.f32 %v326_v43, %v87_v19  ;;  %v111_v27 = vadd.f32 %v326_v43, %v88_v20  ;;  %v112_v28 = vadd.f32 %v326_v43, %v89_v21  ;;  %v91_v29 = vmul.f32 %v315_v39, %v69_v46 }
  0x26   :  { %vm124_vm8 = vcmp.ge.f32.partialorder %v108_v23, 0.0  ;;  %v147_v30 = vmul.f32 %v343_v52, %v108_v23  ;;  %vm125_vm9 = vcmp.ge.f32.partialorder %v109_v24, 0.0  ;;  %v148_v31 = vmul.f32 %v343_v52, %v109_v24 }
  0x27   :  { %vm126_vm10 = vcmp.ge.f32.partialorder %v110_v26, 0.0  ;;  %v149_v32 = vmul.f32 %v343_v52, %v110_v26  ;;  %vm127_vm11 = vcmp.ge.f32.partialorder %v111_v27, 0.0  ;;  %v150_v35 = vmul.f32 %v343_v52, %v111_v27 }
  0x28   :  { %v163_v36 = vsel %vm124_vm8, %v108_v23, %v147_v30  ;;  %v164_v37 = vsel %vm125_vm9, %v109_v24, %v148_v31  ;;  %vm128_vm12 = vcmp.ge.f32.partialorder %v112_v28, 0.0  ;;  %v151_v38 = vmul.f32 %v343_v52, %v112_v28 }
  0x29   :  { %179 = vst [vmem:[%s449_s6 + $0x40] sm:$0xff] %v163_v36  ;;  %180 = vst [vmem:[%s449_s6 + $0x48] sm:$0xff] %v164_v37  ;;  %v165_v33 = vsel %vm126_vm10, %v110_v26, %v149_v32  ;;  %v166_v40 = vsel %vm127_vm11, %v111_v27, %v150_v35  ;;  %v113_v41 = vadd.f32 %v326_v43, %v90_v25 }
  0x2a   :  { %v114_v42 = vadd.f32 %v326_v43, %v91_v29  ;;  %181 = vst [vmem:[%s449_s6 + $0x50] sm:$0xff] %v165_v33  ;;  %182 = vst [vmem:[%s449_s6 + $0x58] sm:$0xff] %v166_v40  ;;  %v167_v44 = vsel %vm128_vm12, %v112_v28, %v151_v38  ;;  %v92_v45 = vmul.f32 %v315_v39, %v70_v47 }
  0x2b   :  { %183 = vst [vmem:[%s449_s6 + $0x60] sm:$0xff] %v167_v44  ;;  %vm129_vm13 = vcmp.ge.f32.partialorder %v113_v41, 0.0  ;;  %v152_v46 = vmul.f32 %v343_v52, %v113_v41 }
  0x2c   :  { %vm130_vm14 = vcmp.ge.f32.partialorder %v114_v42, 0.0  ;;  %v153_v48 = vmul.f32 %v343_v52, %v114_v42  ;;  %v115_v49 = vadd.f32 %v326_v43, %v92_v45 }
  0x2d   :  { %v168_v50 = vsel %vm129_vm13, %v113_v41, %v152_v46 }
  0x2e   :  { %v169_v51 = vsel %vm130_vm14, %v114_v42, %v153_v48  ;;  %184 = vst [vmem:[%s449_s6 + $0x68] sm:$0xff] %v168_v50  ;;  %vm131_vm15 = vcmp.ge.f32.partialorder %v115_v49, 0.0  ;;  %v154_v12 = vmul.f32 %v343_v52, %v115_v49 }
  0x2f   :  { %185 = vst [vmem:[%s449_s6 + $0x70] sm:$0xff] %v169_v51 }
  0x30   :  { %v170_v34 = vsel %vm131_vm15, %v115_v49, %v154_v12 }
  0x31   :  { %186 = vst [vmem:[%s449_s6 + $0x78] sm:$0xff] %v170_v34 }

// kernel: criss_cross_forward.5
= control target key start
LH: loop header
LB: loop body
LE: loop exit
PB: predicated region body
PF: predicated region fallthrough
CT: control target
= control target key end

     0   :  { %s1232_s1 = inlined_call_operand.vmem [shape: bf16[512,128], index: 1, kind: input, shape index: {}]   ;;  %s1233_s0 = inlined_call_operand.vmem [shape: f32[128,512], index: 0, kind: input, shape index: {}]   ;;  %s1234_s3 = inlined_call_operand.vmem [shape: f32[1,128], index: 3, kind: output, shape index: {1}]   ;;  %s1235_s4 = inlined_call_operand.vmem [shape: f32[1,128], index: 4, kind: output, shape index: {2}]   ;;  %s1236_s2 = inlined_call_operand.vmem [shape: f32[128,128], index: 2, kind: output, shape index: {0}]  }
   0x1   :  { %v820_v0 = vld [vmem:[%s1232_s1 + $0x40] sm:$0xff]   ;;  %v824_v4 = vld [vmem:[%s1232_s1 + $0x48] sm:$0xff]   ;;  %v828_v8 = vld [vmem:[%s1232_s1 + $0x50] sm:$0xff]  }
   0x2   :  { %v821_v1 = vld [vmem:[%s1232_s1 + $0xc0] sm:$0xff]   ;;  %691 = vmatprep.subr.bf16.mxu0 %v820_v0  ;;  %v825_v5 = vld [vmem:[%s1232_s1 + $0xc8] sm:$0xff]   ;;  %v829_v9 = vld [vmem:[%s1232_s1 + $0xd0] sm:$0xff]  }
   0x3   :  { %v822_v2 = vld [vmem:[%s1232_s1] sm:$0xff]   ;;  %755 = vmatprep.subr.bf16.mxu1 %v821_v1  ;;  %v826_v6 = vld [vmem:[%s1232_s1 + $0x8] sm:$0xff]   ;;  %v830_v10 = vld [vmem:[%s1232_s1 + $0x10] sm:$0xff]  }
   0x4   :  { %v823_v3 = vld [vmem:[%s1232_s1 + $0x80] sm:$0xff]   ;;  %692 = vmatpush3.bf16.msra.mxu0 %v822_v2  ;;  %v827_v7 = vld [vmem:[%s1232_s1 + $0x88] sm:$0xff]   ;;  %v831_v11 = vld [vmem:[%s1232_s1 + $0x90] sm:$0xff]  }
   0x5   :  { %756 = vmatpush3.bf16.msra.mxu1 %v823_v3  ;;  %693 = vmatprep.subr.bf16.mxu0 %v824_v4  ;;  %v832_v12 = vld [vmem:[%s1232_s1 + $0x58] sm:$0xff]   ;;  %v836_v16 = vld [vmem:[%s1232_s1 + $0x60] sm:$0xff]   ;;  %v840_v20 = vld [vmem:[%s1232_s1 + $0x68] sm:$0xff]  }
   0x6   :  { %757 = vmatprep.subr.bf16.mxu1 %v825_v5  ;;  %v833_v13 = vld [vmem:[%s1232_s1 + $0xd8] sm:$0xff]   ;;  %v837_v17 = vld [vmem:[%s1232_s1 + $0xe0] sm:$0xff]   ;;  %v841_v21 = vld [vmem:[%s1232_s1 + $0xe8] sm:$0xff]  }
   0x7   :  { %v834_v14 = vld [vmem:[%s1232_s1 + $0x18] sm:$0xff]   ;;  %v838_v18 = vld [vmem:[%s1232_s1 + $0x20] sm:$0xff]   ;;  %v842_v22 = vld [vmem:[%s1232_s1 + $0x28] sm:$0xff]  }
   0x8   :  { %694 = vmatpush3.bf16.msra.mxu0 %v826_v6  ;;  %v835_v15 = vld [vmem:[%s1232_s1 + $0x98] sm:$0xff]   ;;  %v839_v19 = vld [vmem:[%s1232_s1 + $0xa0] sm:$0xff]   ;;  %v843_v23 = vld [vmem:[%s1232_s1 + $0xa8] sm:$0xff]  }
   0x9   :  { %758 = vmatpush3.bf16.msra.mxu1 %v827_v7  ;;  %695 = vmatprep.subr.bf16.mxu0 %v828_v8  ;;  %v844_v24 = vld [vmem:[%s1232_s1 + $0x70] sm:$0xff]   ;;  %v848_v28 = vld [vmem:[%s1232_s1 + $0x78] sm:$0xff]   ;;  %v16_v32 = vld [vmem:[%s1233_s0 + $0x8] sm:$0xff] }
   0xa   :  { %759 = vmatprep.subr.bf16.mxu1 %v829_v9  ;;  %v845_v25 = vld [vmem:[%s1232_s1 + $0xf0] sm:$0xff]   ;;  %v849_v29 = vld [vmem:[%s1232_s1 + $0xf8] sm:$0xff]   ;;  %v20_v33 = vld [vmem:[%s1233_s0 + $0x28] sm:$0xff] }
   0xb   :  { %v846_v26 = vld [vmem:[%s1232_s1 + $0x30] sm:$0xff]   ;;  %v850_v30 = vld [vmem:[%s1232_s1 + $0x38] sm:$0xff]   ;;  %v80_v35 = vpack.c.bf16 %v20_v33, %v16_v32  ;;  %v15_v37 = vld [vmem:[%s1233_s0] sm:$0xff] }
   0xc   :  { %696 = vmatpush3.bf16.msra.mxu0 %v830_v10  ;;  %v847_v27 = vld [vmem:[%s1232_s1 + $0xb0] sm:$0xff]   ;;  %v851_v31 = vld [vmem:[%s1232_s1 + $0xb8] sm:$0xff]   ;;  %v19_v38 = vld [vmem:[%s1233_s0 + $0x20] sm:$0xff] }
   0xd   :  { %760 = vmatpush3.bf16.msra.mxu1 %v831_v11  ;;  %697 = vmatprep.subr.bf16.mxu0 %v832_v12  ;;  %v18_v34 = vld [vmem:[%s1233_s0 + $0x18] sm:$0xff]  ;;  %v79_v40 = vpack.c.bf16 %v19_v38, %v15_v37  ;;  %v17_v41 = vld [vmem:[%s1233_s0 + $0x10] sm:$0xff]  ;;  %v24_v43 = vld [vmem:[%s1233_s0 + $0x48] sm:$0xff] }
   0xe   :  { %761 = vmatprep.subr.bf16.mxu1 %v833_v13  ;;  %v22_v36 = vld [vmem:[%s1233_s0 + $0x38] sm:$0xff]  ;;  %v21_v42 = vld [vmem:[%s1233_s0 + $0x30] sm:$0xff]  ;;  %399 = vmatprep.mubr.bf16.mxu0 %v80_v35  ;;  %v28_v45 = vld [vmem:[%s1233_s0 + $0x68] sm:$0xff] }
   0xf   :  { %v82_v39 = vpack.c.bf16 %v22_v36, %v18_v34  ;;  %v81_v44 = vpack.c.bf16 %v21_v42, %v17_v41  ;;  %v26_v46 = vld [vmem:[%s1233_s0 + $0x58] sm:$0xff]  ;;  %v84_v48 = vpack.c.bf16 %v28_v45, %v24_v43  ;;  %v23_v50 = vld [vmem:[%s1233_s0 + $0x40] sm:$0xff]  ;;  %v25_v52 = vld [vmem:[%s1233_s0 + $0x50] sm:$0xff] }
  0x10   :  { %698 = vmatpush3.bf16.msra.mxu0 %v834_v14  ;;  %v30_v47 = vld [vmem:[%s1233_s0 + $0x78] sm:$0xff]  ;;  %v27_v51 = vld [vmem:[%s1233_s0 + $0x60] sm:$0xff]  ;;  %v29_v53 = vld [vmem:[%s1233_s0 + $0x70] sm:$0xff] }
  0x11   :  { %762 = vmatpush3.bf16.msra.mxu1 %v835_v15  ;;  %699 = vmatprep.subr.bf16.mxu0 %v836_v16  ;;  %v86_v49 = vpack.c.bf16 %v30_v47, %v26_v46  ;;  %v32_v54 = vld [vmem:[%s1233_s0 + $0x88] sm:$0xff]  ;;  %v34_v56 = vld [vmem:[%s1233_s0 + $0x98] sm:$0xff]  ;;  %v83_v58 = vpack.c.bf16 %v27_v51, %v23_v50  ;;  %v85_v59 = vpack.c.bf16 %v29_v53, %v25_v52  ;;  %v31_v62 = vld [vmem:[%s1233_s0 + $0x80] sm:$0xff] }
  0x12   :  { %763 = vmatprep.subr.bf16.mxu1 %v837_v17  ;;  %496 = vmatprep.mubr.bf16.mxu1 %v82_v39  ;;  %v36_v55 = vld [vmem:[%s1233_s0 + $0xa8] sm:$0xff]  ;;  %v38_v57 = vld [vmem:[%s1233_s0 + $0xb8] sm:$0xff]  ;;  %v35_v63 = vld [vmem:[%s1233_s0 + $0xa0] sm:$0xff] }
  0x13   :  { %v88_v60 = vpack.c.bf16 %v36_v55, %v32_v54  ;;  %v90_v61 = vpack.c.bf16 %v38_v57, %v34_v56  ;;  %v33_v0 = vld [vmem:[%s1233_s0 + $0x90] sm:$0xff]  ;;  %v40_v2 = vld [vmem:[%s1233_s0 + $0xc8] sm:$0xff]  ;;  %v42_v4 = vld [vmem:[%s1233_s0 + $0xd8] sm:$0xff]  ;;  %v87_v6 = vpack.c.bf16 %v35_v63, %v31_v62 }
  0x14   :  { %700 = vmatpush3.bf16.msra.mxu0 %v838_v18  ;;  %v37_v1 = vld [vmem:[%s1233_s0 + $0xb0] sm:$0xff]  ;;  %v44_v3 = vld [vmem:[%s1233_s0 + $0xe8] sm:$0xff]  ;;  %v46_v5 = vld [vmem:[%s1233_s0 + $0xf8] sm:$0xff] }
  0x15   :  { %764 = vmatpush3.bf16.msra.mxu1 %v839_v19  ;;  %701 = vmatprep.subr.bf16.mxu0 %v840_v20  ;;  %v89_v7 = vpack.c.bf16 %v37_v1, %v33_v0  ;;  %v92_v8 = vpack.c.bf16 %v44_v3, %v40_v2  ;;  %v94_v9 = vpack.c.bf16 %v46_v5, %v42_v4  ;;  %v39_v10 = vld [vmem:[%s1233_s0 + $0xc0] sm:$0xff]  ;;  %v41_v12 = vld [vmem:[%s1233_s0 + $0xd0] sm:$0xff]  ;;  %v48_v14 = vld [vmem:[%s1233_s0 + $0x108] sm:$0xff]  ;;  %v852_v0 = vmov 0.0  }
  0x16   :  { %765 = vmatprep.subr.bf16.mxu1 %v841_v21  ;;  %v43_v11 = vld [vmem:[%s1233_s0 + $0xe0] sm:$0xff]  ;;  %v45_v13 = vld [vmem:[%s1233_s0 + $0xf0] sm:$0xff]  ;;  %v52_v15 = vld [vmem:[%s1233_s0 + $0x128] sm:$0xff]  ;;  %581 = vst [vmem:[%s1234_s3] sm:$0x1] %v852_v0 }
  0x17   :  { %v50_v16 = vld [vmem:[%s1233_s0 + $0x118] sm:$0xff]  ;;  %v91_v18 = vpack.c.bf16 %v43_v11, %v39_v10  ;;  %v93_v19 = vpack.c.bf16 %v45_v13, %v41_v12  ;;  %v96_v20 = vpack.c.bf16 %v52_v15, %v48_v14  ;;  %v55_v34 = vld [vmem:[%s1233_s0 + $0x140] sm:$0xff]  ;;  %v57_v36 = vld [vmem:[%s1233_s0 + $0x150] sm:$0xff]  ;;  %582 = vst [vmem:[%s1235_s4] sm:$0x1] %v852_v0 }
  0x18   :  { %702 = vmatpush3.bf16.msra.mxu0 %v842_v22  ;;  %v54_v17 = vld [vmem:[%s1233_s0 + $0x138] sm:$0xff]  ;;  %v47_v22 = vld [vmem:[%s1233_s0 + $0x100] sm:$0xff]  ;;  %v61_v37 = vld [vmem:[%s1233_s0 + $0x170] sm:$0xff] }
  0x19   :  { %766 = vmatpush3.bf16.msra.mxu1 %v843_v23  ;;  %703 = vmatprep.subr.bf16.mxu0 %v844_v24  ;;  %v98_v21 = vpack.c.bf16 %v54_v17, %v50_v16  ;;  %v51_v23 = vld [vmem:[%s1233_s0 + $0x120] sm:$0xff]  ;;  %v49_v24 = vld [vmem:[%s1233_s0 + $0x110] sm:$0xff]  ;;  %v64_v38 = vld [vmem:[%s1233_s0 + $0x188] sm:$0xff]  ;;  %v101_v43 = vpack.c.bf16 %v61_v37, %v57_v36 }
  0x1a   :  { %767 = vmatprep.subr.bf16.mxu1 %v845_v25  ;;  %v53_v25 = vld [vmem:[%s1233_s0 + $0x130] sm:$0xff]  ;;  %v59_v35 = vld [vmem:[%s1233_s0 + $0x160] sm:$0xff]  ;;  %v68_v39 = vld [vmem:[%s1233_s0 + $0x1a8] sm:$0xff] }
  0x1b   :  { %v70_v41 = vld [vmem:[%s1233_s0 + $0x1b8] sm:$0xff]  ;;  %v99_v42 = vpack.c.bf16 %v59_v35, %v55_v34  ;;  %v63_v46 = vld [vmem:[%s1233_s0 + $0x180] sm:$0xff]  ;;  %v72_v50 = vld [vmem:[%s1233_s0 + $0x1c8] sm:$0xff] }
  0x1c   :  { %704 = vmatpush3.bf16.msra.mxu0 %v846_v26  ;;  %v56_v26 = vld [vmem:[%s1233_s0 + $0x148] sm:$0xff]  ;;  %v67_v47 = vld [vmem:[%s1233_s0 + $0x1a0] sm:$0xff]  ;;  %v74_v52 = vld [vmem:[%s1233_s0 + $0x1d8] sm:$0xff] }
  0x1d   :  { %768 = vmatpush3.bf16.msra.mxu1 %v847_v27  ;;  %705 = vmatprep.subr.bf16.mxu0 %v848_v28  ;;  %v60_v27 = vld [vmem:[%s1233_s0 + $0x168] sm:$0xff]  ;;  %v58_v28 = vld [vmem:[%s1233_s0 + $0x158] sm:$0xff]  ;;  %v103_v54 = vpack.c.bf16 %v67_v47, %v63_v46 }
  0x1e   :  { %769 = vmatprep.subr.bf16.mxu1 %v849_v29  ;;  %v62_v29 = vld [vmem:[%s1233_s0 + $0x178] sm:$0xff]  ;;  %v100_v32 = vpack.c.bf16 %v60_v27, %v56_v26  ;;  %v76_v51 = vld [vmem:[%s1233_s0 + $0x1e8] sm:$0xff] }
  0x1f   :  { %v102_v33 = vpack.c.bf16 %v62_v29, %v58_v28  ;;  %v78_v53 = vld [vmem:[%s1233_s0 + $0x1f8] sm:$0xff]  ;;  %v108_v56 = vpack.c.bf16 %v76_v51, %v72_v50 }
  0x20   :  { %706 = vmatpush3.bf16.msra.mxu0 %v850_v30  ;;  %v95_v30 = vpack.c.bf16 %v51_v23, %v47_v22  ;;  %v110_v57 = vpack.c.bf16 %v78_v53, %v74_v52 }
  0x21   :  { %770 = vmatpush3.bf16.msra.mxu1 %v851_v31  ;;  %v97_v31 = vpack.c.bf16 %v53_v25, %v49_v24 }
  0x23   :  { %400 = vmatmul.mubr.bf16.vlgmr.msra.gmra.mrb[0].mxu0 %v79_v40  ;;  %v66_v40 = vld [vmem:[%s1233_s0 + $0x198] sm:$0xff] }
  0x24   :  { %497 = vmatmul.mubr.bf16.vlgmr.msra.gmra.mrb[0].mxu1 %v81_v44  ;;  %407 = vmatprep.mubr.bf16.mxu0 %v84_v48  ;;  %v104_v44 = vpack.c.bf16 %v68_v39, %v64_v38  ;;  %v106_v45 = vpack.c.bf16 %v70_v41, %v66_v40  ;;  %v65_v48 = vld [vmem:[%s1233_s0 + $0x190] sm:$0xff] }
  0x25   :  { %504 = vmatprep.mubr.bf16.mxu1 %v86_v49  ;;  %v69_v49 = vld [vmem:[%s1233_s0 + $0x1b0] sm:$0xff] }
  0x26   :  { %v105_v55 = vpack.c.bf16 %v69_v49, %v65_v48 }
  0x2b   :  { %408 = vmatmul.mubr.bf16.gmra.mrb[4].mxu0 %v83_v58  ;;  %v71_v58 = vld [vmem:[%s1233_s0 + $0x1c0] sm:$0xff] }
  0x2c   :  { %505 = vmatmul.mubr.bf16.gmra.mrb[4].mxu1 %v85_v59  ;;  %415 = vmatprep.mubr.bf16.mxu0 %v88_v60  ;;  %v75_v59 = vld [vmem:[%s1233_s0 + $0x1e0] sm:$0xff]  ;;  %v73_v60 = vld [vmem:[%s1233_s0 + $0x1d0] sm:$0xff] }
  0x2d   :  { %512 = vmatprep.mubr.bf16.mxu1 %v90_v61  ;;  %v77_v61 = vld [vmem:[%s1233_s0 + $0x1f0] sm:$0xff]  ;;  %v107_v62 = vpack.c.bf16 %v75_v59, %v71_v58 }
  0x2e   :  { %v109_v63 = vpack.c.bf16 %v77_v61, %v73_v60 }
  0x33   :  { %416 = vmatmul.mubr.bf16.gmra.mrb[8].mxu0 %v87_v6 }
  0x34   :  { %513 = vmatmul.mubr.bf16.gmra.mrb[8].mxu1 %v89_v7  ;;  %423 = vmatprep.mubr.bf16.mxu0 %v92_v8 }
  0x35   :  { %520 = vmatprep.mubr.bf16.mxu1 %v94_v9 }
  0x3b   :  { %424 = vmatmul.mubr.bf16.gmra.mrb[12].mxu0 %v91_v18 }
  0x3c   :  { %521 = vmatmul.mubr.bf16.gmra.mrb[12].mxu1 %v93_v19  ;;  %431 = vmatprep.mubr.bf16.mxu0 %v96_v20 }
  0x3d   :  { %528 = vmatprep.mubr.bf16.mxu1 %v98_v21 }
  0x43   :  { %432 = vmatmul.mubr.bf16.gmra.mrb[16].mxu0 %v95_v30 }
  0x44   :  { %529 = vmatmul.mubr.bf16.gmra.mrb[16].mxu1 %v97_v31  ;;  %439 = vmatprep.mubr.bf16.mxu0 %v100_v32 }
  0x45   :  { %536 = vmatprep.mubr.bf16.mxu1 %v102_v33 }
  0x4b   :  { %440 = vmatmul.mubr.bf16.gmra.mrb[20].mxu0 %v99_v42 }
  0x4c   :  { %537 = vmatmul.mubr.bf16.gmra.mrb[20].mxu1 %v101_v43  ;;  %447 = vmatprep.mubr.bf16.mxu0 %v104_v44 }
  0x4d   :  { %544 = vmatprep.mubr.bf16.mxu1 %v106_v45 }
  0x53   :  { %448 = vmatmul.mubr.bf16.gmra.mrb[24].mxu0 %v103_v54 }
  0x54   :  { %545 = vmatmul.mubr.bf16.gmra.mrb[24].mxu1 %v105_v55  ;;  %455 = vmatprep.mubr.bf16.mxu0 %v108_v56 }
  0x55   :  { %552 = vmatprep.mubr.bf16.mxu1 %v110_v57 }
  0x5b   :  { %456 = vmatmul.mubr.bf16.gmra.mrb[28].mxu0 %v107_v62 }
  0x5c   :  { %553 = vmatmul.mubr.bf16.gmra.mrb[28].mxu1 %v109_v63 }
  0xf6   :  { %v707_v1 = vpop.f32.mrb[0].mxu0 }
  0xf7   :  { %v771_v2 = vpop.f32.mrb[0].mxu1  ;;  %v708_v3 = vpop.f32.mrb[1].mxu0 }
  0xf8   :  { %v709_v4 = vadd.f32 %v708_v3, %v707_v1  ;;  %v772_v5 = vpop.f32.mrb[1].mxu1  ;;  %v710_v6 = vpop.f32.mrb[2].mxu0 }
  0xf9   :  { %v773_v7 = vadd.f32 %v772_v5, %v771_v2  ;;  %v774_v8 = vpop.f32.mrb[2].mxu1  ;;  %v711_v9 = vpop.f32.mrb[3].mxu0 }
  0xfa   :  { %v712_v10 = vadd.f32 %v711_v9, %v710_v6  ;;  %v775_v11 = vpop.f32.mrb[3].mxu1 }
  0xfb   :  { %v499_v12 = vadd.f32 %v773_v7, %v709_v4  ;;  %v776_v13 = vadd.f32 %v775_v11, %v774_v8 }
  0xfd   :  { %561 = vst [vmem:[%s1236_s2] sm:$0xff] %v499_v12  ;;  %v502_v14 = vadd.f32 %v776_v13, %v712_v10  ;;  %v608_v16 = vmul.f32 %v499_v12, %v499_v12 }
  0xfe   :  { %v713_v15 = vpop.f32.mrb[4].mxu0 }
  0xff   :  { %562 = vst [vmem:[%s1236_s2 + $0x8] sm:$0xff] %v502_v14  ;;  %v584_v17 = vadd.f32 %v502_v14, %v499_v12  ;;  %v609_v18 = vmul.f32 %v502_v14, %v502_v14  ;;  %v777_v19 = vpop.f32.mrb[4].mxu1  ;;  %v714_v20 = vpop.f32.mrb[5].mxu0 }
 0x100   :  { %v715_v21 = vadd.f32 %v714_v20, %v713_v15  ;;  %v778_v22 = vpop.f32.mrb[5].mxu1  ;;  %v716_v23 = vpop.f32.mrb[6].mxu0 }
 0x101   :  { %v624_v24 = vadd.f32 %v609_v18, %v608_v16  ;;  %v779_v25 = vadd.f32 %v778_v22, %v777_v19  ;;  %v780_v26 = vpop.f32.mrb[6].mxu1  ;;  %v717_v27 = vpop.f32.mrb[7].mxu0 }
 0x102   :  { %v718_v28 = vadd.f32 %v717_v27, %v716_v23  ;;  %v781_v29 = vpop.f32.mrb[7].mxu1 }
 0x103   :  { %v507_v30 = vadd.f32 %v779_v25, %v715_v21  ;;  %v782_v31 = vadd.f32 %v781_v29, %v780_v26 }
 0x105   :  { %563 = vst [vmem:[%s1236_s2 + $0x10] sm:$0xff] %v507_v30  ;;  %v585_v32 = vadd.f32 %v584_v17, %v507_v30  ;;  %v610_v33 = vmul.f32 %v507_v30, %v507_v30  ;;  %v510_v34 = vadd.f32 %v782_v31, %v718_v28 }
 0x106   :  { %v719_v35 = vpop.f32.mrb[8].mxu0 }
 0x107   :  { %v625_v36 = vadd.f32 %v624_v24, %v610_v33  ;;  %564 = vst [vmem:[%s1236_s2 + $0x18] sm:$0xff] %v510_v34  ;;  %v586_v37 = vadd.f32 %v585_v32, %v510_v34  ;;  %v611_v38 = vmul.f32 %v510_v34, %v510_v34  ;;  %v783_v39 = vpop.f32.mrb[8].mxu1  ;;  %v720_v40 = vpop.f32.mrb[9].mxu0 }
 0x108   :  { %v721_v41 = vadd.f32 %v720_v40, %v719_v35  ;;  %v784_v42 = vpop.f32.mrb[9].mxu1  ;;  %v722_v43 = vpop.f32.mrb[10].mxu0 }
 0x109   :  { %v626_v44 = vadd.f32 %v625_v36, %v611_v38  ;;  %v785_v45 = vadd.f32 %v784_v42, %v783_v39  ;;  %v786_v46 = vpop.f32.mrb[10].mxu1  ;;  %v723_v47 = vpop.f32.mrb[11].mxu0 }
 0x10a   :  { %v724_v48 = vadd.f32 %v723_v47, %v722_v43  ;;  %v787_v49 = vpop.f32.mrb[11].mxu1 }
 0x10b   :  { %v515_v50 = vadd.f32 %v785_v45, %v721_v41  ;;  %v788_v51 = vadd.f32 %v787_v49, %v786_v46 }
 0x10d   :  { %565 = vst [vmem:[%s1236_s2 + $0x20] sm:$0xff] %v515_v50  ;;  %v587_v52 = vadd.f32 %v586_v37, %v515_v50  ;;  %v612_v53 = vmul.f32 %v515_v50, %v515_v50  ;;  %v518_v54 = vadd.f32 %v788_v51, %v724_v48 }
 0x10e   :  { %v725_v55 = vpop.f32.mrb[12].mxu0 }
 0x10f   :  { %v627_v56 = vadd.f32 %v626_v44, %v612_v53  ;;  %566 = vst [vmem:[%s1236_s2 + $0x28] sm:$0xff] %v518_v54  ;;  %v588_v57 = vadd.f32 %v587_v52, %v518_v54  ;;  %v613_v58 = vmul.f32 %v518_v54, %v518_v54  ;;  %v789_v59 = vpop.f32.mrb[12].mxu1  ;;  %v726_v60 = vpop.f32.mrb[13].mxu0 }
 0x110   :  { %v727_v61 = vadd.f32 %v726_v60, %v725_v55  ;;  %v790_v62 = vpop.f32.mrb[13].mxu1  ;;  %v728_v63 = vpop.f32.mrb[14].mxu0 }
 0x111   :  { %v628_v0 = vadd.f32 %v627_v56, %v613_v58  ;;  %v791_v1 = vadd.f32 %v790_v62, %v789_v59  ;;  %v792_v2 = vpop.f32.mrb[14].mxu1  ;;  %v729_v3 = vpop.f32.mrb[15].mxu0 }
 0x112   :  { %v730_v4 = vadd.f32 %v729_v3, %v728_v63  ;;  %v793_v5 = vpop.f32.mrb[15].mxu1 }
 0x113   :  { %v523_v6 = vadd.f32 %v791_v1, %v727_v61  ;;  %v794_v7 = vadd.f32 %v793_v5, %v792_v2 }
 0x115   :  { %567 = vst [vmem:[%s1236_s2 + $0x30] sm:$0xff] %v523_v6  ;;  %v589_v8 = vadd.f32 %v588_v57, %v523_v6  ;;  %v614_v9 = vmul.f32 %v523_v6, %v523_v6  ;;  %v526_v10 = vadd.f32 %v794_v7, %v730_v4 }
 0x116   :  { %v731_v11 = vpop.f32.mrb[16].mxu0 }
 0x117   :  { %v629_v12 = vadd.f32 %v628_v0, %v614_v9  ;;  %568 = vst [vmem:[%s1236_s2 + $0x38] sm:$0xff] %v526_v10  ;;  %v590_v13 = vadd.f32 %v589_v8, %v526_v10  ;;  %v615_v14 = vmul.f32 %v526_v10, %v526_v10  ;;  %v795_v15 = vpop.f32.mrb[16].mxu1  ;;  %v732_v16 = vpop.f32.mrb[17].mxu0 }
 0x118   :  { %v733_v17 = vadd.f32 %v732_v16, %v731_v11  ;;  %v796_v18 = vpop.f32.mrb[17].mxu1  ;;  %v734_v19 = vpop.f32.mrb[18].mxu0 }
 0x119   :  { %v630_v20 = vadd.f32 %v629_v12, %v615_v14  ;;  %v797_v21 = vadd.f32 %v796_v18, %v795_v15  ;;  %v798_v22 = vpop.f32.mrb[18].mxu1  ;;  %v735_v23 = vpop.f32.mrb[19].mxu0 }
 0x11a   :  { %v736_v24 = vadd.f32 %v735_v23, %v734_v19  ;;  %v799_v25 = vpop.f32.mrb[19].mxu1 }
 0x11b   :  { %v531_v26 = vadd.f32 %v797_v21, %v733_v17  ;;  %v800_v27 = vadd.f32 %v799_v25, %v798_v22 }
 0x11d   :  { %569 = vst [vmem:[%s1236_s2 + $0x40] sm:$0xff] %v531_v26  ;;  %v591_v28 = vadd.f32 %v590_v13, %v531_v26  ;;  %v616_v29 = vmul.f32 %v531_v26, %v531_v26  ;;  %v534_v30 = vadd.f32 %v800_v27, %v736_v24 }
 0x11e   :  { %v737_v31 = vpop.f32.mrb[20].mxu0 }
 0x11f   :  { %v631_v32 = vadd.f32 %v630_v20, %v616_v29  ;;  %570 = vst [vmem:[%s1236_s2 + $0x48] sm:$0xff] %v534_v30  ;;  %v592_v33 = vadd.f32 %v591_v28, %v534_v30  ;;  %v617_v34 = vmul.f32 %v534_v30, %v534_v30  ;;  %v801_v35 = vpop.f32.mrb[20].mxu1  ;;  %v738_v36 = vpop.f32.mrb[21].mxu0 }
 0x120   :  { %v739_v37 = vadd.f32 %v738_v36, %v737_v31  ;;  %v802_v38 = vpop.f32.mrb[21].mxu1  ;;  %v740_v39 = vpop.f32.mrb[22].mxu0 }
 0x121   :  { %v632_v40 = vadd.f32 %v631_v32, %v617_v34  ;;  %v803_v41 = vadd.f32 %v802_v38, %v801_v35  ;;  %v804_v42 = vpop.f32.mrb[22].mxu1  ;;  %v741_v43 = vpop.f32.mrb[23].mxu0 }
 0x122   :  { %v742_v44 = vadd.f32 %v741_v43, %v740_v39  ;;  %v805_v45 = vpop.f32.mrb[23].mxu1  ;;  %v607_v43 = vld [vmem:[%s1235_s4] sm:$0x1] }
 0x123   :  { %v539_v46 = vadd.f32 %v803_v41, %v739_v37  ;;  %v806_v47 = vadd.f32 %v805_v45, %v804_v42 }
 0x125   :  { %571 = vst [vmem:[%s1236_s2 + $0x50] sm:$0xff] %v539_v46  ;;  %v593_v48 = vadd.f32 %v592_v33, %v539_v46  ;;  %v618_v49 = vmul.f32 %v539_v46, %v539_v46  ;;  %v542_v50 = vadd.f32 %v806_v47, %v742_v44 }
 0x126   :  { %v743_v51 = vpop.f32.mrb[24].mxu0 }
 0x127   :  { %v633_v52 = vadd.f32 %v632_v40, %v618_v49  ;;  %572 = vst [vmem:[%s1236_s2 + $0x58] sm:$0xff] %v542_v50  ;;  %v594_v53 = vadd.f32 %v593_v48, %v542_v50  ;;  %v619_v54 = vmul.f32 %v542_v50, %v542_v50  ;;  %v807_v55 = vpop.f32.mrb[24].mxu1  ;;  %v744_v56 = vpop.f32.mrb[25].mxu0  ;;  %v583_v40 = vld [vmem:[%s1234_s3] sm:$0x1] }
 0x128   :  { %v745_v57 = vadd.f32 %v744_v56, %v743_v51  ;;  %v808_v58 = vpop.f32.mrb[25].mxu1  ;;  %v746_v59 = vpop.f32.mrb[26].mxu0 }
 0x129   :  { %v634_v60 = vadd.f32 %v633_v52, %v619_v54  ;;  %v809_v61 = vadd.f32 %v808_v58, %v807_v55  ;;  %v810_v62 = vpop.f32.mrb[26].mxu1  ;;  %v747_v63 = vpop.f32.mrb[27].mxu0 }
 0x12a   :  { %v748_v0 = vadd.f32 %v747_v63, %v746_v59  ;;  %v811_v1 = vpop.f32.mrb[27].mxu1 }
 0x12b   :  { %v547_v2 = vadd.f32 %v809_v61, %v745_v57  ;;  %v812_v3 = vadd.f32 %v811_v1, %v810_v62 }
 0x12d   :  { %573 = vst [vmem:[%s1236_s2 + $0x60] sm:$0xff] %v547_v2  ;;  %v595_v4 = vadd.f32 %v594_v53, %v547_v2  ;;  %v620_v5 = vmul.f32 %v547_v2, %v547_v2  ;;  %v550_v6 = vadd.f32 %v812_v3, %v748_v0 }
 0x12e   :  { %v749_v7 = vpop.f32.mrb[28].mxu0 }
 0x12f   :  { %v635_v8 = vadd.f32 %v634_v60, %v620_v5  ;;  %574 = vst [vmem:[%s1236_s2 + $0x68] sm:$0xff] %v550_v6  ;;  %v596_v9 = vadd.f32 %v595_v4, %v550_v6  ;;  %v621_v10 = vmul.f32 %v550_v6, %v550_v6  ;;  %v813_v11 = vpop.f32.mrb[28].mxu1  ;;  %v750_v12 = vpop.f32.mrb[29].mxu0 }
 0x130   :  { %v751_v13 = vadd.f32 %v750_v12, %v749_v7  ;;  %v814_v14 = vpop.f32.mrb[29].mxu1  ;;  %v752_v15 = vpop.f32.mrb[30].mxu0 }
 0x131   :  { %v636_v16 = vadd.f32 %v635_v8, %v621_v10  ;;  %v815_v17 = vadd.f32 %v814_v14, %v813_v11  ;;  %v816_v18 = vpop.f32.mrb[30].mxu1  ;;  %v753_v19 = vpop.f32.mrb[31].mxu0 }
 0x132   :  { %v754_v20 = vadd.f32 %v753_v19, %v752_v15  ;;  %v817_v21 = vpop.f32.mrb[31].mxu1 }
 0x133   :  { %v555_v22 = vadd.f32 %v815_v17, %v751_v13  ;;  %v818_v23 = vadd.f32 %v817_v21, %v816_v18 }
 0x135   :  { %575 = vst [vmem:[%s1236_s2 + $0x70] sm:$0xff] %v555_v22  ;;  %v597_v24 = vadd.f32 %v596_v9, %v555_v22  ;;  %v622_v25 = vmul.f32 %v555_v22, %v555_v22  ;;  %v558_v26 = vadd.f32 %v818_v23, %v754_v20 }
 0x137   :  { %v637_v27 = vadd.f32 %v636_v16, %v622_v25  ;;  %576 = vst [vmem:[%s1236_s2 + $0x78] sm:$0xff] %v558_v26  ;;  %v598_v28 = vadd.f32 %v597_v24, %v558_v26  ;;  %v623_v29 = vmul.f32 %v558_v26, %v558_v26 }
 0x139   :  { %v599_v30 = vrot.slane %v598_v28, 4  ;;  %v638_v31 = vadd.f32 %v637_v27, %v623_v29 }
 0x13b   :  { %v600_v32 = vadd.f32 %v599_v30, %v598_v28  ;;  %v639_v33 = vrot.slane %v638_v31, 4 }
 0x13d   :  { %v601_v34 = vrot.slane %v600_v32, 2  ;;  %v640_v35 = vadd.f32 %v639_v33, %v638_v31 }
 0x13f   :  { %v602_v36 = vadd.f32 %v601_v34, %v600_v32  ;;  %v641_v37 = vrot.slane %v640_v35, 2 }
 0x141   :  { %v603_v38 = vrot.slane %v602_v36, 1  ;;  %v642_v39 = vadd.f32 %v641_v37, %v640_v35 }
 0x143   :  { %v604_v41 = vadd.f32 %v603_v38, %v602_v36  ;;  %v643_v42 = vrot.slane %v642_v39, 1 }
 0x145   :  { %v605_v44 = vadd.f32 %v604_v41, %v583_v40  ;;  %v644_v45 = vadd.f32 %v643_v42, %v642_v39 }
 0x147   :  { %606 = vst [vmem:[%s1234_s3] sm:$0x1] %v605_v44  ;;  %v645_v46 = vadd.f32 %v644_v45, %v607_v43 }
 0x149   :  { %646 = vst [vmem:[%s1235_s4] sm:$0x1] %v645_v46 }

// kernel: criss_cross_forward.7
= control target key start
LH: loop header
LB: loop body
LE: loop exit
PB: predicated region body
PF: predicated region fallthrough
CT: control target
= control target key end

     0   :  { %s2696_s9 = smov 0   ;;  %s4333_s0 = inlined_call_operand.vmem [shape: f32[2,20,20,128], index: 0, kind: input, shape index: {}]   ;;  %s4334_s1 = inlined_call_operand.vmem [shape: f32[4,3,3,128], index: 1, kind: input, shape index: {}]   ;;  %s4335_s2 = inlined_call_operand.vmem [shape: f32[2,8,8,512], index: 2, kind: output, shape index: {}]  }
   0x1 LB: > { %s2604_s10 = sadd.s32 4294967295, %s2679_s9   ;;  %p2608_p0 = scmp.ge.s32.totalorder %s2679_s9, 1  ;;  %s2679_s9 = sphi %s2696_s9, %s12_s9  }
   0x2   : > { %p112_p1 = scmp.lt.s32.totalorder %s2679_s9, 3 }
   0x4   : > { %p113_p2 = pnand %p2608_p0, %p112_p1 }
   0x6   : > { %116 = sbr.rel (%p113_p2) target bundleno = 414 (0x19e), region = 28 }
   0xd   : > { %p134_p3 = scmp.lt.s32.totalorder %s2604_s10, 1  ;;  %v216_v0 = vlaneseq  ;;  %v204_v2 = vld [vmem:[%s4334_s1] sm:$0x7]  ;;  %v205_v3 = vld [vmem:[%s4334_s1 + $0x4] sm:$0x7]  ;;  %vm272_vm0 = vcmask 1046528  }
   0xe   : > { %v206_v4 = vld [vmem:[%s4334_s1 + $0x8] sm:$0x7]  ;;  %vm365_vm1 = vcmask 1045504   ;;  %vm878_vm2 = vcmask 1042432   ;;  %vm1459_vm3 = vcmask 1043456   ;;  %vm2080_vm4 = vcmask 1041408  }
   0xf   : > { %s4389_s10 = smov (!%p134_p3, %s2604_s10), 1  ;;  %v217_v1 = vshrl.u32 %v216_v0, 7 }
  0x10   : > { %s2615_s15 = smul.u32 480, %s4389_s10  ;;  %s2614_s21 = sshll.u32 %s4389_s10, 8 }
  0x11   : > { %v2716_v5 = vsub.s32 0, %v217_v1  ;;  %v2718_v6 = vsub.s32 1, %v217_v1  ;;  %v2720_v7 = vsub.s32 2, %v217_v1  ;;  %s2843_s24 = scalar_lea.vmem %s4335_s2, %s2614_s21 }
  0x12   : > { %s2725_s20 = scalar_lea.vmem %s4333_s0, %s2615_s15 }
  0x13   : > { %v2728_v8 = vrot.slane %v204_v2, %v2716_v5  ;;  %v2731_v9 = vrot.slane %v204_v2, %v2718_v6  ;;  %v2734_v10 = vrot.slane %v204_v2, %v2720_v7  ;;  %v2737_v11 = vrot.slane %v205_v3, %v2716_v5  ;;  %v159_v12 = vld [vmem:[%s2725_s20 + $0x78] sm:$0xff]  ;;  %v160_v13 = vld [vmem:[%s2725_s20 + $0x80] sm:$0xff]  ;;  %v2754_v18 = vld [vmem:[%s2725_s20 + $0x90] sm:$0xff] }
  0x14   : > { %v2742_v14 = vrot.slane %v205_v3, %v2718_v6  ;;  %v2745_v15 = vrot.slane %v205_v3, %v2720_v7  ;;  %v2748_v16 = vrot.slane %v206_v4, %v2716_v5  ;;  %v2751_v17 = vrot.slane %v206_v4, %v2718_v6  ;;  %v2757_v19 = vld [vmem:[%s2725_s20 + $0x98] sm:$0xff]  ;;  %v2779_v40 = vld [vmem:[%s2725_s20 + $0xa8] sm:$0xff]  ;;  %v2782_v41 = vld [vmem:[%s2725_s20 + $0xb0] sm:$0xff] }
  0x15   : > { %v220_v20 = vmul.f32 %v2728_v8, %v159_v12  ;;  %v221_v21 = vmul.f32 %v2728_v8, %v160_v13  ;;  %v240_v22 = vmul.f32 %v2731_v9, %v159_v12  ;;  %v241_v23 = vmul.f32 %v2731_v9, %v160_v13 }
  0x16   : > { %v333_v24 = vmul.f32 %v2734_v10, %v159_v12  ;;  %v334_v25 = vmul.f32 %v2734_v10, %v160_v13  ;;  %v426_v26 = vmul.f32 %v2737_v11, %v2754_v18  ;;  %v427_v27 = vmul.f32 %v2737_v11, %v2757_v19 }
  0x17   : > { %v273_v28 = vrot.slane %v240_v22, 1  ;;  %v274_v29 = vrot.slane %v241_v23, 1  ;;  %v462_v30 = vmul.f32 %v2742_v14, %v2754_v18  ;;  %v463_v31 = vmul.f32 %v2742_v14, %v2757_v19 }
  0x18   : > { %v366_v32 = vrot.slane %v333_v24, 2  ;;  %v367_v33 = vrot.slane %v334_v25, 2  ;;  %v554_v34 = vmul.f32 %v2745_v15, %v2754_v18  ;;  %v555_v35 = vmul.f32 %v2745_v15, %v2757_v19 }
  0x19   : > { %v275_v36 = vsel %vm272_vm0, %v273_v28, %v274_v29  ;;  %v314_v37 = vadd.f32 %v274_v29, %v221_v21  ;;  %v494_v38 = vrot.slane %v462_v30, 1  ;;  %v495_v39 = vrot.slane %v463_v31, 1 }
  0x1a   : > { %v313_v42 = vadd.f32 %v275_v36, %v220_v20  ;;  %v368_v43 = vsel %vm365_vm1, %v366_v32, %v367_v33  ;;  %v586_v44 = vrot.slane %v554_v34, 2  ;;  %v587_v45 = vrot.slane %v555_v35, 2 }
  0x1b   : > { %v407_v46 = vadd.f32 %v367_v33, %v314_v37  ;;  %v496_v47 = vsel %vm272_vm0, %v494_v38, %v495_v39  ;;  %v646_v48 = vmul.f32 %v2748_v16, %v2779_v40  ;;  %v647_v49 = vmul.f32 %v2748_v16, %v2782_v41 }
  0x1c   : > { %v406_v50 = vadd.f32 %v368_v43, %v313_v42  ;;  %v588_v51 = vsel %vm365_vm1, %v586_v44, %v587_v45  ;;  %v682_v52 = vmul.f32 %v2751_v17, %v2779_v40  ;;  %v683_v53 = vmul.f32 %v2751_v17, %v2782_v41 }
  0x1d   : > { %v443_v54 = vadd.f32 %v427_v27, %v407_v46  ;;  %v2796_v55 = vrot.slane %v206_v4, %v2720_v7  ;;  %v222_v56 = vmul.f32 %v2728_v8, %v2754_v18  ;;  %v223_v57 = vmul.f32 %v2728_v8, %v2757_v19 }
  0x1e   : > { %v442_v58 = vadd.f32 %v426_v26, %v406_v50  ;;  %v714_v59 = vrot.slane %v682_v52, 1  ;;  %v715_v60 = vrot.slane %v683_v53, 1  ;;  %v242_v61 = vmul.f32 %v2731_v9, %v2754_v18  ;;  %v2832_v50 = vld [vmem:[%s2725_s20 + $0xc0] sm:$0xff] }
  0x1f   : > { %v535_v62 = vadd.f32 %v495_v39, %v443_v54  ;;  %v774_v63 = vmul.f32 %v2796_v55, %v2779_v40  ;;  %v775_v0 = vmul.f32 %v2796_v55, %v2782_v41  ;;  %v243_v1 = vmul.f32 %v2731_v9, %v2757_v19 }
  0x20   : > { %v534_v2 = vadd.f32 %v496_v47, %v442_v58  ;;  %v716_v3 = vsel %vm272_vm0, %v714_v59, %v715_v60  ;;  %v276_v4 = vrot.slane %v242_v61, 1  ;;  %v335_v12 = vmul.f32 %v2734_v10, %v2754_v18 }
  0x21   : > { %v627_v13 = vadd.f32 %v587_v45, %v535_v62  ;;  %v806_v20 = vrot.slane %v774_v63, 2  ;;  %v807_v21 = vrot.slane %v775_v0, 2  ;;  %v277_v22 = vrot.slane %v243_v1, 1 }
  0x22   : > { %v626_v23 = vadd.f32 %v588_v51, %v534_v2  ;;  %v336_v24 = vmul.f32 %v2734_v10, %v2757_v19  ;;  %v369_v25 = vrot.slane %v335_v12, 2  ;;  %v428_v26 = vmul.f32 %v2737_v11, %v2779_v40 }
  0x23   : > { %v663_v27 = vadd.f32 %v647_v49, %v627_v13  ;;  %v808_v28 = vsel %vm365_vm1, %v806_v20, %v807_v21  ;;  %v278_v29 = vsel %vm272_vm0, %v276_v4, %v277_v22  ;;  %v316_v30 = vadd.f32 %v277_v22, %v223_v57 }
  0x24   : > { %v662_v31 = vadd.f32 %v646_v48, %v626_v23  ;;  %v315_v32 = vadd.f32 %v278_v29, %v222_v56  ;;  %v370_v33 = vrot.slane %v336_v24, 2  ;;  %v429_v34 = vmul.f32 %v2737_v11, %v2782_v41  ;;  %v2835_v56 = vld [vmem:[%s2725_s20 + $0xc8] sm:$0xff] }
  0x25   : > { %v755_v35 = vadd.f32 %v715_v60, %v663_v27  ;;  %v464_v36 = vmul.f32 %v2742_v14, %v2779_v40  ;;  %v465_v37 = vmul.f32 %v2742_v14, %v2782_v41  ;;  %v556_v38 = vmul.f32 %v2745_v15, %v2779_v40 }
  0x26   : > { %v754_v39 = vadd.f32 %v716_v3, %v662_v31  ;;  %v371_v42 = vsel %vm365_vm1, %v369_v25, %v370_v33  ;;  %v409_v43 = vadd.f32 %v370_v33, %v316_v30  ;;  %v557_v44 = vmul.f32 %v2745_v15, %v2782_v41 }
  0x27   : > { %v847_v45 = vadd.f32 %v807_v21, %v755_v35  ;;  %v408_v46 = vadd.f32 %v371_v42, %v315_v32  ;;  %v497_v47 = vrot.slane %v464_v36, 1  ;;  %v498_v48 = vrot.slane %v465_v37, 1 }
  0x28   : > { %v846_v49 = vadd.f32 %v808_v28, %v754_v39  ;;  %v445_v51 = vadd.f32 %v429_v34, %v409_v43  ;;  %v589_v52 = vrot.slane %v556_v38, 2  ;;  %v590_v53 = vrot.slane %v557_v44, 2 }
  0x29   : > { %v880_v54 = vrot.slane %v847_v45, 5  ;;  %v444_v57 = vadd.f32 %v428_v26, %v408_v46  ;;  %v499_v58 = vsel %vm272_vm0, %v497_v47, %v498_v48  ;;  %v648_v59 = vmul.f32 %v2748_v16, %v2832_v50 }
  0x2a   : > { %v879_v60 = vrot.slane %v846_v49, 5  ;;  %v537_v61 = vadd.f32 %v498_v48, %v445_v51  ;;  %v591_v62 = vsel %vm365_vm1, %v589_v52, %v590_v53  ;;  %v649_v63 = vmul.f32 %v2748_v16, %v2835_v56 }
  0x2b   : > { %v536_v0 = vadd.f32 %v499_v58, %v444_v57  ;;  %v684_v1 = vmul.f32 %v2751_v17, %v2832_v50  ;;  %v685_v2 = vmul.f32 %v2751_v17, %v2835_v56  ;;  %v776_v3 = vmul.f32 %v2796_v55, %v2832_v50 }
  0x2c   : > { %v881_v4 = vsel %vm878_vm2, %v879_v60, %v880_v54  ;;  %v629_v12 = vadd.f32 %v590_v53, %v537_v61  ;;  %v777_v13 = vmul.f32 %v2796_v55, %v2835_v56  ;;  %v224_v20 = vmul.f32 %v2728_v8, %v2779_v40  ;;  %v2886_v60 = vld [vmem:[%s2725_s20 + $0xe0] sm:$0xff] }
  0x2d   : > { %911 = vst [vmem:[%s2843_s24] sm:$0xff] %v881_v4  ;;  %v628_v21 = vadd.f32 %v591_v62, %v536_v0  ;;  %v717_v22 = vrot.slane %v684_v1, 1  ;;  %v718_v23 = vrot.slane %v685_v2, 1  ;;  %v809_v24 = vrot.slane %v776_v3, 2 }
  0x2e   : > { %v665_v25 = vadd.f32 %v649_v63, %v629_v12  ;;  %v810_v26 = vrot.slane %v777_v13, 2  ;;  %v225_v27 = vmul.f32 %v2728_v8, %v2782_v41  ;;  %v244_v28 = vmul.f32 %v2731_v9, %v2779_v40 }
  0x2f   : > { %v664_v29 = vadd.f32 %v648_v59, %v628_v21  ;;  %v719_v30 = vsel %vm272_vm0, %v717_v22, %v718_v23  ;;  %v245_v31 = vmul.f32 %v2731_v9, %v2782_v41  ;;  %v337_v32 = vmul.f32 %v2734_v10, %v2779_v40  ;;  %v2883_v59 = vld [vmem:[%s2725_s20 + $0xd8] sm:$0xff] }
  0x30   : > { %v757_v33 = vadd.f32 %v718_v23, %v665_v25  ;;  %v811_v34 = vsel %vm365_vm1, %v809_v24, %v810_v26  ;;  %v279_v35 = vrot.slane %v244_v28, 1  ;;  %v338_v36 = vmul.f32 %v2734_v10, %v2782_v41 }
  0x31   : > { %v756_v37 = vadd.f32 %v719_v30, %v664_v29  ;;  %v280_v38 = vrot.slane %v245_v31, 1  ;;  %v372_v39 = vrot.slane %v337_v32, 2  ;;  %v430_v42 = vmul.f32 %v2737_v11, %v2832_v50 }
  0x32   : > { %v849_v43 = vadd.f32 %v810_v26, %v757_v33  ;;  %v373_v44 = vrot.slane %v338_v36, 2  ;;  %v431_v45 = vmul.f32 %v2737_v11, %v2835_v56  ;;  %v466_v46 = vmul.f32 %v2742_v14, %v2832_v50 }
  0x33   : > { %v848_v47 = vadd.f32 %v811_v34, %v756_v37  ;;  %v281_v48 = vsel %vm272_vm0, %v279_v35, %v280_v38  ;;  %v318_v49 = vadd.f32 %v280_v38, %v225_v27  ;;  %v467_v51 = vmul.f32 %v2742_v14, %v2835_v56 }
  0x34   : > { %v883_v52 = vrot.slane %v849_v43, 5  ;;  %v317_v53 = vadd.f32 %v281_v48, %v224_v20  ;;  %v374_v54 = vsel %vm365_vm1, %v372_v39, %v373_v44  ;;  %v500_v57 = vrot.slane %v466_v46, 1 }
  0x35   : > { %v882_v58 = vrot.slane %v848_v47, 5  ;;  %v411_v61 = vadd.f32 %v373_v44, %v318_v49  ;;  %v501_v62 = vrot.slane %v467_v51, 1  ;;  %v558_v63 = vmul.f32 %v2745_v15, %v2832_v50 }
  0x36   : > { %v410_v0 = vadd.f32 %v374_v54, %v317_v53  ;;  %v559_v1 = vmul.f32 %v2745_v15, %v2835_v56  ;;  %v650_v2 = vmul.f32 %v2748_v16, %v2883_v59  ;;  %v651_v3 = vmul.f32 %v2748_v16, %v2886_v60 }
  0x37   : > { %v884_v4 = vsel %vm878_vm2, %v882_v58, %v883_v52  ;;  %v447_v12 = vadd.f32 %v431_v45, %v411_v61  ;;  %v502_v13 = vsel %vm272_vm0, %v500_v57, %v501_v62  ;;  %v592_v20 = vrot.slane %v558_v63, 2 }
  0x38   : > { %912 = vst [vmem:[%s2843_s24 + $0x20] sm:$0xff] %v884_v4  ;;  %v446_v21 = vadd.f32 %v430_v42, %v410_v0  ;;  %v593_v22 = vrot.slane %v559_v1, 2  ;;  %v686_v23 = vmul.f32 %v2751_v17, %v2883_v59  ;;  %v687_v24 = vmul.f32 %v2751_v17, %v2886_v60 }
  0x39   : > { %v539_v25 = vadd.f32 %v501_v62, %v447_v12  ;;  %v778_v26 = vmul.f32 %v2796_v55, %v2883_v59  ;;  %v779_v27 = vmul.f32 %v2796_v55, %v2886_v60  ;;  %v226_v28 = vmul.f32 %v2728_v8, %v2832_v50 }
  0x3a   : > { %v538_v29 = vadd.f32 %v502_v13, %v446_v21  ;;  %v594_v30 = vsel %vm365_vm1, %v592_v20, %v593_v22  ;;  %v720_v31 = vrot.slane %v686_v23, 1  ;;  %v721_v32 = vrot.slane %v687_v24, 1 }
  0x3b   : > { %v631_v33 = vadd.f32 %v593_v22, %v539_v25  ;;  %v812_v34 = vrot.slane %v778_v26, 2  ;;  %v813_v35 = vrot.slane %v779_v27, 2  ;;  %v227_v36 = vmul.f32 %v2728_v8, %v2835_v56  ;;  %v2935_v22 = vld [vmem:[%s2725_s20 + $0xf0] sm:$0xff]  ;;  %v2940_v27 = vld [vmem:[%s2725_s20 + $0xf8] sm:$0xff] }
  0x3c   : > { %v630_v37 = vadd.f32 %v594_v30, %v538_v29  ;;  %v722_v38 = vsel %vm272_vm0, %v720_v31, %v721_v32  ;;  %v246_v39 = vmul.f32 %v2731_v9, %v2832_v50  ;;  %v247_v42 = vmul.f32 %v2731_v9, %v2835_v56 }
  0x3d   : > { %v667_v43 = vadd.f32 %v651_v3, %v631_v33  ;;  %v814_v44 = vsel %vm365_vm1, %v812_v34, %v813_v35  ;;  %v339_v45 = vmul.f32 %v2734_v10, %v2832_v50  ;;  %v340_v46 = vmul.f32 %v2734_v10, %v2835_v56 }
  0x3e   : > { %v666_v47 = vadd.f32 %v650_v2, %v630_v37  ;;  %v282_v48 = vrot.slane %v246_v39, 1  ;;  %v283_v49 = vrot.slane %v247_v42, 1  ;;  %v432_v51 = vmul.f32 %v2737_v11, %v2883_v59 }
  0x3f   : > { %v759_v52 = vadd.f32 %v721_v32, %v667_v43  ;;  %v375_v53 = vrot.slane %v339_v45, 2  ;;  %v376_v54 = vrot.slane %v340_v46, 2  ;;  %v433_v57 = vmul.f32 %v2737_v11, %v2886_v60 }
  0x40   : > { %v758_v58 = vadd.f32 %v722_v38, %v666_v47  ;;  %v284_v61 = vsel %vm272_vm0, %v282_v48, %v283_v49  ;;  %v320_v62 = vadd.f32 %v283_v49, %v227_v36  ;;  %v468_v63 = vmul.f32 %v2742_v14, %v2883_v59 }
  0x41   : > { %v851_v0 = vadd.f32 %v813_v35, %v759_v52  ;;  %v319_v1 = vadd.f32 %v284_v61, %v226_v28  ;;  %v377_v2 = vsel %vm365_vm1, %v375_v53, %v376_v54  ;;  %v469_v3 = vmul.f32 %v2742_v14, %v2886_v60 }
  0x42   : > { %v850_v4 = vadd.f32 %v814_v44, %v758_v58  ;;  %v413_v12 = vadd.f32 %v376_v54, %v320_v62  ;;  %v503_v13 = vrot.slane %v468_v63, 1  ;;  %v560_v20 = vmul.f32 %v2745_v15, %v2883_v59 }
  0x43   : > { %v886_v21 = vrot.slane %v851_v0, 5  ;;  %v412_v23 = vadd.f32 %v377_v2, %v319_v1  ;;  %v504_v24 = vrot.slane %v469_v3, 1  ;;  %v561_v25 = vmul.f32 %v2745_v15, %v2886_v60 }
  0x44   : > { %v885_v26 = vrot.slane %v850_v4, 5  ;;  %v449_v28 = vadd.f32 %v433_v57, %v413_v12  ;;  %v595_v29 = vrot.slane %v560_v20, 2  ;;  %v652_v30 = vmul.f32 %v2748_v16, %v2935_v22 }
  0x45   : > { %v448_v31 = vadd.f32 %v432_v51, %v412_v23  ;;  %v505_v32 = vsel %vm272_vm0, %v503_v13, %v504_v24  ;;  %v596_v33 = vrot.slane %v561_v25, 2  ;;  %v653_v34 = vmul.f32 %v2748_v16, %v2940_v27 }
  0x46   : > { %v887_v35 = vsel %vm878_vm2, %v885_v26, %v886_v21  ;;  %v541_v36 = vadd.f32 %v504_v24, %v449_v28  ;;  %v688_v37 = vmul.f32 %v2751_v17, %v2935_v22  ;;  %v689_v38 = vmul.f32 %v2751_v17, %v2940_v27 }
  0x47   : > { %913 = vst [vmem:[%s2843_s24 + $0x40] sm:$0xff] %v887_v35  ;;  %v540_v39 = vadd.f32 %v505_v32, %v448_v31  ;;  %v597_v42 = vsel %vm365_vm1, %v595_v29, %v596_v33  ;;  %v780_v43 = vmul.f32 %v2796_v55, %v2935_v22  ;;  %v781_v44 = vmul.f32 %v2796_v55, %v2940_v27 }
  0x48   : > { %v633_v45 = vadd.f32 %v596_v33, %v541_v36  ;;  %v723_v46 = vrot.slane %v688_v37, 1  ;;  %v724_v47 = vrot.slane %v689_v38, 1  ;;  %v228_v48 = vmul.f32 %v2728_v8, %v2883_v59  ;;  %v2985_v38 = vld [vmem:[%s2725_s20 + $0x108] sm:$0xff] }
  0x49   : > { %v632_v49 = vadd.f32 %v597_v42, %v540_v39  ;;  %v815_v51 = vrot.slane %v780_v43, 2  ;;  %v816_v52 = vrot.slane %v781_v44, 2  ;;  %v229_v53 = vmul.f32 %v2728_v8, %v2886_v60  ;;  %v2988_v39 = vld [vmem:[%s2725_s20 + $0x110] sm:$0xff] }
  0x4a   : > { %v669_v54 = vadd.f32 %v653_v34, %v633_v45  ;;  %v725_v57 = vsel %vm272_vm0, %v723_v46, %v724_v47  ;;  %v248_v58 = vmul.f32 %v2731_v9, %v2883_v59  ;;  %v249_v61 = vmul.f32 %v2731_v9, %v2886_v60 }
  0x4b   : > { %v668_v62 = vadd.f32 %v652_v30, %v632_v49  ;;  %v817_v63 = vsel %vm365_vm1, %v815_v51, %v816_v52  ;;  %v341_v0 = vmul.f32 %v2734_v10, %v2883_v59  ;;  %v342_v1 = vmul.f32 %v2734_v10, %v2886_v60 }
  0x4c   : > { %v761_v2 = vadd.f32 %v724_v47, %v669_v54  ;;  %v285_v3 = vrot.slane %v248_v58, 1  ;;  %v286_v4 = vrot.slane %v249_v61, 1  ;;  %v434_v12 = vmul.f32 %v2737_v11, %v2935_v22 }
  0x4d   : > { %v760_v13 = vadd.f32 %v725_v57, %v668_v62  ;;  %v378_v20 = vrot.slane %v341_v0, 2  ;;  %v379_v21 = vrot.slane %v342_v1, 2  ;;  %v435_v23 = vmul.f32 %v2737_v11, %v2940_v27 }
  0x4e   : > { %v853_v24 = vadd.f32 %v816_v52, %v761_v2  ;;  %v287_v25 = vsel %vm272_vm0, %v285_v3, %v286_v4  ;;  %v322_v26 = vadd.f32 %v286_v4, %v229_v53  ;;  %v470_v28 = vmul.f32 %v2742_v14, %v2935_v22 }
  0x4f   : > { %v852_v29 = vadd.f32 %v817_v63, %v760_v13  ;;  %v321_v30 = vadd.f32 %v287_v25, %v228_v48  ;;  %v380_v31 = vsel %vm365_vm1, %v378_v20, %v379_v21  ;;  %v471_v32 = vmul.f32 %v2742_v14, %v2940_v27 }
  0x50   : > { %v889_v33 = vrot.slane %v853_v24, 5  ;;  %v415_v34 = vadd.f32 %v379_v21, %v322_v26  ;;  %v506_v35 = vrot.slane %v470_v28, 1  ;;  %v562_v36 = vmul.f32 %v2745_v15, %v2935_v22 }
  0x51   : > { %v888_v37 = vrot.slane %v852_v29, 5  ;;  %v414_v42 = vadd.f32 %v380_v31, %v321_v30  ;;  %v507_v43 = vrot.slane %v471_v32, 1  ;;  %v563_v44 = vmul.f32 %v2745_v15, %v2940_v27 }
  0x52   : > { %v451_v45 = vadd.f32 %v435_v23, %v415_v34  ;;  %v598_v46 = vrot.slane %v562_v36, 2  ;;  %v654_v47 = vmul.f32 %v2748_v16, %v2985_v38  ;;  %v655_v48 = vmul.f32 %v2748_v16, %v2988_v39 }
  0x53   : > { %v890_v49 = vsel %vm878_vm2, %v888_v37, %v889_v33  ;;  %v450_v51 = vadd.f32 %v434_v12, %v414_v42  ;;  %v508_v52 = vsel %vm272_vm0, %v506_v35, %v507_v43  ;;  %v599_v53 = vrot.slane %v563_v44, 2 }
  0x54   : > { %914 = vst [vmem:[%s2843_s24 + $0x60] sm:$0xff] %v890_v49  ;;  %v543_v54 = vadd.f32 %v507_v43, %v451_v45  ;;  %v690_v57 = vmul.f32 %v2751_v17, %v2985_v38  ;;  %v691_v58 = vmul.f32 %v2751_v17, %v2988_v39  ;;  %v782_v61 = vmul.f32 %v2796_v55, %v2985_v38 }
  0x55   : > { %v542_v62 = vadd.f32 %v508_v52, %v450_v51  ;;  %v600_v63 = vsel %vm365_vm1, %v598_v46, %v599_v53  ;;  %v783_v0 = vmul.f32 %v2796_v55, %v2988_v39  ;;  %v230_v1 = vmul.f32 %v2728_v8, %v2935_v22 }
  0x56   : > { %v635_v2 = vadd.f32 %v599_v53, %v543_v54  ;;  %v726_v3 = vrot.slane %v690_v57, 1  ;;  %v727_v4 = vrot.slane %v691_v58, 1  ;;  %v818_v12 = vrot.slane %v782_v61, 2  ;;  %v3033_v57 = vld [vmem:[%s2725_s20 + $0x120] sm:$0xff] }
  0x57   : > { %v634_v13 = vadd.f32 %v600_v63, %v542_v62  ;;  %v819_v20 = vrot.slane %v783_v0, 2  ;;  %v231_v21 = vmul.f32 %v2728_v8, %v2940_v27  ;;  %v250_v23 = vmul.f32 %v2731_v9, %v2935_v22  ;;  %v3038_v0 = vld [vmem:[%s2725_s20 + $0x128] sm:$0xff] }
  0x58   : > { %v671_v24 = vadd.f32 %v655_v48, %v635_v2  ;;  %v728_v25 = vsel %vm272_vm0, %v726_v3, %v727_v4  ;;  %v251_v26 = vmul.f32 %v2731_v9, %v2940_v27  ;;  %v343_v28 = vmul.f32 %v2734_v10, %v2935_v22 }
  0x59   : > { %v670_v29 = vadd.f32 %v654_v47, %v634_v13  ;;  %v820_v30 = vsel %vm365_vm1, %v818_v12, %v819_v20  ;;  %v288_v31 = vrot.slane %v250_v23, 1  ;;  %v344_v32 = vmul.f32 %v2734_v10, %v2940_v27 }
  0x5a   : > { %v763_v33 = vadd.f32 %v727_v4, %v671_v24  ;;  %v289_v34 = vrot.slane %v251_v26, 1  ;;  %v381_v35 = vrot.slane %v343_v28, 2  ;;  %v436_v36 = vmul.f32 %v2737_v11, %v2985_v38 }
  0x5b   : > { %v762_v37 = vadd.f32 %v728_v25, %v670_v29  ;;  %v382_v42 = vrot.slane %v344_v32, 2  ;;  %v437_v43 = vmul.f32 %v2737_v11, %v2988_v39  ;;  %v472_v44 = vmul.f32 %v2742_v14, %v2985_v38 }
  0x5c   : > { %v855_v45 = vadd.f32 %v819_v20, %v763_v33  ;;  %v290_v46 = vsel %vm272_vm0, %v288_v31, %v289_v34  ;;  %v324_v47 = vadd.f32 %v289_v34, %v231_v21  ;;  %v473_v48 = vmul.f32 %v2742_v14, %v2988_v39 }
  0x5d   : > { %v854_v49 = vadd.f32 %v820_v30, %v762_v37  ;;  %v323_v51 = vadd.f32 %v290_v46, %v230_v1  ;;  %v383_v52 = vsel %vm365_vm1, %v381_v35, %v382_v42  ;;  %v509_v53 = vrot.slane %v472_v44, 1 }
  0x5e   : > { %v892_v54 = vrot.slane %v855_v45, 5  ;;  %v417_v58 = vadd.f32 %v382_v42, %v324_v47  ;;  %v510_v61 = vrot.slane %v473_v48, 1  ;;  %v564_v62 = vmul.f32 %v2745_v15, %v2985_v38 }
  0x5f   : > { %v891_v63 = vrot.slane %v854_v49, 5  ;;  %v416_v2 = vadd.f32 %v383_v52, %v323_v51  ;;  %v565_v3 = vmul.f32 %v2745_v15, %v2988_v39  ;;  %v656_v1 = vmul.f32 %v2748_v16, %v3033_v57 }
  0x60   : > { %v453_v4 = vadd.f32 %v437_v43, %v417_v58  ;;  %v511_v12 = vsel %vm272_vm0, %v509_v53, %v510_v61  ;;  %v601_v13 = vrot.slane %v564_v62, 2  ;;  %v657_v20 = vmul.f32 %v2748_v16, %v3038_v0 }
  0x61   : > { %v893_v21 = vsel %vm878_vm2, %v891_v63, %v892_v54  ;;  %v452_v23 = vadd.f32 %v436_v36, %v416_v2  ;;  %v602_v24 = vrot.slane %v565_v3, 2  ;;  %v692_v25 = vmul.f32 %v2751_v17, %v3033_v57 }
  0x62   : > { %915 = vst [vmem:[%s2843_s24 + $0x80] sm:$0xff] %v893_v21  ;;  %v545_v26 = vadd.f32 %v510_v61, %v453_v4  ;;  %v693_v28 = vmul.f32 %v2751_v17, %v3038_v0  ;;  %v784_v29 = vmul.f32 %v2796_v55, %v3033_v57  ;;  %v785_v30 = vmul.f32 %v2796_v55, %v3038_v0 }
  0x63   : > { %v544_v31 = vadd.f32 %v511_v12, %v452_v23  ;;  %v603_v32 = vsel %vm365_vm1, %v601_v13, %v602_v24  ;;  %v729_v33 = vrot.slane %v692_v25, 1  ;;  %v232_v34 = vmul.f32 %v2728_v8, %v2985_v38 }
  0x64   : > { %v637_v35 = vadd.f32 %v602_v24, %v545_v26  ;;  %v730_v36 = vrot.slane %v693_v28, 1  ;;  %v821_v37 = vrot.slane %v784_v29, 2  ;;  %v822_v42 = vrot.slane %v785_v30, 2 }
  0x65   : > { %v636_v43 = vadd.f32 %v603_v32, %v544_v31  ;;  %v233_v44 = vmul.f32 %v2728_v8, %v2988_v39  ;;  %v252_v45 = vmul.f32 %v2731_v9, %v2985_v38  ;;  %v253_v46 = vmul.f32 %v2731_v9, %v2988_v39 }
  0x66   : > { %v673_v47 = vadd.f32 %v657_v20, %v637_v35  ;;  %v731_v48 = vsel %vm272_vm0, %v729_v33, %v730_v36  ;;  %v823_v49 = vsel %vm365_vm1, %v821_v37, %v822_v42  ;;  %v345_v51 = vmul.f32 %v2734_v10, %v2985_v38  ;;  %v3088_v35 = vld [vmem:[%s2725_s20 + $0x140] sm:$0xff] }
  0x67   : > { %v672_v52 = vadd.f32 %v656_v1, %v636_v43  ;;  %v291_v53 = vrot.slane %v252_v45, 1  ;;  %v292_v54 = vrot.slane %v253_v46, 1  ;;  %v346_v58 = vmul.f32 %v2734_v10, %v2988_v39 }
  0x68   : > { %v765_v61 = vadd.f32 %v730_v36, %v673_v47  ;;  %v384_v62 = vrot.slane %v345_v51, 2  ;;  %v438_v63 = vmul.f32 %v2737_v11, %v3033_v57  ;;  %v439_v2 = vmul.f32 %v2737_v11, %v3038_v0 }
  0x69   : > { %v764_v3 = vadd.f32 %v731_v48, %v672_v52  ;;  %v293_v4 = vsel %vm272_vm0, %v291_v53, %v292_v54  ;;  %v326_v12 = vadd.f32 %v292_v54, %v233_v44  ;;  %v385_v1 = vrot.slane %v346_v58, 2 }
  0x6a   : > { %v857_v13 = vadd.f32 %v822_v42, %v765_v61  ;;  %v325_v20 = vadd.f32 %v293_v4, %v232_v34  ;;  %v474_v21 = vmul.f32 %v2742_v14, %v3033_v57  ;;  %v475_v23 = vmul.f32 %v2742_v14, %v3038_v0  ;;  %v3085_v34 = vld [vmem:[%s2725_s20 + $0x138] sm:$0xff] }
  0x6b   : > { %v856_v24 = vadd.f32 %v823_v49, %v764_v3  ;;  %v386_v25 = vsel %vm365_vm1, %v384_v62, %v385_v1  ;;  %v419_v26 = vadd.f32 %v385_v1, %v326_v12  ;;  %v566_v28 = vmul.f32 %v2745_v15, %v3033_v57 }
  0x6c   : > { %v895_v29 = vrot.slane %v857_v13, 5  ;;  %v418_v30 = vadd.f32 %v386_v25, %v325_v20  ;;  %v512_v31 = vrot.slane %v474_v21, 1  ;;  %v513_v32 = vrot.slane %v475_v23, 1 }
  0x6d   : > { %v894_v33 = vrot.slane %v856_v24, 5  ;;  %v455_v36 = vadd.f32 %v439_v2, %v419_v26  ;;  %v567_v37 = vmul.f32 %v2745_v15, %v3038_v0  ;;  %v604_v42 = vrot.slane %v566_v28, 2 }
  0x6e   : > { %v454_v43 = vadd.f32 %v438_v63, %v418_v30  ;;  %v514_v44 = vsel %vm272_vm0, %v512_v31, %v513_v32  ;;  %v658_v45 = vmul.f32 %v2748_v16, %v3085_v34  ;;  %v659_v46 = vmul.f32 %v2748_v16, %v3088_v35 }
  0x6f   : > { %v896_v47 = vsel %vm878_vm2, %v894_v33, %v895_v29  ;;  %v547_v48 = vadd.f32 %v513_v32, %v455_v36  ;;  %v605_v49 = vrot.slane %v567_v37, 2  ;;  %v694_v51 = vmul.f32 %v2751_v17, %v3085_v34 }
  0x70   : > { %916 = vst [vmem:[%s2843_s24 + $0xa0] sm:$0xff] %v896_v47  ;;  %v546_v52 = vadd.f32 %v514_v44, %v454_v43  ;;  %v695_v53 = vmul.f32 %v2751_v17, %v3088_v35  ;;  %v786_v54 = vmul.f32 %v2796_v55, %v3085_v34  ;;  %v787_v58 = vmul.f32 %v2796_v55, %v3088_v35 }
  0x71   : > { %v606_v61 = vsel %vm365_vm1, %v604_v42, %v605_v49  ;;  %v639_v62 = vadd.f32 %v605_v49, %v547_v48  ;;  %v732_v63 = vrot.slane %v694_v51, 1  ;;  %v234_v2 = vmul.f32 %v2728_v8, %v3033_v57  ;;  %v3135_v51 = vld [vmem:[%s2725_s20 + $0x158] sm:$0xff] }
  0x72   : > { %v638_v3 = vadd.f32 %v606_v61, %v546_v52  ;;  %v733_v4 = vrot.slane %v695_v53, 1  ;;  %v824_v12 = vrot.slane %v786_v54, 2  ;;  %v825_v1 = vrot.slane %v787_v58, 2 }
  0x73   : > { %v675_v13 = vadd.f32 %v659_v46, %v639_v62  ;;  %v235_v20 = vmul.f32 %v2728_v8, %v3038_v0  ;;  %v254_v21 = vmul.f32 %v2731_v9, %v3033_v57  ;;  %v255_v23 = vmul.f32 %v2731_v9, %v3038_v0  ;;  %v3128_v46 = vld [vmem:[%s2725_s20 + $0x150] sm:$0xff] }
  0x74   : > { %v674_v24 = vadd.f32 %v658_v45, %v638_v3  ;;  %v734_v25 = vsel %vm272_vm0, %v732_v63, %v733_v4  ;;  %v826_v26 = vsel %vm365_vm1, %v824_v12, %v825_v1  ;;  %v347_v28 = vmul.f32 %v2734_v10, %v3033_v57 }
  0x75   : > { %v767_v29 = vadd.f32 %v733_v4, %v675_v13  ;;  %v294_v30 = vrot.slane %v254_v21, 1  ;;  %v295_v31 = vrot.slane %v255_v23, 1  ;;  %v348_v8 = vmul.f32 %v2734_v10, %v3038_v0 }
  0x76   : > { %v766_v32 = vadd.f32 %v734_v25, %v674_v24  ;;  %v387_v33 = vrot.slane %v347_v28, 2  ;;  %v440_v9 = vmul.f32 %v2737_v11, %v3085_v34  ;;  %v441_v36 = vmul.f32 %v2737_v11, %v3088_v35  ;;  %v207_v24 = vld [vmem:[%s4334_s1 + $0xc] sm:$0x7] }
  0x77   : > { %v859_v37 = vadd.f32 %v825_v1, %v767_v29  ;;  %v296_v42 = vsel %vm272_vm0, %v294_v30, %v295_v31  ;;  %v328_v43 = vadd.f32 %v295_v31, %v235_v20  ;;  %v388_v44 = vrot.slane %v348_v8, 2 }
  0x78   : > { %v858_v45 = vadd.f32 %v826_v26, %v766_v32  ;;  %v327_v47 = vadd.f32 %v296_v42, %v234_v2  ;;  %v476_v10 = vmul.f32 %v2742_v14, %v3085_v34  ;;  %v477_v48 = vmul.f32 %v2742_v14, %v3088_v35  ;;  %v208_v32 = vld [vmem:[%s4334_s1 + $0x10] sm:$0x7] }
  0x79   : > { %v898_v49 = vrot.slane %v859_v37, 5  ;;  %v389_v11 = vsel %vm365_vm1, %v387_v33, %v388_v44  ;;  %v421_v52 = vadd.f32 %v388_v44, %v328_v43  ;;  %v568_v53 = vmul.f32 %v2745_v15, %v3085_v34  ;;  %v157_v37 = vld [vmem:[%s2725_s20 + $0x68] sm:$0xff] }
  0x7a   : > { %v897_v54 = vrot.slane %v858_v45, 5  ;;  %v420_v58 = vadd.f32 %v389_v11, %v327_v47  ;;  %v515_v61 = vrot.slane %v476_v10, 1  ;;  %v516_v62 = vrot.slane %v477_v48, 1 }
  0x7b   : > { %v457_v63 = vadd.f32 %v441_v36, %v421_v52  ;;  %v569_v2 = vmul.f32 %v2745_v15, %v3088_v35  ;;  %v607_v3 = vrot.slane %v568_v53, 2  ;;  %v660_v14 = vmul.f32 %v2748_v16, %v3128_v46 }
  0x7c   : > { %v899_v4 = vsel %vm878_vm2, %v897_v54, %v898_v49  ;;  %v456_v12 = vadd.f32 %v440_v9, %v420_v58  ;;  %v517_v1 = vsel %vm272_vm0, %v515_v61, %v516_v62  ;;  %v661_v13 = vmul.f32 %v2748_v16, %v3135_v51 }
  0x7d   : > { %917 = vst [vmem:[%s2843_s24 + $0xc0] sm:$0xff] %v899_v4  ;;  %v549_v20 = vadd.f32 %v516_v62, %v457_v63  ;;  %v608_v21 = vrot.slane %v569_v2, 2  ;;  %v696_v23 = vmul.f32 %v2751_v17, %v3128_v46  ;;  %v697_v15 = vmul.f32 %v2751_v17, %v3135_v51  ;;  %v156_v17 = vld [vmem:[%s2725_s20 + $0x60] sm:$0xff] }
  0x7e   : > { %v548_v25 = vadd.f32 %v517_v1, %v456_v12  ;;  %v788_v26 = vmul.f32 %v2796_v55, %v3128_v46  ;;  %v789_v16 = vmul.f32 %v2796_v55, %v3135_v51  ;;  %v3161_v28 = vrot.slane %v207_v24, %v2716_v5  ;;  %v209_v1 = vld [vmem:[%s4334_s1 + $0x14] sm:$0x7] }
  0x7f   : > { %v609_v29 = vsel %vm365_vm1, %v607_v3, %v608_v21  ;;  %v641_v30 = vadd.f32 %v608_v21, %v549_v20  ;;  %v735_v31 = vrot.slane %v696_v23, 1  ;;  %v736_v8 = vrot.slane %v697_v15, 1 }
  0x80   : > { %v640_v33 = vadd.f32 %v609_v29, %v548_v25  ;;  %v827_v9 = vrot.slane %v788_v26, 2  ;;  %v828_v36 = vrot.slane %v789_v16, 2  ;;  %v923_v42 = vmul.f32 %v3161_v28, %v156_v17 }
  0x81   : > { %v677_v55 = vadd.f32 %v661_v13, %v641_v30  ;;  %v737_v43 = vsel %vm272_vm0, %v735_v31, %v736_v8  ;;  %v924_v44 = vmul.f32 %v3161_v28, %v157_v37  ;;  %v3173_v45 = vrot.slane %v207_v24, %v2718_v6 }
  0x82   : > { %v676_v47 = vadd.f32 %v660_v14, %v640_v33  ;;  %v829_v10 = vsel %vm365_vm1, %v827_v9, %v828_v36  ;;  %v3177_v48 = vrot.slane %v207_v24, %v2720_v7  ;;  %v3180_v49 = vrot.slane %v208_v32, %v2716_v5 }
  0x83   : > { %v769_v11 = vadd.f32 %v736_v8, %v677_v55  ;;  %v943_v52 = vmul.f32 %v3173_v45, %v156_v17  ;;  %v944_v53 = vmul.f32 %v3173_v45, %v157_v37  ;;  %v3185_v54 = vrot.slane %v208_v32, %v2718_v6 }
  0x84   : > { %v768_v58 = vadd.f32 %v737_v43, %v676_v47  ;;  %v1035_v61 = vmul.f32 %v3177_v48, %v157_v37  ;;  %v1087_v62 = vmul.f32 %v3180_v49, %v2754_v18  ;;  %v1088_v63 = vmul.f32 %v3180_v49, %v2757_v19 }
  0x85   : > { %v861_v2 = vadd.f32 %v828_v36, %v769_v11  ;;  %v975_v3 = vrot.slane %v943_v52, 2  ;;  %v976_v14 = vrot.slane %v944_v53, 2  ;;  %v1123_v4 = vmul.f32 %v3185_v54, %v2754_v18 }
  0x86   : > { %v860_v12 = vadd.f32 %v829_v10, %v768_v58  ;;  %v1051_v13 = vrot.slane %v1035_v61, 4  ;;  %v1124_v20 = vmul.f32 %v3185_v54, %v2757_v19  ;;  %v3200_v21 = vrot.slane %v208_v32, %v2720_v7  ;;  %v3228_v10 = vld [vmem:[%s2725_s20 + $0x78] sm:$0xff]  ;;  %v3233_v58 = vld [vmem:[%s2725_s20 + $0x80] sm:$0xff] }
  0x87   : > { %v901_v23 = vrot.slane %v861_v2, 5  ;;  %v977_v15 = vsel %vm365_vm1, %v975_v3, %v976_v14  ;;  %v1016_v24 = vadd.f32 %v976_v14, %v924_v44  ;;  %v1155_v25 = vrot.slane %v1123_v4, 2 }
  0x88   : > { %v900_v26 = vrot.slane %v860_v12, 5  ;;  %v1015_v18 = vadd.f32 %v977_v15, %v923_v42  ;;  %v1156_v16 = vrot.slane %v1124_v20, 2  ;;  %v1215_v29 = vmul.f32 %v3200_v21, %v2757_v19 }
  0x89   : > { %v1068_v30 = vadd.f32 %v1051_v13, %v1016_v24  ;;  %v3206_v31 = vrot.slane %v209_v1, %v2716_v5  ;;  %v3209_v8 = vrot.slane %v209_v1, %v2718_v6  ;;  %v3212_v17 = vrot.slane %v209_v1, %v2720_v7 }
  0x8a   : > { %v902_v32 = vsel %vm878_vm2, %v900_v26, %v901_v23  ;;  %v1067_v33 = vadd.f32 %v1051_v13, %v1015_v18  ;;  %v1157_v9 = vsel %vm365_vm1, %v1155_v25, %v1156_v16  ;;  %v1231_v36 = vrot.slane %v1215_v29, 4 }
  0x8b   : > { %918 = vst [vmem:[%s2843_s24 + $0xe0] sm:$0xff] %v902_v32  ;;  %v1104_v19 = vadd.f32 %v1088_v63, %v1068_v30  ;;  %v1267_v37 = vmul.f32 %v3206_v31, %v2832_v50  ;;  %v1268_v42 = vmul.f32 %v3206_v31, %v2835_v56  ;;  %v1303_v55 = vmul.f32 %v3209_v8, %v2832_v50 }
  0x8c   : > { %v1103_v43 = vadd.f32 %v1087_v62, %v1067_v33  ;;  %v1304_v44 = vmul.f32 %v3209_v8, %v2835_v56  ;;  %v1395_v47 = vmul.f32 %v3212_v17, %v2835_v56  ;;  %v925_v11 = vmul.f32 %v3228_v10, %v3161_v28  ;;  %v3254_v33 = vld [vmem:[%s2725_s20 + $0xb0] sm:$0xff] }
  0x8d   : > { %v1196_v52 = vadd.f32 %v1156_v16, %v1104_v19  ;;  %v1335_v53 = vrot.slane %v1303_v55, 2  ;;  %v926_v61 = vmul.f32 %v3233_v58, %v3161_v28  ;;  %v945_v62 = vmul.f32 %v3228_v10, %v3173_v45 }
  0x8e   : > { %v1195_v63 = vadd.f32 %v1157_v9, %v1103_v43  ;;  %v1336_v2 = vrot.slane %v1304_v44, 2  ;;  %v1411_v3 = vrot.slane %v1395_v47, 4  ;;  %v946_v14 = vmul.f32 %v3233_v58, %v3173_v45 }
  0x8f   : > { %v1248_v4 = vadd.f32 %v1231_v36, %v1196_v52  ;;  %v978_v12 = vrot.slane %v945_v62, 2  ;;  %v1036_v1 = vmul.f32 %v3233_v58, %v3177_v48  ;;  %v1089_v13 = vmul.f32 %v3180_v49, %v2779_v40 }
  0x90   : > { %v1247_v20 = vadd.f32 %v1231_v36, %v1195_v63  ;;  %v1337_v23 = vsel %vm365_vm1, %v1335_v53, %v1336_v2  ;;  %v979_v15 = vrot.slane %v946_v14, 2  ;;  %v1090_v24 = vmul.f32 %v3180_v49, %v2782_v41 }
  0x91   : > { %v1284_v25 = vadd.f32 %v1268_v42, %v1248_v4  ;;  %v1052_v26 = vrot.slane %v1036_v1, 4  ;;  %v1125_v18 = vmul.f32 %v3185_v54, %v2779_v40  ;;  %v1126_v16 = vmul.f32 %v3185_v54, %v2782_v41 }
  0x92   : > { %v1283_v29 = vadd.f32 %v1267_v37, %v1247_v20  ;;  %v980_v30 = vsel %vm365_vm1, %v978_v12, %v979_v15  ;;  %v1018_v32 = vadd.f32 %v979_v15, %v926_v61  ;;  %v1216_v9 = vmul.f32 %v3254_v33, %v3200_v21  ;;  %v3270_v12 = vld [vmem:[%s2725_s20 + $0x90] sm:$0xff] }
  0x93   : > { %v1376_v36 = vadd.f32 %v1336_v2, %v1284_v25  ;;  %v1017_v19 = vadd.f32 %v980_v30, %v925_v11  ;;  %v1158_v42 = vrot.slane %v1125_v18, 2  ;;  %v1159_v55 = vrot.slane %v1126_v16, 2 }
  0x94   : > { %v1375_v43 = vadd.f32 %v1337_v23, %v1283_v29  ;;  %v1070_v44 = vadd.f32 %v1052_v26, %v1018_v32  ;;  %v1232_v40 = vrot.slane %v1216_v9, 4  ;;  %v1269_v41 = vmul.f32 %v3206_v31, %v2883_v59 }
  0x95   : > { %v1428_v37 = vadd.f32 %v1411_v3, %v1376_v36  ;;  %v1069_v47 = vadd.f32 %v1052_v26, %v1017_v19  ;;  %v1160_v52 = vsel %vm365_vm1, %v1158_v42, %v1159_v55  ;;  %v1270_v53 = vmul.f32 %v3206_v31, %v2886_v60  ;;  %v3275_v26 = vld [vmem:[%s2725_s20 + $0x98] sm:$0xff] }
  0x96   : > { %v1427_v61 = vadd.f32 %v1411_v3, %v1375_v43  ;;  %v1106_v62 = vadd.f32 %v1090_v24, %v1070_v44  ;;  %v1305_v11 = vmul.f32 %v3209_v8, %v2883_v59  ;;  %v1306_v63 = vmul.f32 %v3209_v8, %v2886_v60 }
  0x97   : > { %v1461_v2 = vrot.slane %v1428_v37, 4  ;;  %v1105_v14 = vadd.f32 %v1089_v13, %v1069_v47  ;;  %v1396_v4 = vmul.f32 %v3212_v17, %v2886_v60  ;;  %v927_v1 = vmul.f32 %v3270_v12, %v3161_v28 }
  0x98   : > { %v1460_v20 = vrot.slane %v1427_v61, 4  ;;  %v1198_v3 = vadd.f32 %v1159_v55, %v1106_v62  ;;  %v1338_v23 = vrot.slane %v1305_v11, 2  ;;  %v1339_v15 = vrot.slane %v1306_v63, 2 }
  0x99   : > { %v1197_v24 = vadd.f32 %v1160_v52, %v1105_v14  ;;  %v1412_v25 = vrot.slane %v1396_v4, 4  ;;  %v928_v13 = vmul.f32 %v3275_v26, %v3161_v28  ;;  %v947_v18 = vmul.f32 %v3270_v12, %v3173_v45 }
  0x9a   : > { %v1462_v16 = vsel %vm1459_vm3, %v1460_v20, %v1461_v2  ;;  %v1250_v29 = vadd.f32 %v1232_v40, %v1198_v3  ;;  %v1340_v30 = vsel %vm365_vm1, %v1338_v23, %v1339_v15  ;;  %v948_v32 = vmul.f32 %v3275_v26, %v3173_v45 }
  0x9b   : > { %1492 = vst [vmem:[%s2843_s24 + $0x8] sm:$0xff] %v1462_v16  ;;  %v1249_v9 = vadd.f32 %v1232_v40, %v1197_v24  ;;  %v981_v36 = vrot.slane %v947_v18, 2  ;;  %v1037_v19 = vmul.f32 %v3275_v26, %v3177_v48  ;;  %v1091_v42 = vmul.f32 %v3180_v49, %v2832_v50 }
  0x9c   : > { %v1286_v55 = vadd.f32 %v1270_v53, %v1250_v29  ;;  %v982_v43 = vrot.slane %v948_v32, 2  ;;  %v1092_v44 = vmul.f32 %v3180_v49, %v2835_v56  ;;  %v1127_v37 = vmul.f32 %v3185_v54, %v2832_v50 }
  0x9d   : > { %v1285_v47 = vadd.f32 %v1269_v41, %v1249_v9  ;;  %v1053_v52 = vrot.slane %v1037_v19, 4  ;;  %v1128_v40 = vmul.f32 %v3185_v54, %v2835_v56  ;;  %v1217_v61 = vmul.f32 %v3200_v21, %v2835_v56 }
  0x9e   : > { %v1378_v62 = vadd.f32 %v1339_v15, %v1286_v55  ;;  %v983_v11 = vsel %vm365_vm1, %v981_v36, %v982_v43  ;;  %v1020_v63 = vadd.f32 %v982_v43, %v928_v13  ;;  %v1161_v53 = vrot.slane %v1127_v37, 2  ;;  %v3311_v36 = vld [vmem:[%s2725_s20 + $0xa8] sm:$0xff] }
  0x9f   : > { %v1377_v2 = vadd.f32 %v1340_v30, %v1285_v47  ;;  %v1019_v14 = vadd.f32 %v983_v11, %v927_v1  ;;  %v1162_v4 = vrot.slane %v1128_v40, 2  ;;  %v1233_v20 = vrot.slane %v1217_v61, 4 }
  0xa0   : > { %v1430_v3 = vadd.f32 %v1412_v25, %v1378_v62  ;;  %v1072_v50 = vadd.f32 %v1053_v52, %v1020_v63  ;;  %v1271_v41 = vmul.f32 %v3206_v31, %v2935_v22  ;;  %v1272_v23 = vmul.f32 %v3206_v31, %v2940_v27 }
  0xa1   : > { %v1429_v24 = vadd.f32 %v1412_v25, %v1377_v2  ;;  %v1071_v56 = vadd.f32 %v1053_v52, %v1019_v14  ;;  %v1163_v15 = vsel %vm365_vm1, %v1161_v53, %v1162_v4  ;;  %v1307_v13 = vmul.f32 %v3209_v8, %v2935_v22 }
  0xa2   : > { %v1464_v18 = vrot.slane %v1430_v3, 4  ;;  %v1108_v1 = vadd.f32 %v1092_v44, %v1072_v50  ;;  %v1308_v16 = vmul.f32 %v3209_v8, %v2940_v27  ;;  %v1397_v29 = vmul.f32 %v3212_v17, %v2940_v27 }
  0xa3   : > { %v1463_v30 = vrot.slane %v1429_v24, 4  ;;  %v1107_v32 = vadd.f32 %v1091_v42, %v1071_v56  ;;  %v1341_v9 = vrot.slane %v1307_v13, 2  ;;  %v929_v25 = vmul.f32 %v3311_v36, %v3161_v28 }
  0xa4   : > { %v1200_v19 = vadd.f32 %v1162_v4, %v1108_v1  ;;  %v1342_v55 = vrot.slane %v1308_v16, 2  ;;  %v1413_v43 = vrot.slane %v1397_v29, 4  ;;  %v930_v44 = vmul.f32 %v3254_v33, %v3161_v28 }
  0xa5   : > { %v1465_v37 = vsel %vm1459_vm3, %v1463_v30, %v1464_v18  ;;  %v1199_v47 = vadd.f32 %v1163_v15, %v1107_v32  ;;  %v949_v52 = vmul.f32 %v3311_v36, %v3173_v45  ;;  %v950_v42 = vmul.f32 %v3254_v33, %v3173_v45 }
  0xa6   : > { %1493 = vst [vmem:[%s2843_s24 + $0x28] sm:$0xff] %v1465_v37  ;;  %v1252_v40 = vadd.f32 %v1233_v20, %v1200_v19  ;;  %v1343_v61 = vsel %vm365_vm1, %v1341_v9, %v1342_v55  ;;  %v1038_v62 = vmul.f32 %v3254_v33, %v3177_v48  ;;  %v1093_v11 = vmul.f32 %v3180_v49, %v2883_v59 }
  0xa7   : > { %v1251_v63 = vadd.f32 %v1233_v20, %v1199_v47  ;;  %v984_v53 = vrot.slane %v949_v52, 2  ;;  %v985_v2 = vrot.slane %v950_v42, 2  ;;  %v1094_v14 = vmul.f32 %v3180_v49, %v2886_v60 }
  0xa8   : > { %v1288_v4 = vadd.f32 %v1272_v23, %v1252_v40  ;;  %v1054_v3 = vrot.slane %v1038_v62, 4  ;;  %v1129_v50 = vmul.f32 %v3185_v54, %v2883_v59  ;;  %v1130_v24 = vmul.f32 %v3185_v54, %v2886_v60  ;;  %v3349_v40 = vld [vmem:[%s2725_s20 + $0xc0] sm:$0xff] }
  0xa9   : > { %v1287_v56 = vadd.f32 %v1271_v41, %v1251_v63  ;;  %v986_v15 = vsel %vm365_vm1, %v984_v53, %v985_v2  ;;  %v1022_v13 = vadd.f32 %v985_v2, %v930_v44  ;;  %v1218_v20 = vmul.f32 %v3200_v21, %v2886_v60 }
  0xaa   : > { %v1380_v18 = vadd.f32 %v1342_v55, %v1288_v4  ;;  %v1021_v1 = vadd.f32 %v986_v15, %v929_v25  ;;  %v1164_v16 = vrot.slane %v1129_v50, 2  ;;  %v1165_v29 = vrot.slane %v1130_v24, 2  ;;  %v3354_v4 = vld [vmem:[%s2725_s20 + $0xc8] sm:$0xff] }
  0xab   : > { %v1379_v23 = vadd.f32 %v1343_v61, %v1287_v56  ;;  %v1074_v30 = vadd.f32 %v1054_v3, %v1022_v13  ;;  %v1234_v32 = vrot.slane %v1218_v20, 4  ;;  %v1273_v59 = vmul.f32 %v3206_v31, %v2985_v38 }
  0xac   : > { %v1432_v9 = vadd.f32 %v1413_v43, %v1380_v18  ;;  %v1073_v19 = vadd.f32 %v1054_v3, %v1021_v1  ;;  %v1166_v41 = vsel %vm365_vm1, %v1164_v16, %v1165_v29  ;;  %v1274_v44 = vmul.f32 %v3206_v31, %v2988_v39 }
  0xad   : > { %v1431_v60 = vadd.f32 %v1413_v43, %v1379_v23  ;;  %v1110_v55 = vadd.f32 %v1094_v14, %v1074_v30  ;;  %v1309_v25 = vmul.f32 %v3209_v8, %v2985_v38  ;;  %v1310_v37 = vmul.f32 %v3209_v8, %v2988_v39 }
  0xae   : > { %v1467_v47 = vrot.slane %v1432_v9, 4  ;;  %v1109_v52 = vadd.f32 %v1093_v11, %v1073_v19  ;;  %v1398_v42 = vmul.f32 %v3212_v17, %v2988_v39  ;;  %v931_v61 = vmul.f32 %v3349_v40, %v3161_v28 }
  0xaf   : > { %v1466_v62 = vrot.slane %v1431_v60, 4  ;;  %v1202_v43 = vadd.f32 %v1165_v29, %v1110_v55  ;;  %v1344_v63 = vrot.slane %v1309_v25, 2  ;;  %v1345_v53 = vrot.slane %v1310_v37, 2 }
  0xb0   : > { %v1201_v2 = vadd.f32 %v1166_v41, %v1109_v52  ;;  %v1414_v14 = vrot.slane %v1398_v42, 4  ;;  %v932_v11 = vmul.f32 %v3354_v4, %v3161_v28  ;;  %v951_v3 = vmul.f32 %v3349_v40, %v3173_v45 }
  0xb1   : > { %v1468_v50 = vsel %vm1459_vm3, %v1466_v62, %v1467_v47  ;;  %v1254_v24 = vadd.f32 %v1234_v32, %v1202_v43  ;;  %v1346_v56 = vsel %vm365_vm1, %v1344_v63, %v1345_v53  ;;  %v952_v15 = vmul.f32 %v3354_v4, %v3173_v45 }
  0xb2   : > { %1494 = vst [vmem:[%s2843_s24 + $0x48] sm:$0xff] %v1468_v50  ;;  %v1253_v13 = vadd.f32 %v1234_v32, %v1201_v2  ;;  %v987_v20 = vrot.slane %v951_v3, 2  ;;  %v1039_v18 = vmul.f32 %v3354_v4, %v3177_v48  ;;  %v1095_v1 = vmul.f32 %v3180_v49, %v2935_v22 }
  0xb3   : > { %v1290_v16 = vadd.f32 %v1274_v44, %v1254_v24  ;;  %v988_v29 = vrot.slane %v952_v15, 2  ;;  %v1096_v23 = vmul.f32 %v3180_v49, %v2940_v27  ;;  %v1131_v30 = vmul.f32 %v3185_v54, %v2935_v22 }
  0xb4   : > { %v1289_v9 = vadd.f32 %v1273_v59, %v1253_v13  ;;  %v1055_v19 = vrot.slane %v1039_v18, 4  ;;  %v1132_v32 = vmul.f32 %v3185_v54, %v2940_v27  ;;  %v1219_v41 = vmul.f32 %v3200_v21, %v2940_v27 }
  0xb5   : > { %v1382_v60 = vadd.f32 %v1345_v53, %v1290_v16  ;;  %v989_v55 = vsel %vm365_vm1, %v987_v20, %v988_v29  ;;  %v1024_v25 = vadd.f32 %v988_v29, %v932_v11  ;;  %v1167_v44 = vrot.slane %v1131_v30, 2  ;;  %v3395_v29 = vld [vmem:[%s2725_s20 + $0xe0] sm:$0xff] }
  0xb6   : > { %v1381_v37 = vadd.f32 %v1346_v56, %v1289_v9  ;;  %v1023_v47 = vadd.f32 %v989_v55, %v931_v61  ;;  %v1168_v52 = vrot.slane %v1132_v32, 2  ;;  %v1235_v42 = vrot.slane %v1219_v41, 4 }
  0xb7   : > { %v1434_v62 = vadd.f32 %v1414_v14, %v1382_v60  ;;  %v1076_v22 = vadd.f32 %v1055_v19, %v1024_v25  ;;  %v1275_v59 = vmul.f32 %v3206_v31, %v3033_v57  ;;  %v1276_v43 = vmul.f32 %v3206_v31, %v3038_v0 }
  0xb8   : > { %v1433_v63 = vadd.f32 %v1414_v14, %v1381_v37  ;;  %v1075_v27 = vadd.f32 %v1055_v19, %v1023_v47  ;;  %v1169_v53 = vsel %vm365_vm1, %v1167_v44, %v1168_v52  ;;  %v1311_v2 = vmul.f32 %v3209_v8, %v3033_v57  ;;  %v3390_v14 = vld [vmem:[%s2725_s20 + $0xd8] sm:$0xff] }
  0xb9   : > { %v1470_v61 = vrot.slane %v1434_v62, 4  ;;  %v1112_v11 = vadd.f32 %v1096_v23, %v1076_v22  ;;  %v1312_v3 = vmul.f32 %v3209_v8, %v3038_v0  ;;  %v1399_v50 = vmul.f32 %v3212_v17, %v3038_v0 }
  0xba   : > { %v1469_v24 = vrot.slane %v1433_v63, 4  ;;  %v1111_v56 = vadd.f32 %v1095_v1, %v1075_v27  ;;  %v1347_v15 = vrot.slane %v1311_v2, 2  ;;  %v933_v13 = vmul.f32 %v3390_v14, %v3161_v28 }
  0xbb   : > { %v1204_v20 = vadd.f32 %v1168_v52, %v1112_v11  ;;  %v1348_v18 = vrot.slane %v1312_v3, 2  ;;  %v1415_v16 = vrot.slane %v1399_v50, 4  ;;  %v934_v23 = vmul.f32 %v3395_v29, %v3161_v28 }
  0xbc   : > { %v1471_v30 = vsel %vm1459_vm3, %v1469_v24, %v1470_v61  ;;  %v1203_v9 = vadd.f32 %v1169_v53, %v1111_v56  ;;  %v953_v1 = vmul.f32 %v3390_v14, %v3173_v45  ;;  %v954_v19 = vmul.f32 %v3395_v29, %v3173_v45 }
  0xbd   : > { %1495 = vst [vmem:[%s2843_s24 + $0x68] sm:$0xff] %v1471_v30  ;;  %v1256_v32 = vadd.f32 %v1235_v42, %v1204_v20  ;;  %v1349_v41 = vsel %vm365_vm1, %v1347_v15, %v1348_v18  ;;  %v1040_v60 = vmul.f32 %v3395_v29, %v3177_v48  ;;  %v1097_v55 = vmul.f32 %v3180_v49, %v2985_v38 }
  0xbe   : > { %v1255_v25 = vadd.f32 %v1235_v42, %v1203_v9  ;;  %v990_v44 = vrot.slane %v953_v1, 2  ;;  %v991_v37 = vrot.slane %v954_v19, 2  ;;  %v1098_v47 = vmul.f32 %v3180_v49, %v2988_v39 }
  0xbf   : > { %v1292_v52 = vadd.f32 %v1276_v43, %v1256_v32  ;;  %v1056_v62 = vrot.slane %v1040_v60, 4  ;;  %v1133_v22 = vmul.f32 %v3185_v54, %v2985_v38  ;;  %v1134_v63 = vmul.f32 %v3185_v54, %v2988_v39  ;;  %v3431_v32 = vld [vmem:[%s2725_s20 + $0xf0] sm:$0xff] }
  0xc0   : > { %v1291_v27 = vadd.f32 %v1275_v59, %v1255_v25  ;;  %v992_v53 = vsel %vm365_vm1, %v990_v44, %v991_v37  ;;  %v1026_v2 = vadd.f32 %v991_v37, %v934_v23  ;;  %v1220_v42 = vmul.f32 %v3200_v21, %v2988_v39 }
  0xc1   : > { %v1384_v61 = vadd.f32 %v1348_v18, %v1292_v52  ;;  %v1025_v11 = vadd.f32 %v992_v53, %v933_v13  ;;  %v1170_v3 = vrot.slane %v1133_v22, 2  ;;  %v1171_v50 = vrot.slane %v1134_v63, 2  ;;  %v3436_v52 = vld [vmem:[%s2725_s20 + $0xf8] sm:$0xff] }
  0xc2   : > { %v1383_v43 = vadd.f32 %v1349_v41, %v1291_v27  ;;  %v1078_v24 = vadd.f32 %v1056_v62, %v1026_v2  ;;  %v1236_v56 = vrot.slane %v1220_v42, 4  ;;  %v1277_v38 = vmul.f32 %v3206_v31, %v3085_v34 }
  0xc3   : > { %v1436_v15 = vadd.f32 %v1415_v16, %v1384_v61  ;;  %v1077_v20 = vadd.f32 %v1056_v62, %v1025_v11  ;;  %v1172_v59 = vsel %vm365_vm1, %v1170_v3, %v1171_v50  ;;  %v1278_v23 = vmul.f32 %v3206_v31, %v3088_v35 }
  0xc4   : > { %v1435_v39 = vadd.f32 %v1415_v16, %v1383_v43  ;;  %v1114_v18 = vadd.f32 %v1098_v47, %v1078_v24  ;;  %v1313_v13 = vmul.f32 %v3209_v8, %v3085_v34  ;;  %v1314_v30 = vmul.f32 %v3209_v8, %v3088_v35 }
  0xc5   : > { %v1473_v9 = vrot.slane %v1436_v15, 4  ;;  %v1113_v1 = vadd.f32 %v1097_v55, %v1077_v20  ;;  %v1400_v19 = vmul.f32 %v3212_v17, %v3088_v35  ;;  %v935_v41 = vmul.f32 %v3431_v32, %v3161_v28 }
  0xc6   : > { %v1472_v60 = vrot.slane %v1435_v39, 4  ;;  %v1206_v16 = vadd.f32 %v1171_v50, %v1114_v18  ;;  %v1350_v25 = vrot.slane %v1313_v13, 2  ;;  %v1351_v44 = vrot.slane %v1314_v30, 2 }
  0xc7   : > { %v1205_v37 = vadd.f32 %v1172_v59, %v1113_v1  ;;  %v1416_v47 = vrot.slane %v1400_v19, 4  ;;  %v936_v55 = vmul.f32 %v3436_v52, %v3161_v28  ;;  %v955_v62 = vmul.f32 %v3431_v32, %v3173_v45 }
  0xc8   : > { %v1474_v22 = vsel %vm1459_vm3, %v1472_v60, %v1473_v9  ;;  %v1258_v63 = vadd.f32 %v1236_v56, %v1206_v16  ;;  %v1352_v27 = vsel %vm365_vm1, %v1350_v25, %v1351_v44  ;;  %v956_v53 = vmul.f32 %v3436_v52, %v3173_v45 }
  0xc9   : > { %1496 = vst [vmem:[%s2843_s24 + $0x88] sm:$0xff] %v1474_v22  ;;  %v1257_v2 = vadd.f32 %v1236_v56, %v1205_v37  ;;  %v993_v42 = vrot.slane %v955_v62, 2  ;;  %v1041_v61 = vmul.f32 %v3436_v52, %v3177_v48  ;;  %v1099_v11 = vmul.f32 %v3180_v49, %v3033_v57 }
  0xca   : > { %v1294_v3 = vadd.f32 %v1278_v23, %v1258_v63  ;;  %v994_v50 = vrot.slane %v956_v53, 2  ;;  %v1100_v43 = vmul.f32 %v3180_v49, %v3038_v0  ;;  %v1135_v24 = vmul.f32 %v3185_v54, %v3033_v57 }
  0xcb   : > { %v1293_v15 = vadd.f32 %v1277_v38, %v1257_v2  ;;  %v1057_v20 = vrot.slane %v1041_v61, 4  ;;  %v1136_v56 = vmul.f32 %v3185_v54, %v3038_v0  ;;  %v1221_v59 = vmul.f32 %v3200_v21, %v3038_v0 }
  0xcc   : > { %v1386_v39 = vadd.f32 %v1351_v44, %v1294_v3  ;;  %v995_v18 = vsel %vm365_vm1, %v993_v42, %v994_v50  ;;  %v1028_v13 = vadd.f32 %v994_v50, %v936_v55  ;;  %v1173_v23 = vrot.slane %v1135_v24, 2  ;;  %v3477_v3 = vld [vmem:[%s2725_s20 + $0x110] sm:$0xff] }
  0xcd   : > { %v1385_v30 = vadd.f32 %v1352_v27, %v1293_v15  ;;  %v1027_v9 = vadd.f32 %v995_v18, %v935_v41  ;;  %v1174_v1 = vrot.slane %v1136_v56, 2  ;;  %v1237_v19 = vrot.slane %v1221_v59, 4 }
  0xce   : > { %v1438_v60 = vadd.f32 %v1416_v47, %v1386_v39  ;;  %v1080_v57 = vadd.f32 %v1057_v20, %v1028_v13  ;;  %v1279_v38 = vmul.f32 %v3206_v31, %v3128_v46  ;;  %v1280_v16 = vmul.f32 %v3206_v31, %v3135_v51 }
  0xcf   : > { %v1437_v25 = vadd.f32 %v1416_v47, %v1385_v30  ;;  %v1079_v0 = vadd.f32 %v1057_v20, %v1027_v9  ;;  %v1175_v44 = vsel %vm365_vm1, %v1173_v23, %v1174_v1  ;;  %v1315_v37 = vmul.f32 %v3209_v8, %v3128_v46  ;;  %v3472_v47 = vld [vmem:[%s2725_s20 + $0x108] sm:$0xff] }
  0xd0   : > { %v1476_v41 = vrot.slane %v1438_v60, 4  ;;  %v1116_v55 = vadd.f32 %v1100_v43, %v1080_v57  ;;  %v1316_v62 = vmul.f32 %v3209_v8, %v3135_v51  ;;  %v1401_v22 = vmul.f32 %v3212_v17, %v3135_v51 }
  0xd1   : > { %v1475_v63 = vrot.slane %v1437_v25, 4  ;;  %v1115_v27 = vadd.f32 %v1099_v11, %v1079_v0  ;;  %v1353_v53 = vrot.slane %v1315_v37, 2  ;;  %v937_v2 = vmul.f32 %v3472_v47, %v3161_v28  ;;  %v3505_v0 = vld [vmem:[%s2725_s20 + $0x168] sm:$0xff] }
  0xd2   : > { %v1208_v42 = vadd.f32 %v1174_v1, %v1116_v55  ;;  %v1354_v61 = vrot.slane %v1316_v62, 2  ;;  %v1417_v46 = vrot.slane %v1401_v22, 4  ;;  %v938_v50 = vmul.f32 %v3477_v3, %v3161_v28 }
  0xd3   : > { %v1477_v43 = vsel %vm1459_vm3, %v1475_v63, %v1476_v41  ;;  %v1207_v24 = vadd.f32 %v1175_v44, %v1115_v27  ;;  %v957_v51 = vmul.f32 %v3472_v47, %v3173_v45  ;;  %v958_v11 = vmul.f32 %v3477_v3, %v3173_v45  ;;  %v210_v27 = vld [vmem:[%s4334_s1 + $0x18] sm:$0x7] }
  0xd4   : > { %1497 = vst [vmem:[%s2843_s24 + $0xa8] sm:$0xff] %v1477_v43  ;;  %v1260_v15 = vadd.f32 %v1237_v19, %v1208_v42  ;;  %v1355_v20 = vsel %vm365_vm1, %v1353_v53, %v1354_v61  ;;  %v1042_v56 = vmul.f32 %v3477_v3, %v3177_v48  ;;  %v1101_v28 = vmul.f32 %v3180_v49, %v3085_v34  ;;  %v3499_v48 = vld [vmem:[%s2725_s20 + $0x170] sm:$0xff] }
  0xd5   : > { %v1259_v59 = vadd.f32 %v1237_v19, %v1207_v24  ;;  %v996_v39 = vrot.slane %v957_v51, 2  ;;  %v997_v18 = vrot.slane %v958_v11, 2  ;;  %v1102_v13 = vmul.f32 %v3180_v49, %v3088_v35  ;;  %v151_v51 = vld [vmem:[%s2725_s20 + $0x38] sm:$0xff] }
  0xd6   : > { %v1296_v23 = vadd.f32 %v1280_v16, %v1260_v15  ;;  %v1058_v30 = vrot.slane %v1042_v56, 4  ;;  %v1137_v45 = vmul.f32 %v3185_v54, %v3085_v34  ;;  %v1138_v9 = vmul.f32 %v3185_v54, %v3088_v35 }
  0xd7   : > { %v1295_v1 = vadd.f32 %v1279_v38, %v1259_v59  ;;  %v998_v60 = vsel %vm365_vm1, %v996_v39, %v997_v18  ;;  %v1030_v57 = vadd.f32 %v997_v18, %v938_v50  ;;  %v1222_v19 = vmul.f32 %v3200_v21, %v3088_v35  ;;  %v152_v18 = vld [vmem:[%s2725_s20 + $0x40] sm:$0xf] }
  0xd8   : > { %v1388_v25 = vadd.f32 %v1354_v61, %v1296_v23  ;;  %v1029_v49 = vadd.f32 %v998_v60, %v937_v2  ;;  %v1176_v16 = vrot.slane %v1137_v45, 2  ;;  %v1177_v44 = vrot.slane %v1138_v9, 2 }
  0xd9   : > { %v1387_v37 = vadd.f32 %v1355_v20, %v1295_v1  ;;  %v1082_v34 = vadd.f32 %v1058_v30, %v1030_v57  ;;  %v1238_v41 = vrot.slane %v1222_v19, 4  ;;  %v1282_v62 = vmul.f32 %v3206_v31, %v3499_v48 }
  0xda   : > { %v1440_v55 = vadd.f32 %v1417_v46, %v1388_v25  ;;  %v1081_v54 = vadd.f32 %v1058_v30, %v1029_v49  ;;  %v1178_v38 = vsel %vm365_vm1, %v1176_v16, %v1177_v44  ;;  %v1317_v35 = vmul.f32 %v3209_v8, %v3505_v0 }
  0xdb   : > { %v1439_v22 = vadd.f32 %v1417_v46, %v1387_v37  ;;  %v1118_v63 = vadd.f32 %v1102_v13, %v1082_v34  ;;  %v1318_v21 = vmul.f32 %v3209_v8, %v3499_v48  ;;  %v1402_v42 = vmul.f32 %v3212_v17, %v3499_v48  ;;  %v211_v8 = vld [vmem:[%s4334_s1 + $0x1c] sm:$0x7]  ;;  %v150_v17 = vld [vmem:[%s2725_s20 + $0x30] sm:$0xff] }
  0xdc   : > { %v1479_v53 = vrot.slane %v1440_v55, 4  ;;  %v1117_v2 = vadd.f32 %v1101_v28, %v1081_v54  ;;  %v3520_v61 = vrot.slane %v210_v27, %v2716_v5  ;;  %v1356_v43 = vrot.slane %v1317_v35, 2  ;;  %v212_v54 = vld [vmem:[%s4334_s1 + $0x20] sm:$0x7] }
  0xdd   : > { %v1478_v46 = vrot.slane %v1439_v22, 4  ;;  %v1210_v50 = vadd.f32 %v1177_v44, %v1118_v63  ;;  %v1357_v24 = vrot.slane %v1318_v21, 2  ;;  %v1281_v15 = vmul.f32 %v3206_v31, %v3505_v0  ;;  %v176_v35 = vld [vmem:[%s2725_s20 + $0x100] sm:$0xf] }
  0xde   : > { %v1209_v11 = vadd.f32 %v1178_v38, %v1117_v2  ;;  %v1418_v20 = vrot.slane %v1402_v42, 4  ;;  %v1505_v56 = vmul.f32 %v3520_v61, %v151_v51  ;;  %v3534_v13 = vrot.slane %v210_v27, %v2718_v6  ;;  %v3570_v42 = vld [vmem:[%s2725_s20 + $0xa0] sm:$0xf] }
  0xdf   : > { %v1480_v28 = vsel %vm1459_vm3, %v1478_v46, %v1479_v53  ;;  %v1262_v59 = vadd.f32 %v1238_v41, %v1210_v50  ;;  %v1358_v39 = vsel %vm365_vm1, %v1356_v43, %v1357_v24  ;;  %v3538_v30 = vrot.slane %v210_v27, %v2720_v7  ;;  %4357 = vst [vmem:[#allocation2_spill] sm:$0xff] %v3570_v42 }
  0xe0   : > { %1498 = vst [vmem:[%s2843_s24 + $0xc8] sm:$0xff] %v1480_v28  ;;  %v1261_v23 = vadd.f32 %v1238_v41, %v1209_v11  ;;  %v3541_v31 = vrot.slane %v211_v8, %v2716_v5  ;;  %v3544_v45 = vrot.slane %v211_v8, %v2718_v6  ;;  %v1524_v1 = vmul.f32 %v3534_v13, %v150_v17 }
  0xe1   : > { %v1298_v9 = vadd.f32 %v1282_v62, %v1262_v59  ;;  %v1525_v60 = vmul.f32 %v3534_v13, %v151_v51  ;;  %v3549_v57 = vrot.slane %v211_v8, %v2720_v7  ;;  %v1504_v25 = vmul.f32 %v3520_v61, %v150_v17 }
  0xe2   : > { %v1297_v19 = vadd.f32 %v1281_v15, %v1261_v23  ;;  %v1616_v49 = vmul.f32 %v3538_v30, %v151_v51  ;;  %v1617_v16 = vmul.f32 %v3538_v30, %v152_v18  ;;  %v1556_v37 = vrot.slane %v1524_v1, 4  ;;  %v3593_v23 = vld [vmem:[%s4334_s1 + $0x28] sm:$0x7] }
  0xe3   : > { %v1390_v44 = vadd.f32 %v1357_v24, %v1298_v9  ;;  %v1557_v34 = vrot.slane %v1525_v60, 4  ;;  %v1652_v41 = vmul.f32 %v3270_v12, %v3541_v31  ;;  %v1653_v38 = vmul.f32 %v3275_v26, %v3541_v31 }
  0xe4   : > { %v1389_v55 = vadd.f32 %v1358_v39, %v1297_v19  ;;  %v1688_v62 = vmul.f32 %v3270_v12, %v3544_v45  ;;  %v1689_v22 = vmul.f32 %v3275_v26, %v3544_v45  ;;  %v1780_v53 = vmul.f32 %v3275_v26, %v3549_v57  ;;  %v3600_v19 = vld [vmem:[%s2725_s20 + $0x48] sm:$0xff] }
  0xe5   : > { %v1442_v63 = vadd.f32 %v1418_v20, %v1390_v44  ;;  %v1558_v21 = vsel %vm1459_vm3, %v1556_v37, %v1557_v34  ;;  %v1597_v27 = vadd.f32 %v1557_v34, %v1505_v56  ;;  %v1781_v12 = vmul.f32 %v3549_v57, %v3570_v42  ;;  %4358 = vst [vmem:[#allocation3_spill] sm:$0xff] %v3600_v19  ;;  %v3612_v37 = vld [vmem:[%s2725_s20 + $0x50] sm:$0xff] }
  0xe6   : > { %v1441_v2 = vadd.f32 %v1418_v20, %v1389_v55  ;;  %v1596_v46 = vadd.f32 %v1558_v21, %v1504_v25  ;;  %v1720_v50 = vrot.slane %v1688_v62, 4  ;;  %v1721_v43 = vrot.slane %v1689_v22, 4  ;;  %4359 = vst [vmem:[#allocation4_spill] sm:$0xff] %v3612_v37  ;;  %v3619_v22 = vld [vmem:[%s2725_s20 + $0x58] sm:$0xf] }
  0xe7   : > { %v1482_v24 = vrot.slane %v1442_v63, 4  ;;  %v1633_v51 = vadd.f32 %v1617_v16, %v1597_v27  ;;  %v3575_v8 = vrot.slane %v212_v54, %v2716_v5  ;;  %v3578_v17 = vmul.f32 %v3549_v57, %v176_v35  ;;  %4361 = vst [vmem:[#allocation6_spill] sm:$0xff] %v3619_v22 }
  0xe8   : > { %v1481_v11 = vrot.slane %v1441_v2, 4  ;;  %v1632_v15 = vadd.f32 %v1616_v49, %v1596_v46  ;;  %v3581_v20 = vrot.slane %v212_v54, %v2718_v6  ;;  %v1722_v28 = vsel %vm1459_vm3, %v1720_v50, %v1721_v43 }
  0xe9   : > { %v1669_v56 = vadd.f32 %v1653_v38, %v1633_v51  ;;  %v1816_v59 = vmul.f32 %v3431_v32, %v3575_v8  ;;  %v3587_v39 = vrot.slane %v212_v54, %v2720_v7  ;;  %v1817_v49 = vmul.f32 %v3436_v52, %v3575_v8 }
  0xea   : > { %v1483_v18 = vsel %vm1459_vm3, %v1481_v11, %v1482_v24  ;;  %v1668_v9 = vadd.f32 %v1652_v41, %v1632_v15  ;;  %v1852_v1 = vmul.f32 %v3431_v32, %v3581_v20  ;;  %v1853_v60 = vmul.f32 %v3436_v52, %v3581_v20 }
  0xeb   : > { %1499 = vst [vmem:[%s2843_s24 + $0xe8] sm:$0xff] %v1483_v18  ;;  %v1761_v25 = vadd.f32 %v1721_v43, %v1669_v56  ;;  %v1944_v16 = vmul.f32 %v3436_v52, %v3587_v39  ;;  %v3609_v44 = vrot.slane %v3593_v23, %v2720_v7  ;;  %v1945_v54 = vmul.f32 %v3587_v39, %v176_v35 }
  0xec   : > { %v1760_v34 = vadd.f32 %v1722_v28, %v1668_v9  ;;  %v1884_v41 = vrot.slane %v1852_v1, 4  ;;  %v1885_v55 = vrot.slane %v1853_v60, 4  ;;  %v1506_v63 = vmul.f32 %v3520_v61, %v3600_v19  ;;  %v179_v28 = vld [vmem:[%s2725_s20 + $0x118] sm:$0xf] }
  0xed   : > { %v1797_v38 = vadd.f32 %v1781_v12, %v1761_v25  ;;  %v3616_v62 = vmul.f32 %v3609_v44, %v176_v35  ;;  %v1526_v21 = vmul.f32 %v3534_v13, %v3600_v19  ;;  %v1507_v46 = vmul.f32 %v3520_v61, %v3612_v37 }
  0xee   : > { %v1796_v27 = vadd.f32 %v1780_v53, %v1760_v34  ;;  %v1886_v2 = vsel %vm1459_vm3, %v1884_v41, %v1885_v55  ;;  %v1527_v50 = vmul.f32 %v3534_v13, %v3612_v37  ;;  %v1618_v51 = vmul.f32 %v3538_v30, %v3612_v37  ;;  %v3648_v41 = vld [vmem:[%s2725_s20 + $0xb8] sm:$0xf] }
  0xef   : > { %4360 = vst [vmem:[#allocation5_spill] sm:$0xff] %v3616_v62  ;;  %v1833_v35 = vadd.f32 %v1817_v49, %v1797_v38  ;;  %v1559_v24 = vrot.slane %v1526_v21, 4  ;;  %v1619_v53 = vmul.f32 %v3538_v30, %v3619_v22  ;;  %v1654_v15 = vmul.f32 %v3311_v36, %v3541_v31  ;;  %v3781_v37 = vld [vmem:[%s2725_s20 + $0x138] sm:$0xff] }
  0xf0   : > { %v1832_v12 = vadd.f32 %v1816_v59, %v1796_v27  ;;  %v1560_v11 = vrot.slane %v1527_v50, 4  ;;  %v1655_v18 = vmul.f32 %v3254_v33, %v3541_v31  ;;  %v1690_v9 = vmul.f32 %v3311_v36, %v3544_v45 }
  0xf1   : > { %v1925_v56 = vadd.f32 %v1885_v55, %v1833_v35  ;;  %v1691_v1 = vmul.f32 %v3254_v33, %v3544_v45  ;;  %v1782_v49 = vmul.f32 %v3254_v33, %v3549_v57  ;;  %v1783_v36 = vmul.f32 %v3549_v57, %v3648_v41 }
  0xf2   : > { %v1924_v60 = vadd.f32 %v1886_v2, %v1832_v12  ;;  %v1561_v59 = vsel %vm1459_vm3, %v1559_v24, %v1560_v11  ;;  %v1599_v25 = vadd.f32 %v1560_v11, %v1507_v46  ;;  %v1723_v38 = vrot.slane %v1690_v9, 4 }
  0xf3   : > { %v1961_v34 = vadd.f32 %v1945_v54, %v1925_v56  ;;  %v1598_v55 = vadd.f32 %v1561_v59, %v1506_v63  ;;  %v1724_v21 = vrot.slane %v1691_v1, 4  ;;  %v3653_v35 = vmul.f32 %v3549_v57, %v179_v28  ;;  %v3669_v59 = vld [vmem:[%s2725_s20 + $0x70] sm:$0xf] }
  0xf4   : > { %v1960_v27 = vadd.f32 %v1944_v16, %v1924_v60  ;;  %v1635_v50 = vadd.f32 %v1619_v53, %v1599_v25  ;;  %v1818_v54 = vmul.f32 %v3472_v47, %v3575_v8  ;;  %v1854_v16 = vmul.f32 %v3472_v47, %v3581_v20  ;;  %4362 = vst [vmem:[#allocation7_spill] sm:$0xff] %v3669_v59  ;;  %v3672_v25 = vld [vmem:[%s2725_s20 + $0xd0] sm:$0xf] }
  0xf5   : > { %v1993_v2 = vrot.slane %v1961_v34, 2  ;;  %v1634_v46 = vadd.f32 %v1618_v51, %v1598_v55  ;;  %v1725_v33 = vsel %vm1459_vm3, %v1723_v38, %v1724_v21  ;;  %v1855_v12 = vmul.f32 %v3477_v3, %v3581_v20  ;;  %4363 = vst [vmem:[#allocation8_spill] sm:$0xff] %v3672_v25  ;;  %v3679_v55 = vld [vmem:[%s2725_s20 + $0x60] sm:$0xff] }
  0xf6   : > { %v1992_v63 = vrot.slane %v1960_v27, 2  ;;  %v1671_v24 = vadd.f32 %v1655_v18, %v1635_v50  ;;  %v1819_v51 = vmul.f32 %v3477_v3, %v3575_v8  ;;  %v1946_v53 = vmul.f32 %v3477_v3, %v3587_v39  ;;  %4365 = vst [vmem:[#allocation10_spill] sm:$0xff] %v3679_v55  ;;  %v3684_v27 = vld [vmem:[%s2725_s20 + $0x68] sm:$0xff] }
  0xf7   : > { %v1670_v11 = vadd.f32 %v1654_v15, %v1634_v46  ;;  %v1947_v56 = vmul.f32 %v3587_v39, %v179_v28  ;;  %v1887_v1 = vrot.slane %v1854_v16, 4  ;;  %v1888_v60 = vrot.slane %v1855_v12, 4  ;;  %4366 = vst [vmem:[#allocation11_spill] sm:$0xff] %v3684_v27 }
  0xf8   : > { %v1994_v9 = vsel %vm365_vm1, %v1992_v63, %v1993_v2  ;;  %v1763_v18 = vadd.f32 %v1724_v21, %v1671_v24  ;;  %v3676_v15 = vmul.f32 %v3609_v44, %v179_v28  ;;  %v1508_v38 = vmul.f32 %v3679_v55, %v3520_v61 }
  0xf9   : > { %2024 = vst [vmem:[%s2843_s24 + $0x10] sm:$0xff] %v1994_v9  ;;  %v1762_v34 = vadd.f32 %v1725_v33, %v1670_v11  ;;  %v1509_v21 = vmul.f32 %v3684_v27, %v3520_v61  ;;  %v1889_v2 = vsel %vm1459_vm3, %v1887_v1, %v1888_v60  ;;  %v1528_v46 = vmul.f32 %v3679_v55, %v3534_v13  ;;  %v3715_v55 = vld [vmem:[%s2725_s20 + $0x120] sm:$0xff] }
  0xfa   : > { %4364 = vst [vmem:[#allocation9_spill] sm:$0xff] %v3676_v15  ;;  %v1799_v50 = vadd.f32 %v1783_v36, %v1763_v18  ;;  %v1529_v28 = vmul.f32 %v3684_v27, %v3534_v13  ;;  %v1620_v63 = vmul.f32 %v3684_v27, %v3538_v30  ;;  %v1621_v24 = vmul.f32 %v3538_v30, %v3669_v59 }
  0xfb   : > { %v1798_v33 = vadd.f32 %v1782_v49, %v1762_v34  ;;  %v3699_v16 = vmul.f32 %v3538_v30, %v3672_v25  ;;  %v1562_v12 = vrot.slane %v1528_v46, 4  ;;  %v1656_v9 = vmul.f32 %v3349_v40, %v3541_v31 }
  0xfc   : > { %v1835_v36 = vadd.f32 %v1819_v51, %v1799_v50  ;;  %v1563_v11 = vrot.slane %v1529_v28, 4  ;;  %v1657_v49 = vmul.f32 %v3354_v4, %v3541_v31  ;;  %v1692_v1 = vmul.f32 %v3349_v40, %v3544_v45 }
  0xfd   : > { %v1834_v18 = vadd.f32 %v1818_v54, %v1798_v33  ;;  %v1693_v34 = vmul.f32 %v3354_v4, %v3544_v45  ;;  %v1784_v46 = vmul.f32 %v3354_v4, %v3549_v57  ;;  %v1785_v40 = vmul.f32 %v3549_v57, %v3672_v25  ;;  %v3786_v25 = vld [vmem:[%s2725_s20 + $0x140] sm:$0xff] }
  0xfe   : > { %v1927_v43 = vadd.f32 %v1888_v60, %v1835_v36  ;;  %v1564_v51 = vsel %vm1459_vm3, %v1562_v12, %v1563_v11  ;;  %v1601_v50 = vadd.f32 %v1563_v11, %v1509_v21  ;;  %v1726_v33 = vrot.slane %v1692_v1, 4 }
  0xff   : > { %v1926_v28 = vadd.f32 %v1889_v2, %v1834_v18  ;;  %v1600_v54 = vadd.f32 %v1564_v51, %v1508_v38  ;;  %v1727_v62 = vrot.slane %v1693_v34, 4  ;;  %v1820_v60 = vmul.f32 %v3715_v55, %v3575_v8  ;;  %v3721_v2 = vld [vmem:[%s2725_s20 + $0x128] sm:$0xff]  ;;  %v3726_v38 = vld [vmem:[%s2725_s20 + $0x130] sm:$0xf] }
 0x100   : > { %v1963_v59 = vadd.f32 %v1947_v56, %v1927_v43  ;;  %v1637_v27 = vadd.f32 %v1621_v24, %v1601_v50  ;;  %v1821_v43 = vmul.f32 %v3721_v2, %v3575_v8  ;;  %v1856_v11 = vmul.f32 %v3715_v55, %v3581_v20  ;;  %v3740_v50 = vld [vmem:[%s2725_s20 + $0xe8] sm:$0xf] }
 0x101   : > { %v1962_v36 = vadd.f32 %v1946_v53, %v1926_v28  ;;  %v1636_v21 = vadd.f32 %v1620_v63, %v1600_v54  ;;  %v1728_v12 = vsel %vm1459_vm3, %v1726_v33, %v1727_v62  ;;  %v1857_v53 = vmul.f32 %v3721_v2, %v3581_v20  ;;  %4368 = vst [vmem:[#allocation13_spill] sm:$0xff] %v3740_v50 }
 0x102   : > { %v1996_v56 = vrot.slane %v1963_v59, 2  ;;  %v1673_v24 = vadd.f32 %v1657_v49, %v1637_v27  ;;  %v1948_v1 = vmul.f32 %v3721_v2, %v3587_v39  ;;  %v1949_v59 = vmul.f32 %v3587_v39, %v3726_v38  ;;  %v3737_v49 = vld [vmem:[%s2725_s20 + $0x88] sm:$0xf] }
 0x103   : > { %v1995_v63 = vrot.slane %v1962_v36, 2  ;;  %v1672_v18 = vadd.f32 %v1656_v9, %v1636_v21  ;;  %v1890_v51 = vrot.slane %v1856_v11, 4  ;;  %v1891_v27 = vrot.slane %v1857_v53, 4  ;;  %4367 = vst [vmem:[#allocation12_spill] sm:$0xff] %v3737_v49  ;;  %v3748_v36 = vld [vmem:[%s2725_s20 + $0x78] sm:$0xff]  ;;  %v3755_v11 = vld [vmem:[%s2725_s20 + $0x80] sm:$0xff] }
 0x104   : > { %v1765_v34 = vadd.f32 %v1727_v62, %v1673_v24  ;;  %v1510_v28 = vmul.f32 %v3228_v10, %v3520_v61  ;;  %v1511_v33 = vmul.f32 %v3233_v58, %v3520_v61  ;;  %4369 = vst [vmem:[#allocation14_spill] sm:$0xff] %v3748_v36  ;;  %v1530_v62 = vmul.f32 %v3748_v36, %v3534_v13 }
 0x105   : > { %v1997_v54 = vsel %vm365_vm1, %v1995_v63, %v1996_v56  ;;  %v1764_v9 = vadd.f32 %v1728_v12, %v1672_v18  ;;  %v1892_v24 = vsel %vm1459_vm3, %v1890_v51, %v1891_v27  ;;  %4370 = vst [vmem:[#allocation15_spill] sm:$0xff] %v3755_v11  ;;  %v1531_v10 = vmul.f32 %v3755_v11, %v3534_v13 }
 0x106   : > { %2025 = vst [vmem:[%s2843_s24 + $0x30] sm:$0xff] %v1997_v54  ;;  %v1801_v21 = vadd.f32 %v1785_v40, %v1765_v34  ;;  %v1622_v12 = vmul.f32 %v3755_v11, %v3538_v30  ;;  %v1565_v53 = vrot.slane %v1530_v62, 4  ;;  %v1623_v58 = vmul.f32 %v3538_v30, %v3737_v49 }
 0x107   : > { %v1800_v56 = vadd.f32 %v1784_v46, %v1764_v9  ;;  %v3765_v63 = vmul.f32 %v3538_v30, %v3740_v50  ;;  %v1566_v18 = vrot.slane %v1531_v10, 4  ;;  %v1658_v34 = vmul.f32 %v3390_v14, %v3541_v31 }
 0x108   : > { %v1837_v40 = vadd.f32 %v1821_v43, %v1801_v21  ;;  %v1659_v51 = vmul.f32 %v3395_v29, %v3541_v31  ;;  %v1694_v46 = vmul.f32 %v3390_v14, %v3544_v45  ;;  %v1695_v9 = vmul.f32 %v3395_v29, %v3544_v45 }
 0x109   : > { %v1836_v54 = vadd.f32 %v1820_v60, %v1800_v56  ;;  %v1786_v62 = vmul.f32 %v3395_v29, %v3549_v57  ;;  %v1567_v21 = vsel %vm1459_vm3, %v1565_v53, %v1566_v18  ;;  %v1603_v10 = vadd.f32 %v1566_v18, %v1511_v33 }
 0x10a   : > { %v1929_v43 = vadd.f32 %v1891_v27, %v1837_v40  ;;  %v1787_v49 = vmul.f32 %v3549_v57, %v3740_v50  ;;  %v1602_v60 = vadd.f32 %v1567_v21, %v1510_v28  ;;  %v1729_v56 = vrot.slane %v1694_v46, 4  ;;  %v3835_v50 = vld [vmem:[%s2725_s20 + $0x160] sm:$0xf] }
 0x10b   : > { %v1928_v11 = vadd.f32 %v1892_v24, %v1836_v54  ;;  %v1730_v36 = vrot.slane %v1695_v9, 4  ;;  %v1639_v14 = vadd.f32 %v1623_v58, %v1603_v10  ;;  %v1822_v19 = vmul.f32 %v3781_v37, %v3575_v8  ;;  %v3794_v58 = vld [vmem:[%s2725_s20 + $0x148] sm:$0xf]  ;;  %4371 = vst [vmem:[#allocation16_spill] sm:$0xff] %v3835_v50 }
 0x10c   : > { %v1965_v22 = vadd.f32 %v1949_v59, %v1929_v43  ;;  %v1823_v27 = vmul.f32 %v3786_v25, %v3575_v8  ;;  %v1638_v53 = vadd.f32 %v1622_v12, %v1602_v60  ;;  %v1858_v28 = vmul.f32 %v3781_v37, %v3581_v20 }
 0x10d   : > { %v1964_v33 = vadd.f32 %v1948_v1, %v1928_v11  ;;  %v1731_v24 = vsel %vm1459_vm3, %v1729_v56, %v1730_v36  ;;  %v1675_v40 = vadd.f32 %v1659_v51, %v1639_v14  ;;  %v1859_v18 = vmul.f32 %v3786_v25, %v3581_v20  ;;  %v3813_v56 = vld [vmem:[%s2725_s20 + $0x98] sm:$0xff] }
 0x10e   : > { %v1999_v59 = vrot.slane %v1965_v22, 2  ;;  %v1950_v54 = vmul.f32 %v3786_v25, %v3587_v39  ;;  %v1674_v1 = vadd.f32 %v1658_v34, %v1638_v53  ;;  %v1893_v11 = vrot.slane %v1858_v28, 4  ;;  %v3803_v22 = vld [vmem:[%s2725_s20 + $0x90] sm:$0xff] }
 0x10f   : > { %v1998_v46 = vrot.slane %v1964_v33, 2  ;;  %v1951_v12 = vmul.f32 %v3587_v39, %v3794_v58  ;;  %v1767_v9 = vadd.f32 %v1730_v36, %v1675_v40  ;;  %v1894_v43 = vrot.slane %v1859_v18, 4 }
 0x110   : > { %v1512_v51 = vmul.f32 %v3803_v22, %v3520_v61  ;;  %v1513_v21 = vmul.f32 %v3275_v26, %v3520_v61  ;;  %v1766_v60 = vadd.f32 %v1731_v24, %v1674_v1  ;;  %v1532_v34 = vmul.f32 %v3803_v22, %v3534_v13 }
 0x111   : > { %v2000_v10 = vsel %vm365_vm1, %v1998_v46, %v1999_v59  ;;  %v1533_v36 = vmul.f32 %v3813_v56, %v3534_v13  ;;  %v1803_v14 = vadd.f32 %v1787_v49, %v1767_v9  ;;  %v1895_v33 = vsel %vm1459_vm3, %v1893_v11, %v1894_v43 }
 0x112   : > { %2026 = vst [vmem:[%s2843_s24 + $0x50] sm:$0xff] %v2000_v10  ;;  %v1624_v53 = vmul.f32 %v3813_v56, %v3538_v30  ;;  %v1625_v26 = vmul.f32 %v3538_v30, %v3570_v42  ;;  %v1802_v28 = vadd.f32 %v1786_v62, %v1766_v60  ;;  %v1568_v24 = vrot.slane %v1532_v34, 4  ;;  %v3838_v42 = vld [vmem:[%s2725_s20 + $0x150] sm:$0xff] }
 0x113   : > { %v1569_v59 = vrot.slane %v1533_v36, 4  ;;  %v1660_v40 = vmul.f32 %v3431_v32, %v3541_v31  ;;  %v1839_v18 = vadd.f32 %v1823_v27, %v1803_v14  ;;  %v1661_v49 = vmul.f32 %v3436_v52, %v3541_v31 }
 0x114   : > { %v1696_v46 = vmul.f32 %v3431_v32, %v3544_v45  ;;  %v1697_v1 = vmul.f32 %v3436_v52, %v3544_v45  ;;  %v1838_v11 = vadd.f32 %v1822_v19, %v1802_v28  ;;  %v1788_v10 = vmul.f32 %v3436_v52, %v3549_v57  ;;  %v3843_v19 = vld [vmem:[%s2725_s20 + $0x158] sm:$0xff] }
 0x115   : > { %v1570_v62 = vsel %vm1459_vm3, %v1568_v24, %v1569_v59  ;;  %v1605_v9 = vadd.f32 %v1569_v59, %v1513_v21  ;;  %v1931_v60 = vadd.f32 %v1894_v43, %v1839_v18  ;;  %v1824_v32 = vmul.f32 %v3838_v42, %v3575_v8 }
 0x116   : > { %v1604_v34 = vadd.f32 %v1570_v62, %v1512_v51  ;;  %v1732_v27 = vrot.slane %v1696_v46, 4  ;;  %v1733_v36 = vrot.slane %v1697_v1, 4  ;;  %v1930_v14 = vadd.f32 %v1895_v33, %v1838_v11 }
 0x117   : > { %v1641_v15 = vadd.f32 %v1625_v26, %v1605_v9  ;;  %v1825_v21 = vmul.f32 %v3843_v19, %v3575_v8  ;;  %v1967_v52 = vadd.f32 %v1951_v12, %v1931_v60  ;;  %v1860_v33 = vmul.f32 %v3838_v42, %v3581_v20  ;;  %v3857_v9 = vld [vmem:[%s2725_s20 + $0xa8] sm:$0xff] }
 0x118   : > { %v1640_v43 = vadd.f32 %v1624_v53, %v1604_v34  ;;  %v1734_v51 = vsel %vm1459_vm3, %v1732_v27, %v1733_v36  ;;  %v1966_v26 = vadd.f32 %v1950_v54, %v1930_v14  ;;  %v1861_v24 = vmul.f32 %v3843_v19, %v3581_v20 }
 0x119   : > { %v1677_v28 = vadd.f32 %v1661_v49, %v1641_v15  ;;  %v1952_v59 = vmul.f32 %v3843_v19, %v3587_v39  ;;  %v2002_v18 = vrot.slane %v1967_v52, 2  ;;  %v1896_v1 = vrot.slane %v1860_v33, 4  ;;  %v3862_v49 = vld [vmem:[%s2725_s20 + $0xb0] sm:$0xff] }
 0x11a   : > { %v1676_v46 = vadd.f32 %v1660_v40, %v1640_v43  ;;  %v1953_v12 = vmul.f32 %v3587_v39, %v3835_v50  ;;  %v2001_v53 = vrot.slane %v1966_v26, 2  ;;  %v1897_v62 = vrot.slane %v1861_v24, 4 }
 0x11b   : > { %v1769_v11 = vadd.f32 %v1733_v36, %v1677_v28  ;;  %v1514_v15 = vmul.f32 %v3857_v9, %v3520_v61  ;;  %v1515_v60 = vmul.f32 %v3862_v49, %v3520_v61  ;;  %v1534_v40 = vmul.f32 %v3857_v9, %v3534_v13 }
 0x11c   : > { %v1768_v54 = vadd.f32 %v1734_v51, %v1676_v46  ;;  %v1535_v34 = vmul.f32 %v3862_v49, %v3534_v13  ;;  %v2003_v27 = vsel %vm365_vm1, %v2001_v53, %v2002_v18  ;;  %v1898_v14 = vsel %vm1459_vm3, %v1896_v1, %v1897_v62 }
 0x11d   : > { %v1805_v36 = vadd.f32 %v3578_v17, %v1769_v11  ;;  %v1626_v52 = vmul.f32 %v3862_v49, %v3538_v30  ;;  %2027 = vst [vmem:[%s2843_s24 + $0x70] sm:$0xff] %v2003_v27  ;;  %v1571_v51 = vrot.slane %v1534_v40, 4  ;;  %v1627_v26 = vmul.f32 %v3538_v30, %v3648_v41 }
 0x11e   : > { %v1804_v43 = vadd.f32 %v1788_v10, %v1768_v54  ;;  %v1572_v33 = vrot.slane %v1535_v34, 4  ;;  %v1662_v24 = vmul.f32 %v3472_v47, %v3541_v31  ;;  %v1663_v17 = vmul.f32 %v3477_v3, %v3541_v31 }
 0x11f   : > { %v1841_v28 = vadd.f32 %v1825_v21, %v1805_v36  ;;  %v1698_v18 = vmul.f32 %v3472_v47, %v3544_v45  ;;  %v1699_v53 = vmul.f32 %v3477_v3, %v3544_v45  ;;  %v1790_v40 = vmul.f32 %v3477_v3, %v3549_v57 }
 0x120   : > { %v1840_v46 = vadd.f32 %v1824_v32, %v1804_v43  ;;  %v1573_v1 = vsel %vm1459_vm3, %v1571_v51, %v1572_v33  ;;  %v1607_v10 = vadd.f32 %v1572_v33, %v1515_v60  ;;  %v1826_v50 = vmul.f32 %v3575_v8, %v3505_v0  ;;  %v3892_v32 = vld [vmem:[%s2725_s20 + $0x178] sm:$0xf] }
 0x121   : > { %v1933_v11 = vadd.f32 %v1897_v62, %v1841_v28  ;;  %v1606_v54 = vadd.f32 %v1573_v1, %v1514_v15  ;;  %v1735_v21 = vrot.slane %v1698_v18, 4  ;;  %v1736_v36 = vrot.slane %v1699_v53, 4 }
 0x122   : > { %v1932_v34 = vadd.f32 %v1898_v14, %v1840_v46  ;;  %v1643_v27 = vadd.f32 %v1627_v26, %v1607_v10  ;;  %v1827_v60 = vmul.f32 %v3575_v8, %v3499_v48  ;;  %v1862_v62 = vmul.f32 %v3581_v20, %v3505_v0 }
 0x123   : > { %v1969_v47 = vadd.f32 %v1953_v12, %v1933_v11  ;;  %v1642_v43 = vadd.f32 %v1626_v52, %v1606_v54  ;;  %v1737_v3 = vsel %vm1459_vm3, %v1735_v21, %v1736_v36  ;;  %v1863_v14 = vmul.f32 %v3581_v20, %v3499_v48  ;;  %v3918_v54 = vld [vmem:[%s2725_s20 + $0xc8] sm:$0xff] }
 0x124   : > { %v1968_v15 = vadd.f32 %v1952_v59, %v1932_v34  ;;  %v1679_v51 = vadd.f32 %v1663_v17, %v1643_v27  ;;  %v1899_v26 = vrot.slane %v1862_v62, 4  ;;  %v1954_v52 = vmul.f32 %v3587_v39, %v3499_v48  ;;  %v3906_v17 = vld [vmem:[%s2725_s20 + $0xc0] sm:$0xff] }
 0x125   : > { %v2005_v33 = vrot.slane %v1969_v47, 2  ;;  %v1678_v12 = vadd.f32 %v1662_v24, %v1642_v43  ;;  %v1900_v46 = vrot.slane %v1863_v14, 4  ;;  %v1955_v0 = vmul.f32 %v3587_v39, %v3892_v32  ;;  %v3928_v43 = vld [vmem:[%s2725_s20 + $0x180] sm:$0xff] }
 0x126   : > { %v2004_v28 = vrot.slane %v1968_v15, 2  ;;  %v1771_v18 = vadd.f32 %v1736_v36, %v1679_v51  ;;  %v1516_v1 = vmul.f32 %v3906_v17, %v3520_v61  ;;  %v1517_v24 = vmul.f32 %v3354_v4, %v3520_v61 }
 0x127   : > { %v1770_v59 = vadd.f32 %v1737_v3, %v1678_v12  ;;  %v1536_v10 = vmul.f32 %v3906_v17, %v3534_v13  ;;  %v1901_v11 = vsel %vm1459_vm3, %v1899_v26, %v1900_v46  ;;  %v1537_v21 = vmul.f32 %v3918_v54, %v3534_v13 }
 0x128   : > { %v2006_v48 = vsel %vm365_vm1, %v2004_v28, %v2005_v33  ;;  %v1807_v53 = vadd.f32 %v3653_v35, %v1771_v18  ;;  %v1628_v4 = vmul.f32 %v3918_v54, %v3538_v30  ;;  %v1664_v36 = vmul.f32 %v3715_v55, %v3541_v31 }
 0x129   : > { %2028 = vst [vmem:[%s2843_s24 + $0x90] sm:$0xff] %v2006_v48  ;;  %v1806_v34 = vadd.f32 %v1790_v40, %v1770_v59  ;;  %v1574_v27 = vrot.slane %v1536_v10, 4  ;;  %v1575_v35 = vrot.slane %v1537_v21, 4  ;;  %v1665_v62 = vmul.f32 %v3721_v2, %v3541_v31  ;;  %v3935_v40 = vld [vmem:[%s2725_s20 + $0x188] sm:$0xff] }
 0x12a   : > { %v1843_v47 = vadd.f32 %v1827_v60, %v1807_v53  ;;  %v1700_v15 = vmul.f32 %v3715_v55, %v3544_v45  ;;  %v1701_v3 = vmul.f32 %v3721_v2, %v3544_v45  ;;  %v1792_v14 = vmul.f32 %v3721_v2, %v3549_v57  ;;  %v3947_v53 = vld [vmem:[%s2725_s20 + $0x190] sm:$0xf] }
 0x12b   : > { %v1842_v51 = vadd.f32 %v1826_v50, %v1806_v34  ;;  %v1793_v60 = vmul.f32 %v3549_v57, %v3726_v38  ;;  %v1576_v12 = vsel %vm1459_vm3, %v1574_v27, %v1575_v35  ;;  %v1609_v26 = vadd.f32 %v1575_v35, %v1517_v24 }
 0x12c   : > { %v1935_v33 = vadd.f32 %v1900_v46, %v1843_v47  ;;  %v1738_v28 = vrot.slane %v1700_v15, 4  ;;  %v1608_v59 = vadd.f32 %v1576_v12, %v1516_v1  ;;  %v1739_v10 = vrot.slane %v1701_v3, 4 }
 0x12d   : > { %v1934_v18 = vadd.f32 %v1901_v11, %v1842_v51  ;;  %v1828_v50 = vmul.f32 %v3575_v8, %v3928_v43  ;;  %v1645_v21 = vadd.f32 %v3699_v16, %v1609_v26  ;;  %v1829_v34 = vmul.f32 %v3575_v8, %v3935_v40 }
 0x12e   : > { %v1971_v48 = vadd.f32 %v1955_v0, %v1935_v33  ;;  %v1864_v46 = vmul.f32 %v3581_v20, %v3928_v43  ;;  %v1644_v27 = vadd.f32 %v1628_v4, %v1608_v59  ;;  %v1740_v1 = vsel %vm1459_vm3, %v1738_v28, %v1739_v10  ;;  %v3962_v33 = vld [vmem:[%s2725_s20 + $0xd8] sm:$0xff]  ;;  %v3973_v59 = vld [vmem:[%s2725_s20 + $0xe0] sm:$0xff] }
 0x12f   : > { %v1970_v24 = vadd.f32 %v1954_v52, %v1934_v18  ;;  %v1865_v11 = vmul.f32 %v3581_v20, %v3935_v40  ;;  %v1681_v0 = vadd.f32 %v1665_v62, %v1645_v21  ;;  %v1956_v16 = vmul.f32 %v3587_v39, %v3935_v40 }
 0x130   : > { %v2008_v47 = vrot.slane %v1971_v48, 2  ;;  %v1902_v35 = vrot.slane %v1864_v46, 4  ;;  %v1680_v51 = vadd.f32 %v1664_v36, %v1644_v27  ;;  %v1957_v52 = vmul.f32 %v3587_v39, %v3947_v53 }
 0x131   : > { %v2007_v15 = vrot.slane %v1970_v24, 2  ;;  %v1903_v3 = vrot.slane %v1865_v11, 4  ;;  %v1773_v4 = vadd.f32 %v1739_v10, %v1681_v0  ;;  %v1518_v12 = vmul.f32 %v3962_v33, %v3520_v61  ;;  %v3983_v24 = vld [vmem:[%s2725_s20 + $0x198] sm:$0xff] }
 0x132   : > { %v1519_v62 = vmul.f32 %v3395_v29, %v3520_v61  ;;  %v1538_v26 = vmul.f32 %v3962_v33, %v3534_v13  ;;  %v1772_v36 = vadd.f32 %v1740_v1, %v1680_v51  ;;  %v1539_v10 = vmul.f32 %v3973_v59, %v3534_v13 }
 0x133   : > { %v2009_v28 = vsel %vm365_vm1, %v2007_v15, %v2008_v47  ;;  %v1904_v18 = vsel %vm1459_vm3, %v1902_v35, %v1903_v3  ;;  %v1809_v48 = vadd.f32 %v1793_v60, %v1773_v4  ;;  %v1630_v29 = vmul.f32 %v3973_v59, %v3538_v30  ;;  %v3990_v60 = vld [vmem:[%s2725_s20 + $0x1a0] sm:$0xff] }
 0x134   : > { %2029 = vst [vmem:[%s2843_s24 + $0xb0] sm:$0xff] %v2009_v28  ;;  %v1577_v21 = vrot.slane %v1538_v26, 4  ;;  %v1666_v61 = vmul.f32 %v3781_v37, %v3541_v31  ;;  %v1808_v46 = vadd.f32 %v1792_v14, %v1772_v36  ;;  %v1578_v27 = vrot.slane %v1539_v10, 4  ;;  %v4002_v36 = vld [vmem:[%s2725_s20 + $0x1a8] sm:$0xf] }
 0x135   : > { %v1667_v1 = vmul.f32 %v3786_v25, %v3541_v31  ;;  %v1702_v13 = vmul.f32 %v3781_v37, %v3544_v45  ;;  %v1845_v11 = vadd.f32 %v1829_v34, %v1809_v48  ;;  %v1703_v30 = vmul.f32 %v3786_v25, %v3544_v45 }
 0x136   : > { %v1794_v47 = vmul.f32 %v3786_v25, %v3549_v57  ;;  %v1795_v14 = vmul.f32 %v3549_v57, %v3794_v58  ;;  %v1844_v0 = vadd.f32 %v1828_v50, %v1808_v46  ;;  %v1579_v35 = vsel %vm1459_vm3, %v1577_v21, %v1578_v27 }
 0x137   : > { %v1611_v31 = vadd.f32 %v1578_v27, %v1519_v62  ;;  %v1741_v15 = vrot.slane %v1702_v13, 4  ;;  %v1937_v51 = vadd.f32 %v1903_v3, %v1845_v11  ;;  %v1610_v4 = vadd.f32 %v1579_v35, %v1518_v12  ;;  %v144_v13 = vld [vmem:[%s2725_s20] sm:$0xff] }
 0x138   : > { %v1742_v26 = vrot.slane %v1703_v30, 4  ;;  %v1830_v34 = vmul.f32 %v3575_v8, %v3983_v24  ;;  %v1936_v28 = vadd.f32 %v1904_v18, %v1844_v0  ;;  %v1831_v57 = vmul.f32 %v3575_v8, %v3990_v60  ;;  %v145_v30 = vld [vmem:[%s2725_s20 + $0x8] sm:$0xff]  ;;  %v146_v0 = vld [vmem:[%s2725_s20 + $0x10] sm:$0xf] }
 0x139   : > { %v1647_v45 = vadd.f32 %v3765_v63, %v1611_v31  ;;  %v1866_v50 = vmul.f32 %v3581_v20, %v3983_v24  ;;  %v1973_v62 = vadd.f32 %v1957_v52, %v1937_v51  ;;  %v1646_v3 = vadd.f32 %v1630_v29, %v1610_v4  ;;  %v213_v63 = vld [vmem:[%s4334_s1 + $0x24] sm:$0x7] }
 0x13a   : > { %v1743_v12 = vsel %vm1459_vm3, %v1741_v15, %v1742_v26  ;;  %v1867_v18 = vmul.f32 %v3581_v20, %v3990_v60  ;;  %v1972_v10 = vadd.f32 %v1956_v16, %v1936_v28  ;;  %v1958_v8 = vmul.f32 %v3587_v39, %v3990_v60 }
 0x13b   : > { %v1683_v48 = vadd.f32 %v1667_v1, %v1647_v45  ;;  %v1905_v21 = vrot.slane %v1866_v50, 4  ;;  %v2011_v46 = vrot.slane %v1973_v62, 2  ;;  %v1682_v52 = vadd.f32 %v1666_v61, %v1646_v3 }
 0x13c   : > { %v1906_v27 = vrot.slane %v1867_v18, 4  ;;  %v1959_v29 = vmul.f32 %v3587_v39, %v4002_v36  ;;  %v2010_v11 = vrot.slane %v1972_v10, 2  ;;  %v4023_v35 = vrot.slane %v213_v63, %v2716_v5 }
 0x13d   : > { %v1775_v20 = vadd.f32 %v1742_v26, %v1683_v48  ;;  %v4026_v16 = vrot.slane %v213_v63, %v2718_v6  ;;  %v1774_v1 = vadd.f32 %v1743_v12, %v1682_v52  ;;  %v4030_v61 = vrot.slane %v213_v63, %v2720_v7 }
 0x13e   : > { %v1907_v31 = vsel %vm1459_vm3, %v1905_v21, %v1906_v27  ;;  %v2012_v39 = vsel %vm365_vm1, %v2010_v11, %v2011_v46  ;;  %v2036_v51 = vmul.f32 %v4023_v35, %v144_v13  ;;  %v4041_v12 = vrot.slane %v3593_v23, %v2716_v5  ;;  %v215_v21 = vld [vmem:[%s4334_s1 + $0x2c] sm:$0x7] }
 0x13f   : > { %v1811_v15 = vadd.f32 %v1795_v14, %v1775_v20  ;;  %v2048_v4 = vmul.f32 %v4026_v16, %v144_v13  ;;  %2030 = vst [vmem:[%s2843_s24 + $0xd0] sm:$0xff] %v2012_v39  ;;  %v1810_v26 = vadd.f32 %v1794_v47, %v1774_v1  ;;  %v2049_v28 = vmul.f32 %v4026_v16, %v145_v30  ;;  %v4372_v39 = vld [vmem:[#allocation2_spill] sm:$0xff] }
 0x140   : > { %v2125_v45 = vmul.f32 %v4030_v61, %v145_v30  ;;  %v2126_v50 = vmul.f32 %v4030_v61, %v146_v0  ;;  %v4045_v14 = vrot.slane %v3593_v23, %v2718_v6 }
 0x141   : > { %v1847_v62 = vadd.f32 %v1831_v57, %v1811_v15  ;;  %v2081_v3 = vrot.slane %v2048_v4, 6  ;;  %v1846_v18 = vadd.f32 %v1830_v34, %v1810_v26  ;;  %v2082_v63 = vrot.slane %v2049_v28, 6  ;;  %v4373_v26 = vld [vmem:[#allocation9_spill] sm:$0xff] }
 0x142   : > { %v2157_v10 = vrot.slane %v2125_v45, 4  ;;  %v2158_v47 = vrot.slane %v2126_v50, 4  ;;  %v2201_v57 = vmul.f32 %v3803_v22, %v4041_v12  ;;  %v2221_v46 = vmul.f32 %v3803_v22, %v4045_v14 }
 0x143   : > { %v1939_v48 = vadd.f32 %v1906_v27, %v1847_v62  ;;  %v2222_v52 = vmul.f32 %v3813_v56, %v4045_v14  ;;  %v1938_v23 = vadd.f32 %v1907_v31, %v1846_v18  ;;  %v2083_v34 = vsel %vm2080_vm4, %v2081_v3, %v2082_v63  ;;  %v147_v18 = vld [vmem:[%s2725_s20 + $0x18] sm:$0xff] }
 0x144   : > { %v2159_v13 = vsel %vm1459_vm3, %v2157_v10, %v2158_v47  ;;  %v2297_v27 = vmul.f32 %v3813_v56, %v3609_v44  ;;  %v2113_v20 = vadd.f32 %v2083_v34, %v2036_v51  ;;  %v2253_v30 = vrot.slane %v2221_v46, 6  ;;  %v148_v47 = vld [vmem:[%s2725_s20 + $0x20] sm:$0xff] }
 0x145   : > { %v1975_v11 = vadd.f32 %v1959_v29, %v1939_v48  ;;  %v2254_v0 = vrot.slane %v2222_v52, 6  ;;  %v1974_v1 = vadd.f32 %v1958_v8, %v1938_v23  ;;  %v2298_v15 = vmul.f32 %v3609_v44, %v4372_v39 }
 0x146   : > { %v2329_v4 = vrot.slane %v2297_v27, 4  ;;  %v4063_v31 = vrot.slane %v215_v21, %v2716_v5  ;;  %v2345_v28 = vrot.slane %v4373_v26, 4  ;;  %v2189_v50 = vadd.f32 %v2159_v13, %v2113_v20 }
 0x147   : > { %v2014_v45 = vrot.slane %v1975_v11, 2  ;;  %v4067_v29 = vrot.slane %v215_v21, %v2718_v6  ;;  %v2013_v51 = vrot.slane %v1974_v1, 2  ;;  %v2255_v8 = vsel %vm2080_vm4, %v2253_v30, %v2254_v0 }
 0x148   : > { %v2330_v62 = vrot.slane %v2298_v15, 4  ;;  %v4071_v3 = vrot.slane %v215_v21, %v2720_v7  ;;  %v2209_v63 = vadd.f32 %v2201_v57, %v2189_v50  ;;  %v2373_v5 = vmul.f32 %v3715_v55, %v4063_v31  ;;  %v149_v57 = vld [vmem:[%s2725_s20 + $0x28] sm:$0xf] }
 0x149   : > { %v2393_v10 = vmul.f32 %v3715_v55, %v4067_v29  ;;  %v2394_v6 = vmul.f32 %v3721_v2, %v4067_v29  ;;  %v2015_v48 = vsel %vm365_vm1, %v2013_v51, %v2014_v45  ;;  %v2050_v55 = vmul.f32 %v4026_v16, %v147_v18 }
 0x14a   : > { %v2331_v46 = vsel %vm1459_vm3, %v2329_v4, %v2330_v62  ;;  %v2469_v7 = vmul.f32 %v3721_v2, %v4071_v3  ;;  %v2470_v21 = vmul.f32 %v4071_v3, %v3726_v38  ;;  %2031 = vst [vmem:[%s2843_s24 + $0xf0] sm:$0xff] %v2015_v48  ;;  %v2285_v52 = vadd.f32 %v2255_v8, %v2209_v63 }
 0x14b   : > { %v2425_v23 = vrot.slane %v2393_v10, 6  ;;  %v2426_v34 = vrot.slane %v2394_v6, 6  ;;  %v2051_v11 = vmul.f32 %v4026_v16, %v148_v47  ;;  %v2127_v20 = vmul.f32 %v4030_v61, %v148_v47 }
 0x14c   : > { %v2501_v13 = vrot.slane %v2469_v7, 4  ;;  %v2502_v27 = vrot.slane %v2470_v21, 4  ;;  %v2361_v30 = vadd.f32 %v2331_v46, %v2285_v52  ;;  %v2037_v0 = vmul.f32 %v4023_v35, %v147_v18 }
 0x14d   : > { %v2084_v2 = vrot.slane %v2050_v55, 6  ;;  %v2128_v1 = vmul.f32 %v4030_v61, %v149_v57  ;;  %v2427_v38 = vsel %vm2080_vm4, %v2425_v23, %v2426_v34  ;;  %v2085_v15 = vrot.slane %v2051_v11, 6 }
 0x14e   : > { %v2503_v39 = vsel %vm1459_vm3, %v2501_v13, %v2502_v27  ;;  %v2160_v4 = vrot.slane %v2127_v20, 4  ;;  %v2381_v45 = vadd.f32 %v2373_v5, %v2361_v30  ;;  %v2223_v51 = vmul.f32 %v3857_v9, %v4045_v14 }
 0x14f   : > { %v2161_v50 = vrot.slane %v2128_v1, 4  ;;  %v2224_v8 = vmul.f32 %v3862_v49, %v4045_v14  ;;  %v2086_v62 = vsel %vm2080_vm4, %v2084_v2, %v2085_v15  ;;  %v2202_v18 = vmul.f32 %v3857_v9, %v4041_v12 }
 0x150   : > { %v2299_v63 = vmul.f32 %v3862_v49, %v3609_v44  ;;  %v2300_v10 = vmul.f32 %v3609_v44, %v3648_v41  ;;  %v2457_v6 = vadd.f32 %v2427_v38, %v2381_v45  ;;  %v2114_v5 = vadd.f32 %v2086_v62, %v2037_v0  ;;  %v2656_v38 = vld [vmem:[%s2725_s20 + $0x30] sm:$0xff] }
 0x151   : > { %v2162_v47 = vsel %vm1459_vm3, %v2160_v4, %v2161_v50  ;;  %v2256_v48 = vrot.slane %v2223_v51, 6  ;;  %v2257_v46 = vrot.slane %v2224_v8, 6  ;;  %v2395_v57 = vmul.f32 %v3781_v37, %v4067_v29  ;;  %v2658_v50 = vld [vmem:[%s2725_s20 + $0x40] sm:$0xf] }
 0x152   : > { %v2332_v7 = vrot.slane %v2299_v63, 4  ;;  %v2333_v21 = vrot.slane %v2300_v10, 4  ;;  %v2533_v52 = vadd.f32 %v2503_v39, %v2457_v6  ;;  %v2190_v23 = vadd.f32 %v2162_v47, %v2114_v5  ;;  %v2657_v39 = vld [vmem:[%s2725_s20 + $0x38] sm:$0xff] }
 0x153   : > { %v2396_v34 = vmul.f32 %v3786_v25, %v4067_v29  ;;  %v2471_v41 = vmul.f32 %v3786_v25, %v4071_v3  ;;  %v2258_v55 = vsel %vm2080_vm4, %v2256_v48, %v2257_v46  ;;  %v2374_v13 = vmul.f32 %v3781_v37, %v4063_v31 }
 0x154   : > { %v2428_v27 = vrot.slane %v2395_v57, 6  ;;  %v2472_v11 = vmul.f32 %v4071_v3, %v3794_v58  ;;  %2541 = vst [vmem:[%s2843_s24 + $0x18] sm:$0xff] %v2533_v52  ;;  %v2210_v20 = vadd.f32 %v2202_v18, %v2190_v23  ;;  %v2334_v30 = vsel %vm1459_vm3, %v2332_v7, %v2333_v21  ;;  %v4374_v21 = vld [vmem:[#allocation8_spill] sm:$0xff] }
 0x155   : > { %v2429_v0 = vrot.slane %v2396_v34, 6  ;;  %v2504_v2 = vrot.slane %v2471_v41, 4  ;;  %v2052_v25 = vmul.f32 %v2656_v38, %v4026_v16  ;;  %v2053_v15 = vmul.f32 %v2657_v39, %v4026_v16 }
 0x156   : > { %v2505_v1 = vrot.slane %v2472_v11, 4  ;;  %v2129_v37 = vmul.f32 %v2657_v39, %v4030_v61  ;;  %v2286_v4 = vadd.f32 %v2258_v55, %v2210_v20  ;;  %v2038_v58 = vmul.f32 %v2656_v38, %v4023_v35  ;;  %v4375_v38 = vld [vmem:[#allocation16_spill] sm:$0xff] }
 0x157   : > { %v2430_v45 = vsel %vm2080_vm4, %v2428_v27, %v2429_v0  ;;  %v2130_v51 = vmul.f32 %v2658_v50, %v4030_v61  ;;  %v2087_v8 = vrot.slane %v2052_v25, 6  ;;  %v2088_v62 = vrot.slane %v2053_v15, 6  ;;  %v4376_v50 = vld [vmem:[#allocation3_spill] sm:$0xff] }
 0x158   : > { %v2163_v18 = vrot.slane %v2129_v37, 4  ;;  %v2203_v63 = vmul.f32 %v3906_v17, %v4041_v12  ;;  %v2362_v10 = vadd.f32 %v2334_v30, %v2286_v4  ;;  %v2225_v5 = vmul.f32 %v3906_v17, %v4045_v14 }
 0x159   : > { %v2164_v6 = vrot.slane %v2130_v51, 4  ;;  %v2226_v47 = vmul.f32 %v3918_v54, %v4045_v14  ;;  %v2506_v48 = vsel %vm1459_vm3, %v2504_v2, %v2505_v1  ;;  %v2089_v46 = vsel %vm2080_vm4, %v2087_v8, %v2088_v62 }
 0x15a   : > { %v2301_v7 = vmul.f32 %v3918_v54, %v3609_v44  ;;  %v2302_v57 = vmul.f32 %v3609_v44, %v4374_v21  ;;  %v2382_v52 = vadd.f32 %v2374_v13, %v2362_v10  ;;  %v2115_v23 = vadd.f32 %v2089_v46, %v2038_v58 }
 0x15b   : > { %v2165_v34 = vsel %vm1459_vm3, %v2163_v18, %v2164_v6  ;;  %v2259_v41 = vrot.slane %v2225_v5, 6  ;;  %v2260_v55 = vrot.slane %v2226_v47, 6  ;;  %v2397_v11 = vmul.f32 %v3838_v42, %v4067_v29 }
 0x15c   : > { %v2335_v17 = vrot.slane %v2301_v7, 4  ;;  %v2336_v27 = vrot.slane %v2302_v57, 4  ;;  %v2458_v20 = vadd.f32 %v2430_v45, %v2382_v52  ;;  %v2191_v30 = vadd.f32 %v2165_v34, %v2115_v23 }
 0x15d   : > { %v2398_v54 = vmul.f32 %v3843_v19, %v4067_v29  ;;  %v2473_v0 = vmul.f32 %v3843_v19, %v4071_v3  ;;  %v2261_v13 = vsel %vm2080_vm4, %v2259_v41, %v2260_v55  ;;  %v2375_v2 = vmul.f32 %v3838_v42, %v4063_v31  ;;  %v4377_v19 = vld [vmem:[#allocation4_spill] sm:$0xff]  ;;  %v4379_v41 = vld [vmem:[#allocation13_spill] sm:$0xff] }
 0x15e   : > { %v2431_v1 = vrot.slane %v2397_v11, 6  ;;  %v2474_v25 = vmul.f32 %v4071_v3, %v4375_v38  ;;  %v2534_v39 = vadd.f32 %v2506_v48, %v2458_v20  ;;  %v2211_v15 = vadd.f32 %v2203_v63, %v2191_v30  ;;  %v4378_v63 = vld [vmem:[#allocation6_spill] sm:$0xff]  ;;  %v2659_v38 = vld [vmem:[%s2725_s20 + $0x168] sm:$0xff] }
 0x15f   : > { %v2337_v37 = vsel %vm1459_vm3, %v2335_v17, %v2336_v27  ;;  %v2432_v4 = vrot.slane %v2398_v54, 6  ;;  %v2507_v45 = vrot.slane %v2473_v0, 4  ;;  %v2054_v51 = vmul.f32 %v4026_v16, %v4376_v50 }
 0x160   : > { %v2508_v58 = vrot.slane %v2474_v25, 4  ;;  %v2055_v8 = vmul.f32 %v4026_v16, %v4377_v19  ;;  %2542 = vst [vmem:[%s2843_s24 + $0x38] sm:$0xff] %v2534_v39  ;;  %v2287_v62 = vadd.f32 %v2261_v13, %v2211_v15  ;;  %v2039_v42 = vmul.f32 %v4023_v35, %v4376_v50 }
 0x161   : > { %v2131_v18 = vmul.f32 %v4030_v61, %v4377_v19  ;;  %v2132_v10 = vmul.f32 %v4030_v61, %v4378_v63  ;;  %v2433_v6 = vsel %vm2080_vm4, %v2431_v1, %v2432_v4  ;;  %v2090_v5 = vrot.slane %v2054_v51, 6 }
 0x162   : > { %v2091_v47 = vrot.slane %v2055_v8, 6  ;;  %v2204_v48 = vmul.f32 %v3962_v33, %v4041_v12  ;;  %v2363_v46 = vadd.f32 %v2337_v37, %v2287_v62  ;;  %v2227_v57 = vmul.f32 %v3962_v33, %v4045_v14 }
 0x163   : > { %v2166_v7 = vrot.slane %v2131_v18, 4  ;;  %v2167_v21 = vrot.slane %v2132_v10, 4  ;;  %v2228_v23 = vmul.f32 %v3973_v59, %v4045_v14  ;;  %v2303_v34 = vmul.f32 %v3973_v59, %v3609_v44  ;;  %v2660_v59 = vld [vmem:[%s2725_s20 + $0x170] sm:$0xff] }
 0x164   : > { %v2092_v52 = vsel %vm2080_vm4, %v2090_v5, %v2091_v47  ;;  %v2304_v55 = vmul.f32 %v3609_v44, %v4379_v41  ;;  %v2383_v17 = vadd.f32 %v2375_v2, %v2363_v46  ;;  %v2262_v20 = vrot.slane %v2227_v57, 6 }
 0x165   : > { %v2116_v27 = vadd.f32 %v2092_v52, %v2039_v42  ;;  %v2168_v11 = vsel %vm1459_vm3, %v2166_v7, %v2167_v21  ;;  %v2509_v30 = vsel %vm1459_vm3, %v2507_v45, %v2508_v58  ;;  %v2263_v33 = vrot.slane %v2228_v23, 6  ;;  %v4380_v42 = vld [vmem:[#allocation10_spill] sm:$0xff]  ;;  %v4382_v7 = vld [vmem:[#allocation7_spill] sm:$0xff] }
 0x166   : > { %v2338_v54 = vrot.slane %v2303_v34, 4  ;;  %v2339_v0 = vrot.slane %v2304_v55, 4  ;;  %v2459_v13 = vadd.f32 %v2433_v6, %v2383_v17  ;;  %v2399_v25 = vmul.f32 %v2659_v38, %v4067_v29  ;;  %v2661_v34 = vld [vmem:[%s2725_s20 + $0xf0] sm:$0xff] }
 0x167   : > { %v2192_v1 = vadd.f32 %v2168_v11, %v2116_v27  ;;  %v2400_v39 = vmul.f32 %v2660_v59, %v4067_v29  ;;  %v2264_v2 = vsel %vm2080_vm4, %v2262_v20, %v2263_v33  ;;  %v2376_v15 = vmul.f32 %v2659_v38, %v4063_v31  ;;  %v2662_v27 = vld [vmem:[%s2725_s20 + $0xf8] sm:$0xff] }
 0x168   : > { %v2475_v37 = vmul.f32 %v2660_v59, %v4071_v3  ;;  %v2476_v4 = vmul.f32 %v4071_v3, %v3892_v32  ;;  %v2535_v45 = vadd.f32 %v2509_v30, %v2459_v13  ;;  %v2434_v50 = vrot.slane %v2399_v25, 6  ;;  %v4381_v32 = vld [vmem:[#allocation11_spill] sm:$0xff] }
 0x169   : > { %v2212_v58 = vadd.f32 %v2204_v48, %v2192_v1  ;;  %v2435_v51 = vrot.slane %v2400_v39, 6  ;;  %v2340_v19 = vsel %vm1459_vm3, %v2338_v54, %v2339_v0  ;;  %v2056_v18 = vmul.f32 %v4380_v42, %v4026_v16 }
 0x16a   : > { %v2510_v8 = vrot.slane %v2475_v37, 4  ;;  %v2511_v62 = vrot.slane %v2476_v4, 4  ;;  %2543 = vst [vmem:[%s2843_s24 + $0x58] sm:$0xff] %v2535_v45  ;;  %v2040_v10 = vmul.f32 %v4380_v42, %v4023_v35  ;;  %v2057_v6 = vmul.f32 %v4381_v32, %v4026_v16 }
 0x16b   : > { %v2288_v63 = vadd.f32 %v2264_v2, %v2212_v58  ;;  %v2133_v5 = vmul.f32 %v4381_v32, %v4030_v61  ;;  %v2436_v47 = vsel %vm2080_vm4, %v2434_v50, %v2435_v51  ;;  %v2093_v46 = vrot.slane %v2056_v18, 6  ;;  %v4383_v51 = vld [vmem:[#allocation5_spill] sm:$0xff]  ;;  %v4386_v32 = vld [vmem:[#allocation15_spill] sm:$0xff] }
 0x16c   : > { %v2512_v48 = vsel %vm1459_vm3, %v2510_v8, %v2511_v62  ;;  %v2134_v21 = vmul.f32 %v4030_v61, %v4382_v7  ;;  %v2094_v52 = vrot.slane %v2057_v6, 6  ;;  %v2229_v41 = vmul.f32 %v2661_v34, %v4045_v14 }
 0x16d   : > { %v2364_v57 = vadd.f32 %v2340_v19, %v2288_v63  ;;  %v2169_v23 = vrot.slane %v2133_v5, 4  ;;  %v2205_v17 = vmul.f32 %v2661_v34, %v4041_v12  ;;  %v2230_v11 = vmul.f32 %v2662_v27, %v4045_v14 }
 0x16e   : > { %v2170_v55 = vrot.slane %v2134_v21, 4  ;;  %v2305_v20 = vmul.f32 %v2662_v27, %v3609_v44  ;;  %v2095_v33 = vsel %vm2080_vm4, %v2093_v46, %v2094_v52  ;;  %v2265_v54 = vrot.slane %v2229_v41, 6 }
 0x16f   : > { %v2384_v30 = vadd.f32 %v2376_v15, %v2364_v57  ;;  %v2401_v0 = vmul.f32 %v4067_v29, %v3928_v43  ;;  %v2117_v13 = vadd.f32 %v2095_v33, %v2040_v10  ;;  %v2266_v38 = vrot.slane %v2230_v11, 6  ;;  %v2663_v57 = vld [vmem:[%s2725_s20 + $0x108] sm:$0xff] }
 0x170   : > { %v2171_v1 = vsel %vm1459_vm3, %v2169_v23, %v2170_v55  ;;  %v2341_v25 = vrot.slane %v2305_v20, 4  ;;  %v2402_v39 = vmul.f32 %v4067_v29, %v3935_v40  ;;  %v2477_v15 = vmul.f32 %v4071_v3, %v3935_v40  ;;  %v4385_v40 = vld [vmem:[#allocation14_spill] sm:$0xff]  ;;  %v2664_v55 = vld [vmem:[%s2725_s20 + $0x110] sm:$0xff] }
 0x171   : > { %v2460_v59 = vadd.f32 %v2436_v47, %v2384_v30  ;;  %v2437_v2 = vrot.slane %v2401_v0, 6  ;;  %v2193_v37 = vadd.f32 %v2171_v1, %v2117_v13  ;;  %v2267_v4 = vsel %vm2080_vm4, %v2265_v54, %v2266_v38  ;;  %v4387_v47 = vld [vmem:[#allocation12_spill] sm:$0xff] }
 0x172   : > { %v2377_v45 = vmul.f32 %v4063_v31, %v3928_v43  ;;  %v2478_v58 = vmul.f32 %v4071_v3, %v3947_v53  ;;  %v4384_v19 = vrot.slane %v4383_v51, 4  ;;  %v2438_v62 = vrot.slane %v2402_v39, 6 }
 0x173   : > { %v2536_v50 = vadd.f32 %v2512_v48, %v2460_v59  ;;  %v2513_v42 = vrot.slane %v2477_v15, 4  ;;  %v2213_v18 = vadd.f32 %v2205_v17, %v2193_v37  ;;  %v2058_v10 = vmul.f32 %v4385_v40, %v4026_v16 }
 0x174   : > { %v2343_v8 = vsel %vm1459_vm3, %v2341_v25, %v4384_v19  ;;  %v2514_v63 = vrot.slane %v2478_v58, 4  ;;  %v2059_v43 = vmul.f32 %v4386_v32, %v4026_v16  ;;  %v2439_v53 = vsel %vm2080_vm4, %v2437_v2, %v2438_v62 }
 0x175   : > { %2544 = vst [vmem:[%s2843_s24 + $0x78] sm:$0xff] %v2536_v50  ;;  %v2041_v6 = vmul.f32 %v4385_v40, %v4023_v35  ;;  %v2135_v5 = vmul.f32 %v4386_v32, %v4030_v61  ;;  %v2136_v48 = vmul.f32 %v4030_v61, %v4387_v47  ;;  %v2289_v46 = vadd.f32 %v2267_v4, %v2213_v18 }
 0x176   : > { %v2096_v7 = vrot.slane %v2058_v10, 6  ;;  %v2097_v21 = vrot.slane %v2059_v43, 6  ;;  %v2206_v52 = vmul.f32 %v2663_v57, %v4041_v12  ;;  %v2231_v41 = vmul.f32 %v2663_v57, %v4045_v14  ;;  %v2666_v43 = vld [vmem:[%s2725_s20 + $0x120] sm:$0xff] }
 0x177   : > { %v2172_v23 = vrot.slane %v2135_v5, 4  ;;  %v2173_v34 = vrot.slane %v2136_v48, 4  ;;  %v2232_v17 = vmul.f32 %v2664_v55, %v4045_v14  ;;  %v2365_v27 = vadd.f32 %v2343_v8, %v2289_v46  ;;  %v198_v5 = vld [vmem:[%s2725_s20 + $0x1b0] sm:$0xff]  ;;  %v2667_v46 = vld [vmem:[%s2725_s20 + $0x128] sm:$0xff] }
 0x178   : > { %v2515_v11 = vsel %vm1459_vm3, %v2513_v42, %v2514_v63  ;;  %v2098_v20 = vsel %vm2080_vm4, %v2096_v7, %v2097_v21  ;;  %v2307_v30 = vmul.f32 %v2664_v55, %v3609_v44  ;;  %v2268_v0 = vrot.slane %v2231_v41, 6  ;;  %v2665_v63 = vld [vmem:[%s2725_s20 + $0xa0] sm:$0xf]  ;;  %v199_v7 = vld [vmem:[%s2725_s20 + $0x1b8] sm:$0xff] }
 0x179   : > { %v2118_v33 = vadd.f32 %v2098_v20, %v2041_v6  ;;  %v2174_v54 = vsel %vm1459_vm3, %v2172_v23, %v2173_v34  ;;  %v2269_v13 = vrot.slane %v2232_v17, 6  ;;  %v2385_v1 = vadd.f32 %v2377_v45, %v2365_v27  ;;  %v2668_v23 = vld [vmem:[%s2725_s20 + $0x130] sm:$0xf]  ;;  %v200_v55 = vld [vmem:[%s2725_s20 + $0x1c0] sm:$0xf] }
 0x17a   : > { %v2344_v38 = vrot.slane %v2307_v30, 4  ;;  %v2403_v25 = vmul.f32 %v4067_v29, %v3983_v24  ;;  %v2404_v59 = vmul.f32 %v4067_v29, %v3990_v60  ;;  %v2378_v2 = vmul.f32 %v4063_v31, %v3983_v24 }
 0x17b   : > { %v2194_v39 = vadd.f32 %v2174_v54, %v2118_v33  ;;  %v2479_v15 = vmul.f32 %v4071_v3, %v3990_v60  ;;  %v2480_v37 = vmul.f32 %v4071_v3, %v4002_v36  ;;  %v2461_v4 = vadd.f32 %v2439_v53, %v2385_v1 }
 0x17c   : > { %v2270_v45 = vsel %vm2080_vm4, %v2268_v0, %v2269_v13  ;;  %v2440_v58 = vrot.slane %v2403_v25, 6  ;;  %v2441_v50 = vrot.slane %v2404_v59, 6  ;;  %v2346_v19 = vsel %vm1459_vm3, %v2344_v38, %v2345_v28 }
 0x17d   : > { %v2214_v51 = vadd.f32 %v2206_v52, %v2194_v39  ;;  %v2516_v24 = vrot.slane %v2479_v15, 4  ;;  %v2517_v8 = vrot.slane %v2480_v37, 4  ;;  %v2537_v62 = vadd.f32 %v2515_v11, %v2461_v4 }
 0x17e   : > { %v2042_v60 = vmul.f32 %v3803_v22, %v4023_v35  ;;  %v2060_v36 = vmul.f32 %v3803_v22, %v4026_v16  ;;  %v2061_v42 = vmul.f32 %v3813_v56, %v4026_v16  ;;  %v2442_v26 = vsel %vm2080_vm4, %v2440_v58, %v2441_v50 }
 0x17f   : > { %v2290_v18 = vadd.f32 %v2270_v45, %v2214_v51  ;;  %v2137_v28 = vmul.f32 %v3813_v56, %v4030_v61  ;;  %v2138_v40 = vmul.f32 %v2665_v63, %v4030_v61  ;;  %2545 = vst [vmem:[%s2843_s24 + $0x98] sm:$0xff] %v2537_v62  ;;  %v2207_v22 = vmul.f32 %v2666_v43, %v4041_v12 }
 0x180   : > { %v2099_v10 = vrot.slane %v2060_v36, 6  ;;  %v2100_v32 = vrot.slane %v2061_v42, 6  ;;  %v2233_v53 = vmul.f32 %v2666_v43, %v4045_v14  ;;  %v2234_v56 = vmul.f32 %v2667_v46, %v4045_v14  ;;  %v2671_v43 = vld [vmem:[%s2725_s20 + $0x140] sm:$0xff] }
 0x181   : > { %v2366_v6 = vadd.f32 %v2346_v19, %v2290_v18  ;;  %v2175_v47 = vrot.slane %v2137_v28, 4  ;;  %v2176_v48 = vrot.slane %v2138_v40, 4  ;;  %v2309_v52 = vmul.f32 %v2667_v46, %v3609_v44  ;;  %v2670_v18 = vld [vmem:[%s2725_s20 + $0x138] sm:$0xff] }
 0x182   : > { %v2101_v21 = vsel %vm2080_vm4, %v2099_v10, %v2100_v32  ;;  %v2271_v57 = vrot.slane %v2233_v53, 6  ;;  %v2310_v34 = vmul.f32 %v2668_v23, %v3609_v44  ;;  %v2272_v11 = vrot.slane %v2234_v56, 6  ;;  %v201_v10 = vld [vmem:[%s2725_s20 + $0x1c8] sm:$0xff]  ;;  %v202_v32 = vld [vmem:[%s2725_s20 + $0x1d0] sm:$0xff] }
 0x183   : > { %v2386_v41 = vadd.f32 %v2378_v2, %v2366_v6  ;;  %v2119_v17 = vadd.f32 %v2101_v21, %v2042_v60  ;;  %v2177_v27 = vsel %vm1459_vm3, %v2175_v47, %v2176_v48  ;;  %v2518_v20 = vsel %vm1459_vm3, %v2516_v24, %v2517_v8  ;;  %v2669_v60 = vld [vmem:[%s2725_s20 + $0xb8] sm:$0xf]  ;;  %v2672_v53 = vld [vmem:[%s2725_s20 + $0x148] sm:$0xf] }
 0x184   : > { %v2347_v30 = vrot.slane %v2309_v52, 4  ;;  %v2348_v33 = vrot.slane %v2310_v34, 4  ;;  %v2405_v54 = vmul.f32 %v4067_v29, %v198_v5  ;;  %v2379_v1 = vmul.f32 %v4063_v31, %v198_v5  ;;  %v203_v47 = vld [vmem:[%s2725_s20 + $0x1d8] sm:$0xf] }
 0x185   : > { %v2462_v0 = vadd.f32 %v2442_v26, %v2386_v41  ;;  %v2195_v13 = vadd.f32 %v2177_v27, %v2119_v17  ;;  %v2406_v38 = vmul.f32 %v4067_v29, %v199_v7  ;;  %v2273_v25 = vsel %vm2080_vm4, %v2271_v57, %v2272_v11 }
 0x186   : > { %v2443_v59 = vrot.slane %v2405_v54, 6  ;;  %v2481_v39 = vmul.f32 %v4071_v3, %v199_v7  ;;  %v2482_v2 = vmul.f32 %v4071_v3, %v200_v55  ;;  %v2349_v4 = vsel %vm1459_vm3, %v2347_v30, %v2348_v33 }
 0x187   : > { %v2538_v15 = vadd.f32 %v2518_v20, %v2462_v0  ;;  %v2215_v37 = vadd.f32 %v2207_v22, %v2195_v13  ;;  %v2444_v45 = vrot.slane %v2406_v38, 6  ;;  %v2043_v50 = vmul.f32 %v3857_v9, %v4023_v35 }
 0x188   : > { %v2519_v58 = vrot.slane %v2481_v39, 4  ;;  %v2062_v51 = vmul.f32 %v3857_v9, %v4026_v16  ;;  %v2063_v19 = vmul.f32 %v3862_v49, %v4026_v16  ;;  %v2520_v8 = vrot.slane %v2482_v2, 4 }
 0x189   : > { %2546 = vst [vmem:[%s2843_s24 + $0xb8] sm:$0xff] %v2538_v15  ;;  %v2291_v24 = vadd.f32 %v2273_v25, %v2215_v37  ;;  %v2139_v62 = vmul.f32 %v3862_v49, %v4030_v61  ;;  %v2140_v36 = vmul.f32 %v2669_v60, %v4030_v61  ;;  %v2445_v35 = vsel %vm2080_vm4, %v2443_v59, %v2444_v45 }
 0x18a   : > { %v2102_v42 = vrot.slane %v2062_v51, 6  ;;  %v2103_v9 = vrot.slane %v2063_v19, 6  ;;  %v2208_v16 = vmul.f32 %v2670_v18, %v4041_v12  ;;  %v2235_v40 = vmul.f32 %v2670_v18, %v4045_v14 }
 0x18b   : > { %v2367_v26 = vadd.f32 %v2349_v4, %v2291_v24  ;;  %v2178_v28 = vrot.slane %v2139_v62, 4  ;;  %v2179_v63 = vrot.slane %v2140_v36, 4  ;;  %v2236_v61 = vmul.f32 %v2671_v43, %v4045_v14 }
 0x18c   : > { %v2104_v49 = vsel %vm2080_vm4, %v2102_v42, %v2103_v9  ;;  %v2311_v22 = vmul.f32 %v2671_v43, %v3609_v44  ;;  %v2312_v6 = vmul.f32 %v2672_v53, %v3609_v44  ;;  %v2274_v46 = vrot.slane %v2235_v40, 6 }
 0x18d   : > { %v2387_v5 = vadd.f32 %v2379_v1, %v2367_v26  ;;  %v2120_v12 = vadd.f32 %v2104_v49, %v2043_v50  ;;  %v2180_v48 = vsel %vm1459_vm3, %v2178_v28, %v2179_v63  ;;  %v2521_v56 = vsel %vm1459_vm3, %v2519_v58, %v2520_v8 }
 0x18e   : > { %v2275_v7 = vrot.slane %v2236_v61, 6  ;;  %v2350_v21 = vrot.slane %v2311_v22, 4  ;;  %v2351_v57 = vrot.slane %v2312_v6, 4  ;;  %v2407_v14 = vmul.f32 %v4067_v29, %v201_v10 }
 0x18f   : > { %v2463_v52 = vadd.f32 %v2445_v35, %v2387_v5  ;;  %v2196_v23 = vadd.f32 %v2180_v48, %v2120_v12  ;;  %v2408_v34 = vmul.f32 %v4067_v29, %v202_v32  ;;  %v2483_v41 = vmul.f32 %v4071_v3, %v202_v32 }
 0x190   : > { %v2276_v44 = vsel %vm2080_vm4, %v2274_v46, %v2275_v7  ;;  %v2484_v55 = vmul.f32 %v4071_v3, %v203_v47  ;;  %v2352_v11 = vsel %vm1459_vm3, %v2350_v21, %v2351_v57  ;;  %v2446_v20 = vrot.slane %v2407_v14, 6 }
 0x191   : > { %v2539_v17 = vadd.f32 %v2521_v56, %v2463_v52  ;;  %v2216_v27 = vadd.f32 %v2208_v16, %v2196_v23  ;;  %v2447_v30 = vrot.slane %v2408_v34, 6  ;;  %v2380_v54 = vmul.f32 %v4063_v31, %v201_v10 }
 0x192   : > { %v2522_v0 = vrot.slane %v2483_v41, 4  ;;  %v2523_v13 = vrot.slane %v2484_v55, 4 }
 0x193   : > { %2547 = vst [vmem:[%s2843_s24 + $0xd8] sm:$0xff] %v2539_v17  ;;  %v2292_v33 = vadd.f32 %v2276_v44, %v2216_v27  ;;  %v2448_v1 = vsel %vm2080_vm4, %v2446_v20, %v2447_v30 }
 0x194   : > { %v2524_v25 = vsel %vm1459_vm3, %v2522_v0, %v2523_v13 }
 0x195   : > { %v2368_v29 = vadd.f32 %v2352_v11, %v2292_v33 }
 0x197   : > { %v2388_v38 = vadd.f32 %v2380_v54, %v2368_v29 }
 0x199   : > { %v2464_v3 = vadd.f32 %v2448_v1, %v2388_v38 }
 0x19b   : > { %v2540_v59 = vadd.f32 %v2524_v25, %v2464_v3 }
 0x19d   : > { %2548 = vst [vmem:[%s2843_s24 + $0xf8] sm:$0xff] %v2540_v59 }
 0x19e PF: > { %s12_s9 = sadd.s32 1, %s2679_s9  }
 0x19f   : > { %p9_p4 = scmp.ge.s32.totalorder %s12_s9, 4  }
 0x1a1   :  { %11 = sbr.rel (!%p9_p4) target bundleno = 1 (0x1), region = 58 }

// kernel: criss_cross_forward.8
= control target key start
LH: loop header
LB: loop body
LE: loop exit
PB: predicated region body
PF: predicated region fallthrough
CT: control target
= control target key end

     0   :  { %s3696_s1 = inlined_call_operand.vmem [shape: bf16[512,640], index: 1, kind: input, shape index: {}]   ;;  %s3697_s0 = inlined_call_operand.vmem [shape: f32[128,512], index: 0, kind: input, shape index: {}]   ;;  %s3698_s2 = inlined_call_operand.vmem [shape: f32[1,640], index: 2, kind: input, shape index: {}]   ;;  %s3699_s3 = inlined_call_operand.vmem [shape: f32[128,640], index: 3, kind: output, shape index: {}]  }
   0x1   :  { %v2308_v0 = vld [vmem:[%s3696_s1 + $0x4] ss:$20 sps:$4 sm:$0xff]   ;;  %v2310_v1 = vld [vmem:[%s3696_s1 + $0xc] ss:$20 sps:$4 sm:$0xff]   ;;  %v2313_v3 = vld [vmem:[%s3696_s1 + $0x8] ss:$20 sps:$4 sm:$0xff]  }
   0x2   :  { %1162 = vmatprep.subr.bf16.mxu0 %v2308_v0  ;;  %v2312_v2 = vld [vmem:[%s3696_s1] ss:$20 sps:$4 sm:$0xff]   ;;  %1388 = vmatprep.subr.bf16.mxu1 %v2310_v1  ;;  %v2318_v6 = vld [vmem:[%s3696_s1 + $0x28] ss:$20 sps:$4 sm:$0xff]   ;;  %v2319_v7 = vld [vmem:[%s3696_s1 + $0x30] ss:$20 sps:$4 sm:$0xff]  }
   0x3   :  { %v2314_v4 = vld [vmem:[%s3696_s1 + $0x2c] ss:$20 sps:$4 sm:$0xff]   ;;  %1163 = vmatpush1.bf16.msra.mxu0 %v2312_v2  ;;  %1389 = vmatpush1.bf16.msra.mxu1 %v2313_v3  ;;  %v2316_v5 = vld [vmem:[%s3696_s1 + $0x34] ss:$20 sps:$4 sm:$0xff]   ;;  %v2322_v9 = vld [vmem:[%s3696_s1 + $0x5c] ss:$20 sps:$4 sm:$0xff]  }
   0x4   :  { %1164 = vmatprep.subr.bf16.mxu0 %v2314_v4  ;;  %1390 = vmatprep.subr.bf16.mxu1 %v2316_v5  ;;  %v2320_v8 = vld [vmem:[%s3696_s1 + $0x54] ss:$20 sps:$4 sm:$0xff]   ;;  %v2324_v10 = vld [vmem:[%s3696_s1 + $0x50] ss:$20 sps:$4 sm:$0xff]   ;;  %v2325_v11 = vld [vmem:[%s3696_s1 + $0x58] ss:$20 sps:$4 sm:$0xff]  }
   0x5   :  { %v2326_v12 = vld [vmem:[%s3696_s1 + $0x7c] ss:$20 sps:$4 sm:$0xff]   ;;  %v2328_v13 = vld [vmem:[%s3696_s1 + $0x84] ss:$20 sps:$4 sm:$0xff]   ;;  %v2331_v15 = vld [vmem:[%s3696_s1 + $0x80] ss:$20 sps:$4 sm:$0xff]  }
   0x6   :  { %v2330_v14 = vld [vmem:[%s3696_s1 + $0x78] ss:$20 sps:$4 sm:$0xff]   ;;  %v2336_v18 = vld [vmem:[%s3696_s1 + $0xa0] ss:$20 sps:$4 sm:$0xff]   ;;  %v2337_v19 = vld [vmem:[%s3696_s1 + $0xa8] ss:$20 sps:$4 sm:$0xff]  }
   0x7   :  { %1165 = vmatpush1.bf16.msra.mxu0 %v2318_v6  ;;  %1391 = vmatpush1.bf16.msra.mxu1 %v2319_v7  ;;  %v2332_v16 = vld [vmem:[%s3696_s1 + $0xa4] ss:$20 sps:$4 sm:$0xff]   ;;  %v2334_v17 = vld [vmem:[%s3696_s1 + $0xac] ss:$20 sps:$4 sm:$0xff]   ;;  %v2340_v21 = vld [vmem:[%s3696_s1 + $0xd4] ss:$20 sps:$4 sm:$0xff]  }
   0x8   :  { %1166 = vmatprep.subr.bf16.mxu0 %v2320_v8  ;;  %1392 = vmatprep.subr.bf16.mxu1 %v2322_v9  ;;  %v2338_v20 = vld [vmem:[%s3696_s1 + $0xcc] ss:$20 sps:$4 sm:$0xff]   ;;  %v2342_v22 = vld [vmem:[%s3696_s1 + $0xc8] ss:$20 sps:$4 sm:$0xff]   ;;  %v2343_v23 = vld [vmem:[%s3696_s1 + $0xd0] ss:$20 sps:$4 sm:$0xff]  }
   0x9   :  { %v2344_v24 = vld [vmem:[%s3696_s1 + $0xf4] ss:$20 sps:$4 sm:$0xff]   ;;  %v2346_v25 = vld [vmem:[%s3696_s1 + $0xfc] ss:$20 sps:$4 sm:$0xff]   ;;  %v2349_v27 = vld [vmem:[%s3696_s1 + $0xf8] ss:$20 sps:$4 sm:$0xff]  }
   0xa   :  { %v2348_v26 = vld [vmem:[%s3696_s1 + $0xf0] ss:$20 sps:$4 sm:$0xff]   ;;  %v2354_v30 = vld [vmem:[%s3696_s1 + $0x118] ss:$20 sps:$4 sm:$0xff]   ;;  %v2355_v31 = vld [vmem:[%s3696_s1 + $0x120] ss:$20 sps:$4 sm:$0xff]  }
   0xb   :  { %1167 = vmatpush1.bf16.msra.mxu0 %v2324_v10  ;;  %1393 = vmatpush1.bf16.msra.mxu1 %v2325_v11  ;;  %v2350_v28 = vld [vmem:[%s3696_s1 + $0x11c] ss:$20 sps:$4 sm:$0xff]   ;;  %v2352_v29 = vld [vmem:[%s3696_s1 + $0x124] ss:$20 sps:$4 sm:$0xff]   ;;  %v2358_v33 = vld [vmem:[%s3696_s1 + $0x14c] ss:$20 sps:$4 sm:$0xff]  }
   0xc   :  { %1168 = vmatprep.subr.bf16.mxu0 %v2326_v12  ;;  %1394 = vmatprep.subr.bf16.mxu1 %v2328_v13  ;;  %v2356_v32 = vld [vmem:[%s3696_s1 + $0x144] ss:$20 sps:$4 sm:$0xff]   ;;  %v2360_v34 = vld [vmem:[%s3696_s1 + $0x140] ss:$20 sps:$4 sm:$0xff]   ;;  %v2361_v35 = vld [vmem:[%s3696_s1 + $0x148] ss:$20 sps:$4 sm:$0xff]  }
   0xd   :  { %v2362_v36 = vld [vmem:[%s3696_s1 + $0x16c] ss:$20 sps:$4 sm:$0xff]   ;;  %v2364_v37 = vld [vmem:[%s3696_s1 + $0x174] ss:$20 sps:$4 sm:$0xff]   ;;  %v2367_v39 = vld [vmem:[%s3696_s1 + $0x170] ss:$20 sps:$4 sm:$0xff]  }
   0xe   :  { %v2366_v38 = vld [vmem:[%s3696_s1 + $0x168] ss:$20 sps:$4 sm:$0xff]   ;;  %v2372_v42 = vld [vmem:[%s3696_s1 + $0x190] ss:$20 sps:$4 sm:$0xff]   ;;  %v2373_v43 = vld [vmem:[%s3696_s1 + $0x198] ss:$20 sps:$4 sm:$0xff]  }
   0xf   :  { %1169 = vmatpush1.bf16.msra.mxu0 %v2330_v14  ;;  %1395 = vmatpush1.bf16.msra.mxu1 %v2331_v15  ;;  %v2368_v40 = vld [vmem:[%s3696_s1 + $0x194] ss:$20 sps:$4 sm:$0xff]   ;;  %v2370_v41 = vld [vmem:[%s3696_s1 + $0x19c] ss:$20 sps:$4 sm:$0xff]   ;;  %v2376_v45 = vld [vmem:[%s3696_s1 + $0x1c4] ss:$20 sps:$4 sm:$0xff]  }
  0x10   :  { %1170 = vmatprep.subr.bf16.mxu0 %v2332_v16  ;;  %1396 = vmatprep.subr.bf16.mxu1 %v2334_v17  ;;  %v2374_v44 = vld [vmem:[%s3696_s1 + $0x1bc] ss:$20 sps:$4 sm:$0xff]   ;;  %v16_v46 = vld [vmem:[%s3697_s0 + $0x8] sm:$0xff]  ;;  %v2379_v48 = vld [vmem:[%s3696_s1 + $0x1c0] ss:$20 sps:$4 sm:$0xff]  }
  0x11   :  { %v2378_v47 = vld [vmem:[%s3696_s1 + $0x1b8] ss:$20 sps:$4 sm:$0xff]   ;;  %v2384_v53 = vld [vmem:[%s3696_s1 + $0x1e0] ss:$20 sps:$4 sm:$0xff]   ;;  %v2385_v54 = vld [vmem:[%s3696_s1 + $0x1e8] ss:$20 sps:$4 sm:$0xff]  }
  0x12   :  { %v20_v49 = vld [vmem:[%s3697_s0 + $0x28] sm:$0xff]  ;;  %v2380_v50 = vld [vmem:[%s3696_s1 + $0x1e4] ss:$20 sps:$4 sm:$0xff]   ;;  %v2394_v60 = vld [vmem:[%s3696_s1 + $0x23c] ss:$20 sps:$4 sm:$0xff]  }
  0x13   :  { %1171 = vmatpush1.bf16.msra.mxu0 %v2336_v18  ;;  %1397 = vmatpush1.bf16.msra.mxu1 %v2337_v19  ;;  %v2705_v51 = vpack.c.bf16 %v20_v49, %v16_v46  ;;  %v2382_v52 = vld [vmem:[%s3696_s1 + $0x1ec] ss:$20 sps:$4 sm:$0xff]   ;;  %v2388_v56 = vld [vmem:[%s3696_s1 + $0x214] ss:$20 sps:$4 sm:$0xff]   ;;  %v2391_v58 = vld [vmem:[%s3696_s1 + $0x210] ss:$20 sps:$4 sm:$0xff]  }
  0x14   :  { %1172 = vmatprep.subr.bf16.mxu0 %v2338_v20  ;;  %1398 = vmatprep.subr.bf16.mxu1 %v2340_v21  ;;  %v2386_v55 = vld [vmem:[%s3696_s1 + $0x20c] ss:$20 sps:$4 sm:$0xff]   ;;  %v2390_v57 = vld [vmem:[%s3696_s1 + $0x208] ss:$20 sps:$4 sm:$0xff]   ;;  %v2396_v61 = vld [vmem:[%s3696_s1 + $0x230] ss:$20 sps:$4 sm:$0xff]  }
  0x15   :  { %1194 = vmatprep.mubr.bf16.mxu0 %v2705_v51  ;;  %1420 = vmatprep.mubr.bf16.mxu1 %v2705_v51  ;;  %v2392_v59 = vld [vmem:[%s3696_s1 + $0x234] ss:$20 sps:$4 sm:$0xff]   ;;  %v2397_v62 = vld [vmem:[%s3696_s1 + $0x238] ss:$20 sps:$4 sm:$0xff]   ;;  %v2398_v63 = vld [vmem:[%s3696_s1 + $0x25c] ss:$20 sps:$4 sm:$0xff]  }
  0x16   :  { %v2400_v0 = vld [vmem:[%s3696_s1 + $0x264] ss:$20 sps:$4 sm:$0xff]   ;;  %v2403_v2 = vld [vmem:[%s3696_s1 + $0x260] ss:$20 sps:$4 sm:$0xff]   ;;  %v2407_v9 = vld [vmem:[%s3696_s1 + $0x288] ss:$20 sps:$4 sm:$0xff]  }
  0x17   :  { %1173 = vmatpush1.bf16.msra.mxu0 %v2342_v22  ;;  %1399 = vmatpush1.bf16.msra.mxu1 %v2343_v23  ;;  %v2402_v1 = vld [vmem:[%s3696_s1 + $0x258] ss:$20 sps:$4 sm:$0xff]   ;;  %v15_v3 = vld [vmem:[%s3697_s0] sm:$0xff]  ;;  %v2415_v13 = vld [vmem:[%s3696_s1 + $0x2b4] ss:$20 sps:$4 sm:$0xff]  }
  0x18   :  { %1174 = vmatprep.subr.bf16.mxu0 %v2344_v24  ;;  %1400 = vmatprep.subr.bf16.mxu1 %v2346_v25  ;;  %v19_v4 = vld [vmem:[%s3697_s0 + $0x20] sm:$0xff]  ;;  %v24_v10 = vld [vmem:[%s3697_s0 + $0x48] sm:$0xff]  ;;  %v2421_v20 = vld [vmem:[%s3696_s1 + $0x2dc] ss:$20 sps:$4 sm:$0xff]  }
  0x19   :  { %v2406_v5 = vld [vmem:[%s3696_s1 + $0x284] ss:$20 sps:$4 sm:$0xff]   ;;  %v2409_v6 = vld [vmem:[%s3696_s1 + $0x28c] ss:$20 sps:$4 sm:$0xff]   ;;  %v2769_v8 = vpack.c.bf16 %v19_v4, %v15_v3  ;;  %v2410_v14 = vld [vmem:[%s3696_s1 + $0x2a8] ss:$20 sps:$4 sm:$0xff]  }
  0x1a   :  { %v2404_v7 = vld [vmem:[%s3696_s1 + $0x280] ss:$20 sps:$4 sm:$0xff]   ;;  %v28_v11 = vld [vmem:[%s3697_s0 + $0x68] sm:$0xff]  ;;  %v2413_v16 = vld [vmem:[%s3696_s1 + $0x2b0] ss:$20 sps:$4 sm:$0xff]  }
  0x1b   :  { %1175 = vmatpush1.bf16.msra.mxu0 %v2348_v26  ;;  %1401 = vmatpush1.bf16.msra.mxu1 %v2349_v27  ;;  %v2412_v12 = vld [vmem:[%s3696_s1 + $0x2ac] ss:$20 sps:$4 sm:$0xff]   ;;  %v2789_v15 = vpack.c.bf16 %v28_v11, %v24_v10  ;;  %v2418_v19 = vld [vmem:[%s3696_s1 + $0x2d4] ss:$20 sps:$4 sm:$0xff]   ;;  %v2416_v21 = vld [vmem:[%s3696_s1 + $0x2d0] ss:$20 sps:$4 sm:$0xff]  }
  0x1c   :  { %1176 = vmatprep.subr.bf16.mxu0 %v2350_v28  ;;  %1402 = vmatprep.subr.bf16.mxu1 %v2352_v29  ;;  %v23_v17 = vld [vmem:[%s3697_s0 + $0x40] sm:$0xff]  ;;  %v2419_v22 = vld [vmem:[%s3696_s1 + $0x2d8] ss:$20 sps:$4 sm:$0xff]   ;;  %v2424_v26 = vld [vmem:[%s3696_s1 + $0x2fc] ss:$20 sps:$4 sm:$0xff]  }
  0x1d   :  { %v27_v18 = vld [vmem:[%s3697_s0 + $0x60] sm:$0xff]  ;;  %v32_v24 = vld [vmem:[%s3697_s0 + $0x88] sm:$0xff] }
  0x1e   :  { %v2816_v23 = vpack.c.bf16 %v27_v18, %v23_v17  ;;  %v36_v25 = vld [vmem:[%s3697_s0 + $0xa8] sm:$0xff]  ;;  %v2427_v27 = vld [vmem:[%s3696_s1 + $0x304] ss:$20 sps:$4 sm:$0xff]   ;;  %v2452_v3 = vld [vmem:[%s3696_s1 + $0x3c0] ss:$20 sps:$4 sm:$0xff]  }
  0x1f   :  { %1177 = vmatpush1.bf16.msra.mxu0 %v2354_v30  ;;  %1403 = vmatpush1.bf16.msra.mxu1 %v2355_v31  ;;  %v2830_v28 = vpack.c.bf16 %v36_v25, %v32_v24  ;;  %v2422_v29 = vld [vmem:[%s3696_s1 + $0x2f8] ss:$20 sps:$4 sm:$0xff]   ;;  %v2425_v30 = vld [vmem:[%s3696_s1 + $0x300] ss:$20 sps:$4 sm:$0xff]   ;;  %v2440_v49 = vld [vmem:[%s3696_s1 + $0x370] ss:$20 sps:$4 sm:$0xff]  }
  0x20   :  { %1178 = vmatprep.subr.bf16.mxu0 %v2356_v32  ;;  %1404 = vmatprep.subr.bf16.mxu1 %v2358_v33  ;;  %v31_v31 = vld [vmem:[%s3697_s0 + $0x80] sm:$0xff]  ;;  %v2455_v4 = vld [vmem:[%s3696_s1 + $0x3c8] ss:$20 sps:$4 sm:$0xff]   ;;  %v2467_v17 = vld [vmem:[%s3696_s1 + $0x418] ss:$20 sps:$4 sm:$0xff]  }
  0x21   :  { %v35_v32 = vld [vmem:[%s3697_s0 + $0xa0] sm:$0xff]  ;;  %v64_v18 = vld [vmem:[%s3697_s0 + $0x188] sm:$0xff] }
  0x22   :  { %v2430_v33 = vld [vmem:[%s3696_s1 + $0x324] ss:$20 sps:$4 sm:$0xff]  }
  0x23   :  { %1179 = vmatpush1.bf16.msra.mxu0 %v2360_v34  ;;  %1405 = vmatpush1.bf16.msra.mxu1 %v2361_v35  ;;  %v2433_v34 = vld [vmem:[%s3696_s1 + $0x32c] ss:$20 sps:$4 sm:$0xff]  }
  0x24   :  { %1180 = vmatprep.subr.bf16.mxu0 %v2362_v36  ;;  %1406 = vmatprep.subr.bf16.mxu1 %v2364_v37  ;;  %v2428_v35 = vld [vmem:[%s3696_s1 + $0x320] ss:$20 sps:$4 sm:$0xff]   ;;  %v2431_v36 = vld [vmem:[%s3696_s1 + $0x328] ss:$20 sps:$4 sm:$0xff]   ;;  %v2860_v37 = vpack.c.bf16 %v35_v32, %v31_v31  ;;  %v2470_v24 = vld [vmem:[%s3696_s1 + $0x438] ss:$20 sps:$4 sm:$0xff]  }
  0x25   :  { %v43_v46 = vld [vmem:[%s3697_s0 + $0xe0] sm:$0xff]  ;;  %v72_v32 = vld [vmem:[%s3697_s0 + $0x1c8] sm:$0xff] }
  0x26   :  { %v55_v11 = vld [vmem:[%s3697_s0 + $0x140] sm:$0xff] }
  0x27   :  { %1181 = vmatpush1.bf16.msra.mxu0 %v2366_v38  ;;  %1407 = vmatpush1.bf16.msra.mxu1 %v2367_v39  ;;  %v40_v38 = vld [vmem:[%s3697_s0 + $0xc8] sm:$0xff] }
  0x28   :  { %1182 = vmatprep.subr.bf16.mxu0 %v2368_v40  ;;  %1408 = vmatprep.subr.bf16.mxu1 %v2370_v41  ;;  %v44_v39 = vld [vmem:[%s3697_s0 + $0xe8] sm:$0xff] }
  0x29   :  { %v2436_v40 = vld [vmem:[%s3696_s1 + $0x34c] ss:$20 sps:$4 sm:$0xff]   ;;  %v2439_v41 = vld [vmem:[%s3696_s1 + $0x354] ss:$20 sps:$4 sm:$0xff]  }
  0x2a   :  { %v2481_v31 = vld [vmem:[%s3696_s1 + $0x46c] ss:$20 sps:$4 sm:$0xff]  }
  0x2b   :  { %1183 = vmatpush1.bf16.msra.mxu0 %v2372_v42  ;;  %1409 = vmatpush1.bf16.msra.mxu1 %v2373_v43  ;;  %v2434_v42 = vld [vmem:[%s3696_s1 + $0x348] ss:$20 sps:$4 sm:$0xff]   ;;  %v2877_v43 = vpack.c.bf16 %v44_v39, %v40_v38  ;;  %v2484_v38 = vld [vmem:[%s3696_s1 + $0x48c] ss:$20 sps:$4 sm:$0xff]  }
  0x2c   :  { %1184 = vmatprep.subr.bf16.mxu0 %v2374_v44  ;;  %1410 = vmatprep.subr.bf16.mxu1 %v2376_v45  ;;  %v2437_v44 = vld [vmem:[%s3696_s1 + $0x350] ss:$20 sps:$4 sm:$0xff]   ;;  %v2487_v39 = vld [vmem:[%s3696_s1 + $0x494] ss:$20 sps:$4 sm:$0xff]  }
  0x2d   :  { %v39_v45 = vld [vmem:[%s3697_s0 + $0xc0] sm:$0xff] }
  0x2f   :  { %1185 = vmatpush1.bf16.msra.mxu0 %v2378_v47  ;;  %1411 = vmatpush1.bf16.msra.mxu1 %v2379_v48  ;;  %v2442_v47 = vld [vmem:[%s3696_s1 + $0x374] ss:$20 sps:$4 sm:$0xff]   ;;  %v2445_v48 = vld [vmem:[%s3696_s1 + $0x37c] ss:$20 sps:$4 sm:$0xff]  }
  0x30   :  { %1186 = vmatprep.subr.bf16.mxu0 %v2380_v50  ;;  %1412 = vmatprep.subr.bf16.mxu1 %v2382_v52  ;;  %v2901_v50 = vpack.c.bf16 %v43_v46, %v39_v45  ;;  %v48_v52 = vld [vmem:[%s3697_s0 + $0x108] sm:$0xff]  ;;  %v75_v45 = vld [vmem:[%s3697_s0 + $0x1e0] sm:$0xff] }
  0x31   :  { %v2490_v46 = vld [vmem:[%s3696_s1 + $0x4b4] ss:$20 sps:$4 sm:$0xff]  }
  0x33   :  { %1187 = vmatpush1.bf16.msra.mxu0 %v2384_v53  ;;  %1413 = vmatpush1.bf16.msra.mxu1 %v2385_v54  ;;  %v52_v53 = vld [vmem:[%s3697_s0 + $0x128] sm:$0xff] }
  0x34   :  { %1188 = vmatprep.subr.bf16.mxu0 %v2386_v55  ;;  %1414 = vmatprep.subr.bf16.mxu1 %v2388_v56  ;;  %v2443_v54 = vld [vmem:[%s3696_s1 + $0x378] ss:$20 sps:$4 sm:$0xff]   ;;  %v2448_v55 = vld [vmem:[%s3696_s1 + $0x39c] ss:$20 sps:$4 sm:$0xff]  }
  0x35   :  { %v2451_v56 = vld [vmem:[%s3696_s1 + $0x3a4] ss:$20 sps:$4 sm:$0xff]  }
  0x37   :  { %1189 = vmatpush1.bf16.msra.mxu0 %v2390_v57  ;;  %1415 = vmatpush1.bf16.msra.mxu1 %v2391_v58  ;;  %v2446_v57 = vld [vmem:[%s3696_s1 + $0x398] ss:$20 sps:$4 sm:$0xff]   ;;  %v2449_v58 = vld [vmem:[%s3696_s1 + $0x3a0] ss:$20 sps:$4 sm:$0xff]  }
  0x38   :  { %1190 = vmatprep.subr.bf16.mxu0 %v2392_v59  ;;  %1416 = vmatprep.subr.bf16.mxu1 %v2394_v60  ;;  %v2924_v59 = vpack.c.bf16 %v52_v53, %v48_v52  ;;  %v47_v60 = vld [vmem:[%s3697_s0 + $0x100] sm:$0xff]  ;;  %v18_v52 = vld [vmem:[%s3697_s0 + $0x18] sm:$0xff] }
  0x3b   :  { %1191 = vmatpush1.bf16.msra.mxu0 %v2396_v61  ;;  %1417 = vmatpush1.bf16.msra.mxu1 %v2397_v62  ;;  %v51_v61 = vld [vmem:[%s3697_s0 + $0x120] sm:$0xff] }
  0x3c   :  { %1192 = vmatprep.subr.bf16.mxu0 %v2398_v63  ;;  %1418 = vmatprep.subr.bf16.mxu1 %v2400_v0  ;;  %v2454_v62 = vld [vmem:[%s3696_s1 + $0x3c4] ss:$20 sps:$4 sm:$0xff]   ;;  %v2457_v63 = vld [vmem:[%s3696_s1 + $0x3cc] ss:$20 sps:$4 sm:$0xff]   ;;  %v2942_v0 = vpack.c.bf16 %v51_v61, %v47_v60  ;;  %v17_v61 = vld [vmem:[%s3697_s0 + $0x10] sm:$0xff] }
  0x3f   :  { %1193 = vmatpush1.bf16.msra.mxu0 %v2402_v1  ;;  %1419 = vmatpush1.bf16.msra.mxu1 %v2403_v2  ;;  %v56_v1 = vld [vmem:[%s3697_s0 + $0x148] sm:$0xff] }
  0x40   :  { %1275 = vmatprep.subr.bf16.mxu0 %v2406_v5  ;;  %1501 = vmatprep.subr.bf16.mxu1 %v2409_v6  ;;  %v60_v2 = vld [vmem:[%s3697_s0 + $0x168] sm:$0xff] }
  0x41   :  { %v2460_v5 = vld [vmem:[%s3696_s1 + $0x3ec] ss:$20 sps:$4 sm:$0xff]   ;;  %v2463_v6 = vld [vmem:[%s3696_s1 + $0x3f4] ss:$20 sps:$4 sm:$0xff]   ;;  %v2968_v10 = vpack.c.bf16 %v60_v2, %v56_v1  ;;  %v2502_v1 = vld [vmem:[%s3696_s1 + $0x3d0] ss:$20 sps:$4 sm:$0xff]  }
  0x42   :  { %1195 = vmatmul.mubr.bf16.vlgmr.msra.gmra.mrb[0].mxu0 %v2769_v8  ;;  %1421 = vmatmul.mubr.bf16.vlgmr.msra.gmra.mrb[0].mxu1 %v2769_v8  ;;  %v26_v2 = vld [vmem:[%s3697_s0 + $0x58] sm:$0xff] }
  0x43   :  { %1276 = vmatpush1.bf16.msra.mxu0 %v2404_v7  ;;  %1502 = vmatpush1.bf16.msra.mxu1 %v2407_v9  ;;  %v2458_v7 = vld [vmem:[%s3696_s1 + $0x3e8] ss:$20 sps:$4 sm:$0xff]   ;;  %v2461_v9 = vld [vmem:[%s3696_s1 + $0x3f0] ss:$20 sps:$4 sm:$0xff]  }
  0x44   :  { %1277 = vmatprep.subr.bf16.mxu0 %v2412_v12  ;;  %1503 = vmatprep.subr.bf16.mxu1 %v2415_v13  ;;  %v59_v12 = vld [vmem:[%s3697_s0 + $0x160] sm:$0xff]  ;;  %v2466_v13 = vld [vmem:[%s3696_s1 + $0x414] ss:$20 sps:$4 sm:$0xff]  }
  0x45   :  { %1204 = vmatprep.mubr.bf16.mxu0 %v2789_v15  ;;  %1430 = vmatprep.mubr.bf16.mxu1 %v2789_v15 }
  0x47   :  { %1278 = vmatpush1.bf16.msra.mxu0 %v2410_v14  ;;  %1504 = vmatpush1.bf16.msra.mxu1 %v2413_v16  ;;  %v2469_v14 = vld [vmem:[%s3696_s1 + $0x41c] ss:$20 sps:$4 sm:$0xff]  }
  0x48   :  { %1279 = vmatprep.subr.bf16.mxu0 %v2418_v19  ;;  %1505 = vmatprep.subr.bf16.mxu1 %v2421_v20  ;;  %v2464_v16 = vld [vmem:[%s3696_s1 + $0x410] ss:$20 sps:$4 sm:$0xff]   ;;  %v2995_v19 = vpack.c.bf16 %v59_v12, %v55_v11  ;;  %v68_v20 = vld [vmem:[%s3697_s0 + $0x1a8] sm:$0xff] }
  0x49   :  { %v3009_v25 = vpack.c.bf16 %v68_v20, %v64_v18  ;;  %v25_v11 = vld [vmem:[%s3697_s0 + $0x50] sm:$0xff]  ;;  %v38_v18 = vld [vmem:[%s3697_s0 + $0xb8] sm:$0xff] }
  0x4a   :  { %1205 = vmatmul.mubr.bf16.gmra.mrb[4].mxu0 %v2816_v23  ;;  %1431 = vmatmul.mubr.bf16.gmra.mrb[4].mxu1 %v2816_v23  ;;  %v29_v12 = vld [vmem:[%s3697_s0 + $0x70] sm:$0xff] }
  0x4b   :  { %1280 = vmatpush1.bf16.msra.mxu0 %v2416_v21  ;;  %1506 = vmatpush1.bf16.msra.mxu1 %v2419_v22  ;;  %v2472_v21 = vld [vmem:[%s3696_s1 + $0x43c] ss:$20 sps:$4 sm:$0xff]   ;;  %v2475_v22 = vld [vmem:[%s3696_s1 + $0x444] ss:$20 sps:$4 sm:$0xff]   ;;  %v2508_v20 = vld [vmem:[%s3696_s1 + $0x1a0] ss:$20 sps:$4 sm:$0xff]  }
  0x4c   :  { %1281 = vmatprep.subr.bf16.mxu0 %v2424_v26  ;;  %1507 = vmatprep.subr.bf16.mxu1 %v2427_v27  ;;  %v2473_v26 = vld [vmem:[%s3696_s1 + $0x440] ss:$20 sps:$4 sm:$0xff]  }
  0x4d   :  { %1214 = vmatprep.mubr.bf16.mxu0 %v2830_v28  ;;  %1440 = vmatprep.mubr.bf16.mxu1 %v2830_v28  ;;  %v63_v27 = vld [vmem:[%s3697_s0 + $0x180] sm:$0xff] }
  0x4f   :  { %1282 = vmatpush1.bf16.msra.mxu0 %v2422_v29  ;;  %1508 = vmatpush1.bf16.msra.mxu1 %v2425_v30  ;;  %v67_v29 = vld [vmem:[%s3697_s0 + $0x1a0] sm:$0xff] }
  0x50   :  { %1283 = vmatprep.subr.bf16.mxu0 %v2430_v33  ;;  %1509 = vmatprep.subr.bf16.mxu1 %v2433_v34  ;;  %v2478_v30 = vld [vmem:[%s3696_s1 + $0x464] ss:$20 sps:$4 sm:$0xff]   ;;  %v3033_v33 = vpack.c.bf16 %v67_v29, %v63_v27  ;;  %v76_v34 = vld [vmem:[%s3697_s0 + $0x1e8] sm:$0xff]  ;;  %v2511_v27 = vld [vmem:[%s3696_s1 + $0x2e0] ss:$20 sps:$4 sm:$0xff]  }
  0x51   :  { %v2512_v29 = vld [vmem:[%s3696_s1 + $0x1c8] ss:$20 sps:$4 sm:$0xff]  }
  0x52   :  { %1215 = vmatmul.mubr.bf16.gmra.mrb[8].mxu0 %v2860_v37  ;;  %1441 = vmatmul.mubr.bf16.gmra.mrb[8].mxu1 %v2860_v37 }
  0x53   :  { %1284 = vmatpush1.bf16.msra.mxu0 %v2428_v35  ;;  %1510 = vmatpush1.bf16.msra.mxu1 %v2431_v36  ;;  %v2476_v35 = vld [vmem:[%s3696_s1 + $0x460] ss:$20 sps:$4 sm:$0xff]   ;;  %v2479_v36 = vld [vmem:[%s3696_s1 + $0x468] ss:$20 sps:$4 sm:$0xff]  }
  0x54   :  { %1285 = vmatprep.subr.bf16.mxu0 %v2436_v40  ;;  %1511 = vmatprep.subr.bf16.mxu1 %v2439_v41  ;;  %v2482_v40 = vld [vmem:[%s3696_s1 + $0x488] ss:$20 sps:$4 sm:$0xff]   ;;  %v2485_v41 = vld [vmem:[%s3696_s1 + $0x490] ss:$20 sps:$4 sm:$0xff]  }
  0x55   :  { %1224 = vmatprep.mubr.bf16.mxu0 %v2877_v43  ;;  %1450 = vmatprep.mubr.bf16.mxu1 %v2877_v43 }
  0x57   :  { %1286 = vmatpush1.bf16.msra.mxu0 %v2434_v42  ;;  %1512 = vmatpush1.bf16.msra.mxu1 %v2437_v44  ;;  %v3056_v42 = vpack.c.bf16 %v76_v34, %v72_v32  ;;  %v71_v44 = vld [vmem:[%s3697_s0 + $0x1c0] sm:$0xff]  ;;  %v37_v32 = vld [vmem:[%s3697_s0 + $0xb0] sm:$0xff]  ;;  %v42_v34 = vld [vmem:[%s3697_s0 + $0xd8] sm:$0xff] }
  0x58   :  { %1287 = vmatprep.subr.bf16.mxu0 %v2442_v47  ;;  %1513 = vmatprep.subr.bf16.mxu1 %v2445_v48  ;;  %v2493_v47 = vld [vmem:[%s3696_s1 + $0x4bc] ss:$20 sps:$4 sm:$0xff]   ;;  %v3083_v53 = vpack.c.bf16 %v75_v45, %v71_v44 }
  0x59   :  { %v2488_v48 = vld [vmem:[%s3696_s1 + $0x4b0] ss:$20 sps:$4 sm:$0xff]  }
  0x5a   :  { %1225 = vmatmul.mubr.bf16.gmra.mrb[12].mxu0 %v2901_v50  ;;  %1451 = vmatmul.mubr.bf16.gmra.mrb[12].mxu1 %v2901_v50  ;;  %v2517_v45 = vld [vmem:[%s3696_s1 + $0xb0] ss:$20 sps:$4 sm:$0xff]  }
  0x5b   :  { %1288 = vmatpush1.bf16.msra.mxu0 %v2440_v49  ;;  %1514 = vmatpush1.bf16.msra.mxu1 %v2443_v54  ;;  %v2491_v49 = vld [vmem:[%s3696_s1 + $0x4b8] ss:$20 sps:$4 sm:$0xff]  }
  0x5c   :  { %1289 = vmatprep.subr.bf16.mxu0 %v2448_v55  ;;  %1515 = vmatprep.subr.bf16.mxu1 %v2451_v56  ;;  %v22_v54 = vld [vmem:[%s3697_s0 + $0x38] sm:$0xff] }
  0x5d   :  { %1234 = vmatprep.mubr.bf16.mxu0 %v2924_v59  ;;  %1460 = vmatprep.mubr.bf16.mxu1 %v2924_v59  ;;  %v2496_v55 = vld [vmem:[%s3696_s1 + $0x4dc] ss:$20 sps:$4 sm:$0xff]   ;;  %v2499_v56 = vld [vmem:[%s3696_s1 + $0x4e4] ss:$20 sps:$4 sm:$0xff]   ;;  %v3100_v60 = vpack.c.bf16 %v22_v54, %v18_v52 }
  0x5e   :  { %v45_v52 = vld [vmem:[%s3697_s0 + $0xf0] sm:$0xff]  ;;  %v50_v54 = vld [vmem:[%s3697_s0 + $0x118] sm:$0xff] }
  0x5f   :  { %1290 = vmatpush1.bf16.msra.mxu0 %v2446_v57  ;;  %1516 = vmatpush1.bf16.msra.mxu1 %v2449_v58  ;;  %v2494_v57 = vld [vmem:[%s3696_s1 + $0x4d8] ss:$20 sps:$4 sm:$0xff]   ;;  %v2497_v58 = vld [vmem:[%s3696_s1 + $0x4e0] ss:$20 sps:$4 sm:$0xff]  }
  0x60   :  { %1291 = vmatprep.subr.bf16.mxu0 %v2454_v62  ;;  %1517 = vmatprep.subr.bf16.mxu1 %v2457_v63  ;;  %v21_v62 = vld [vmem:[%s3697_s0 + $0x30] sm:$0xff] }
  0x61   :  { %v2500_v63 = vld [vmem:[%s3696_s1 + $0x150] ss:$20 sps:$4 sm:$0xff]  }
  0x62   :  { %1235 = vmatmul.mubr.bf16.gmra.mrb[16].mxu0 %v2942_v0  ;;  %1461 = vmatmul.mubr.bf16.gmra.mrb[16].mxu1 %v2942_v0 }
  0x63   :  { %1292 = vmatpush1.bf16.msra.mxu0 %v2452_v3  ;;  %1518 = vmatpush1.bf16.msra.mxu1 %v2455_v4  ;;  %v30_v3 = vld [vmem:[%s3697_s0 + $0x78] sm:$0xff]  ;;  %v3124_v4 = vpack.c.bf16 %v21_v62, %v17_v61  ;;  %v2526_v61 = vld [vmem:[%s3696_s1 + $0x4c0] ss:$20 sps:$4 sm:$0xff]  }
  0x64   :  { %1293 = vmatprep.subr.bf16.mxu0 %v2460_v5  ;;  %1519 = vmatprep.subr.bf16.mxu1 %v2463_v6  ;;  %v2501_v5 = vld [vmem:[%s3696_s1 + $0x10] ss:$20 sps:$4 sm:$0xff]  }
  0x65   :  { %1244 = vmatprep.mubr.bf16.mxu0 %v2968_v10  ;;  %1470 = vmatprep.mubr.bf16.mxu1 %v2968_v10  ;;  %v2503_v6 = vld [vmem:[%s3696_s1 + $0x290] ss:$20 sps:$4 sm:$0xff]  }
  0x67   :  { %1294 = vmatpush1.bf16.msra.mxu0 %v2458_v7  ;;  %1520 = vmatpush1.bf16.msra.mxu1 %v2461_v9  ;;  %v3132_v7 = vpack.c.bf16 %v30_v3, %v26_v2  ;;  %v2504_v9 = vld [vmem:[%s3696_s1 + $0x178] ss:$20 sps:$4 sm:$0xff]   ;;  %v2527_v2 = vld [vmem:[%s3696_s1 + $0x380] ss:$20 sps:$4 sm:$0xff]   ;;  %v2528_v3 = vld [vmem:[%s3696_s1 + $0x268] ss:$20 sps:$4 sm:$0xff]  }
  0x68   :  { %1295 = vmatprep.subr.bf16.mxu0 %v2466_v13  ;;  %1521 = vmatprep.subr.bf16.mxu1 %v2469_v14  ;;  %v2505_v13 = vld [vmem:[%s3696_s1 + $0x38] ss:$20 sps:$4 sm:$0xff]  }
  0x69   :  { %v2506_v14 = vld [vmem:[%s3696_s1 + $0x3f8] ss:$20 sps:$4 sm:$0xff]  }
  0x6a   :  { %1245 = vmatmul.mubr.bf16.gmra.mrb[20].mxu0 %v2995_v19  ;;  %1471 = vmatmul.mubr.bf16.gmra.mrb[20].mxu1 %v2995_v19 }
  0x6b   :  { %1296 = vmatpush1.bf16.msra.mxu0 %v2464_v16  ;;  %1522 = vmatpush1.bf16.msra.mxu1 %v2467_v17  ;;  %v2507_v16 = vld [vmem:[%s3696_s1 + $0x2b8] ss:$20 sps:$4 sm:$0xff]  }
  0x6c   :  { %1297 = vmatprep.subr.bf16.mxu0 %v2472_v21  ;;  %1523 = vmatprep.subr.bf16.mxu1 %v2475_v22  ;;  %v34_v17 = vld [vmem:[%s3697_s0 + $0x98] sm:$0xff]  ;;  %v2510_v21 = vld [vmem:[%s3696_s1 + $0x420] ss:$20 sps:$4 sm:$0xff]   ;;  %v3168_v22 = vpack.c.bf16 %v29_v12, %v25_v11 }
  0x6d   :  { %1254 = vmatprep.mubr.bf16.mxu0 %v3009_v25  ;;  %1480 = vmatprep.mubr.bf16.mxu1 %v3009_v25  ;;  %v58_v11 = vld [vmem:[%s3697_s0 + $0x158] sm:$0xff] }
  0x6e   :  { %v62_v12 = vld [vmem:[%s3697_s0 + $0x178] sm:$0xff] }
  0x6f   :  { %1298 = vmatpush1.bf16.msra.mxu0 %v2470_v24  ;;  %1524 = vmatpush1.bf16.msra.mxu1 %v2473_v26  ;;  %v3170_v24 = vpack.c.bf16 %v38_v18, %v34_v17  ;;  %v2509_v26 = vld [vmem:[%s3696_s1 + $0x60] ss:$20 sps:$4 sm:$0xff]   ;;  %v102_v17 = vpack.c.bf16 %v62_v12, %v58_v11 }
  0x70   :  { %1299 = vmatprep.subr.bf16.mxu0 %v2478_v30  ;;  %1525 = vmatprep.subr.bf16.mxu1 %v2481_v31  ;;  %v2514_v30 = vld [vmem:[%s3696_s1 + $0x448] ss:$20 sps:$4 sm:$0xff]   ;;  %v33_v31 = vld [vmem:[%s3697_s0 + $0x90] sm:$0xff] }
  0x71   :  { %v57_v18 = vld [vmem:[%s3697_s0 + $0x150] sm:$0xff] }
  0x72   :  { %1255 = vmatmul.mubr.bf16.gmra.mrb[24].mxu0 %v3033_v33  ;;  %1481 = vmatmul.mubr.bf16.gmra.mrb[24].mxu1 %v3033_v33 }
  0x73   :  { %1300 = vmatpush1.bf16.msra.mxu0 %v2476_v35  ;;  %1526 = vmatpush1.bf16.msra.mxu1 %v2479_v36  ;;  %v46_v35 = vld [vmem:[%s3697_s0 + $0xf8] sm:$0xff] }
  0x74   :  { %1301 = vmatprep.subr.bf16.mxu0 %v2484_v38  ;;  %1527 = vmatprep.subr.bf16.mxu1 %v2487_v39  ;;  %v2513_v36 = vld [vmem:[%s3696_s1 + $0x88] ss:$20 sps:$4 sm:$0xff]   ;;  %v2516_v39 = vld [vmem:[%s3696_s1 + $0x1f0] ss:$20 sps:$4 sm:$0xff]   ;;  %v3214_v44 = vpack.c.bf16 %v46_v35, %v42_v34 }
  0x75   :  { %1264 = vmatprep.mubr.bf16.mxu0 %v3056_v42  ;;  %1490 = vmatprep.mubr.bf16.mxu1 %v3056_v42  ;;  %v2515_v38 = vld [vmem:[%s3696_s1 + $0x308] ss:$20 sps:$4 sm:$0xff]  }
  0x76   :  { %v78_v34 = vld [vmem:[%s3697_s0 + $0x1f8] sm:$0xff] }
  0x77   :  { %1302 = vmatpush1.bf16.msra.mxu0 %v2482_v40  ;;  %1528 = vmatpush1.bf16.msra.mxu1 %v2485_v41  ;;  %v2518_v40 = vld [vmem:[%s3696_s1 + $0x470] ss:$20 sps:$4 sm:$0xff]   ;;  %v3212_v41 = vpack.c.bf16 %v37_v32, %v33_v31  ;;  %v74_v32 = vld [vmem:[%s3697_s0 + $0x1d8] sm:$0xff] }
  0x78   :  { %1303 = vmatprep.subr.bf16.mxu0 %v2490_v46  ;;  %1529 = vmatprep.subr.bf16.mxu1 %v2493_v47  ;;  %v2519_v46 = vld [vmem:[%s3696_s1 + $0x330] ss:$20 sps:$4 sm:$0xff]   ;;  %v2520_v47 = vld [vmem:[%s3696_s1 + $0x218] ss:$20 sps:$4 sm:$0xff]  }
  0x79   :  { %v69_v31 = vld [vmem:[%s3697_s0 + $0x1b0] sm:$0xff] }
  0x7a   :  { %1265 = vmatmul.mubr.bf16.gmra.mrb[28].mxu0 %v3083_v53  ;;  %1491 = vmatmul.mubr.bf16.gmra.mrb[28].mxu1 %v3083_v53 }
  0x7b   :  { %1304 = vmatpush1.bf16.msra.mxu0 %v2488_v48  ;;  %1530 = vmatpush1.bf16.msra.mxu1 %v2491_v49  ;;  %v2522_v48 = vld [vmem:[%s3696_s1 + $0x498] ss:$20 sps:$4 sm:$0xff]   ;;  %v41_v49 = vld [vmem:[%s3697_s0 + $0xd0] sm:$0xff] }
  0x7c   :  { %1305 = vmatprep.subr.bf16.mxu0 %v2496_v55  ;;  %1531 = vmatprep.subr.bf16.mxu1 %v2499_v56  ;;  %v54_v55 = vld [vmem:[%s3697_s0 + $0x138] sm:$0xff]  ;;  %v3256_v62 = vpack.c.bf16 %v45_v52, %v41_v49 }
  0x7d   :  { %1307 = vmatprep.mubr.bf16.mxu0 %v3100_v60  ;;  %1533 = vmatprep.mubr.bf16.mxu1 %v3100_v60  ;;  %v2521_v56 = vld [vmem:[%s3696_s1 + $0xd8] ss:$20 sps:$4 sm:$0xff]  }
  0x7f   :  { %1306 = vmatpush1.bf16.msra.mxu0 %v2494_v57  ;;  %1532 = vmatpush1.bf16.msra.mxu1 %v2497_v58  ;;  %v2523_v57 = vld [vmem:[%s3696_s1 + $0x358] ss:$20 sps:$4 sm:$0xff]   ;;  %v2524_v58 = vld [vmem:[%s3696_s1 + $0x240] ss:$20 sps:$4 sm:$0xff]  }
  0x80   :  { %2052 = vmatprep.subr.bf16.mxu0 %v2500_v63  ;;  %2116 = vmatprep.subr.bf16.mxu1 %v2502_v1  ;;  %v3258_v63 = vpack.c.bf16 %v54_v55, %v50_v54  ;;  %v2525_v1 = vld [vmem:[%s3696_s1 + $0x100] ss:$20 sps:$4 sm:$0xff]  }
  0x82   :  { %1308 = vmatmul.mubr.bf16.vlgmr.msra.gmra.mrb[0].mxu0 %v3124_v4  ;;  %1534 = vmatmul.mubr.bf16.vlgmr.msra.gmra.mrb[0].mxu1 %v3124_v4 }
  0x83   :  { %2053 = vmatpush3.bf16.msra.mxu0 %v2501_v5  ;;  %2117 = vmatpush3.bf16.msra.mxu1 %v2503_v6  ;;  %v2530_v5 = vld [vmem:[%s3696_s1 + $0x4e8] ss:$20 sps:$4 sm:$0xff]   ;;  %v49_v6 = vld [vmem:[%s3697_s0 + $0x110] sm:$0xff] }
  0x84   :  { %1317 = vmatprep.mubr.bf16.mxu0 %v3132_v7  ;;  %1543 = vmatprep.mubr.bf16.mxu1 %v3132_v7 }
  0x85   :  { %2054 = vmatprep.subr.bf16.mxu0 %v2504_v9  ;;  %2118 = vmatprep.subr.bf16.mxu1 %v2506_v14  ;;  %v53_v9 = vld [vmem:[%s3697_s0 + $0x130] sm:$0xff]  ;;  %v2531_v14 = vld [vmem:[%s3696_s1 + $0x3a8] ss:$20 sps:$4 sm:$0xff]  }
  0x87   :  { %2055 = vmatpush3.bf16.msra.mxu0 %v2505_v13  ;;  %2119 = vmatpush3.bf16.msra.mxu1 %v2507_v16  ;;  %v2529_v13 = vld [vmem:[%s3696_s1 + $0x128] ss:$20 sps:$4 sm:$0xff]   ;;  %v97_v16 = vpack.c.bf16 %v53_v9, %v49_v6 }
  0x88   :  { %2056 = vmatprep.subr.bf16.mxu0 %v2508_v20  ;;  %2120 = vmatprep.subr.bf16.mxu1 %v2510_v21  ;;  %v61_v20 = vld [vmem:[%s3697_s0 + $0x170] sm:$0xff]  ;;  %v66_v21 = vld [vmem:[%s3697_s0 + $0x198] sm:$0xff] }
  0x8a   :  { %1318 = vmatmul.mubr.bf16.gmra.mrb[4].mxu0 %v3168_v22  ;;  %1544 = vmatmul.mubr.bf16.gmra.mrb[4].mxu1 %v3168_v22 }
  0x8b   :  { %1327 = vmatprep.mubr.bf16.mxu0 %v3170_v24  ;;  %1553 = vmatprep.mubr.bf16.mxu1 %v3170_v24 }
  0x8c   :  { %2057 = vmatpush3.bf16.msra.mxu0 %v2509_v26  ;;  %2121 = vmatpush3.bf16.msra.mxu1 %v2511_v27  ;;  %v70_v26 = vld [vmem:[%s3697_s0 + $0x1b8] sm:$0xff]  ;;  %v101_v27 = vpack.c.bf16 %v61_v20, %v57_v18 }
  0x8d   :  { %2058 = vmatprep.subr.bf16.mxu0 %v2512_v29  ;;  %2122 = vmatprep.subr.bf16.mxu1 %v2514_v30  ;;  %v106_v29 = vpack.c.bf16 %v70_v26, %v66_v21  ;;  %v65_v30 = vld [vmem:[%s3697_s0 + $0x190] sm:$0xff] }
  0x8e   :  { %v105_v35 = vpack.c.bf16 %v69_v31, %v65_v30 }
  0x90   :  { %2059 = vmatpush3.bf16.msra.mxu0 %v2513_v36  ;;  %2123 = vmatpush3.bf16.msra.mxu1 %v2515_v38  ;;  %v110_v36 = vpack.c.bf16 %v78_v34, %v74_v32  ;;  %v73_v38 = vld [vmem:[%s3697_s0 + $0x1d0] sm:$0xff] }
  0x91   :  { %2060 = vmatprep.subr.bf16.mxu0 %v2516_v39  ;;  %2124 = vmatprep.subr.bf16.mxu1 %v2518_v40  ;;  %v77_v39 = vld [vmem:[%s3697_s0 + $0x1f0] sm:$0xff] }
  0x92   :  { %1328 = vmatmul.mubr.bf16.gmra.mrb[8].mxu0 %v3212_v41  ;;  %1554 = vmatmul.mubr.bf16.gmra.mrb[8].mxu1 %v3212_v41  ;;  %v109_v40 = vpack.c.bf16 %v77_v39, %v73_v38 }
  0x93   :  { %1337 = vmatprep.mubr.bf16.mxu0 %v3214_v44  ;;  %1563 = vmatprep.mubr.bf16.mxu1 %v3214_v44 }
  0x94   :  { %2061 = vmatpush3.bf16.msra.mxu0 %v2517_v45  ;;  %2125 = vmatpush3.bf16.msra.mxu1 %v2519_v46 }
  0x95   :  { %2062 = vmatprep.subr.bf16.mxu0 %v2520_v47  ;;  %2126 = vmatprep.subr.bf16.mxu1 %v2522_v48 }
  0x98   :  { %2063 = vmatpush3.bf16.msra.mxu0 %v2521_v56  ;;  %2127 = vmatpush3.bf16.msra.mxu1 %v2523_v57 }
  0x99   :  { %2064 = vmatprep.subr.bf16.mxu0 %v2524_v58  ;;  %2128 = vmatprep.subr.bf16.mxu1 %v2526_v61 }
  0x9a   :  { %1338 = vmatmul.mubr.bf16.gmra.mrb[12].mxu0 %v3256_v62  ;;  %1564 = vmatmul.mubr.bf16.gmra.mrb[12].mxu1 %v3256_v62 }
  0x9b   :  { %1347 = vmatprep.mubr.bf16.mxu0 %v3258_v63  ;;  %1573 = vmatprep.mubr.bf16.mxu1 %v3258_v63 }
  0x9c   :  { %2065 = vmatpush3.bf16.msra.mxu0 %v2525_v1  ;;  %2129 = vmatpush3.bf16.msra.mxu1 %v2527_v2 }
  0x9d   :  { %2066 = vmatprep.subr.bf16.mxu0 %v2528_v3  ;;  %2130 = vmatprep.subr.bf16.mxu1 %v2530_v5 }
  0xa0   :  { %2067 = vmatpush3.bf16.msra.mxu0 %v2529_v13  ;;  %2131 = vmatpush3.bf16.msra.mxu1 %v2531_v14 }
  0xa2   :  { %1348 = vmatmul.mubr.bf16.gmra.mrb[16].mxu0 %v97_v16  ;;  %1574 = vmatmul.mubr.bf16.gmra.mrb[16].mxu1 %v97_v16 }
  0xa3   :  { %1357 = vmatprep.mubr.bf16.mxu0 %v102_v17  ;;  %1583 = vmatprep.mubr.bf16.mxu1 %v102_v17 }
  0xaa   :  { %1358 = vmatmul.mubr.bf16.gmra.mrb[20].mxu0 %v101_v27  ;;  %1584 = vmatmul.mubr.bf16.gmra.mrb[20].mxu1 %v101_v27 }
  0xab   :  { %1367 = vmatprep.mubr.bf16.mxu0 %v106_v29  ;;  %1593 = vmatprep.mubr.bf16.mxu1 %v106_v29 }
  0xb2   :  { %1368 = vmatmul.mubr.bf16.gmra.mrb[24].mxu0 %v105_v35  ;;  %1594 = vmatmul.mubr.bf16.gmra.mrb[24].mxu1 %v105_v35 }
  0xb3   :  { %1377 = vmatprep.mubr.bf16.mxu0 %v110_v36  ;;  %1603 = vmatprep.mubr.bf16.mxu1 %v110_v36 }
  0xba   :  { %1378 = vmatmul.mubr.bf16.gmra.mrb[28].mxu0 %v109_v40  ;;  %1604 = vmatmul.mubr.bf16.gmra.mrb[28].mxu1 %v109_v40 }
  0xbb   :  { %1646 = vmatprep.mubr.bf16.mxu0 %v2705_v51  ;;  %1743 = vmatprep.mubr.bf16.mxu1 %v3100_v60  ;;  %v305_v51 = vlaneseq }
  0xc2   :  { %1647 = vmatmul.mubr.bf16.vlgmr.msra.gmra.mrb[32].mxu0 %v2769_v8  ;;  %1744 = vmatmul.mubr.bf16.vlgmr.msra.gmra.mrb[32].mxu1 %v3124_v4  ;;  %v3349_v8 = vshrl.u32 %v305_v51, 7 }
  0xc3   :  { %1654 = vmatprep.mubr.bf16.mxu0 %v2789_v15  ;;  %1751 = vmatprep.mubr.bf16.mxu1 %v3132_v7 }
  0xc4   :  { %v307_v15 = vsub.s32 0, %v3349_v8 }
  0xca   :  { %1655 = vmatmul.mubr.bf16.gmra.mrb[36].mxu0 %v2816_v23  ;;  %1752 = vmatmul.mubr.bf16.gmra.mrb[36].mxu1 %v3168_v22  ;;  %v315_v23 = vsub.s32 2, %v3349_v8 }
  0xcb   :  { %1662 = vmatprep.mubr.bf16.mxu0 %v2830_v28  ;;  %1759 = vmatprep.mubr.bf16.mxu1 %v3170_v24  ;;  %v3356_v28 = vld [vmem:[%s3698_s2] sm:$0x1f] }
  0xd2   :  { %1663 = vmatmul.mubr.bf16.gmra.mrb[40].mxu0 %v2860_v37  ;;  %1760 = vmatmul.mubr.bf16.gmra.mrb[40].mxu1 %v3212_v41  ;;  %v311_v37 = vsub.s32 1, %v3349_v8 }
  0xd3   :  { %1670 = vmatprep.mubr.bf16.mxu0 %v2877_v43  ;;  %1767 = vmatprep.mubr.bf16.mxu1 %v3214_v44  ;;  %v319_v43 = vsub.s32 3, %v3349_v8 }
  0xda   :  { %1671 = vmatmul.mubr.bf16.gmra.mrb[44].mxu0 %v2901_v50  ;;  %1768 = vmatmul.mubr.bf16.gmra.mrb[44].mxu1 %v3256_v62  ;;  %v3361_v50 = vrot.slane %v3356_v28, %v307_v15 }
  0xdb   :  { %1678 = vmatprep.mubr.bf16.mxu0 %v2924_v59  ;;  %1775 = vmatprep.mubr.bf16.mxu1 %v3258_v63  ;;  %v3364_v59 = vrot.slane %v3356_v28, %v315_v23 }
  0xe2   :  { %1679 = vmatmul.mubr.bf16.gmra.mrb[48].mxu0 %v2942_v0  ;;  %1776 = vmatmul.mubr.bf16.gmra.mrb[48].mxu1 %v97_v16  ;;  %v3367_v0 = vrot.slane %v3356_v28, %v311_v37 }
  0xe3   :  { %1686 = vmatprep.mubr.bf16.mxu0 %v2968_v10  ;;  %1783 = vmatprep.mubr.bf16.mxu1 %v102_v17  ;;  %v3370_v10 = vrot.slane %v3356_v28, %v319_v43 }
  0xea   :  { %1687 = vmatmul.mubr.bf16.gmra.mrb[52].mxu0 %v2995_v19  ;;  %1784 = vmatmul.mubr.bf16.gmra.mrb[52].mxu1 %v101_v27 }
  0xeb   :  { %1694 = vmatprep.mubr.bf16.mxu0 %v3009_v25  ;;  %1791 = vmatprep.mubr.bf16.mxu1 %v106_v29 }
  0xf2   :  { %1695 = vmatmul.mubr.bf16.gmra.mrb[56].mxu0 %v3033_v33  ;;  %1792 = vmatmul.mubr.bf16.gmra.mrb[56].mxu1 %v105_v35 }
  0xf3   :  { %1702 = vmatprep.mubr.bf16.mxu0 %v3056_v42  ;;  %1799 = vmatprep.mubr.bf16.mxu1 %v110_v36 }
  0xfa   :  { %1703 = vmatmul.mubr.bf16.gmra.mrb[60].mxu0 %v3083_v53  ;;  %1800 = vmatmul.mubr.bf16.gmra.mrb[60].mxu1 %v109_v40 }
 0x155   :  { %v1309_v19 = vpop.f32.mrb[0].mxu0  ;;  %v1535_v25 = vpop.f32.mrb[0].mxu1 }
 0x156   :  { %v2180_v33 = vadd.f32 %v1309_v19, %v3361_v50  ;;  %v2212_v42 = vadd.f32 %v1535_v25, %v3364_v59  ;;  %v1311_v53 = vpop.f32.mrb[1].mxu0  ;;  %v1537_v60 = vpop.f32.mrb[1].mxu1 }
 0x157   :  { %v2181_v4 = vadd.f32 %v1311_v53, %v3367_v0  ;;  %v2213_v7 = vadd.f32 %v1537_v60, %v3370_v10  ;;  %v1313_v22 = vpop.f32.mrb[2].mxu0  ;;  %v1539_v24 = vpop.f32.mrb[2].mxu1 }
 0x158   :  { %1808 = vst [vmem:[%s3699_s3] sm:$0xff] %v2180_v33  ;;  %1810 = vst [vmem:[%s3699_s3 + $0x10] sm:$0xff] %v2212_v42  ;;  %v2182_v41 = vadd.f32 %v1313_v22, %v3361_v50  ;;  %v2214_v44 = vadd.f32 %v1539_v24, %v3364_v59  ;;  %v1315_v45 = vpop.f32.mrb[3].mxu0  ;;  %v1541_v46 = vpop.f32.mrb[3].mxu1 }
 0x159   :  { %1809 = vst [vmem:[%s3699_s3 + $0x8] sm:$0xff] %v2181_v4  ;;  %1811 = vst [vmem:[%s3699_s3 + $0x18] sm:$0xff] %v2213_v7  ;;  %v2183_v47 = vadd.f32 %v1315_v45, %v3367_v0  ;;  %v2215_v48 = vadd.f32 %v1541_v46, %v3370_v10 }
 0x15a   :  { %1813 = vst [vmem:[%s3699_s3 + $0x28] sm:$0xff] %v2182_v41  ;;  %1815 = vst [vmem:[%s3699_s3 + $0x38] sm:$0xff] %v2214_v44 }
 0x15b   :  { %1814 = vst [vmem:[%s3699_s3 + $0x30] sm:$0xff] %v2183_v47  ;;  %1816 = vst [vmem:[%s3699_s3 + $0x40] sm:$0xff] %v2215_v48 }
 0x15d   :  { %v1319_v49 = vpop.f32.mrb[4].mxu0  ;;  %v1545_v52 = vpop.f32.mrb[4].mxu1 }
 0x15e   :  { %v2184_v54 = vadd.f32 %v1319_v49, %v3361_v50  ;;  %v2216_v55 = vadd.f32 %v1545_v52, %v3364_v59  ;;  %v1321_v56 = vpop.f32.mrb[5].mxu0  ;;  %v1547_v57 = vpop.f32.mrb[5].mxu1 }
 0x15f   :  { %v2185_v58 = vadd.f32 %v1321_v56, %v3367_v0  ;;  %v2217_v61 = vadd.f32 %v1547_v57, %v3370_v10  ;;  %v1323_v62 = vpop.f32.mrb[6].mxu0  ;;  %v1549_v63 = vpop.f32.mrb[6].mxu1 }
 0x160   :  { %1818 = vst [vmem:[%s3699_s3 + $0x50] sm:$0xff] %v2184_v54  ;;  %1820 = vst [vmem:[%s3699_s3 + $0x60] sm:$0xff] %v2216_v55  ;;  %v2186_v1 = vadd.f32 %v1323_v62, %v3361_v50  ;;  %v2218_v2 = vadd.f32 %v1549_v63, %v3364_v59  ;;  %v1325_v3 = vpop.f32.mrb[7].mxu0  ;;  %v1551_v5 = vpop.f32.mrb[7].mxu1 }
 0x161   :  { %1819 = vst [vmem:[%s3699_s3 + $0x58] sm:$0xff] %v2185_v58  ;;  %1821 = vst [vmem:[%s3699_s3 + $0x68] sm:$0xff] %v2217_v61  ;;  %v2187_v6 = vadd.f32 %v1325_v3, %v3367_v0  ;;  %v2219_v9 = vadd.f32 %v1551_v5, %v3370_v10 }
 0x162   :  { %1823 = vst [vmem:[%s3699_s3 + $0x78] sm:$0xff] %v2186_v1  ;;  %1825 = vst [vmem:[%s3699_s3 + $0x88] sm:$0xff] %v2218_v2 }
 0x163   :  { %1824 = vst [vmem:[%s3699_s3 + $0x80] sm:$0xff] %v2187_v6  ;;  %1826 = vst [vmem:[%s3699_s3 + $0x90] sm:$0xff] %v2219_v9 }
 0x165   :  { %v1329_v11 = vpop.f32.mrb[8].mxu0  ;;  %v1555_v12 = vpop.f32.mrb[8].mxu1 }
 0x166   :  { %v2188_v13 = vadd.f32 %v1329_v11, %v3361_v50  ;;  %v2220_v14 = vadd.f32 %v1555_v12, %v3364_v59  ;;  %v1331_v16 = vpop.f32.mrb[9].mxu0  ;;  %v1557_v17 = vpop.f32.mrb[9].mxu1 }
 0x167   :  { %v2189_v18 = vadd.f32 %v1331_v16, %v3367_v0  ;;  %v2221_v20 = vadd.f32 %v1557_v17, %v3370_v10  ;;  %v1333_v21 = vpop.f32.mrb[10].mxu0  ;;  %v1559_v26 = vpop.f32.mrb[10].mxu1 }
 0x168   :  { %1828 = vst [vmem:[%s3699_s3 + $0xa0] sm:$0xff] %v2188_v13  ;;  %1830 = vst [vmem:[%s3699_s3 + $0xb0] sm:$0xff] %v2220_v14  ;;  %v2190_v27 = vadd.f32 %v1333_v21, %v3361_v50  ;;  %v2222_v29 = vadd.f32 %v1559_v26, %v3364_v59  ;;  %v1335_v30 = vpop.f32.mrb[11].mxu0  ;;  %v1561_v31 = vpop.f32.mrb[11].mxu1 }
 0x169   :  { %1829 = vst [vmem:[%s3699_s3 + $0xa8] sm:$0xff] %v2189_v18  ;;  %1831 = vst [vmem:[%s3699_s3 + $0xb8] sm:$0xff] %v2221_v20  ;;  %v2191_v32 = vadd.f32 %v1335_v30, %v3367_v0  ;;  %v2223_v34 = vadd.f32 %v1561_v31, %v3370_v10 }
 0x16a   :  { %1833 = vst [vmem:[%s3699_s3 + $0xc8] sm:$0xff] %v2190_v27  ;;  %1835 = vst [vmem:[%s3699_s3 + $0xd8] sm:$0xff] %v2222_v29 }
 0x16b   :  { %1834 = vst [vmem:[%s3699_s3 + $0xd0] sm:$0xff] %v2191_v32  ;;  %1836 = vst [vmem:[%s3699_s3 + $0xe0] sm:$0xff] %v2223_v34 }
 0x16d   :  { %v1339_v35 = vpop.f32.mrb[12].mxu0  ;;  %v1565_v36 = vpop.f32.mrb[12].mxu1 }
 0x16e   :  { %v2192_v38 = vadd.f32 %v1339_v35, %v3361_v50  ;;  %v2224_v39 = vadd.f32 %v1565_v36, %v3364_v59  ;;  %v1341_v40 = vpop.f32.mrb[13].mxu0  ;;  %v1567_v51 = vpop.f32.mrb[13].mxu1 }
 0x16f   :  { %v2193_v15 = vadd.f32 %v1341_v40, %v3367_v0  ;;  %v2225_v23 = vadd.f32 %v1567_v51, %v3370_v10  ;;  %v1343_v37 = vpop.f32.mrb[14].mxu0  ;;  %v1569_v43 = vpop.f32.mrb[14].mxu1 }
 0x170   :  { %1838 = vst [vmem:[%s3699_s3 + $0xf0] sm:$0xff] %v2192_v38  ;;  %1840 = vst [vmem:[%s3699_s3 + $0x100] sm:$0xff] %v2224_v39  ;;  %v2194_v19 = vadd.f32 %v1343_v37, %v3361_v50  ;;  %v2226_v25 = vadd.f32 %v1569_v43, %v3364_v59  ;;  %v1345_v33 = vpop.f32.mrb[15].mxu0  ;;  %v1571_v42 = vpop.f32.mrb[15].mxu1 }
 0x171   :  { %1839 = vst [vmem:[%s3699_s3 + $0xf8] sm:$0xff] %v2193_v15  ;;  %1841 = vst [vmem:[%s3699_s3 + $0x108] sm:$0xff] %v2225_v23  ;;  %v2195_v53 = vadd.f32 %v1345_v33, %v3367_v0  ;;  %v2227_v60 = vadd.f32 %v1571_v42, %v3370_v10 }
 0x172   :  { %1843 = vst [vmem:[%s3699_s3 + $0x118] sm:$0xff] %v2194_v19  ;;  %1845 = vst [vmem:[%s3699_s3 + $0x128] sm:$0xff] %v2226_v25 }
 0x173   :  { %1844 = vst [vmem:[%s3699_s3 + $0x120] sm:$0xff] %v2195_v53  ;;  %1846 = vst [vmem:[%s3699_s3 + $0x130] sm:$0xff] %v2227_v60 }
 0x175   :  { %v1349_v4 = vpop.f32.mrb[16].mxu0  ;;  %v1575_v7 = vpop.f32.mrb[16].mxu1 }
 0x176   :  { %v2196_v22 = vadd.f32 %v1349_v4, %v3361_v50  ;;  %v2228_v24 = vadd.f32 %v1575_v7, %v3364_v59  ;;  %v1351_v41 = vpop.f32.mrb[17].mxu0  ;;  %v1577_v44 = vpop.f32.mrb[17].mxu1 }
 0x177   :  { %v2197_v45 = vadd.f32 %v1351_v41, %v3367_v0  ;;  %v2229_v46 = vadd.f32 %v1577_v44, %v3370_v10  ;;  %v1353_v47 = vpop.f32.mrb[18].mxu0  ;;  %v1579_v48 = vpop.f32.mrb[18].mxu1 }
 0x178   :  { %1848 = vst [vmem:[%s3699_s3 + $0x140] sm:$0xff] %v2196_v22  ;;  %1850 = vst [vmem:[%s3699_s3 + $0x150] sm:$0xff] %v2228_v24  ;;  %v2198_v49 = vadd.f32 %v1353_v47, %v3361_v50  ;;  %v2230_v52 = vadd.f32 %v1579_v48, %v3364_v59  ;;  %v1355_v54 = vpop.f32.mrb[19].mxu0  ;;  %v1581_v55 = vpop.f32.mrb[19].mxu1 }
 0x179   :  { %1849 = vst [vmem:[%s3699_s3 + $0x148] sm:$0xff] %v2197_v45  ;;  %1851 = vst [vmem:[%s3699_s3 + $0x158] sm:$0xff] %v2229_v46  ;;  %v2199_v56 = vadd.f32 %v1355_v54, %v3367_v0  ;;  %v2231_v57 = vadd.f32 %v1581_v55, %v3370_v10  ;;  %v323_v45 = vsub.s32 4, %v3349_v8 }
 0x17a   :  { %1853 = vst [vmem:[%s3699_s3 + $0x168] sm:$0xff] %v2198_v49  ;;  %1855 = vst [vmem:[%s3699_s3 + $0x178] sm:$0xff] %v2230_v52 }
 0x17b   :  { %1854 = vst [vmem:[%s3699_s3 + $0x170] sm:$0xff] %v2199_v56  ;;  %1856 = vst [vmem:[%s3699_s3 + $0x180] sm:$0xff] %v2231_v57  ;;  %v3630_v8 = vrot.slane %v3356_v28, %v323_v45 }
 0x17d   :  { %v1359_v58 = vpop.f32.mrb[20].mxu0  ;;  %v1585_v61 = vpop.f32.mrb[20].mxu1 }
 0x17e   :  { %v2200_v62 = vadd.f32 %v1359_v58, %v3361_v50  ;;  %v2232_v63 = vadd.f32 %v1585_v61, %v3364_v59  ;;  %v1361_v1 = vpop.f32.mrb[21].mxu0  ;;  %v1587_v2 = vpop.f32.mrb[21].mxu1 }
 0x17f   :  { %v2201_v3 = vadd.f32 %v1361_v1, %v3367_v0  ;;  %v2233_v5 = vadd.f32 %v1587_v2, %v3370_v10  ;;  %v1363_v6 = vpop.f32.mrb[22].mxu0  ;;  %v1589_v9 = vpop.f32.mrb[22].mxu1 }
 0x180   :  { %1858 = vst [vmem:[%s3699_s3 + $0x190] sm:$0xff] %v2200_v62  ;;  %1860 = vst [vmem:[%s3699_s3 + $0x1a0] sm:$0xff] %v2232_v63  ;;  %v2202_v11 = vadd.f32 %v1363_v6, %v3361_v50  ;;  %v2234_v12 = vadd.f32 %v1589_v9, %v3364_v59  ;;  %v1365_v13 = vpop.f32.mrb[23].mxu0  ;;  %v1591_v14 = vpop.f32.mrb[23].mxu1 }
 0x181   :  { %1859 = vst [vmem:[%s3699_s3 + $0x198] sm:$0xff] %v2201_v3  ;;  %1861 = vst [vmem:[%s3699_s3 + $0x1a8] sm:$0xff] %v2233_v5  ;;  %v2203_v16 = vadd.f32 %v1365_v13, %v3367_v0  ;;  %v2235_v17 = vadd.f32 %v1591_v14, %v3370_v10 }
 0x182   :  { %1863 = vst [vmem:[%s3699_s3 + $0x1b8] sm:$0xff] %v2202_v11  ;;  %1865 = vst [vmem:[%s3699_s3 + $0x1c8] sm:$0xff] %v2234_v12 }
 0x183   :  { %1864 = vst [vmem:[%s3699_s3 + $0x1c0] sm:$0xff] %v2203_v16  ;;  %1866 = vst [vmem:[%s3699_s3 + $0x1d0] sm:$0xff] %v2235_v17 }
 0x185   :  { %v1369_v18 = vpop.f32.mrb[24].mxu0  ;;  %v1595_v20 = vpop.f32.mrb[24].mxu1 }
 0x186   :  { %v2204_v21 = vadd.f32 %v1369_v18, %v3361_v50  ;;  %v2236_v26 = vadd.f32 %v1595_v20, %v3364_v59  ;;  %v1371_v27 = vpop.f32.mrb[25].mxu0  ;;  %v1597_v29 = vpop.f32.mrb[25].mxu1 }
 0x187   :  { %v2205_v30 = vadd.f32 %v1371_v27, %v3367_v0  ;;  %v2237_v31 = vadd.f32 %v1597_v29, %v3370_v10  ;;  %v1373_v32 = vpop.f32.mrb[26].mxu0  ;;  %v1599_v34 = vpop.f32.mrb[26].mxu1 }
 0x188   :  { %1868 = vst [vmem:[%s3699_s3 + $0x1e0] sm:$0xff] %v2204_v21  ;;  %1870 = vst [vmem:[%s3699_s3 + $0x1f0] sm:$0xff] %v2236_v26  ;;  %v2206_v35 = vadd.f32 %v1373_v32, %v3361_v50  ;;  %v2238_v36 = vadd.f32 %v1599_v34, %v3364_v59  ;;  %v1375_v38 = vpop.f32.mrb[27].mxu0  ;;  %v1601_v39 = vpop.f32.mrb[27].mxu1 }
 0x189   :  { %1869 = vst [vmem:[%s3699_s3 + $0x1e8] sm:$0xff] %v2205_v30  ;;  %1871 = vst [vmem:[%s3699_s3 + $0x1f8] sm:$0xff] %v2237_v31  ;;  %v2207_v40 = vadd.f32 %v1375_v38, %v3367_v0  ;;  %v2239_v51 = vadd.f32 %v1601_v39, %v3370_v10 }
 0x18a   :  { %1873 = vst [vmem:[%s3699_s3 + $0x208] sm:$0xff] %v2206_v35  ;;  %1875 = vst [vmem:[%s3699_s3 + $0x218] sm:$0xff] %v2238_v36 }
 0x18b   :  { %1874 = vst [vmem:[%s3699_s3 + $0x210] sm:$0xff] %v2207_v40  ;;  %1876 = vst [vmem:[%s3699_s3 + $0x220] sm:$0xff] %v2239_v51 }
 0x18d   :  { %v1379_v15 = vpop.f32.mrb[28].mxu0  ;;  %v1605_v23 = vpop.f32.mrb[28].mxu1 }
 0x18e   :  { %v2208_v37 = vadd.f32 %v1379_v15, %v3361_v50  ;;  %v2240_v43 = vadd.f32 %v1605_v23, %v3364_v59  ;;  %v1381_v19 = vpop.f32.mrb[29].mxu0  ;;  %v1607_v25 = vpop.f32.mrb[29].mxu1 }
 0x18f   :  { %v2209_v33 = vadd.f32 %v1381_v19, %v3367_v0  ;;  %v2241_v42 = vadd.f32 %v1607_v25, %v3370_v10  ;;  %v1383_v53 = vpop.f32.mrb[30].mxu0  ;;  %v1609_v60 = vpop.f32.mrb[30].mxu1 }
 0x190   :  { %1878 = vst [vmem:[%s3699_s3 + $0x230] sm:$0xff] %v2208_v37  ;;  %1880 = vst [vmem:[%s3699_s3 + $0x240] sm:$0xff] %v2240_v43  ;;  %v2210_v4 = vadd.f32 %v1383_v53, %v3361_v50  ;;  %v2242_v7 = vadd.f32 %v1609_v60, %v3364_v59  ;;  %v1385_v22 = vpop.f32.mrb[31].mxu0  ;;  %v1611_v24 = vpop.f32.mrb[31].mxu1 }
 0x191   :  { %1879 = vst [vmem:[%s3699_s3 + $0x238] sm:$0xff] %v2209_v33  ;;  %1881 = vst [vmem:[%s3699_s3 + $0x248] sm:$0xff] %v2241_v42  ;;  %v2211_v41 = vadd.f32 %v1385_v22, %v3367_v0  ;;  %v2243_v44 = vadd.f32 %v1611_v24, %v3370_v10 }
 0x192   :  { %1883 = vst [vmem:[%s3699_s3 + $0x258] sm:$0xff] %v2210_v4  ;;  %1885 = vst [vmem:[%s3699_s3 + $0x268] sm:$0xff] %v2242_v7 }
 0x193   :  { %1884 = vst [vmem:[%s3699_s3 + $0x260] sm:$0xff] %v2211_v41  ;;  %1886 = vst [vmem:[%s3699_s3 + $0x270] sm:$0xff] %v2243_v44 }
 0x195   :  { %v2068_v50 = vpop.f32.mrb[32].mxu0  ;;  %v2132_v59 = vpop.f32.mrb[32].mxu1 }
 0x196   :  { %v2069_v0 = vpop.f32.mrb[33].mxu0  ;;  %v2133_v10 = vpop.f32.mrb[33].mxu1 }
 0x197   :  { %v2070_v46 = vadd.f32 %v2069_v0, %v2068_v50  ;;  %v2134_v47 = vadd.f32 %v2133_v10, %v2132_v59  ;;  %v2071_v48 = vpop.f32.mrb[34].mxu0  ;;  %v2135_v49 = vpop.f32.mrb[34].mxu1 }
 0x198   :  { %v2072_v52 = vpop.f32.mrb[35].mxu0  ;;  %v2136_v54 = vpop.f32.mrb[35].mxu1 }
 0x199   :  { %v1649_v55 = vadd.f32 %v2070_v46, %v3630_v8  ;;  %v2073_v56 = vadd.f32 %v2072_v52, %v2071_v48  ;;  %v2137_v57 = vadd.f32 %v2136_v54, %v2135_v49 }
 0x19b   :  { %v1746_v58 = vadd.f32 %v2134_v47, %v1649_v55  ;;  %v1652_v61 = vadd.f32 %v2073_v56, %v3630_v8 }
 0x19d   :  { %1812 = vst [vmem:[%s3699_s3 + $0x20] sm:$0xff] %v1746_v58  ;;  %v1749_v28 = vadd.f32 %v2137_v57, %v1652_v61  ;;  %v2074_v62 = vpop.f32.mrb[36].mxu0  ;;  %v2138_v63 = vpop.f32.mrb[36].mxu1 }
 0x19e   :  { %v2075_v1 = vpop.f32.mrb[37].mxu0  ;;  %v2139_v2 = vpop.f32.mrb[37].mxu1 }
 0x19f   :  { %1817 = vst [vmem:[%s3699_s3 + $0x48] sm:$0xff] %v1749_v28  ;;  %v2076_v3 = vadd.f32 %v2075_v1, %v2074_v62  ;;  %v2140_v5 = vadd.f32 %v2139_v2, %v2138_v63  ;;  %v2077_v6 = vpop.f32.mrb[38].mxu0  ;;  %v2141_v9 = vpop.f32.mrb[38].mxu1 }
 0x1a0   :  { %v2078_v11 = vpop.f32.mrb[39].mxu0  ;;  %v2142_v12 = vpop.f32.mrb[39].mxu1 }
 0x1a1   :  { %v1657_v13 = vadd.f32 %v2076_v3, %v3630_v8  ;;  %v2079_v14 = vadd.f32 %v2078_v11, %v2077_v6  ;;  %v2143_v16 = vadd.f32 %v2142_v12, %v2141_v9 }
 0x1a3   :  { %v1754_v17 = vadd.f32 %v2140_v5, %v1657_v13  ;;  %v1660_v18 = vadd.f32 %v2079_v14, %v3630_v8 }
 0x1a5   :  { %1822 = vst [vmem:[%s3699_s3 + $0x70] sm:$0xff] %v1754_v17  ;;  %v1757_v20 = vadd.f32 %v2143_v16, %v1660_v18  ;;  %v2080_v21 = vpop.f32.mrb[40].mxu0  ;;  %v2144_v26 = vpop.f32.mrb[40].mxu1 }
 0x1a6   :  { %v2081_v27 = vpop.f32.mrb[41].mxu0  ;;  %v2145_v29 = vpop.f32.mrb[41].mxu1 }
 0x1a7   :  { %1827 = vst [vmem:[%s3699_s3 + $0x98] sm:$0xff] %v1757_v20  ;;  %v2082_v30 = vadd.f32 %v2081_v27, %v2080_v21  ;;  %v2146_v31 = vadd.f32 %v2145_v29, %v2144_v26  ;;  %v2083_v32 = vpop.f32.mrb[42].mxu0  ;;  %v2147_v34 = vpop.f32.mrb[42].mxu1 }
 0x1a8   :  { %v2084_v35 = vpop.f32.mrb[43].mxu0  ;;  %v2148_v36 = vpop.f32.mrb[43].mxu1 }
 0x1a9   :  { %v1665_v38 = vadd.f32 %v2082_v30, %v3630_v8  ;;  %v2085_v39 = vadd.f32 %v2084_v35, %v2083_v32  ;;  %v2149_v40 = vadd.f32 %v2148_v36, %v2147_v34 }
 0x1ab   :  { %v1762_v51 = vadd.f32 %v2146_v31, %v1665_v38  ;;  %v1668_v15 = vadd.f32 %v2085_v39, %v3630_v8 }
 0x1ad   :  { %1832 = vst [vmem:[%s3699_s3 + $0xc0] sm:$0xff] %v1762_v51  ;;  %v1765_v23 = vadd.f32 %v2149_v40, %v1668_v15  ;;  %v2086_v37 = vpop.f32.mrb[44].mxu0  ;;  %v2150_v43 = vpop.f32.mrb[44].mxu1 }
 0x1ae   :  { %v2087_v19 = vpop.f32.mrb[45].mxu0  ;;  %v2151_v25 = vpop.f32.mrb[45].mxu1 }
 0x1af   :  { %1837 = vst [vmem:[%s3699_s3 + $0xe8] sm:$0xff] %v1765_v23  ;;  %v2088_v33 = vadd.f32 %v2087_v19, %v2086_v37  ;;  %v2152_v42 = vadd.f32 %v2151_v25, %v2150_v43  ;;  %v2089_v53 = vpop.f32.mrb[46].mxu0  ;;  %v2153_v60 = vpop.f32.mrb[46].mxu1 }
 0x1b0   :  { %v2090_v4 = vpop.f32.mrb[47].mxu0  ;;  %v2154_v7 = vpop.f32.mrb[47].mxu1 }
 0x1b1   :  { %v1673_v22 = vadd.f32 %v2088_v33, %v3630_v8  ;;  %v2091_v24 = vadd.f32 %v2090_v4, %v2089_v53  ;;  %v2155_v41 = vadd.f32 %v2154_v7, %v2153_v60 }
 0x1b3   :  { %v1770_v44 = vadd.f32 %v2152_v42, %v1673_v22  ;;  %v1676_v45 = vadd.f32 %v2091_v24, %v3630_v8 }
 0x1b5   :  { %1842 = vst [vmem:[%s3699_s3 + $0x110] sm:$0xff] %v1770_v44  ;;  %v1773_v50 = vadd.f32 %v2155_v41, %v1676_v45  ;;  %v2092_v59 = vpop.f32.mrb[48].mxu0  ;;  %v2156_v0 = vpop.f32.mrb[48].mxu1 }
 0x1b6   :  { %v2093_v10 = vpop.f32.mrb[49].mxu0  ;;  %v2157_v46 = vpop.f32.mrb[49].mxu1 }
 0x1b7   :  { %1847 = vst [vmem:[%s3699_s3 + $0x138] sm:$0xff] %v1773_v50  ;;  %v2094_v47 = vadd.f32 %v2093_v10, %v2092_v59  ;;  %v2158_v48 = vadd.f32 %v2157_v46, %v2156_v0  ;;  %v2095_v49 = vpop.f32.mrb[50].mxu0  ;;  %v2159_v52 = vpop.f32.mrb[50].mxu1 }
 0x1b8   :  { %v2096_v54 = vpop.f32.mrb[51].mxu0  ;;  %v2160_v55 = vpop.f32.mrb[51].mxu1 }
 0x1b9   :  { %v1681_v56 = vadd.f32 %v2094_v47, %v3630_v8  ;;  %v2097_v57 = vadd.f32 %v2096_v54, %v2095_v49  ;;  %v2161_v58 = vadd.f32 %v2160_v55, %v2159_v52 }
 0x1bb   :  { %v1778_v61 = vadd.f32 %v2158_v48, %v1681_v56  ;;  %v1684_v28 = vadd.f32 %v2097_v57, %v3630_v8 }
 0x1bd   :  { %1852 = vst [vmem:[%s3699_s3 + $0x160] sm:$0xff] %v1778_v61  ;;  %v1781_v62 = vadd.f32 %v2161_v58, %v1684_v28  ;;  %v2098_v63 = vpop.f32.mrb[52].mxu0  ;;  %v2162_v1 = vpop.f32.mrb[52].mxu1 }
 0x1be   :  { %v2099_v2 = vpop.f32.mrb[53].mxu0  ;;  %v2163_v3 = vpop.f32.mrb[53].mxu1 }
 0x1bf   :  { %1857 = vst [vmem:[%s3699_s3 + $0x188] sm:$0xff] %v1781_v62  ;;  %v2100_v5 = vadd.f32 %v2099_v2, %v2098_v63  ;;  %v2164_v6 = vadd.f32 %v2163_v3, %v2162_v1  ;;  %v2101_v9 = vpop.f32.mrb[54].mxu0  ;;  %v2165_v11 = vpop.f32.mrb[54].mxu1 }
 0x1c0   :  { %v2102_v12 = vpop.f32.mrb[55].mxu0  ;;  %v2166_v13 = vpop.f32.mrb[55].mxu1 }
 0x1c1   :  { %v1689_v14 = vadd.f32 %v2100_v5, %v3630_v8  ;;  %v2103_v16 = vadd.f32 %v2102_v12, %v2101_v9  ;;  %v2167_v17 = vadd.f32 %v2166_v13, %v2165_v11 }
 0x1c3   :  { %v1786_v18 = vadd.f32 %v2164_v6, %v1689_v14  ;;  %v1692_v20 = vadd.f32 %v2103_v16, %v3630_v8 }
 0x1c5   :  { %1862 = vst [vmem:[%s3699_s3 + $0x1b0] sm:$0xff] %v1786_v18  ;;  %v1789_v21 = vadd.f32 %v2167_v17, %v1692_v20  ;;  %v2104_v26 = vpop.f32.mrb[56].mxu0  ;;  %v2168_v27 = vpop.f32.mrb[56].mxu1 }
 0x1c6   :  { %v2105_v29 = vpop.f32.mrb[57].mxu0  ;;  %v2169_v30 = vpop.f32.mrb[57].mxu1 }
 0x1c7   :  { %1867 = vst [vmem:[%s3699_s3 + $0x1d8] sm:$0xff] %v1789_v21  ;;  %v2106_v31 = vadd.f32 %v2105_v29, %v2104_v26  ;;  %v2170_v32 = vadd.f32 %v2169_v30, %v2168_v27  ;;  %v2107_v34 = vpop.f32.mrb[58].mxu0  ;;  %v2171_v35 = vpop.f32.mrb[58].mxu1 }
 0x1c8   :  { %v2108_v36 = vpop.f32.mrb[59].mxu0  ;;  %v2172_v38 = vpop.f32.mrb[59].mxu1 }
 0x1c9   :  { %v1697_v39 = vadd.f32 %v2106_v31, %v3630_v8  ;;  %v2109_v40 = vadd.f32 %v2108_v36, %v2107_v34  ;;  %v2173_v51 = vadd.f32 %v2172_v38, %v2171_v35 }
 0x1cb   :  { %v1794_v15 = vadd.f32 %v2170_v32, %v1697_v39  ;;  %v1700_v23 = vadd.f32 %v2109_v40, %v3630_v8 }
 0x1cd   :  { %1872 = vst [vmem:[%s3699_s3 + $0x200] sm:$0xff] %v1794_v15  ;;  %v1797_v37 = vadd.f32 %v2173_v51, %v1700_v23  ;;  %v2110_v43 = vpop.f32.mrb[60].mxu0  ;;  %v2174_v19 = vpop.f32.mrb[60].mxu1 }
 0x1ce   :  { %v2111_v25 = vpop.f32.mrb[61].mxu0  ;;  %v2175_v33 = vpop.f32.mrb[61].mxu1 }
 0x1cf   :  { %1877 = vst [vmem:[%s3699_s3 + $0x228] sm:$0xff] %v1797_v37  ;;  %v2112_v42 = vadd.f32 %v2111_v25, %v2110_v43  ;;  %v2176_v53 = vadd.f32 %v2175_v33, %v2174_v19  ;;  %v2113_v60 = vpop.f32.mrb[62].mxu0  ;;  %v2177_v4 = vpop.f32.mrb[62].mxu1 }
 0x1d0   :  { %v2114_v7 = vpop.f32.mrb[63].mxu0  ;;  %v2178_v22 = vpop.f32.mrb[63].mxu1 }
 0x1d1   :  { %v1705_v24 = vadd.f32 %v2112_v42, %v3630_v8  ;;  %v2115_v41 = vadd.f32 %v2114_v7, %v2113_v60  ;;  %v2179_v44 = vadd.f32 %v2178_v22, %v2177_v4 }
 0x1d3   :  { %v1802_v45 = vadd.f32 %v2176_v53, %v1705_v24  ;;  %v1708_v50 = vadd.f32 %v2115_v41, %v3630_v8 }
 0x1d5   :  { %1882 = vst [vmem:[%s3699_s3 + $0x250] sm:$0xff] %v1802_v45  ;;  %v1805_v59 = vadd.f32 %v2179_v44, %v1708_v50 }
 0x1d7   :  { %1887 = vst [vmem:[%s3699_s3 + $0x278] sm:$0xff] %v1805_v59 }

// kernel: criss_cross_forward.9
= control target key start
LH: loop header
LB: loop body
LE: loop exit
PB: predicated region body
PF: predicated region fallthrough
CT: control target
= control target key end

     0   :  { %s7142_s0 = inlined_call_operand.<no memory space> [shape: f32[1], index: 0, kind: input, shape index: {}]   ;;  %s7143_s1 = inlined_call_operand.vmem [shape: f32[2,8,8,64], index: 1, kind: input, shape index: {}]   ;;  %s7144_s2 = inlined_call_operand.vmem [shape: f32[2,8,8,64], index: 2, kind: input, shape index: {}]   ;;  %s7145_s3 = inlined_call_operand.vmem [shape: f32[2,8,8,512], index: 3, kind: input, shape index: {}]   ;;  %s7146_s4 = inlined_call_operand.vmem [shape: f32[2,8,8,512], index: 4, kind: input, shape index: {}]   ;;  %s7147_s5 = inlined_call_operand.hbm [shape: f32[2,8,8,512], index: 5, kind: output, shape index: {}]  }
   0x1   :  { %10 = sst [smem:[#allocation2]] %s7142_s0 }
   0x2   :  { %11 = vsyncpa [#allocation4], 0 }
   0x3   :  { %13 = vsyncpa [#allocation4 + $0x1], 0  ;;  %s5585_s20 = smov 0   ;;  %s5587_s21 = smov 0  }
   0x4   :  { %s5589_s22 = smov 0   ;;  %s5591_s23 = smov 0  }
   0x5 LB: > { %s5606_s0 = sadd.s32 4294967295, %s5542_s23   ;;  %s5064_s24 = sadd.s32 4294967294, %s5542_s23   ;;  %s5542_s23 = sphi %s5591_s23, %s7297_s23   ;;  %s5538_s22 = sphi %s5589_s22, %s7296_s22   ;;  %s5534_s21 = sphi %s5587_s21, %s7295_s21   ;;  %s5530_s20 = sphi %s5585_s20, %s7294_s20  }
   0x6   : > { %s5610_s25 = sadd.s32 1, %s5542_s23   ;;  %s151_s26 = sadd.s32 1, %s5538_s22 }
   0x7   : > { %s148_s27 = ssub.s32 %s5542_s23, %s5610_s25  ;;  %p161_p0 = scmp.ne.s32.totalorder %s5538_s22, %s5534_s21 }
   0x8   : > { %p149_p1 = scmp.eq.s32.totalorder %s148_s27, 0  ;;  %p162_p2 = scmp.eq.s32.totalorder %s5606_s0, 1 }
   0x9   : > { %p167_p3 = scmp.ne.s32.totalorder %s5534_s21, %s5530_s20  ;;  %p168_p4 = scmp.eq.s32.totalorder %s5064_s24, 1 }
   0xa   : > { %s5621_s28 = scalar_select %p149_p1, %s5538_s22, %s151_s26  }
   0xb   : > { %p5623_p5 = por %p162_p2, %p161_p0  ;;  %p5627_p6 = por %p168_p4, %p167_p3 }
   0xc   : > { %p5067_p7 = scmp.ge.s32.totalorder %s5542_s23, 1  ;;  %p221_p8 = scmp.lt.s32.totalorder %s5542_s23, 3 }
   0xe   : > { %p222_p9 = pnand %p5067_p7, %p221_p8 }
  0x10   : > { %225 = sbr.rel (%p222_p9) target bundleno = 1311 (0x51f), region = 40 }
  0x17   : > { %p264_p10 = scmp.lt.s32.totalorder %s5606_s0, 1  ;;  %v417_v0 = vlaneseq  ;;  %v5544_v1 = vmov 0.0   ;;  %v5545_v2 = vmov 1983009808   ;;  %v5546_v5 = vmov 1934713408  }
  0x18   : > { %5287 = vmatprep.subr.bf16.mxu0 %v5544_v1  ;;  %v415_v3 = vunpack.c.l.s4 %v5545_v2  ;;  %5293 = vmatprep.subr.bf16.mxu1 %v5544_v1  ;;  %v432_v6 = vunpack.c.l.s4 %v5546_v5  ;;  %vm5547_vm0 = vmmov 0   ;;  %v7148_v9 = vmov 0   ;;  %s4278_s18 = sld [smem:[#allocation2]]  ;;  %s261_s19 = sand.u32 1, %s5534_s21  }
  0x19   : > { %s5637_s6 = scalar_select %p264_p10, %s5606_s0, 1  ;;  %v5639_v4 = vshrl.u32 %v417_v0, 7  ;;  %5289 = vmatprep.mubr.msk.bf16.mxu0 %vm5547_vm0, %v5544_v1  ;;  %5295 = vmatprep.mubr.msk.bf16.mxu1 %vm5547_vm0, %v5544_v1  ;;  %v5645_v7 = vand.u32 127, %v417_v0  ;;  %vm1019_vm2 = vcmask 523264   ;;  %vm1756_vm3 = vcmask 64512  }
  0x1a   : > { %v416_v8 = vunpack.c.0.s8 %v415_v3  ;;  %5430 = vset.pattern.permute.xlu0 %v7148_v9  ;;  %5429 = vset.pattern.permute.xlu1 %v7148_v9  ;;  %v433_v14 = vunpack.c.0.s8 %v432_v6  ;;  %vm2672_vm4 = vcmask 1043456   ;;  %s5254_s8 = sshll.u32 %s5606_s0, 12  ;;  %s7101_s12 = scalar_lea.sflag [#allocation4], %s261_s19 }
  0x1b   : > { %s5234_s7 = sshll.u32 %s5637_s6, 6  ;;  %vm1017_vm1 = vcmp.eq.s32.totalorder %v5639_v4, %v5645_v7  ;;  %s5236_s14 = sshll.u32 %s5637_s6, 8 }
  0x1c   : > { %s268_s10 = scalar_lea.vmem %s7143_s1, %s5234_s7  ;;  %s273_s13 = scalar_lea.vmem %s7144_s2, %s5234_s7  ;;  %v5665_v13 = vsub.s32 %v416_v8, %v5639_v4  ;;  %v5694_v28 = vsub.s32 %v433_v14, %v5639_v4 }
  0x1d   : > { %v5658_v10 = vld [vmem:[%s273_s13] sm:$0xff]  ;;  %v5660_v11 = vld [vmem:[%s273_s13 + $0x8] sm:$0xff]  ;;  %v5662_v12 = vld [vmem:[%s273_s13 + $0x10] sm:$0xff]  ;;  %s6045_s17 = scalar_lea.vmem %s7145_s3, %s5236_s14  ;;  %s6797_s27 = scalar_lea.vmem %s7146_s4, %s5236_s14 }
  0x1e   : > { %v5667_v15 = vld [vmem:[%s273_s13 + $0x18] sm:$0xff]  ;;  %v5669_v16 = vld [vmem:[%s273_s13 + $0x20] sm:$0xff]  ;;  %v5671_v17 = vld [vmem:[%s273_s13 + $0x28] sm:$0xff]  ;;  %s6809_s6 = sshll.u32 %s261_s19, 8  ;;  %s7091_s11 = scalar_lea.hbm %s7147_s5, %s5254_s8 }
  0x1f   : > { %v5673_v18 = vld [vmem:[%s273_s13 + $0x30] sm:$0xff]  ;;  %v5675_v19 = vld [vmem:[%s273_s13 + $0x38] sm:$0xff]  ;;  %v5081_v20 = vpack.c.bf16 %v5669_v16, %v5658_v10  ;;  %v5083_v21 = vpack.c.bf16 %v5671_v17, %v5660_v11  ;;  %v5681_v22 = vld [vmem:[%s268_s10] sm:$0xff]  ;;  %s6837_s7 = scalar_lea.vmem [#allocation3], %s6809_s6  ;;  %s5549_s14 = smov [#allocation3]  }
  0x20   : > { %v5082_v23 = vpack.c.bf16 %v5673_v18, %v5662_v12  ;;  %v5084_v24 = vpack.c.bf16 %v5675_v19, %v5667_v15  ;;  %v5687_v25 = vld [vmem:[%s268_s10 + $0x8] sm:$0xff]  ;;  %v5689_v26 = vld [vmem:[%s268_s10 + $0x10] sm:$0xff]  ;;  %v5691_v27 = vld [vmem:[%s268_s10 + $0x18] sm:$0xff]  ;;  %s4966_s9 = sshll.u32 %s6837_s7, 4  ;;  %s5484_s15 = sshll.u32 %s5549_s14, 4  ;;  %s7093_s9 = int_to_ptr.vmem [resolvable:$true] %s4966_s9  ;;  %s5485_s15 = int_to_ptr.vmem [resolvable:$false] %s5484_s15 }
  0x21   : > { %v512_v29 = vrot.slane %v5081_v20, %v5665_v13  ;;  %v546_v30 = vrot.slane %v5083_v21, %v5665_v13  ;;  %v5698_v31 = vld [vmem:[%s268_s10 + $0x20] sm:$0xff]  ;;  %v5700_v32 = vld [vmem:[%s268_s10 + $0x28] sm:$0xff]  ;;  %v5702_v33 = vld [vmem:[%s268_s10 + $0x30] sm:$0xff]  ;;  %s5480_s13 = scalar_lea.vmem %s7093_s9, 4096  ;;  %s5486_s16 = scalar_lea.vmem %s5485_s15, 8192 }
  0x22   : > { %v520_v34 = vrot.slane %v5082_v23, %v5665_v13  ;;  %v554_v35 = vrot.slane %v5084_v24, %v5665_v13  ;;  %v5706_v36 = vld [vmem:[%s268_s10 + $0x38] sm:$0xff]  ;;  %v5077_v37 = vpack.c.bf16 %v5698_v31, %v5681_v22  ;;  %v5078_v38 = vpack.c.bf16 %v5702_v33, %v5689_v26  ;;  %p5481_p11 = scmp.ne.s32.totalorder %s7093_s9, %s5480_s13  ;;  %p5487_p0 = scmp.lt.s32.totalorder %s7093_s9, %s5485_s15 }
  0x23   : > { %v5079_v39 = vpack.c.bf16 %v5700_v32, %v5687_v25  ;;  %v5080_v40 = vpack.c.bf16 %v5706_v36, %v5691_v27  ;;  %p5488_p1 = scmp.lt.s32.totalorder %s5486_s16, %s5480_s13 }
  0x24   : > { %v521_v41 = vcombine.low %v512_v29, %v520_v34  ;;  %v555_v42 = vcombine.low %v546_v30, %v554_v35  ;;  %v420_v43 = vrot.slane %v5077_v37, %v5665_v13  ;;  %v428_v44 = vrot.slane %v5078_v38, %v5665_v13  ;;  %p5482_p12 = pnand %p5481_p11, %p5623_p5 }
  0x25   : > { %v454_v45 = vrot.slane %v5079_v39, %v5665_v13  ;;  %v462_v46 = vrot.slane %v5080_v40, %v5665_v13  ;;  %v522_v60 = vcombine.high %v512_v29, %v520_v34  ;;  %v556_v61 = vcombine.high %v546_v30, %v554_v35  ;;  %p5489_p2 = por %p5488_p1, %p5487_p0 }
  0x26   : > { %v529_v47 = vrot.slane %v521_v41, %v5694_v28  ;;  %v563_v48 = vrot.slane %v555_v42, %v5694_v28  ;;  %v429_v49 = vcombine.low %v420_v43, %v428_v44  ;;  %v430_v37 = vcombine.high %v420_v43, %v428_v44  ;;  %p5483_p13 = pneg %p5482_p12 }
  0x27   : > { %v463_v50 = vcombine.low %v454_v45, %v462_v46  ;;  %v536_v14 = vrot.slane %v522_v60, %v5694_v28  ;;  %v570_v20 = vrot.slane %v556_v61, %v5694_v28  ;;  %v464_v38 = vcombine.high %v454_v45, %v462_v46 }
  0x28   : > { %v575_v51 = vpack.i.b16 %v563_v48, %v529_v47  ;;  %v576_v52 = vshrl.u32 %v529_v47, 16  ;;  %v577_v53 = vshrl.u32 %v563_v48, 16  ;;  %v437_v54 = vrot.slane %v429_v49, %v5694_v28  ;;  %p5490_p3 = pnand %p5489_p2, %p5483_p13 }
  0x29   : > { %v471_v55 = vrot.slane %v463_v50, %v5694_v28  ;;  %v537_v56 = vcombine.high %v529_v47, %v7148_v9  ;;  %v571_v57 = vcombine.high %v563_v48, %v7148_v9  ;;  %v588_v34 = vshrl.u32 %v536_v14, 16 }
  0x2a   : > { %v1024_v58 = vsel %vm1019_vm2, %v575_v51, 0  ;;  %v578_v59 = vpack.i.b16 %v577_v53, %v576_v52  ;;  %v484_v62 = vshrl.u32 %v437_v54, 16  ;;  %v445_v24 = vcombine.high %v437_v54, %v7148_v9 }
  0x2b   : > { %5288 = vmatpush3.bf16.xpose.msra.mxu0 %v1024_v58  ;;  %v582_v63 = vshrl.u32 %v537_v56, 16  ;;  %v581_v2 = vpack.i.b16 %v571_v57, %v537_v56  ;;  %v485_v3 = vshrl.u32 %v471_v55, 16  ;;  %v583_v5 = vshrl.u32 %v571_v57, 16 }
  0x2c   : > { %v1070_v0 = vsel %vm1019_vm2, %v578_v59, 0  ;;  %5299 = vmatprep.subr.bf16.mxu0 %v5544_v1  ;;  %v483_v6 = vpack.i.b16 %v471_v55, %v437_v54  ;;  %v479_v29 = vcombine.high %v471_v55, %v7148_v9  ;;  %v589_v35 = vshrl.u32 %v570_v20, 16 }
  0x2d   : > { %5294 = vmatpush3.bf16.xpose.msra.mxu1 %v1070_v0  ;;  %v584_v8 = vpack.i.b16 %v583_v5, %v582_v63  ;;  %v1116_v21 = vsel %vm1019_vm2, %v581_v2, 0  ;;  %v486_v23 = vpack.i.b16 %v485_v3, %v484_v62  ;;  %v587_v39 = vpack.i.b16 %v570_v20, %v536_v14 }
  0x2e   : > { %5305 = vmatprep.subr.bf16.mxu1 %v5544_v1  ;;  %v490_v40 = vshrl.u32 %v445_v24, 16  ;;  %v491_v41 = vshrl.u32 %v479_v29, 16  ;;  %v489_v42 = vpack.i.b16 %v479_v29, %v445_v24  ;;  %v590_v43 = vpack.i.b16 %v589_v35, %v588_v34 }
  0x2f   : > { %v1162_v30 = vsel %vm1019_vm2, %v584_v8, 0  ;;  %v538_v44 = vcombine.high %v536_v14, %v7148_v9  ;;  %v572_v47 = vcombine.high %v570_v20, %v7148_v9  ;;  %v1208_v45 = vsel %vm1019_vm2, %v587_v39, 0 }
  0x30   : > { %v492_v46 = vpack.i.b16 %v491_v41, %v490_v40  ;;  %v444_v48 = vrot.slane %v430_v37, %v5694_v28  ;;  %v478_v49 = vrot.slane %v464_v38, %v5694_v28  ;;  %v1254_v50 = vsel %vm1019_vm2, %v590_v43, 0 }
  0x31   : > { %v594_v51 = vshrl.u32 %v538_v44, 16  ;;  %v595_v52 = vshrl.u32 %v572_v47, 16  ;;  %v593_v53 = vpack.i.b16 %v572_v47, %v538_v44  ;;  %v309_v63 = vpack.c.bf16 %v5658_v10, %v5658_v10 }
  0x32   : > { %5290 = vmatmul.mubr.msk.bf16.vlgmr.msra.gmra.mrb[0].mxu0 %vm1019_vm2, %v483_v6  ;;  %v496_v54 = vshrl.u32 %v444_v48, 16  ;;  %v497_v55 = vshrl.u32 %v478_v49, 16  ;;  %v495_v56 = vpack.i.b16 %v478_v49, %v444_v48  ;;  %v446_v60 = vcombine.high %v444_v48, %v7148_v9 }
  0x33   : > { %5300 = vmatpush3.bf16.xpose.msra.mxu0 %v1116_v21  ;;  %5301 = vmatprep.mubr.msk.bf16.mxu0 %vm5547_vm0, %v5544_v1  ;;  %v596_v57 = vpack.i.b16 %v595_v52, %v594_v51  ;;  %v1300_v58 = vsel %vm1019_vm2, %v593_v53, 0  ;;  %v480_v61 = vcombine.high %v478_v49, %v7148_v9  ;;  %v310_v5 = vpack.c.bf16 %v5660_v11, %v5660_v11 }
  0x34   : > { %5296 = vmatmul.mubr.msk.bf16.vlgmr.msra.gmra.mrb[0].mxu1 %vm1019_vm2, %v486_v23  ;;  %5311 = vmatprep.subr.bf16.mxu0 %v5544_v1  ;;  %v498_v59 = vpack.i.b16 %v497_v55, %v496_v54  ;;  %v502_v0 = vshrl.u32 %v446_v60, 16  ;;  %v1392_v6 = vsel %vm1019_vm2, %v309_v63, 0  ;;  %v311_v10 = vpack.c.bf16 %v5662_v12, %v5662_v12 }
  0x35   : > { %5306 = vmatpush3.bf16.xpose.msra.mxu1 %v1162_v30  ;;  %5307 = vmatprep.mubr.msk.bf16.mxu1 %vm5547_vm0, %v5544_v1  ;;  %v1346_v62 = vsel %vm1019_vm2, %v596_v57, 0  ;;  %v503_v2 = vshrl.u32 %v480_v61, 16  ;;  %v501_v3 = vpack.i.b16 %v480_v61, %v446_v60  ;;  %v1438_v14 = vsel %vm1019_vm2, %v310_v5, 0 }
  0x36   : > { %5317 = vmatprep.subr.bf16.mxu1 %v5544_v1  ;;  %v293_v11 = vpack.c.bf16 %v5681_v22, %v5681_v22  ;;  %v312_v20 = vpack.c.bf16 %v5667_v15, %v5667_v15  ;;  %v1484_v21 = vsel %vm1019_vm2, %v311_v10, 0  ;;  %v294_v23 = vpack.c.bf16 %v5687_v25, %v5687_v25 }
  0x37   : > { %v504_v8 = vpack.i.b16 %v503_v2, %v502_v0  ;;  %v313_v15 = vpack.c.bf16 %v5669_v16, %v5669_v16  ;;  %v295_v22 = vpack.c.bf16 %v5689_v26, %v5689_v26  ;;  %v314_v25 = vpack.c.bf16 %v5671_v17, %v5671_v17 }
  0x38   : > { %v1530_v12 = vsel %vm1019_vm2, %v312_v20, 0  ;;  %v296_v29 = vpack.c.bf16 %v5691_v27, %v5691_v27  ;;  %v315_v17 = vpack.c.bf16 %v5673_v18, %v5673_v18  ;;  %v297_v26 = vpack.c.bf16 %v5698_v31, %v5698_v31 }
  0x39   : > { %v1576_v24 = vsel %vm1019_vm2, %v313_v15, 0  ;;  %v1622_v16 = vsel %vm1019_vm2, %v314_v25, 0  ;;  %v316_v27 = vpack.c.bf16 %v5675_v19, %v5675_v19  ;;  %v298_v34 = vpack.c.bf16 %v5700_v32, %v5700_v32 }
  0x3a   : > { %5302 = vmatmul.mubr.msk.bf16.vlgmr.msra.gmra.mrb[4].mxu0 %vm1019_vm2, %v489_v42  ;;  %v1668_v30 = vsel %vm1019_vm2, %v315_v17, 0  ;;  %v299_v19 = vpack.c.bf16 %v5702_v33, %v5702_v33  ;;  %v300_v31 = vpack.c.bf16 %v5706_v36, %v5706_v36  ;;  %v1018_v32 = vsel %vm1017_vm1, -inf, %v5544_v1 }
  0x3b   : > { %5312 = vmatpush3.bf16.xpose.msra.mxu0 %v1208_v45  ;;  %5313 = vmatprep.mubr.msk.bf16.mxu0 %vm5547_vm0, %v5544_v1  ;;  %v1714_v18 = vsel %vm1019_vm2, %v316_v27, 0 }
  0x3c   : > { %5308 = vmatmul.mubr.msk.bf16.vlgmr.msra.gmra.mrb[4].mxu1 %vm1019_vm2, %v492_v46  ;;  %5323 = vmatprep.subr.bf16.mxu0 %v5544_v1 }
  0x3d   : > { %5318 = vmatpush3.bf16.xpose.msra.mxu1 %v1254_v50  ;;  %5319 = vmatprep.mubr.msk.bf16.mxu1 %vm5547_vm0, %v5544_v1 }
  0x3e   : > { %5329 = vmatprep.subr.bf16.mxu1 %v5544_v1 }
  0x42   : > { %5314 = vmatmul.mubr.msk.bf16.vlgmr.msra.gmra.mrb[8].mxu0 %vm1019_vm2, %v495_v56 }
  0x43   : > { %5324 = vmatpush3.bf16.xpose.msra.mxu0 %v1300_v58  ;;  %5325 = vmatprep.mubr.msk.bf16.mxu0 %vm5547_vm0, %v5544_v1 }
  0x44   : > { %5320 = vmatmul.mubr.msk.bf16.vlgmr.msra.gmra.mrb[8].mxu1 %vm1019_vm2, %v498_v59  ;;  %5335 = vmatprep.subr.bf16.mxu0 %v5544_v1 }
  0x45   : > { %5330 = vmatpush3.bf16.xpose.msra.mxu1 %v1346_v62  ;;  %5331 = vmatprep.mubr.msk.bf16.mxu1 %vm5547_vm0, %v5544_v1 }
  0x46   : > { %5341 = vmatprep.subr.bf16.mxu1 %v5544_v1 }
  0x4a   : > { %5326 = vmatmul.mubr.msk.bf16.vlgmr.msra.gmra.mrb[12].mxu0 %vm1019_vm2, %v501_v3 }
  0x4b   : > { %5336 = vmatpush3.bf16.xpose.msra.mxu0 %v1392_v6  ;;  %5337 = vmatprep.mubr.msk.bf16.mxu0 %vm5547_vm0, %v5544_v1 }
  0x4c   : > { %5332 = vmatmul.mubr.msk.bf16.vlgmr.msra.gmra.mrb[12].mxu1 %vm1019_vm2, %v504_v8  ;;  %5347 = vmatprep.subr.bf16.mxu0 %v5544_v1 }
  0x4d   : > { %5342 = vmatpush3.bf16.xpose.msra.mxu1 %v1438_v14  ;;  %5343 = vmatprep.mubr.msk.bf16.mxu1 %vm5547_vm0, %v5544_v1 }
  0x4e   : > { %5353 = vmatprep.subr.bf16.mxu1 %v5544_v1 }
  0x52   : > { %5338 = vmatmul.mubr.msk.bf16.vlgmr.msra.gmra.mrb[16].mxu0 %vm1019_vm2, %v293_v11 }
  0x53   : > { %5348 = vmatpush3.bf16.xpose.msra.mxu0 %v1484_v21  ;;  %5349 = vmatprep.mubr.msk.bf16.mxu0 %vm5547_vm0, %v5544_v1 }
  0x54   : > { %5344 = vmatmul.mubr.msk.bf16.vlgmr.msra.gmra.mrb[16].mxu1 %vm1019_vm2, %v294_v23  ;;  %5359 = vmatprep.subr.bf16.mxu0 %v5544_v1 }
  0x55   : > { %5354 = vmatpush3.bf16.xpose.msra.mxu1 %v1530_v12  ;;  %5355 = vmatprep.mubr.msk.bf16.mxu1 %vm5547_vm0, %v5544_v1 }
  0x56   : > { %5365 = vmatprep.subr.bf16.mxu1 %v5544_v1 }
  0x5a   : > { %5350 = vmatmul.mubr.msk.bf16.vlgmr.msra.gmra.mrb[20].mxu0 %vm1019_vm2, %v295_v22 }
  0x5b   : > { %5360 = vmatpush3.bf16.xpose.msra.mxu0 %v1576_v24  ;;  %5361 = vmatprep.mubr.msk.bf16.mxu0 %vm5547_vm0, %v5544_v1 }
  0x5c   : > { %5356 = vmatmul.mubr.msk.bf16.vlgmr.msra.gmra.mrb[20].mxu1 %vm1019_vm2, %v296_v29  ;;  %5371 = vmatprep.subr.bf16.mxu0 %v5544_v1 }
  0x5d   : > { %5366 = vmatpush3.bf16.xpose.msra.mxu1 %v1622_v16  ;;  %5367 = vmatprep.mubr.msk.bf16.mxu1 %vm5547_vm0, %v5544_v1 }
  0x5e   : > { %5377 = vmatprep.subr.bf16.mxu1 %v5544_v1 }
  0x62   : > { %5362 = vmatmul.mubr.msk.bf16.vlgmr.msra.gmra.mrb[24].mxu0 %vm1019_vm2, %v297_v26 }
  0x63   : > { %5372 = vmatpush3.bf16.xpose.msra.mxu0 %v1668_v30  ;;  %5373 = vmatprep.mubr.msk.bf16.mxu0 %vm5547_vm0, %v5544_v1 }
  0x64   : > { %5368 = vmatmul.mubr.msk.bf16.vlgmr.msra.gmra.mrb[24].mxu1 %vm1019_vm2, %v298_v34 }
  0x65   : > { %5378 = vmatpush3.bf16.xpose.msra.mxu1 %v1714_v18  ;;  %5379 = vmatprep.mubr.msk.bf16.mxu1 %vm5547_vm0, %v5544_v1 }
  0x6a   : > { %5374 = vmatmul.mubr.msk.bf16.vlgmr.msra.gmra.mrb[28].mxu0 %vm1019_vm2, %v299_v19 }
  0x6b   : > { %2717 = vmatprep.mubr.bf16.mxu0 %v7148_v9 }
  0x6c   : > { %5380 = vmatmul.mubr.msk.bf16.vlgmr.msra.gmra.mrb[28].mxu1 %vm1019_vm2, %v300_v31 }
  0x6d   : > { %2758 = vmatprep.mubr.bf16.mxu1 %v7148_v9 }
 0x105   : > { %v1060_v35 = vpop.f32.mrb[0].mxu0 }
 0x106   : > { %v5848_v37 = vadd.f32 %v1060_v35, %v1018_v32  ;;  %v5291_v33 = vpop.f32.mrb[1].mxu0 }
 0x107   : > { %v1063_v38 = vpop.f32.mrb[2].mxu0  ;;  %v1106_v36 = vpop.f32.mrb[0].mxu1 }
 0x108   : > { %v5850_v39 = vadd.f32 %v1106_v36, %v1018_v32  ;;  %v5292_v40 = vpop.f32.mrb[3].mxu0  ;;  %v5297_v41 = vpop.f32.mrb[1].mxu1  ;;  %v1757_v42 = vsel %vm1756_vm3, %v5848_v37, -inf }
 0x109   : > { %v1109_v43 = vpop.f32.mrb[2].mxu1  ;;  %1758 = vmax.xlane.f32.xlu0 %v1757_v42 }
 0x10a   : > { %v5298_v44 = vpop.f32.mrb[3].mxu1  ;;  %v1760_v1 = vsel %vm1756_vm3, %v5850_v39, -inf }
 0x10d   : > { %1761 = vmax.xlane.f32.xlu0 %v1760_v1  ;;  %v1152_v4 = vpop.f32.mrb[4].mxu0 }
 0x10e   : > { %v5856_v7 = vadd.f32 %v1152_v4, %v1018_v32  ;;  %v5303_v47 = vpop.f32.mrb[5].mxu0 }
 0x10f   : > { %v1155_v45 = vpop.f32.mrb[6].mxu0  ;;  %v1198_v46 = vpop.f32.mrb[4].mxu1 }
 0x110   : > { %v5858_v48 = vadd.f32 %v1198_v46, %v1018_v32  ;;  %v5304_v49 = vpop.f32.mrb[7].mxu0  ;;  %v5309_v50 = vpop.f32.mrb[5].mxu1  ;;  %v1763_v51 = vsel %vm1756_vm3, %v5856_v7, -inf }
 0x111   : > { %v1201_v52 = vpop.f32.mrb[6].mxu1  ;;  %1764 = vmax.xlane.f32.xlu1 %v1763_v51 }
 0x112   : > { %v5310_v53 = vpop.f32.mrb[7].mxu1  ;;  %v1766_v54 = vsel %vm1756_vm3, %v5858_v48, -inf }
 0x115   : > { %1767 = vmax.xlane.f32.xlu1 %v1766_v54  ;;  %v1244_v55 = vpop.f32.mrb[8].mxu0 }
 0x116   : > { %v5864_v56 = vadd.f32 %v1244_v55, %v1018_v32  ;;  %v5315_v57 = vpop.f32.mrb[9].mxu0 }
 0x117   : > { %v1247_v58 = vpop.f32.mrb[10].mxu0  ;;  %v1290_v59 = vpop.f32.mrb[8].mxu1 }
 0x118   : > { %v5866_v60 = vadd.f32 %v1290_v59, %v1018_v32  ;;  %v5316_v61 = vpop.f32.mrb[11].mxu0  ;;  %v5321_v62 = vpop.f32.mrb[9].mxu1  ;;  %v1769_v63 = vsel %vm1756_vm3, %v5864_v56, -inf }
 0x119   : > { %v1293_v0 = vpop.f32.mrb[10].mxu1  ;;  %1770 = vmax.xlane.f32.xlu0 %v1769_v63 }
 0x11a   : > { %v5322_v2 = vpop.f32.mrb[11].mxu1  ;;  %v1772_v3 = vsel %vm1756_vm3, %v5866_v60, -inf }
 0x11b   : > { %1773 = vmax.xlane.f32.xlu1 %v1772_v3 }
 0x11d   : > { %v1336_v5 = vpop.f32.mrb[12].mxu0 }
 0x11e   : > { %v5872_v6 = vadd.f32 %v1336_v5, %v1018_v32  ;;  %v5327_v8 = vpop.f32.mrb[13].mxu0 }
 0x11f   : > { %v1339_v14 = vpop.f32.mrb[14].mxu0  ;;  %v1382_v10 = vpop.f32.mrb[12].mxu1 }
 0x120   : > { %v5874_v11 = vadd.f32 %v1382_v10, %v1018_v32  ;;  %v5328_v20 = vpop.f32.mrb[15].mxu0  ;;  %v5333_v21 = vpop.f32.mrb[13].mxu1  ;;  %v1775_v23 = vsel %vm1756_vm3, %v5872_v6, -inf }
 0x121   : > { %v1385_v12 = vpop.f32.mrb[14].mxu1  ;;  %1776 = vmax.xlane.f32.xlu0 %v1775_v23 }
 0x122   : > { %v5334_v15 = vpop.f32.mrb[15].mxu1  ;;  %v1778_v22 = vsel %vm1756_vm3, %v5874_v11, -inf }
 0x123   : > { %1779 = vmax.xlane.f32.xlu1 %v1778_v22 }
 0x125   : > { %v5880_v25 = vpop.f32.mrb[16].mxu0 }
 0x126   : > { %v5339_v24 = vpop.f32.mrb[17].mxu0  ;;  %v1781_v29 = vsel %vm1756_vm3, %v5880_v25, -inf }
 0x127   : > { %v1431_v16 = vpop.f32.mrb[18].mxu0  ;;  %v5884_v17 = vpop.f32.mrb[16].mxu1  ;;  %1782 = vmax.xlane.f32.xlu0 %v1781_v29 }
 0x128   : > { %v5340_v26 = vpop.f32.mrb[19].mxu0  ;;  %v5345_v27 = vpop.f32.mrb[17].mxu1  ;;  %v1784_v30 = vsel %vm1756_vm3, %v5884_v17, -inf }
 0x129   : > { %v1477_v34 = vpop.f32.mrb[18].mxu1  ;;  %1785 = vmax.xlane.f32.xlu1 %v1784_v30 }
 0x12a   : > { %v5346_v18 = vpop.f32.mrb[19].mxu1 }
 0x12d   : > { %v5888_v19 = vpop.f32.mrb[20].mxu0 }
 0x12e   : > { %v5351_v31 = vpop.f32.mrb[21].mxu0  ;;  %v1787_v32 = vsel %vm1756_vm3, %v5888_v19, -inf }
 0x12f   : > { %v5892_v35 = vpop.f32.mrb[20].mxu1  ;;  %1788 = vmax.xlane.f32.xlu0 %v1787_v32  ;;  %v1523_v33 = vpop.f32.mrb[22].mxu0 }
 0x130   : > { %v5352_v38 = vpop.f32.mrb[23].mxu0  ;;  %v5357_v36 = vpop.f32.mrb[21].mxu1  ;;  %v1790_v40 = vsel %vm1756_vm3, %v5892_v35, -inf }
 0x131   : > { %v1569_v41 = vpop.f32.mrb[22].mxu1  ;;  %1791 = vmax.xlane.f32.xlu1 %v1790_v40 }
 0x132   : > { %v5358_v42 = vpop.f32.mrb[23].mxu1 }
 0x135   : > { %v5896_v43 = vpop.f32.mrb[24].mxu0 }
 0x136   : > { %v5363_v44 = vpop.f32.mrb[25].mxu0  ;;  %v1793_v1 = vsel %vm1756_vm3, %v5896_v43, -inf }
 0x137   : > { %v5900_v4 = vpop.f32.mrb[24].mxu1  ;;  %1794 = vmax.xlane.f32.xlu0 %v1793_v1  ;;  %v1615_v47 = vpop.f32.mrb[26].mxu0 }
 0x138   : > { %v5364_v45 = vpop.f32.mrb[27].mxu0  ;;  %v5369_v46 = vpop.f32.mrb[25].mxu1  ;;  %v1796_v49 = vsel %vm1756_vm3, %v5900_v4, -inf }
 0x139   : > { %v1661_v50 = vpop.f32.mrb[26].mxu1  ;;  %1797 = vmax.xlane.f32.xlu1 %v1796_v49 }
 0x13a   : > { %v5370_v51 = vpop.f32.mrb[27].mxu1 }
 0x13d   : > { %v5904_v52 = vpop.f32.mrb[28].mxu0 }
 0x13e   : > { %v5375_v53 = vpop.f32.mrb[29].mxu0  ;;  %v1799_v54 = vsel %vm1756_vm3, %v5904_v52, -inf }
 0x13f   : > { %v5908_v55 = vpop.f32.mrb[28].mxu1  ;;  %1800 = vmax.xlane.f32.xlu0 %v1799_v54  ;;  %v1707_v57 = vpop.f32.mrb[30].mxu0 }
 0x140   : > { %v5376_v58 = vpop.f32.mrb[31].mxu0  ;;  %v5381_v59 = vpop.f32.mrb[29].mxu1  ;;  %v1802_v61 = vsel %vm1756_vm3, %v5908_v55, -inf }
 0x141   : > { %v1753_v62 = vpop.f32.mrb[30].mxu1  ;;  %1803 = vmax.xlane.f32.xlu1 %v1802_v61 }
 0x142   : > { %v5382_v63 = vpop.f32.mrb[31].mxu1 }
 0x196   : > { %v1759_v0 = vpop.xlane.xlu0 %1758 }
 0x19a   : > { %v1762_v3 = vpop.xlane.xlu0 %1761 }
 0x19e   : > { %v1765_v2 = vpop.xlane.xlu1 %1764 }
 0x19f   : > { %v1805_v20 = vcombine.low %v1759_v0, %v1765_v2  ;;  %v1806_v1 = vcombine.high %v1759_v0, %v1765_v2 }
 0x1a1   : > { %v1813_v22 = vrot.slane %v1805_v20, %v5665_v13  ;;  %v1820_v51 = vrot.slane %v1806_v1, %v5665_v13 }
 0x1a2   : > { %v1768_v5 = vpop.xlane.xlu1 %1767 }
 0x1a3   : > { %v1821_v14 = vcombine.low %v1762_v3, %v1768_v5  ;;  %v1822_v41 = vcombine.high %v1762_v3, %v1768_v5 }
 0x1a5   : > { %v1829_v23 = vrot.slane %v1821_v14, %v5665_v13  ;;  %v1836_v46 = vrot.slane %v1822_v41, %v5665_v13 }
 0x1a6   : > { %v1771_v8 = vpop.xlane.xlu0 %1770 }
 0x1a7   : > { %v1869_v29 = vcombine.low %v1813_v22, %v1829_v23  ;;  %v1870_v47 = vcombine.high %v1813_v22, %v1829_v23  ;;  %v1885_v61 = vcombine.low %v1820_v51, %v1836_v46  ;;  %v1886_v62 = vcombine.high %v1820_v51, %v1836_v46 }
 0x1a8   : > { %v1774_v10 = vpop.xlane.xlu1 %1773 }
 0x1a9   : > { %v1877_v30 = vrot.slane %v1869_v29, %v5694_v28  ;;  %v1884_v57 = vrot.slane %v1870_v47, %v5694_v28  ;;  %v1900_v20 = vrot.slane %v1886_v62, %v5694_v28 }
 0x1ae   : > { %v1777_v21 = vpop.xlane.xlu0 %1776 }
 0x1af   : > { %v1837_v12 = vcombine.low %v1771_v8, %v1777_v21  ;;  %v1838_v42 = vcombine.high %v1771_v8, %v1777_v21 }
 0x1b0   : > { %v1780_v15 = vpop.xlane.xlu1 %1779 }
 0x1b1   : > { %v1853_v24 = vcombine.low %v1774_v10, %v1780_v15  ;;  %v1845_v16 = vrot.slane %v1837_v12, %v5665_v13  ;;  %v1854_v38 = vcombine.high %v1774_v10, %v1780_v15  ;;  %v1852_v49 = vrot.slane %v1838_v42, %v5665_v13 }
 0x1b2   : > { %v1893_v10 = vrot.slane %v1885_v61, %v5694_v28 }
 0x1b3   : > { %v1861_v26 = vrot.slane %v1853_v24, %v5665_v13  ;;  %v1868_v45 = vrot.slane %v1854_v38, %v5665_v13 }
 0x1b4   : > { %v1783_v33 = vpop.xlane.xlu0 %1782 }
 0x1b5   : > { %v1901_v27 = vcombine.low %v1845_v16, %v1861_v26  ;;  %v1902_v44 = vcombine.high %v1845_v16, %v1861_v26  ;;  %v1917_v53 = vcombine.low %v1852_v49, %v1868_v45  ;;  %v1918_v54 = vcombine.high %v1852_v49, %v1868_v45 }
 0x1b6   : > { %v1786_v32 = vpop.xlane.xlu1 %1785 }
 0x1b7   : > { %v1909_v34 = vrot.slane %v1901_v27, %v5694_v28  ;;  %v1916_v50 = vrot.slane %v1902_v44, %v5694_v28  ;;  %v1925_v3 = vrot.slane %v1917_v53, %v5694_v28  ;;  %v1932_v5 = vrot.slane %v1918_v54, %v5694_v28 }
 0x1b9   : > { %v1934_v18 = vcombine.high %v1877_v30, %v1909_v34  ;;  %v1933_v31 = vcombine.low %v1877_v30, %v1909_v34  ;;  %v1936_v63 = vcombine.high %v1884_v57, %v1916_v50  ;;  %v1935_v0 = vcombine.low %v1884_v57, %v1916_v50 }
 0x1ba   : > { %v1937_v12 = vcombine.low %v1893_v10, %v1925_v3  ;;  %v1939_v15 = vcombine.low %v1900_v20, %v1932_v5  ;;  %v1938_v22 = vcombine.high %v1893_v10, %v1925_v3  ;;  %v1940_v27 = vcombine.high %v1900_v20, %v1932_v5 }
 0x1bb   : > { %v5918_v36 = vmax.f32 %v1934_v18, %v1786_v32  ;;  %v5920_v40 = vmax.f32 %v1933_v31, %v1783_v33 }
 0x1bc   : > { %v1789_v58 = vpop.xlane.xlu0 %1788 }
 0x1bd   : > { %2151 = vperm.xlu1 %5429, %v5920_v40   ;;  %2156 = vperm.xlu0 %5430, %v5918_v36   ;;  %v5932_v14 = vmax.f32 %v1935_v0, %v1789_v58 }
 0x1be   : > { %v1792_v59 = vpop.xlane.xlu1 %1791 }
 0x1bf   : > { %v1944_v2 = vmax.f32 %v1936_v63, %v1792_v59  ;;  %v1949_v29 = vcombine.low %v5920_v40, %v5932_v14  ;;  %v1950_v54 = vcombine.high %v5920_v40, %v5932_v14 }
 0x1c1   : > { %v1965_v23 = vcombine.low %v5918_v36, %v1944_v2  ;;  %v1957_v33 = vrot.slane %v1949_v29, %v5665_v13  ;;  %v1966_v46 = vcombine.high %v5918_v36, %v1944_v2  ;;  %v1964_v0 = vrot.slane %v1950_v54, %v5665_v13 }
 0x1c3   : > { %v1973_v34 = vrot.slane %v1965_v23, %v5665_v13  ;;  %v1980_v62 = vrot.slane %v1966_v46, %v5665_v13 }
 0x1c4   : > { %v1795_v8 = vpop.xlane.xlu0 %1794 }
 0x1c5   : > { %v1945_v16 = vmax.f32 %v1937_v12, %v1795_v8  ;;  %v2013_v44 = vcombine.low %v1957_v33, %v1973_v34  ;;  %v2014_v53 = vcombine.high %v1957_v33, %v1973_v34  ;;  %v2029_v40 = vcombine.low %v1964_v0, %v1980_v62 }
 0x1c6   : > { %v1798_v21 = vpop.xlane.xlu1 %1797  ;;  %v2030_v12 = vcombine.high %v1964_v0, %v1980_v62 }
 0x1c7   : > { %v1946_v18 = vmax.f32 %v1938_v22, %v1798_v21  ;;  %v2021_v50 = vrot.slane %v2013_v44, %v5694_v28  ;;  %v2028_v36 = vrot.slane %v2014_v53, %v5694_v28  ;;  %v2037_v20 = vrot.slane %v2029_v40, %v5694_v28 }
 0x1cc   : > { %v1801_v24 = vpop.xlane.xlu0 %1800 }
 0x1cd   : > { %v1947_v26 = vmax.f32 %v1939_v15, %v1801_v24  ;;  %v2044_v24 = vrot.slane %v2030_v12, %v5694_v28 }
 0x1ce   : > { %v1804_v30 = vpop.xlane.xlu1 %1803 }
 0x1cf   : > { %v1981_v31 = vcombine.low %v1945_v16, %v1947_v26  ;;  %v1948_v32 = vmax.f32 %v1940_v27, %v1804_v30  ;;  %v1982_v49 = vcombine.high %v1945_v16, %v1947_v26 }
 0x1d1   : > { %v1997_v38 = vcombine.low %v1946_v18, %v1948_v32  ;;  %v1989_v41 = vrot.slane %v1981_v31, %v5665_v13  ;;  %v1998_v1 = vcombine.high %v1946_v18, %v1948_v32  ;;  %v1996_v63 = vrot.slane %v1982_v49, %v5665_v13 }
 0x1d3   : > { %v2005_v42 = vrot.slane %v1997_v38, %v5665_v13  ;;  %v2012_v57 = vrot.slane %v1998_v1, %v5665_v13 }
 0x1d5   : > { %v2045_v47 = vcombine.low %v1989_v41, %v2005_v42  ;;  %v2046_v45 = vcombine.high %v1989_v41, %v2005_v42  ;;  %v2061_v5 = vcombine.low %v1996_v63, %v2012_v57  ;;  %v2062_v23 = vcombine.high %v1996_v63, %v2012_v57 }
 0x1d7   : > { %v2053_v51 = vrot.slane %v2045_v47, %v5694_v28  ;;  %v2060_v61 = vrot.slane %v2046_v45, %v5694_v28  ;;  %v2069_v10 = vrot.slane %v2061_v5, %v5694_v28  ;;  %v2076_v22 = vrot.slane %v2062_v23, %v5694_v28 }
 0x1d9   : > { %v2078_v58 = vcombine.high %v2021_v50, %v2053_v51  ;;  %v2077_v59 = vcombine.low %v2021_v50, %v2053_v51  ;;  %v2079_v3 = vcombine.low %v2028_v36, %v2060_v61  ;;  %v2080_v8 = vcombine.high %v2028_v36, %v2060_v61 }
 0x1da   : > { %v2081_v21 = vcombine.low %v2037_v20, %v2069_v10  ;;  %v2082_v15 = vcombine.high %v2037_v20, %v2069_v10  ;;  %v2084_v29 = vcombine.high %v2044_v24, %v2076_v22 }
 0x1db   : > { %2092 = vperm.xlu1 %5429, %v2078_v58   ;;  %2087 = vperm.xlu0 %5430, %v2077_v59  }
 0x1df   : > { %2097 = vperm.xlu1 %5429, %v2079_v3   ;;  %2166 = vperm.xlu0 %5430, %v1944_v2   ;;  %v2083_v2 = vcombine.low %v2044_v24, %v2076_v22 }
 0x1e3   : > { %2102 = vperm.xlu1 %5429, %v2080_v8   ;;  %2176 = vperm.xlu0 %5430, %v1946_v18  }
 0x1e7   : > { %2107 = vperm.xlu1 %5429, %v2081_v21   ;;  %2186 = vperm.xlu0 %5430, %v1948_v32  }
 0x1eb   : > { %2112 = vperm.xlu1 %5429, %v2082_v15  }
 0x1ef   : > { %2117 = vperm.xlu1 %5429, %v2083_v2  }
 0x1f3   : > { %2122 = vperm.xlu1 %5429, %v2084_v29  }
 0x1f7   : > { %2161 = vperm.xlu1 %5429, %v5932_v14  }
 0x1fb   : > { %2171 = vperm.xlu1 %5429, %v1945_v16  }
 0x1ff   : > { %2181 = vperm.xlu1 %5429, %v1947_v26  }
 0x23c   : > { %v2152_v27 = vpop.permute.xlu1 %2151  ;;  %v2157_v30 = vpop.permute.xlu0 %2156 }
 0x23d   : > { %v2189_v34 = vsub.f32 %v5880_v25, %v2152_v27  ;;  %v2190_v18 = vsub.f32 %v5884_v17, %v2157_v30 }
 0x23f   : > { %v2197_v31 = vmul.f32 1.442695, %v2189_v34  ;;  %v2199_v32 = vmul.f32 1.442695, %v2190_v18 }
 0x241   : > { %5431 = vpow2.f32 %v2197_v31 }
 0x242   : > { %5433 = vpow2.f32 %v2199_v32 }
 0x24b   : > { %v5961_v33 = vpop.eup %5431 }
 0x24c   : > { %7196 = vst [vmem:[#allocation6_spill] sm:$0xff] %v5961_v33  ;;  %v5963_v38 = vpop.eup %5433  ;;  %v2373_v41 = vsel %vm1756_vm3, %v5961_v33, 0.0 }
 0x24d   : > { %7197 = vst [vmem:[#allocation7_spill] sm:$0xff] %v5963_v38  ;;  %2374 = vadd.xlane.f32.xlu0 %v2373_v41  ;;  %v2376_v14 = vsel %vm1756_vm3, %v5963_v38, 0.0 }
 0x24e   : > { %2377 = vadd.xlane.f32.xlu1 %v2376_v14 }
 0x25a   : > { %v2093_v16 = vpop.permute.xlu1 %2092  ;;  %v2088_v25 = vpop.permute.xlu0 %2087 }
 0x25b   : > { %v2126_v17 = vsub.f32 %v5850_v39, %v2093_v16  ;;  %v2125_v26 = vsub.f32 %v5848_v37, %v2088_v25 }
 0x25d   : > { %v2135_v42 = vmul.f32 1.442695, %v2126_v17  ;;  %v2133_v44 = vmul.f32 1.442695, %v2125_v26 }
 0x25e   : > { %v2098_v1 = vpop.permute.xlu1 %2097  ;;  %v2167_v57 = vpop.permute.xlu0 %2166 }
 0x25f   : > { %5435 = vpow2.f32 %v2135_v42  ;;  %v2127_v47 = vsub.f32 %v5856_v7, %v2098_v1 }
 0x260   : > { %5437 = vpow2.f32 %v2133_v44 }
 0x261   : > { %v2137_v45 = vmul.f32 1.442695, %v2127_v47 }
 0x262   : > { %v2103_v46 = vpop.permute.xlu1 %2102  ;;  %v2177_v0 = vpop.permute.xlu0 %2176 }
 0x263   : > { %5439 = vpow2.f32 %v2137_v45  ;;  %v2128_v49 = vsub.f32 %v5858_v48, %v2103_v46 }
 0x265   : > { %v2139_v50 = vmul.f32 1.442695, %v2128_v49 }
 0x266   : > { %v2108_v51 = vpop.permute.xlu1 %2107  ;;  %v2187_v12 = vpop.permute.xlu0 %2186 }
 0x267   : > { %5441 = vpow2.f32 %v2139_v50  ;;  %v2129_v53 = vsub.f32 %v5864_v56, %v2108_v51  ;;  %v2196_v2 = vsub.f32 %v5908_v55, %v2187_v12  ;;  %v6048_v50 = vld [vmem:[%s6045_s17] sm:$0xff]  ;;  %v6051_v51 = vld [vmem:[%s6045_s17 + $0x8] sm:$0xff] }
 0x268   : > { %7209 = vst [vmem:[#allocation19_spill] sm:$0xff] %v6048_v50  ;;  %7210 = vst [vmem:[#allocation20_spill] sm:$0xff] %v6051_v51 }
 0x269   : > { %v5974_v39 = vpop.eup %5435  ;;  %v2141_v37 = vmul.f32 1.442695, %v2129_v53  ;;  %v6054_v53 = vld [vmem:[%s6045_s17 + $0x20] sm:$0xff] }
 0x26a   : > { %v5976_v54 = vpop.eup %5437  ;;  %v2113_v58 = vpop.permute.xlu1 %2112  ;;  %v2216_v7 = vsel %vm1756_vm3, %v5974_v39, 0.0  ;;  %7211 = vst [vmem:[#allocation21_spill] sm:$0xff] %v6054_v53 }
 0x26b   : > { %5443 = vpow2.f32 %v2141_v37  ;;  %v2130_v59 = vsub.f32 %v5866_v60, %v2113_v58  ;;  %2217 = vadd.xlane.f32.xlu0 %v2216_v7  ;;  %v2213_v48 = vsel %vm1756_vm3, %v5976_v54, 0.0  ;;  %v2192_v60 = vsub.f32 %v5892_v35, %v2167_v57  ;;  %v6057_v37 = vld [vmem:[%s6045_s17 + $0x28] sm:$0xff]  ;;  %v6060_v57 = vld [vmem:[%s6045_s17 + $0x40] sm:$0xff] }
 0x26c   : > { %2214 = vadd.xlane.f32.xlu1 %v2213_v48  ;;  %7212 = vst [vmem:[#allocation22_spill] sm:$0xff] %v6057_v37  ;;  %7213 = vst [vmem:[#allocation23_spill] sm:$0xff] %v6060_v57  ;;  %v6063_v58 = vld [vmem:[%s6045_s17 + $0x48] sm:$0xff]  ;;  %v6066_v7 = vld [vmem:[%s6045_s17 + $0x60] sm:$0xff] }
 0x26d   : > { %v5983_v61 = vpop.eup %5439  ;;  %v2143_v56 = vmul.f32 1.442695, %v2130_v59  ;;  %v2203_v21 = vmul.f32 1.442695, %v2192_v60  ;;  %7214 = vst [vmem:[#allocation24_spill] sm:$0xff] %v6063_v58  ;;  %7215 = vst [vmem:[#allocation25_spill] sm:$0xff] %v6066_v7 }
 0x26e   : > { %v2118_v62 = vpop.permute.xlu1 %2117  ;;  %v2219_v63 = vsel %vm1756_vm3, %v5983_v61, 0.0  ;;  %v6069_v59 = vld [vmem:[%s6045_s17 + $0x68] sm:$0xff]  ;;  %v6072_v48 = vld [vmem:[%s6045_s17 + $0x80] sm:$0xff] }
 0x26f   : > { %5445 = vpow2.f32 %v2143_v56  ;;  %v2131_v36 = vsub.f32 %v5872_v6, %v2118_v62  ;;  %2220 = vadd.xlane.f32.xlu0 %v2219_v63  ;;  %v2194_v6 = vsub.f32 %v5900_v4, %v2177_v0  ;;  %7216 = vst [vmem:[#allocation26_spill] sm:$0xff] %v6069_v59  ;;  %7217 = vst [vmem:[#allocation27_spill] sm:$0xff] %v6072_v48  ;;  %v6075_v56 = vld [vmem:[%s6045_s17 + $0x88] sm:$0xff]  ;;  %v6078_v62 = vld [vmem:[%s6045_s17 + $0xa0] sm:$0xff] }
 0x270   : > { %7218 = vst [vmem:[#allocation28_spill] sm:$0xff] %v6075_v56  ;;  %7219 = vst [vmem:[#allocation29_spill] sm:$0xff] %v6078_v62  ;;  %v6081_v63 = vld [vmem:[%s6045_s17 + $0xa8] sm:$0xff]  ;;  %v6086_v0 = vld [vmem:[%s6045_s17 + $0xc0] sm:$0xff] }
 0x271   : > { %v5988_v3 = vpop.eup %5441  ;;  %v2145_v5 = vmul.f32 1.442695, %v2131_v36  ;;  %7220 = vst [vmem:[#allocation30_spill] sm:$0xff] %v6081_v63  ;;  %v5101_v36 = vpack.c.bf16 %v6072_v48, %v6048_v50  ;;  %7221 = vst [vmem:[#allocation31_spill] sm:$0xff] %v6086_v0  ;;  %v6089_v60 = vld [vmem:[%s6045_s17 + $0xc8] sm:$0xff] }
 0x272   : > { %7198 = vst [vmem:[#allocation8_spill] sm:$0xff] %v5988_v3  ;;  %v2123_v40 = vpop.permute.xlu1 %2122  ;;  %v2222_v8 = vsel %vm1756_vm3, %v5988_v3, 0.0  ;;  %7222 = vst [vmem:[#allocation32_spill] sm:$0xff] %v6089_v60  ;;  %v5104_v12 = vpack.c.bf16 %v6089_v60, %v6063_v58 }
 0x273   : > { %5447 = vpow2.f32 %v2145_v5  ;;  %v2132_v10 = vsub.f32 %v5874_v11, %v2123_v40  ;;  %2223 = vadd.xlane.f32.xlu1 %v2222_v8  ;;  %v2207_v11 = vmul.f32 1.442695, %v2194_v6  ;;  %v345_v5 = vld [vmem:[%s6045_s17 + $0xe0] sm:$0xff]  ;;  %v5102_v40 = vpack.c.bf16 %v6075_v56, %v6051_v51 }
 0x274   : > { %v5105_v8 = vpack.c.bf16 %v6078_v62, %v6054_v53  ;;  %v6102_v6 = vrot.slane %v5101_v36, %v5665_v13  ;;  %v6169_v36 = vld [vmem:[%s6045_s17 + $0xd8] sm:$0xff] }
 0x275   : > { %v5994_v20 = vpop.eup %5443  ;;  %v2147_v23 = vmul.f32 1.442695, %v2132_v10  ;;  %v5106_v10 = vpack.c.bf16 %v6081_v63, %v6057_v37  ;;  %7234 = vst [vmem:[#allocation44_spill] sm:$0xff] %v6169_v36 }
 0x276   : > { %7199 = vst [vmem:[#allocation9_spill] sm:$0xff] %v5994_v20  ;;  %v2162_v15 = vpop.permute.xlu1 %2161  ;;  %v2225_v35 = vsel %vm1756_vm3, %v5994_v20, 0.0 }
 0x277   : > { %5449 = vpow2.f32 %v2147_v23  ;;  %v2191_v22 = vsub.f32 %v5888_v19, %v2162_v15  ;;  %2226 = vadd.xlane.f32.xlu0 %v2225_v35  ;;  %v2211_v19 = vmul.f32 1.442695, %v2196_v2  ;;  %v5103_v23 = vpack.c.bf16 %v6086_v0, %v6060_v57  ;;  %v6203_v0 = vld [vmem:[%s6045_s17 + $0xf8] sm:$0xff] }
 0x278   : > { %5451 = vpow2.f32 %v2203_v21  ;;  %v6099_v21 = vld [vmem:[%s6045_s17 + $0xe8] sm:$0xff]  ;;  %v5107_v15 = vpack.c.bf16 %v345_v5, %v6066_v7  ;;  %v6110_v35 = vrot.slane %v5102_v40, %v5665_v13  ;;  %7239 = vst [vmem:[#allocation49_spill] sm:$0xff] %v6203_v0 }
 0x279   : > { %v6000_v24 = vpop.eup %5445  ;;  %v2201_v29 = vmul.f32 1.442695, %v2191_v22  ;;  %7223 = vst [vmem:[#allocation33_spill] sm:$0xff] %v6099_v21  ;;  %v6113_v22 = vrot.slane %v5105_v8, %v5665_v13  ;;  %v5108_v2 = vpack.c.bf16 %v6099_v21, %v6069_v59  ;;  %v6176_v8 = vld [vmem:[%s6045_s17 + $0xb0] sm:$0xff]  ;;  %v6200_v21 = vld [vmem:[%s6045_s17 + $0x78] sm:$0xff] }
 0x27a   : > { %7200 = vst [vmem:[#allocation10_spill] sm:$0xff] %v6000_v24  ;;  %v2172_v27 = vpop.permute.xlu1 %2171  ;;  %v2228_v4 = vsel %vm1756_vm3, %v6000_v24, 0.0  ;;  %7235 = vst [vmem:[#allocation45_spill] sm:$0xff] %v6176_v8  ;;  %v5116_v62 = vpack.c.bf16 %v6203_v0, %v6200_v21 }
 0x27b   : > { %5453 = vpow2.f32 %v2201_v29  ;;  %v2193_v30 = vsub.f32 %v5896_v43, %v2172_v27  ;;  %2229 = vadd.xlane.f32.xlu1 %v2228_v4  ;;  %v6121_v29 = vld [vmem:[%s6045_s17 + $0x10] sm:$0xff]  ;;  %v6124_v27 = vrot.slane %v5103_v23, %v5665_v13  ;;  %v6127_v4 = vrot.slane %v5104_v12, %v5665_v13  ;;  %7238 = vst [vmem:[#allocation48_spill] sm:$0xff] %v6200_v21 }
 0x27c   : > { %5455 = vpow2.f32 %v2207_v11  ;;  %v6116_v11 = vrot.slane %v5106_v10, %v5665_v13  ;;  %7224 = vst [vmem:[#allocation34_spill] sm:$0xff] %v6121_v29  ;;  %v6179_v10 = vld [vmem:[%s6045_s17 + $0xb8] sm:$0xff]  ;;  %v6182_v23 = vld [vmem:[%s6045_s17 + $0xf0] sm:$0xff]  ;;  %v6258_v0 = vrot.slane %v5116_v62, %v5665_v13 }
 0x27d   : > { %v6006_v34 = vpop.eup %5447  ;;  %v2205_v18 = vmul.f32 1.442695, %v2193_v30  ;;  %v6130_v30 = vrot.slane %v5107_v15, %v5665_v13  ;;  %7236 = vst [vmem:[#allocation46_spill] sm:$0xff] %v6179_v10  ;;  %7237 = vst [vmem:[#allocation47_spill] sm:$0xff] %v6182_v23 }
 0x27e   : > { %7201 = vst [vmem:[#allocation11_spill] sm:$0xff] %v6006_v34  ;;  %v2182_v31 = vpop.permute.xlu1 %2181  ;;  %v2231_v32 = vsel %vm1756_vm3, %v6006_v34, 0.0 }
 0x27f   : > { %5457 = vpow2.f32 %v2205_v18  ;;  %v2195_v55 = vsub.f32 %v5904_v52, %v2182_v31  ;;  %2232 = vadd.xlane.f32.xlu0 %v2231_v32  ;;  %v6136_v18 = vld [vmem:[%s6045_s17 + $0x50] sm:$0xff]  ;;  %v6139_v31 = vld [vmem:[%s6045_s17 + $0x58] sm:$0xff]  ;;  %v6142_v32 = vrot.slane %v5108_v2, %v5665_v13 }
 0x280   : > { %5459 = vpow2.f32 %v2211_v19  ;;  %v6133_v19 = vld [vmem:[%s6045_s17 + $0x18] sm:$0xff]  ;;  %7226 = vst [vmem:[#allocation36_spill] sm:$0xff] %v6136_v18  ;;  %7227 = vst [vmem:[#allocation37_spill] sm:$0xff] %v6139_v31  ;;  %v5112_v2 = vpack.c.bf16 %v6169_v36, %v6139_v31 }
 0x281   : > { %v6011_v41 = vpop.eup %5449  ;;  %v2209_v14 = vmul.f32 1.442695, %v2195_v55  ;;  %7225 = vst [vmem:[#allocation35_spill] sm:$0xff] %v6133_v19  ;;  %v6145_v55 = vld [vmem:[%s6045_s17 + $0x30] sm:$0xff]  ;;  %v809_v40 = vcombine.low %v6116_v11, %v6142_v32 }
 0x282   : > { %7202 = vst [vmem:[#allocation12_spill] sm:$0xff] %v6011_v41  ;;  %v2234_v43 = vsel %vm1756_vm3, %v6011_v41, 0.0  ;;  %v6015_v16 = vpop.eup %5451  ;;  %7228 = vst [vmem:[#allocation38_spill] sm:$0xff] %v6145_v55 }
 0x283   : > { %7203 = vst [vmem:[#allocation13_spill] sm:$0xff] %v6015_v16  ;;  %5461 = vpow2.f32 %v2209_v14  ;;  %2235 = vadd.xlane.f32.xlu1 %v2234_v43  ;;  %v2382_v52 = vsel %vm1756_vm3, %v6015_v16, 0.0  ;;  %v6148_v14 = vld [vmem:[%s6045_s17 + $0x38] sm:$0xff]  ;;  %v6151_v43 = vld [vmem:[%s6045_s17 + $0x90] sm:$0xff] }
 0x284   : > { %7229 = vst [vmem:[#allocation39_spill] sm:$0xff] %v6148_v14  ;;  %7230 = vst [vmem:[#allocation40_spill] sm:$0xff] %v6151_v43  ;;  %v5109_v5 = vpack.c.bf16 %v6151_v43, %v6121_v29 }
 0x285   : > { %v6017_v25 = vpop.eup %5453 }
 0x286   : > { %7204 = vst [vmem:[#allocation14_spill] sm:$0xff] %v6017_v25  ;;  %v2379_v17 = vsel %vm1756_vm3, %v6017_v25, 0.0  ;;  %v6023_v26 = vpop.eup %5455 }
 0x287   : > { %7205 = vst [vmem:[#allocation15_spill] sm:$0xff] %v6023_v26  ;;  %2380 = vadd.xlane.f32.xlu0 %v2379_v17  ;;  %2383 = vadd.xlane.f32.xlu1 %v2382_v52  ;;  %v2388_v1 = vsel %vm1756_vm3, %v6023_v26, 0.0  ;;  %v6154_v17 = vld [vmem:[%s6045_s17 + $0x98] sm:$0xff]  ;;  %v725_v52 = vcombine.low %v6102_v6, %v6124_v27  ;;  %v6206_v26 = vrot.slane %v5109_v5, %v5665_v13 }
 0x288   : > { %7231 = vst [vmem:[#allocation41_spill] sm:$0xff] %v6154_v17  ;;  %v5110_v12 = vpack.c.bf16 %v6154_v17, %v6133_v19  ;;  %v5113_v5 = vpack.c.bf16 %v6176_v8, %v6145_v55 }
 0x289   : > { %v6025_v42 = vpop.eup %5457  ;;  %v6191_v9 = vrot.slane %v725_v52, %v5694_v28 }
 0x28a   : > { %7206 = vst [vmem:[#allocation16_spill] sm:$0xff] %v6025_v42  ;;  %v2385_v44 = vsel %vm1756_vm3, %v6025_v42, 0.0  ;;  %v6031_v47 = vpop.eup %5459  ;;  %v6212_v36 = vrot.slane %v5110_v12, %v5665_v13  ;;  %v6241_v8 = vrot.slane %v5113_v5, %v5665_v13 }
 0x28b   : > { %7207 = vst [vmem:[#allocation17_spill] sm:$0xff] %v6031_v47  ;;  %2386 = vadd.xlane.f32.xlu0 %v2385_v44  ;;  %2389 = vadd.xlane.f32.xlu1 %v2388_v1  ;;  %v2394_v49 = vsel %vm1756_vm3, %v6031_v47, 0.0  ;;  %v741_v44 = vcombine.low %v6110_v35, %v6127_v4  ;;  %v793_v1 = vcombine.low %v6113_v22, %v6130_v30 }
 0x28d   : > { %v6033_v45 = vpop.eup %5461  ;;  %v6194_v47 = vrot.slane %v741_v44, %v5694_v28  ;;  %v6218_v44 = vrot.slane %v5112_v2, %v5665_v13 }
 0x28e   : > { %7208 = vst [vmem:[#allocation18_spill] sm:$0xff] %v6033_v45  ;;  %v2391_v46 = vsel %vm1756_vm3, %v6033_v45, 0.0  ;;  %v6197_v45 = vrot.slane %v793_v1, %v5694_v28 }
 0x28f   : > { %2392 = vadd.xlane.f32.xlu0 %v2391_v46  ;;  %2395 = vadd.xlane.f32.xlu1 %v2394_v49  ;;  %v6163_v46 = vld [vmem:[%s6045_s17 + $0x70] sm:$0xff]  ;;  %v6222_v1 = vcombine.low %v6191_v9, %v6194_v47  ;;  %v877_v60 = vcombine.low %v6212_v36, %v6218_v44 }
 0x290   : > { %7232 = vst [vmem:[#allocation42_spill] sm:$0xff] %v6163_v46  ;;  %v6166_v49 = vld [vmem:[%s6045_s17 + $0xd0] sm:$0xff]  ;;  %v5115_v12 = vpack.c.bf16 %v6182_v23, %v6163_v46 }
 0x291   : > { %7233 = vst [vmem:[#allocation43_spill] sm:$0xff] %v6166_v49  ;;  %v5111_v15 = vpack.c.bf16 %v6166_v49, %v6136_v18  ;;  %v6209_v49 = vrot.slane %v809_v40, %v5694_v28  ;;  %v5114_v40 = vpack.c.bf16 %v6179_v10, %v6148_v14  ;;  %v6255_v43 = vrot.slane %v877_v60, %v5694_v28 }
 0x292   : > { %v6247_v23 = vrot.slane %v5115_v12, %v5665_v13 }
 0x293   : > { %v6215_v52 = vrot.slane %v5111_v15, %v5665_v13  ;;  %v6232_v15 = vcombine.low %v6197_v45, %v6209_v49  ;;  %v6244_v42 = vrot.slane %v5114_v40, %v5665_v13 }
 0x294   : > { %v929_v5 = vcombine.low %v6241_v8, %v6247_v23 }
 0x295   : > { %v861_v2 = vcombine.low %v6206_v26, %v6215_v52  ;;  %v967_v10 = vpack.i.b16 %v6232_v15, %v6222_v1  ;;  %v945_v12 = vcombine.low %v6244_v42, %v6258_v0 }
 0x296   : > { %v6265_v16 = vrot.slane %v929_v5, %v5694_v28 }
 0x297   : > { %v6252_v63 = vrot.slane %v861_v2, %v5694_v28  ;;  %v5134_v40 = vcombine.high %v967_v10, %v967_v10  ;;  %v5133_v48 = vcombine.low %v967_v10, %v967_v10  ;;  %v6273_v62 = vrot.slane %v945_v12, %v5694_v28 }
 0x299   : > { %5137 = vmatprep.subr.msk.bf16.mxu0 %vm2672_vm4, %v5134_v40  ;;  %v6270_v60 = vcombine.low %v6252_v63, %v6255_v43  ;;  %v2674_v2 = vsel %vm2672_vm4, %v5133_v48, 0  ;;  %v6278_v17 = vcombine.low %v6265_v16, %v6273_v62 }
 0x29a   : > { %2686 = vmatpush1.bf16.msra.mxu0 %v2674_v2 }
 0x29b   : > { %v991_v10 = vpack.i.b16 %v6278_v17, %v6270_v60 }
 0x29d   : > { %v5136_v5 = vcombine.high %v991_v10, %v991_v10  ;;  %v5135_v56 = vcombine.low %v991_v10, %v991_v10 }
 0x29f   : > { %5139 = vmatprep.subr.msk.bf16.mxu1 %vm2672_vm4, %v5136_v5  ;;  %v2680_v40 = vsel %vm2672_vm4, %v5135_v56, 0 }
 0x2a0   : > { %2727 = vmatpush1.bf16.msra.mxu1 %v2680_v40 }
 0x2da   : > { %v2375_v46 = vpop.xlane.xlu0 %2374 }
 0x2db   : > { %v2378_v7 = vpop.xlane.xlu1 %2377 }
 0x2f8   : > { %v2218_v12 = vpop.xlane.xlu0 %2217 }
 0x2f9   : > { %v2215_v25 = vpop.xlane.xlu1 %2214 }
 0x2fc   : > { %v2221_v48 = vpop.xlane.xlu0 %2220 }
 0x2fd   : > { %v2237_v18 = vcombine.low %v2215_v25, %v2221_v48  ;;  %v2238_v58 = vcombine.high %v2215_v25, %v2221_v48 }
 0x2ff   : > { %v2245_v56 = vrot.slane %v2237_v18, %v5665_v13  ;;  %v2252_v37 = vrot.slane %v2238_v58, %v5665_v13 }
 0x300   : > { %v2224_v2 = vpop.xlane.xlu1 %2223 }
 0x301   : > { %v2253_v59 = vcombine.low %v2218_v12, %v2224_v2  ;;  %v2254_v57 = vcombine.high %v2218_v12, %v2224_v2 }
 0x303   : > { %v2261_v10 = vrot.slane %v2253_v59, %v5665_v13  ;;  %v2268_v40 = vrot.slane %v2254_v57, %v5665_v13 }
 0x304   : > { %v2227_v21 = vpop.xlane.xlu0 %2226 }
 0x305   : > { %v2301_v29 = vcombine.low %v2245_v56, %v2261_v10  ;;  %v2302_v50 = vcombine.high %v2245_v56, %v2261_v10 }
 0x308   : > { %v2230_v38 = vpop.xlane.xlu1 %2229 }
 0x30c   : > { %v2233_v31 = vpop.xlane.xlu0 %2232 }
 0x30d   : > { %v2269_v55 = vcombine.low %v2227_v21, %v2233_v31  ;;  %v2270_v5 = vcombine.high %v2227_v21, %v2233_v31  ;;  %v2317_v21 = vcombine.low %v2252_v37, %v2268_v40 }
 0x30f   : > { %v2277_v12 = vrot.slane %v2269_v55, %v5665_v13  ;;  %v2284_v2 = vrot.slane %v2270_v5, %v5665_v13  ;;  %v2316_v55 = vrot.slane %v2302_v50, %v5694_v28 }
 0x310   : > { %v2236_v53 = vpop.xlane.xlu1 %2235 }
 0x311   : > { %v2285_v33 = vcombine.low %v2230_v38, %v2236_v53  ;;  %v2286_v14 = vcombine.high %v2230_v38, %v2236_v53  ;;  %v2309_v38 = vrot.slane %v2301_v29, %v5694_v28  ;;  %v2318_v53 = vcombine.high %v2252_v37, %v2268_v40 }
 0x313   : > { %v2293_v25 = vrot.slane %v2285_v33, %v5665_v13  ;;  %v2300_v59 = vrot.slane %v2286_v14, %v5665_v13  ;;  %v2325_v14 = vrot.slane %v2317_v21, %v5694_v28  ;;  %v2332_v50 = vrot.slane %v2318_v53, %v5694_v28 }
 0x314   : > { %v2384_v31 = vpop.xlane.xlu1 %2383  ;;  %v2381_v18 = vpop.xlane.xlu0 %2380 }
 0x315   : > { %v2333_v48 = vcombine.low %v2277_v12, %v2293_v25  ;;  %v2334_v57 = vcombine.high %v2277_v12, %v2293_v25  ;;  %v2349_v41 = vcombine.low %v2284_v2, %v2300_v59  ;;  %v2350_v19 = vcombine.high %v2284_v2, %v2300_v59 }
 0x317   : > { %v2341_v58 = vrot.slane %v2333_v48, %v5694_v28  ;;  %v2348_v10 = vrot.slane %v2334_v57, %v5694_v28  ;;  %v2357_v33 = vrot.slane %v2349_v41, %v5694_v28  ;;  %v2364_v51 = vrot.slane %v2350_v19, %v5694_v28 }
 0x318   : > { %v2390_v5 = vpop.xlane.xlu1 %2389  ;;  %v2387_v56 = vpop.xlane.xlu0 %2386 }
 0x319   : > { %v2365_v12 = vcombine.low %v2309_v38, %v2341_v58  ;;  %v2366_v25 = vcombine.high %v2309_v38, %v2341_v58  ;;  %v2368_v2 = vcombine.high %v2316_v55, %v2348_v10  ;;  %v2367_v59 = vcombine.low %v2316_v55, %v2348_v10 }
 0x31a   : > { %v2370_v29 = vcombine.high %v2325_v14, %v2357_v33  ;;  %v2369_v37 = vcombine.low %v2325_v14, %v2357_v33  ;;  %v2372_v20 = vcombine.high %v2332_v50, %v2364_v51  ;;  %v2371_v19 = vcombine.low %v2332_v50, %v2364_v51 }
 0x31b   : > { %v2397_v40 = vadd.f32 %v2375_v46, %v2365_v12  ;;  %v2398_v48 = vadd.f32 %v2378_v7, %v2366_v25  ;;  %v2400_v34 = vadd.f32 %v2384_v31, %v2368_v2  ;;  %v2399_v57 = vadd.f32 %v2381_v18, %v2367_v59 }
 0x31c   : > { %v2396_v24 = vpop.xlane.xlu1 %2395  ;;  %v2402_v41 = vadd.f32 %v2390_v5, %v2370_v29  ;;  %v2393_v21 = vpop.xlane.xlu0 %2392  ;;  %v2401_v3 = vadd.f32 %v2387_v56, %v2369_v37 }
 0x31d   : > { %5463 = vrcp.f32 %v2397_v40  ;;  %v2404_v38 = vadd.f32 %v2396_v24, %v2372_v20  ;;  %v2403_v58 = vadd.f32 %v2393_v21, %v2371_v19 }
 0x31e   : > { %5465 = vrcp.f32 %v2398_v48 }
 0x31f   : > { %5467 = vrcp.f32 %v2400_v34 }
 0x320   : > { %5469 = vrcp.f32 %v2399_v57 }
 0x321   : > { %5471 = vrcp.f32 %v2402_v41 }
 0x322   : > { %5473 = vrcp.f32 %v2401_v3 }
 0x323   : > { %5475 = vrcp.f32 %v2404_v38 }
 0x324   : > { %5477 = vrcp.f32 %v2403_v58 }
 0x327   : > { %v6300_v7 = vpop.eup %5463 }
 0x328   : > { %v6302_v46 = vpop.eup %5465 }
 0x329   : > { %v6304_v31 = vpop.eup %5467 }
 0x32a   : > { %v6306_v18 = vpop.eup %5469  ;;  %v2429_v53 = vcombine.low %v6302_v46, %v6304_v31  ;;  %v2430_v25 = vcombine.high %v6302_v46, %v6304_v31 }
 0x32b   : > { %v6310_v51 = vpop.eup %5471  ;;  %v2413_v20 = vcombine.low %v6300_v7, %v6306_v18  ;;  %v2414_v29 = vcombine.high %v6300_v7, %v6306_v18 }
 0x32c   : > { %v5474_v24 = vpop.eup %5473  ;;  %v2437_v55 = vrot.slane %v2429_v53, %v5665_v13  ;;  %v2444_v57 = vrot.slane %v2430_v25, %v5665_v13 }
 0x32d   : > { %v6314_v3 = vpop.eup %5475  ;;  %v2421_v34 = vrot.slane %v2413_v20, %v5665_v13  ;;  %v2428_v38 = vrot.slane %v2414_v29, %v5665_v13  ;;  %v993_v29 = vshrl.u32 %v6278_v17, 16 }
 0x32e   : > { %v5478_v10 = vpop.eup %5477  ;;  %v2461_v33 = vcombine.low %v6310_v51, %v6314_v3  ;;  %v2462_v56 = vcombine.high %v6310_v51, %v6314_v3 }
 0x32f   : > { %v2445_v5 = vcombine.low %v5474_v24, %v5478_v10  ;;  %v2446_v14 = vcombine.high %v5474_v24, %v5478_v10  ;;  %v2477_v59 = vcombine.low %v2421_v34, %v2437_v55  ;;  %v2478_v19 = vcombine.high %v2421_v34, %v2437_v55 }
 0x330   : > { %v2469_v12 = vrot.slane %v2461_v33, %v5665_v13  ;;  %v2476_v50 = vrot.slane %v2462_v56, %v5665_v13  ;;  %v969_v34 = vshrl.u32 %v6232_v15, 16  ;;  %v992_v55 = vshrl.u32 %v6270_v60, 16 }
 0x331   : > { %v2453_v2 = vrot.slane %v2445_v5, %v5665_v13  ;;  %v2460_v48 = vrot.slane %v2446_v14, %v5665_v13  ;;  %v2485_v41 = vrot.slane %v2477_v59, %v5694_v28  ;;  %v2492_v5 = vrot.slane %v2478_v19, %v5694_v28 }
 0x332   : > { %v2493_v14 = vcombine.low %v2428_v38, %v2444_v57  ;;  %v968_v59 = vshrl.u32 %v6222_v1, 16  ;;  %v758_v60 = vcombine.high %v6191_v9, %v6194_v47 }
 0x333   : > { %v2509_v37 = vcombine.low %v2453_v2, %v2469_v12  ;;  %v2510_v40 = vcombine.high %v2453_v2, %v2469_v12  ;;  %v2525_v33 = vcombine.low %v2460_v48, %v2476_v50  ;;  %v2526_v2 = vcombine.high %v2460_v48, %v2476_v50 }
 0x335   : > { %v2517_v21 = vrot.slane %v2509_v37, %v5694_v28  ;;  %v2524_v20 = vrot.slane %v2510_v40, %v5694_v28  ;;  %v2533_v25 = vrot.slane %v2525_v33, %v5694_v28  ;;  %v2501_v37 = vrot.slane %v2493_v14, %v5694_v28 }
 0x336   : > { %v2494_v40 = vcombine.high %v2428_v38, %v2444_v57  ;;  %v826_v57 = vcombine.high %v6197_v45, %v6209_v49  ;;  %v726_v45 = vcombine.high %v6102_v6, %v6124_v27  ;;  %v810_v49 = vcombine.high %v6116_v11, %v6142_v32 }
 0x337   : > { %v2542_v58 = vcombine.high %v2485_v41, %v2517_v21  ;;  %v2541_v53 = vcombine.low %v2485_v41, %v2517_v21  ;;  %v2543_v56 = vcombine.low %v2492_v5, %v2524_v20  ;;  %v2544_v12 = vcombine.high %v2492_v5, %v2524_v20 }
 0x338   : > { %v970_v41 = vpack.i.b16 %v969_v34, %v968_v59  ;;  %v994_v21 = vpack.i.b16 %v993_v29, %v992_v55  ;;  %v2545_v19 = vcombine.low %v2501_v37, %v2533_v25  ;;  %v2508_v1 = vrot.slane %v2494_v40, %v5694_v28 }
 0x339   : > { %2556 = vperm.xlu1 %5429, %v2542_v58   ;;  %2551 = vperm.xlu0 %5430, %v2541_v53   ;;  %v2546_v58 = vcombine.high %v2501_v37, %v2533_v25  ;;  %v2540_v53 = vrot.slane %v2526_v2, %v5694_v28  ;;  %v878_v33 = vcombine.high %v6212_v36, %v6218_v44 }
 0x33a   : > { %v5142_v48 = vcombine.high %v970_v41, %v970_v41  ;;  %v5144_v50 = vcombine.high %v994_v21, %v994_v21  ;;  %v930_v6 = vcombine.high %v6241_v8, %v6247_v23  ;;  %v7240_v23 = vmov 0  }
 0x33b   : > { %v2547_v17 = vcombine.low %v2508_v1, %v2540_v53  ;;  %v2548_v15 = vcombine.high %v2508_v1, %v2540_v53  ;;  %v892_v36 = vrot.slane %v878_v33, %v5694_v28 }
 0x33c   : > { %5145 = vmatprep.subr.msk.bf16.mxu0 %vm2672_vm4, %v5142_v48  ;;  %5147 = vmatprep.subr.msk.bf16.mxu1 %vm2672_vm4, %v5144_v50 }
 0x33d   : > { %2561 = vperm.xlu1 %5429, %v2543_v56   ;;  %2566 = vperm.xlu0 %5430, %v2544_v12  }
 0x341   : > { %2571 = vperm.xlu1 %5429, %v2545_v19   ;;  %2576 = vperm.xlu0 %5430, %v2546_v58  }
 0x345   : > { %2581 = vperm.xlu1 %5429, %v2547_v17   ;;  %2586 = vperm.xlu0 %5430, %v2548_v15  }
 0x349   : > { %2607 = vperm.xlu1 %5429, %v6300_v7   ;;  %2612 = vperm.xlu0 %5430, %v6302_v46   ;;  %v894_v7 = vcombine.high %v6252_v63, %v6255_v43  ;;  %v962_v46 = vcombine.high %v6265_v16, %v6273_v62  ;;  %v742_v63 = vcombine.high %v6110_v35, %v6127_v4  ;;  %v975_v4 = vshrl.u32 %v826_v57, 16 }
 0x34a   : > { %v794_v16 = vcombine.high %v6113_v22, %v6130_v30  ;;  %v862_v62 = vcombine.high %v6206_v26, %v6215_v52  ;;  %v946_v35 = vcombine.high %v6244_v42, %v6258_v0  ;;  %v974_v22 = vshrl.u32 %v758_v60, 16 }
 0x34b   : > { %v997_v38 = vpack.i.b16 %v962_v46, %v894_v7  ;;  %v998_v30 = vshrl.u32 %v894_v7, 16  ;;  %v999_v14 = vshrl.u32 %v962_v46, 16  ;;  %v6382_v26 = vrot.slane %v726_v45, %v5694_v28 }
 0x34c   : > { %v6385_v11 = vrot.slane %v742_v63, %v5694_v28  ;;  %v6388_v32 = vrot.slane %v794_v16, %v5694_v28  ;;  %v824_v42 = vrot.slane %v810_v49, %v5694_v28  ;;  %v876_v0 = vrot.slane %v862_v62, %v5694_v28 }
 0x34d   : > { %2617 = vperm.xlu1 %5429, %v6306_v18   ;;  %2622 = vperm.xlu0 %5430, %v6304_v31   ;;  %v5141_v18 = vcombine.low %v970_v41, %v970_v41  ;;  %v5143_v31 = vcombine.low %v994_v21, %v994_v21  ;;  %v5152_v9 = vcombine.high %v997_v38, %v997_v38 }
 0x34e   : > { %v5151_v5 = vcombine.low %v997_v38, %v997_v38  ;;  %v944_v52 = vrot.slane %v930_v6, %v5694_v28  ;;  %v960_v44 = vrot.slane %v946_v35, %v5694_v28  ;;  %v976_v56 = vpack.i.b16 %v975_v4, %v974_v22  ;;  %v7241_v38 = vld [vmem:[#allocation8_spill] sm:$0xff]  ;;  %v7242_v6 = vld [vmem:[#allocation9_spill] sm:$0xff] }
 0x34f   : > { %v1000_v12 = vpack.i.b16 %v999_v14, %v998_v30  ;;  %v827_v34 = vcombine.low %v6388_v32, %v824_v42  ;;  %v895_v55 = vcombine.low %v876_v0, %v892_v36  ;;  %v828_v63 = vcombine.high %v6388_v32, %v824_v42 }
 0x350   : > { %v2890_v2 = vsel %vm2672_vm4, %v5151_v5, 0  ;;  %v963_v29 = vcombine.low %v944_v52, %v960_v44  ;;  %v5158_v40 = vcombine.high %v976_v56, %v976_v56  ;;  %v5157_v21 = vcombine.low %v976_v56, %v976_v56 }
 0x351   : > { %2627 = vperm.xlu1 %5429, %v5474_v24   ;;  %2632 = vperm.xlu0 %5430, %v6310_v51   ;;  %v973_v24 = vpack.i.b16 %v826_v57, %v758_v60  ;;  %v5160_v41 = vcombine.high %v1000_v12, %v1000_v12  ;;  %v5159_v19 = vcombine.low %v1000_v12, %v1000_v12  ;;  %v1004_v46 = vshrl.u32 %v895_v55, 16 }
 0x352   : > { %v1003_v48 = vpack.i.b16 %v963_v29, %v895_v55  ;;  %v2989_v50 = vsel %vm2672_vm4, %v5157_v21, 0  ;;  %v896_v16 = vcombine.high %v876_v0, %v892_v36  ;;  %v987_v0 = vshrl.u32 %v828_v63, 16 }
 0x353   : > { %v5150_v20 = vcombine.high %v973_v24, %v973_v24  ;;  %v5149_v43 = vcombine.low %v973_v24, %v973_v24  ;;  %v2995_v17 = vsel %vm2672_vm4, %v5159_v19, 0 }
 0x354   : > { %v5168_v60 = vcombine.high %v1003_v48, %v1003_v48  ;;  %v5167_v24 = vcombine.low %v1003_v48, %v1003_v48  ;;  %v1010_v36 = vshrl.u32 %v896_v16, 16 }
 0x355   : > { %2637 = vperm.xlu1 %5429, %v5478_v10   ;;  %2642 = vperm.xlu0 %5430, %v6314_v3   ;;  %v2779_v10 = vsel %vm2672_vm4, %v5141_v18, 0  ;;  %v2785_v3 = vsel %vm2672_vm4, %v5143_v31, 0  ;;  %v2884_v25 = vsel %vm2672_vm4, %v5149_v43, 0  ;;  %v1005_v18 = vshrl.u32 %v963_v29, 16 }
 0x356   : > { %v964_v43 = vcombine.high %v944_v52, %v960_v44  ;;  %v7243_v52 = vld [vmem:[#allocation10_spill] sm:$0xff] }
 0x358   : > { %v1009_v22 = vpack.i.b16 %v964_v43, %v896_v16  ;;  %v7253_v16 = vld [vmem:[#allocation21_spill] sm:$0xff] }
 0x35a   : > { %v5183_v12 = vcombine.low %v1009_v22, %v1009_v22 }
 0x3b8   : > { %v2552_v51 = vpop.permute.xlu0 %2551  ;;  %v2557_v27 = vpop.permute.xlu1 %2556 }
 0x3b9   : > { %v2589_v47 = vmul.f32 %v5976_v54, %v2552_v51  ;;  %v2590_v8 = vmul.f32 %v5974_v39, %v2557_v27  ;;  %v759_v39 = vcombine.low %v6382_v26, %v6385_v11 }
 0x3bb   : > { %v2597_v54 = vpack.c.bf16 %v2589_v47, %v2589_v47  ;;  %v2598_v59 = vpack.c.bf16 %v2590_v8, %v2590_v8  ;;  %v979_v53 = vpack.i.b16 %v827_v34, %v759_v39  ;;  %v980_v7 = vshrl.u32 %v759_v39, 16 }
 0x3bc   : > { %v2562_v37 = vpop.permute.xlu1 %2561  ;;  %v2567_v57 = vpop.permute.xlu0 %2566  ;;  %v760_v47 = vcombine.high %v6382_v26, %v6385_v11  ;;  %v5184_v11 = vcombine.high %v1009_v22, %v1009_v22  ;;  %v1011_v8 = vshrl.u32 %v964_v43, 16  ;;  %v353_v43 = vpack.c.bf16 %v7253_v16, %v7253_v16  ;;  %v7256_v22 = vld [vmem:[#allocation37_spill] sm:$0xff] }
 0x3bd   : > { %5138 = vmatmul.mubr.msk.bf16.vlgmr.msra.gmra.mrb[32].mxu0 %vm1756_vm3, %v2597_v54  ;;  %5140 = vmatmul.mubr.msk.bf16.vlgmr.msra.gmra.mrb[32].mxu1 %vm1756_vm3, %v2597_v54  ;;  %v2591_v58 = vmul.f32 %v5983_v61, %v2562_v37  ;;  %v5166_v15 = vcombine.high %v979_v53, %v979_v53  ;;  %v981_v61 = vshrl.u32 %v827_v34, 16  ;;  %v5165_v31 = vcombine.low %v979_v53, %v979_v53 }
 0x3be   : > { %2791 = vmatpush1.bf16.msra.mxu0 %v2779_v10  ;;  %2832 = vmatpush1.bf16.msra.mxu1 %v2785_v3  ;;  %v2592_v51 = vmul.f32 %v7241_v38, %v2567_v57  ;;  %v1006_v3 = vpack.i.b16 %v1005_v18, %v1004_v46  ;;  %v985_v27 = vpack.i.b16 %v828_v63, %v760_v47  ;;  %v986_v42 = vshrl.u32 %v760_v47, 16  ;;  %v7247_v57 = vld [vmem:[#allocation12_spill] sm:$0xff]  ;;  %v7249_v18 = vld [vmem:[#allocation34_spill] sm:$0xff] }
 0x3bf   : > { %2822 = vmatprep.mubr.bf16.mxu0 %v7240_v23  ;;  %2863 = vmatprep.mubr.bf16.mxu1 %v7240_v23  ;;  %v2599_v1 = vpack.c.bf16 %v2591_v58, %v2591_v58  ;;  %v982_v10 = vpack.i.b16 %v981_v61, %v980_v7  ;;  %v3310_v34 = vsel %vm2672_vm4, %v5183_v12, 0  ;;  %v7248_v61 = vld [vmem:[#allocation19_spill] sm:$0xff]  ;;  %v7261_v12 = vld [vmem:[#allocation48_spill] sm:$0xff] }
 0x3c0   : > { %5153 = vmatprep.subr.msk.bf16.mxu0 %vm2672_vm4, %v5150_v20  ;;  %5155 = vmatprep.subr.msk.bf16.mxu1 %vm2672_vm4, %v5152_v9  ;;  %v3094_v20 = vsel %vm2672_vm4, %v5165_v31, 0  ;;  %v3100_v9 = vsel %vm2672_vm4, %v5167_v24, 0  ;;  %v2600_v45 = vpack.c.bf16 %v2592_v51, %v2592_v51  ;;  %v2572_v49 = vpop.permute.xlu1 %2571  ;;  %v5176_v33 = vcombine.high %v1006_v3, %v1006_v3  ;;  %v2577_v32 = vpop.permute.xlu0 %2576 }
 0x3c1   : > { %v5174_v62 = vcombine.high %v982_v10, %v982_v10  ;;  %v5173_v54 = vcombine.low %v982_v10, %v982_v10  ;;  %v5175_v5 = vcombine.low %v1006_v3, %v1006_v3  ;;  %v2593_v35 = vmul.f32 %v7242_v6, %v2572_v49  ;;  %v7250_v3 = vld [vmem:[#allocation22_spill] sm:$0xff] }
 0x3c2   : > { %v5182_v26 = vcombine.high %v985_v27, %v985_v27  ;;  %v2594_v44 = vmul.f32 %v7243_v52, %v2577_v32  ;;  %v5181_v56 = vcombine.low %v985_v27, %v985_v27  ;;  %v349_v46 = vpack.c.bf16 %v7248_v61, %v7248_v61  ;;  %v7254_v49 = vld [vmem:[#allocation38_spill] sm:$0xff]  ;;  %v7259_v32 = vld [vmem:[#allocation36_spill] sm:$0xff] }
 0x3c3   : > { %v3199_v4 = vsel %vm2672_vm4, %v5173_v54, 0  ;;  %v2601_v30 = vpack.c.bf16 %v2593_v35, %v2593_v35  ;;  %v3205_v14 = vsel %vm2672_vm4, %v5175_v5, 0  ;;  %v351_v31 = vpack.c.bf16 %v7249_v18, %v7249_v18  ;;  %v7255_v35 = vld [vmem:[#allocation24_spill] sm:$0xff] }
 0x3c4   : > { %v2602_v39 = vpack.c.bf16 %v2594_v44, %v2594_v44  ;;  %v2582_v55 = vpop.permute.xlu1 %2581  ;;  %v3506_v38 = vsel %vm2672_vm4, %v349_v46, 0  ;;  %v3603_v54 = vsel %vm2672_vm4, %v353_v43, 0  ;;  %v358_v27 = vpack.c.bf16 %v7255_v35, %v7255_v35  ;;  %v7260_v44 = vld [vmem:[#allocation26_spill] sm:$0xff] }
 0x3c5   : > { %5146 = vmatmul.mubr.msk.bf16.vlgmr.msra.gmra.mrb[36].mxu0 %vm1756_vm3, %v2598_v59  ;;  %5148 = vmatmul.mubr.msk.bf16.vlgmr.msra.gmra.mrb[36].mxu1 %vm1756_vm3, %v2598_v59  ;;  %v3304_v59 = vsel %vm2672_vm4, %v5181_v56, 0  ;;  %v3512_v51 = vsel %vm2672_vm4, %v351_v31, 0  ;;  %v362_v56 = vpack.c.bf16 %v7260_v44, %v7260_v44  ;;  %v7270_v31 = vld [vmem:[#allocation30_spill] sm:$0xff] }
 0x3c6   : > { %2896 = vmatpush1.bf16.msra.mxu0 %v2884_v25  ;;  %2937 = vmatpush1.bf16.msra.mxu1 %v2890_v2  ;;  %v988_v25 = vpack.i.b16 %v987_v0, %v986_v42  ;;  %v1012_v2 = vpack.i.b16 %v1011_v8, %v1010_v36  ;;  %v359_v42 = vpack.c.bf16 %v7259_v32, %v7259_v32 }
 0x3c7   : > { %2927 = vmatprep.mubr.bf16.mxu0 %v7240_v23  ;;  %2968 = vmatprep.mubr.bf16.mxu1 %v7240_v23 }
 0x3c8   : > { %5161 = vmatprep.subr.msk.bf16.mxu0 %vm2672_vm4, %v5158_v40  ;;  %5163 = vmatprep.subr.msk.bf16.mxu1 %vm2672_vm4, %v5160_v41  ;;  %v5190_v29 = vcombine.high %v988_v25, %v988_v25  ;;  %v5192_v37 = vcombine.high %v1012_v2, %v1012_v2  ;;  %v7244_v40 = vld [vmem:[#allocation11_spill] sm:$0xff]  ;;  %v5189_v21 = vcombine.low %v988_v25, %v988_v25  ;;  %v2608_v10 = vpop.permute.xlu1 %2607  ;;  %v3706_v8 = vsel %vm2672_vm4, %v359_v42, 0  ;;  %v7280_v42 = vld [vmem:[#allocation33_spill] sm:$0xff] }
 0x3c9   : > { %v2595_v41 = vmul.f32 %v7244_v40, %v2582_v55  ;;  %v5191_v19 = vcombine.low %v1012_v2, %v1012_v2  ;;  %v364_v25 = vpack.c.bf16 %v7261_v12, %v7261_v12  ;;  %v7262_v2 = vld [vmem:[#allocation14_spill] sm:$0xff] }
 0x3ca   : > { %v3409_v53 = vsel %vm2672_vm4, %v5189_v21, 0  ;;  %v7264_v55 = vld [vmem:[#allocation42_spill] sm:$0xff] }
 0x3cb   : > { %v2603_v58 = vpack.c.bf16 %v2595_v41, %v2595_v41  ;;  %v3415_v48 = vsel %vm2672_vm4, %v5191_v19, 0  ;;  %v7265_v19 = vld [vmem:[#allocation28_spill] sm:$0xff] }
 0x3cc   : > { %v2618_v52 = vpop.permute.xlu1 %2617 }
 0x3cd   : > { %5154 = vmatmul.mubr.msk.bf16.vlgmr.msra.gmra.mrb[40].mxu0 %vm1756_vm3, %v2599_v1  ;;  %5156 = vmatmul.mubr.msk.bf16.vlgmr.msra.gmra.mrb[40].mxu1 %vm1756_vm3, %v2599_v1  ;;  %v7245_v1 = vld [vmem:[#allocation20_spill] sm:$0xff] }
 0x3ce   : > { %3001 = vmatpush1.bf16.msra.mxu0 %v2989_v50  ;;  %3042 = vmatpush1.bf16.msra.mxu1 %v2995_v17  ;;  %v2587_v50 = vpop.permute.xlu0 %2586  ;;  %v350_v17 = vpack.c.bf16 %v7245_v1, %v7245_v1 }
 0x3cf   : > { %3032 = vmatprep.mubr.bf16.mxu0 %v7240_v23  ;;  %3073 = vmatprep.mubr.bf16.mxu1 %v7240_v23  ;;  %v2596_v7 = vmul.f32 %v7247_v57, %v2587_v50  ;;  %v7267_v50 = vld [vmem:[#allocation13_spill] sm:$0xff] }
 0x3d0   : > { %5169 = vmatprep.subr.msk.bf16.mxu0 %vm2672_vm4, %v5166_v15  ;;  %5171 = vmatprep.subr.msk.bf16.mxu1 %vm2672_vm4, %v5168_v60  ;;  %v7246_v15 = vld [vmem:[#allocation35_spill] sm:$0xff]  ;;  %v2628_v18 = vpop.permute.xlu1 %2627 }
 0x3d1   : > { %v352_v60 = vpack.c.bf16 %v7246_v15, %v7246_v15  ;;  %v2604_v24 = vpack.c.bf16 %v2596_v7, %v2596_v7 }
 0x3d2   : > { %v2613_v6 = vpop.permute.xlu0 %2612 }
 0x3d4   : > { %v2638_v32 = vpop.permute.xlu1 %2637 }
 0x3d5   : > { %5162 = vmatmul.mubr.msk.bf16.vlgmr.msra.gmra.mrb[44].mxu0 %vm1756_vm3, %v2600_v45  ;;  %5164 = vmatmul.mubr.msk.bf16.vlgmr.msra.gmra.mrb[44].mxu1 %vm1756_vm3, %v2600_v45  ;;  %v7252_v45 = vld [vmem:[#allocation6_spill] sm:$0xff] }
 0x3d6   : > { %3106 = vmatpush1.bf16.msra.mxu0 %v3094_v20  ;;  %3147 = vmatpush1.bf16.msra.mxu1 %v3100_v9  ;;  %v354_v20 = vpack.c.bf16 %v7250_v3, %v7250_v3  ;;  %v7251_v9 = vld [vmem:[#allocation39_spill] sm:$0xff]  ;;  %v2645_v63 = vmul.f32 %v7252_v45, %v2608_v10  ;;  %v2623_v21 = vpop.permute.xlu0 %2622  ;;  %v7272_v10 = vld [vmem:[#allocation16_spill] sm:$0xff] }
 0x3d7   : > { %3137 = vmatprep.mubr.bf16.mxu0 %v7240_v23  ;;  %3178 = vmatprep.mubr.bf16.mxu1 %v7240_v23  ;;  %v356_v47 = vpack.c.bf16 %v7251_v9, %v7251_v9  ;;  %v2648_v1 = vmul.f32 %v7267_v50, %v2623_v21  ;;  %v2649_v3 = vmul.f32 %v7272_v10, %v2628_v18 }
 0x3d8   : > { %5177 = vmatprep.subr.msk.bf16.mxu0 %vm2672_vm4, %v5174_v62  ;;  %5179 = vmatprep.subr.msk.bf16.mxu1 %vm2672_vm4, %v5176_v33  ;;  %v355_v62 = vpack.c.bf16 %v7254_v49, %v7254_v49  ;;  %v2653_v33 = vpack.c.bf16 %v2645_v63, %v2645_v63 }
 0x3d9   : > { %v2656_v7 = vpack.c.bf16 %v2648_v1, %v2648_v1  ;;  %v2657_v63 = vpack.c.bf16 %v2649_v3, %v2649_v3 }
 0x3da   : > { %v3609_v5 = vsel %vm2672_vm4, %v355_v62, 0  ;;  %v2633_v49 = vpop.permute.xlu0 %2632  ;;  %v7275_v62 = vld [vmem:[#allocation32_spill] sm:$0xff] }
 0x3dd   : > { %5170 = vmatmul.mubr.msk.bf16.vlgmr.msra.gmra.mrb[48].mxu0 %vm1756_vm3, %v2601_v30  ;;  %5172 = vmatmul.mubr.msk.bf16.vlgmr.msra.gmra.mrb[48].mxu1 %vm1756_vm3, %v2601_v30  ;;  %v7257_v30 = vld [vmem:[#allocation7_spill] sm:$0xff] }
 0x3de   : > { %3211 = vmatpush1.bf16.msra.mxu0 %v3199_v4  ;;  %3252 = vmatpush1.bf16.msra.mxu1 %v3205_v14  ;;  %v360_v4 = vpack.c.bf16 %v7256_v22, %v7256_v22  ;;  %v2646_v14 = vmul.f32 %v7257_v30, %v2613_v6  ;;  %v7277_v6 = vld [vmem:[#allocation15_spill] sm:$0xff] }
 0x3df   : > { %3242 = vmatprep.mubr.bf16.mxu0 %v7240_v23  ;;  %3283 = vmatprep.mubr.bf16.mxu1 %v7240_v23  ;;  %v2650_v35 = vmul.f32 %v7277_v6, %v2633_v49 }
 0x3e0   : > { %5185 = vmatprep.subr.msk.bf16.mxu0 %vm2672_vm4, %v5182_v26  ;;  %5187 = vmatprep.subr.msk.bf16.mxu1 %vm2672_vm4, %v5184_v11  ;;  %v7258_v26 = vld [vmem:[#allocation23_spill] sm:$0xff]  ;;  %v2654_v0 = vpack.c.bf16 %v2646_v14, %v2646_v14 }
 0x3e1   : > { %v357_v11 = vpack.c.bf16 %v7258_v26, %v7258_v26  ;;  %v2658_v14 = vpack.c.bf16 %v2650_v35, %v2650_v35 }
 0x3e3   : > { %v3700_v36 = vsel %vm2672_vm4, %v357_v11, 0 }
 0x3e5   : > { %5178 = vmatmul.mubr.msk.bf16.vlgmr.msra.gmra.mrb[52].mxu0 %vm1756_vm3, %v2602_v39  ;;  %5180 = vmatmul.mubr.msk.bf16.vlgmr.msra.gmra.mrb[52].mxu1 %vm1756_vm3, %v2602_v39  ;;  %v2647_v39 = vmul.f32 %v7262_v2, %v2618_v52  ;;  %v7282_v52 = vld [vmem:[#allocation18_spill] sm:$0xff] }
 0x3e6   : > { %3316 = vmatpush1.bf16.msra.mxu0 %v3304_v59  ;;  %3357 = vmatpush1.bf16.msra.mxu1 %v3310_v34  ;;  %v7263_v59 = vld [vmem:[#allocation25_spill] sm:$0xff]  ;;  %v2651_v44 = vmul.f32 %v7282_v52, %v2638_v32 }
 0x3e7   : > { %3347 = vmatprep.mubr.bf16.mxu0 %v7240_v23  ;;  %3388 = vmatprep.mubr.bf16.mxu1 %v7240_v23  ;;  %v361_v34 = vpack.c.bf16 %v7263_v59, %v7263_v59 }
 0x3e8   : > { %5193 = vmatprep.subr.msk.bf16.mxu0 %vm2672_vm4, %v5190_v29  ;;  %5195 = vmatprep.subr.msk.bf16.mxu1 %vm2672_vm4, %v5192_v37  ;;  %v363_v29 = vpack.c.bf16 %v7264_v55, %v7264_v55  ;;  %v2655_v37 = vpack.c.bf16 %v2647_v39, %v2647_v39  ;;  %v2659_v39 = vpack.c.bf16 %v2651_v44, %v2651_v44  ;;  %v2643_v55 = vpop.permute.xlu0 %2642 }
 0x3e9   : > { %v3797_v40 = vsel %vm2672_vm4, %v361_v34, 0 }
 0x3ea   : > { %v3803_v41 = vsel %vm2672_vm4, %v363_v29, 0  ;;  %v7284_v29 = vld [vmem:[#allocation17_spill] sm:$0xff] }
 0x3ed   : > { %5186 = vmatmul.mubr.msk.bf16.vlgmr.msra.gmra.mrb[56].mxu0 %vm1756_vm3, %v2603_v58  ;;  %5188 = vmatmul.mubr.msk.bf16.vlgmr.msra.gmra.mrb[56].mxu1 %vm1756_vm3, %v2603_v58  ;;  %v366_v58 = vpack.c.bf16 %v7265_v19, %v7265_v19 }
 0x3ee   : > { %3421 = vmatpush1.bf16.msra.mxu0 %v3409_v53  ;;  %3462 = vmatpush1.bf16.msra.mxu1 %v3415_v48  ;;  %v7266_v53 = vld [vmem:[#allocation41_spill] sm:$0xff] }
 0x3ef   : > { %3452 = vmatprep.mubr.bf16.mxu0 %v7240_v23  ;;  %3493 = vmatprep.mubr.bf16.mxu1 %v7240_v23  ;;  %v368_v48 = vpack.c.bf16 %v7266_v53, %v7266_v53 }
 0x3f0   : > { %5197 = vmatprep.subr.msk.bf16.mxu0 %vm2672_vm4, %v350_v17  ;;  %5199 = vmatprep.subr.msk.bf16.mxu1 %vm2672_vm4, %v352_v60  ;;  %v7268_v17 = vld [vmem:[#allocation27_spill] sm:$0xff]  ;;  %v7269_v60 = vld [vmem:[#allocation40_spill] sm:$0xff] }
 0x3f1   : > { %v365_v15 = vpack.c.bf16 %v7268_v17, %v7268_v17  ;;  %v367_v57 = vpack.c.bf16 %v7269_v60, %v7269_v60 }
 0x3f3   : > { %v3894_v61 = vsel %vm2672_vm4, %v365_v15, 0  ;;  %v3900_v46 = vsel %vm2672_vm4, %v367_v57, 0 }
 0x3f5   : > { %5194 = vmatmul.mubr.msk.bf16.vlgmr.msra.gmra.mrb[60].mxu0 %vm1756_vm3, %v2604_v24  ;;  %5196 = vmatmul.mubr.msk.bf16.vlgmr.msra.gmra.mrb[60].mxu1 %vm1756_vm3, %v2604_v24  ;;  %v370_v24 = vpack.c.bf16 %v7270_v31, %v7270_v31 }
 0x3f6   : > { %3518 = vmatpush1.bf16.msra.mxu0 %v3506_v38  ;;  %3559 = vmatpush1.bf16.msra.mxu1 %v3512_v51  ;;  %v7271_v38 = vld [vmem:[#allocation46_spill] sm:$0xff] }
 0x3f7   : > { %3549 = vmatprep.mubr.bf16.mxu0 %v7240_v23  ;;  %3590 = vmatprep.mubr.bf16.mxu1 %v7240_v23  ;;  %v372_v51 = vpack.c.bf16 %v7271_v38, %v7271_v38 }
 0x3f8   : > { %5201 = vmatprep.subr.msk.bf16.mxu0 %vm2672_vm4, %v354_v20  ;;  %5203 = vmatprep.subr.msk.bf16.mxu1 %vm2672_vm4, %v356_v47  ;;  %v7273_v20 = vld [vmem:[#allocation29_spill] sm:$0xff] }
 0x3f9   : > { %v369_v9 = vpack.c.bf16 %v7273_v20, %v7273_v20  ;;  %v7274_v47 = vld [vmem:[#allocation45_spill] sm:$0xff] }
 0x3fa   : > { %v371_v45 = vpack.c.bf16 %v7274_v47, %v7274_v47 }
 0x3fb   : > { %v3991_v16 = vsel %vm2672_vm4, %v369_v9, 0 }
 0x3fc   : > { %v3997_v43 = vsel %vm2672_vm4, %v371_v45, 0 }
 0x3fd   : > { %5198 = vmatmul.mubr.msk.bf16.vlgmr.msra.gmra.mrb[64].mxu0 %vm1756_vm3, %v2653_v33  ;;  %5200 = vmatmul.mubr.msk.bf16.vlgmr.msra.gmra.mrb[64].mxu1 %vm1756_vm3, %v2653_v33  ;;  %v374_v33 = vpack.c.bf16 %v7275_v62, %v7275_v62 }
 0x3fe   : > { %3615 = vmatpush1.bf16.msra.mxu0 %v3603_v54  ;;  %3656 = vmatpush1.bf16.msra.mxu1 %v3609_v5  ;;  %v7276_v54 = vld [vmem:[#allocation44_spill] sm:$0xff] }
 0x3ff   : > { %3646 = vmatprep.mubr.bf16.mxu0 %v7240_v23  ;;  %3687 = vmatprep.mubr.bf16.mxu1 %v7240_v23  ;;  %v376_v5 = vpack.c.bf16 %v7276_v54, %v7276_v54 }
 0x400   : > { %5205 = vmatprep.subr.msk.bf16.mxu0 %vm2672_vm4, %v358_v27  ;;  %5207 = vmatprep.subr.msk.bf16.mxu1 %vm2672_vm4, %v360_v4  ;;  %v7278_v27 = vld [vmem:[#allocation31_spill] sm:$0xff] }
 0x401   : > { %v373_v22 = vpack.c.bf16 %v7278_v27, %v7278_v27  ;;  %v7279_v4 = vld [vmem:[#allocation43_spill] sm:$0xff] }
 0x402   : > { %v375_v30 = vpack.c.bf16 %v7279_v4, %v7279_v4 }
 0x403   : > { %v4088_v26 = vsel %vm2672_vm4, %v373_v22, 0 }
 0x404   : > { %v4094_v11 = vsel %vm2672_vm4, %v375_v30, 0 }
 0x405   : > { %5202 = vmatmul.mubr.msk.bf16.vlgmr.msra.gmra.mrb[68].mxu0 %vm1756_vm3, %v2654_v0  ;;  %5204 = vmatmul.mubr.msk.bf16.vlgmr.msra.gmra.mrb[68].mxu1 %vm1756_vm3, %v2654_v0  ;;  %v378_v0 = vpack.c.bf16 %v7280_v42, %v7280_v42 }
 0x406   : > { %3712 = vmatpush1.bf16.msra.mxu0 %v3700_v36  ;;  %3753 = vmatpush1.bf16.msra.mxu1 %v3706_v8  ;;  %v7281_v36 = vld [vmem:[#allocation49_spill] sm:$0xff] }
 0x407   : > { %3743 = vmatprep.mubr.bf16.mxu0 %v7240_v23  ;;  %3784 = vmatprep.mubr.bf16.mxu1 %v7240_v23  ;;  %v380_v8 = vpack.c.bf16 %v7281_v36, %v7281_v36 }
 0x408   : > { %5209 = vmatprep.subr.msk.bf16.mxu0 %vm2672_vm4, %v362_v56  ;;  %5211 = vmatprep.subr.msk.bf16.mxu1 %vm2672_vm4, %v364_v25  ;;  %v5479_v56 = vld [vmem:[%s6045_s17 + $0xe0] sm:$0xff]  ;;  %v7283_v25 = vld [vmem:[#allocation47_spill] sm:$0xff] }
 0x409   : > { %v377_v12 = vpack.c.bf16 %v5479_v56, %v5479_v56  ;;  %v379_v2 = vpack.c.bf16 %v7283_v25, %v7283_v25 }
 0x40b   : > { %v4185_v59 = vsel %vm2672_vm4, %v377_v12, 0  ;;  %v4191_v34 = vsel %vm2672_vm4, %v379_v2, 0 }
 0x40d   : > { %5206 = vmatmul.mubr.msk.bf16.vlgmr.msra.gmra.mrb[72].mxu0 %vm1756_vm3, %v2655_v37  ;;  %5208 = vmatmul.mubr.msk.bf16.vlgmr.msra.gmra.mrb[72].mxu1 %vm1756_vm3, %v2655_v37  ;;  %v2652_v37 = vmul.f32 %v7284_v29, %v2643_v55 }
 0x40e   : > { %3809 = vmatpush1.bf16.msra.mxu0 %v3797_v40  ;;  %3850 = vmatpush1.bf16.msra.mxu1 %v3803_v41 }
 0x40f   : > { %3840 = vmatprep.mubr.bf16.mxu0 %v7240_v23  ;;  %3881 = vmatprep.mubr.bf16.mxu1 %v7240_v23  ;;  %v2660_v40 = vpack.c.bf16 %v2652_v37, %v2652_v37 }
 0x410   : > { %5213 = vmatprep.subr.msk.bf16.mxu0 %vm2672_vm4, %v366_v58  ;;  %5215 = vmatprep.subr.msk.bf16.mxu1 %vm2672_vm4, %v368_v48 }
 0x415   : > { %5210 = vmatmul.mubr.msk.bf16.vlgmr.msra.gmra.mrb[76].mxu0 %vm1756_vm3, %v2656_v7  ;;  %5212 = vmatmul.mubr.msk.bf16.vlgmr.msra.gmra.mrb[76].mxu1 %vm1756_vm3, %v2656_v7 }
 0x416   : > { %3906 = vmatpush1.bf16.msra.mxu0 %v3894_v61  ;;  %3947 = vmatpush1.bf16.msra.mxu1 %v3900_v46 }
 0x417   : > { %3937 = vmatprep.mubr.bf16.mxu0 %v7240_v23  ;;  %3978 = vmatprep.mubr.bf16.mxu1 %v7240_v23 }
 0x418   : > { %5217 = vmatprep.subr.msk.bf16.mxu0 %vm2672_vm4, %v370_v24  ;;  %5219 = vmatprep.subr.msk.bf16.mxu1 %vm2672_vm4, %v372_v51 }
 0x41d   : > { %5214 = vmatmul.mubr.msk.bf16.vlgmr.msra.gmra.mrb[80].mxu0 %vm1756_vm3, %v2657_v63  ;;  %5216 = vmatmul.mubr.msk.bf16.vlgmr.msra.gmra.mrb[80].mxu1 %vm1756_vm3, %v2657_v63 }
 0x41e   : > { %4003 = vmatpush1.bf16.msra.mxu0 %v3991_v16  ;;  %4044 = vmatpush1.bf16.msra.mxu1 %v3997_v43 }
 0x41f   : > { %4034 = vmatprep.mubr.bf16.mxu0 %v7240_v23  ;;  %4075 = vmatprep.mubr.bf16.mxu1 %v7240_v23 }
 0x420   : > { %5221 = vmatprep.subr.msk.bf16.mxu0 %vm2672_vm4, %v374_v33  ;;  %5223 = vmatprep.subr.msk.bf16.mxu1 %vm2672_vm4, %v376_v5 }
 0x425   : > { %5218 = vmatmul.mubr.msk.bf16.vlgmr.msra.gmra.mrb[84].mxu0 %vm1756_vm3, %v2658_v14  ;;  %5220 = vmatmul.mubr.msk.bf16.vlgmr.msra.gmra.mrb[84].mxu1 %vm1756_vm3, %v2658_v14 }
 0x426   : > { %4100 = vmatpush1.bf16.msra.mxu0 %v4088_v26  ;;  %4141 = vmatpush1.bf16.msra.mxu1 %v4094_v11 }
 0x427   : > { %4131 = vmatprep.mubr.bf16.mxu0 %v7240_v23  ;;  %4172 = vmatprep.mubr.bf16.mxu1 %v7240_v23 }
 0x428   : > { %5225 = vmatprep.subr.msk.bf16.mxu0 %vm2672_vm4, %v378_v0  ;;  %5227 = vmatprep.subr.msk.bf16.mxu1 %vm2672_vm4, %v380_v8 }
 0x42d   : > { %5222 = vmatmul.mubr.msk.bf16.vlgmr.msra.gmra.mrb[88].mxu0 %vm1756_vm3, %v2659_v39  ;;  %5224 = vmatmul.mubr.msk.bf16.vlgmr.msra.gmra.mrb[88].mxu1 %vm1756_vm3, %v2659_v39 }
 0x42e   : > { %4197 = vmatpush1.bf16.msra.mxu0 %v4185_v59  ;;  %4238 = vmatpush1.bf16.msra.mxu1 %v4191_v34 }
 0x42f   : > { %4228 = vmatprep.mubr.bf16.mxu0 %v7240_v23  ;;  %4269 = vmatprep.mubr.bf16.mxu1 %v7240_v23 }
 0x435   : > { %5226 = vmatmul.mubr.msk.bf16.vlgmr.msra.gmra.mrb[92].mxu0 %vm1756_vm3, %v2660_v40  ;;  %5228 = vmatmul.mubr.msk.bf16.vlgmr.msra.gmra.mrb[92].mxu1 %vm1756_vm3, %v2660_v40 }
 0x490   : > { %v2719_v41 = vpop.f32.mrb[32].mxu0  ;;  %v2760_v21 = vpop.f32.mrb[32].mxu1 }
 0x491   : > { %v2721_v19 = vpop.f32.mrb[33].mxu0  ;;  %v2762_v58 = vpop.f32.mrb[33].mxu1 }
 0x492   : > { %v2723_v53 = vpop.f32.mrb[34].mxu0  ;;  %v2764_v48 = vpop.f32.mrb[34].mxu1 }
 0x493   : > { %v2724_v50 = vpop.f32.mrb[35].mxu0  ;;  %v2765_v1 = vpop.f32.mrb[35].mxu1 }
 0x498   : > { %v2824_v17 = vpop.f32.mrb[36].mxu0  ;;  %v2865_v15 = vpop.f32.mrb[36].mxu1 }
 0x499   : > { %v2826_v60 = vpop.f32.mrb[37].mxu0  ;;  %v2867_v57 = vpop.f32.mrb[37].mxu1 }
 0x49a   : > { %v2828_v7 = vpop.f32.mrb[38].mxu0  ;;  %v2869_v61 = vpop.f32.mrb[38].mxu1 }
 0x49b   : > { %v2829_v23 = vpop.f32.mrb[39].mxu0  ;;  %v2870_v46 = vpop.f32.mrb[39].mxu1 }
 0x4a0   : > { %v2929_v18 = vpop.f32.mrb[40].mxu0  ;;  %v2970_v31 = vpop.f32.mrb[40].mxu1 }
 0x4a1   : > { %v4279_v24 = vcombine.low %v2719_v41, %v2929_v18  ;;  %v4280_v38 = vcombine.high %v2719_v41, %v2929_v18  ;;  %v4551_v51 = vcombine.low %v2760_v21, %v2970_v31  ;;  %v4552_v10 = vcombine.high %v2760_v21, %v2970_v31  ;;  %v2931_v3 = vpop.f32.mrb[41].mxu0  ;;  %v2972_v20 = vpop.f32.mrb[41].mxu1  ;;  %v385_v31 = vld [vmem:[%s6797_s27 + $0x20] sm:$0xff] }
 0x4a2   : > { %v4415_v9 = vcombine.low %v2721_v19, %v2931_v3  ;;  %v4416_v47 = vcombine.high %v2721_v19, %v2931_v3  ;;  %v4687_v45 = vcombine.low %v2762_v58, %v2972_v20  ;;  %v4688_v63 = vcombine.high %v2762_v58, %v2972_v20  ;;  %v2933_v16 = vpop.f32.mrb[42].mxu0  ;;  %v2974_v43 = vpop.f32.mrb[42].mxu1 }
 0x4a3   : > { %v2934_v49 = vpop.f32.mrb[43].mxu0  ;;  %v2975_v62 = vpop.f32.mrb[43].mxu1  ;;  %v6596_v33 = vrot.slane %v4279_v24, %v5665_v13  ;;  %v6599_v54 = vrot.slane %v4280_v38, %v5665_v13  ;;  %v6602_v5 = vrot.slane %v4551_v51, %v5665_v13  ;;  %v6605_v6 = vrot.slane %v4552_v10, %v5665_v13 }
 0x4a4   : > { %v6608_v35 = vrot.slane %v4415_v9, %v5665_v13  ;;  %v6611_v27 = vrot.slane %v4416_v47, %v5665_v13  ;;  %v6614_v22 = vrot.slane %v4687_v45, %v5665_v13  ;;  %v6617_v4 = vrot.slane %v4688_v63, %v5665_v13 }
 0x4a8   : > { %v3034_v30 = vpop.f32.mrb[44].mxu0  ;;  %v3075_v14 = vpop.f32.mrb[44].mxu1 }
 0x4a9   : > { %v4295_v26 = vcombine.low %v2824_v17, %v3034_v30  ;;  %v4296_v11 = vcombine.high %v2824_v17, %v3034_v30  ;;  %v4567_v32 = vcombine.low %v2865_v15, %v3075_v14  ;;  %v4568_v42 = vcombine.high %v2865_v15, %v3075_v14  ;;  %v3036_v0 = vpop.f32.mrb[45].mxu0  ;;  %v3077_v36 = vpop.f32.mrb[45].mxu1 }
 0x4aa   : > { %v4431_v8 = vcombine.low %v2826_v60, %v3036_v0  ;;  %v4432_v52 = vcombine.high %v2826_v60, %v3036_v0  ;;  %v4703_v44 = vcombine.low %v2867_v57, %v3077_v36  ;;  %v4704_v56 = vcombine.high %v2867_v57, %v3077_v36  ;;  %v3038_v12 = vpop.f32.mrb[46].mxu0  ;;  %v3079_v25 = vpop.f32.mrb[46].mxu1 }
 0x4ab   : > { %v6620_v2 = vrot.slane %v4295_v26, %v5665_v13  ;;  %v6623_v39 = vrot.slane %v4296_v11, %v5665_v13  ;;  %v6626_v59 = vrot.slane %v4567_v32, %v5665_v13  ;;  %v6629_v34 = vrot.slane %v4568_v42, %v5665_v13  ;;  %v3039_v55 = vpop.f32.mrb[47].mxu0  ;;  %v3080_v29 = vpop.f32.mrb[47].mxu1 }
 0x4ac   : > { %v4439_v37 = vrot.slane %v4431_v8, %v5665_v13  ;;  %v6633_v40 = vrot.slane %v4432_v52, %v5665_v13  ;;  %v4711_v41 = vrot.slane %v4703_v44, %v5665_v13  ;;  %v6637_v21 = vrot.slane %v4704_v56, %v5665_v13 }
 0x4ad   : > { %v4343_v19 = vcombine.low %v6596_v33, %v6620_v2  ;;  %v4344_v58 = vcombine.high %v6596_v33, %v6620_v2  ;;  %v4359_v53 = vcombine.low %v6599_v54, %v6623_v39  ;;  %v4360_v48 = vcombine.high %v6599_v54, %v6623_v39 }
 0x4ae   : > { %v4615_v50 = vcombine.low %v6602_v5, %v6626_v59  ;;  %v4616_v1 = vcombine.high %v6602_v5, %v6626_v59  ;;  %v4631_v17 = vcombine.low %v6605_v6, %v6629_v34  ;;  %v4632_v15 = vcombine.high %v6605_v6, %v6629_v34 }
 0x4af   : > { %v4479_v60 = vcombine.low %v6608_v35, %v4439_v37  ;;  %v4480_v57 = vcombine.high %v6608_v35, %v4439_v37  ;;  %v4495_v7 = vcombine.low %v6611_v27, %v6633_v40  ;;  %v4751_v23 = vcombine.low %v6614_v22, %v4711_v41 }
 0x4b0   : > { %v4752_v46 = vcombine.high %v6614_v22, %v4711_v41  ;;  %v4767_v18 = vcombine.low %v6617_v4, %v6637_v21  ;;  %v3139_v24 = vpop.f32.mrb[48].mxu0  ;;  %v3180_v38 = vpop.f32.mrb[48].mxu1  ;;  %v6676_v12 = vrot.slane %v4343_v19, %v5694_v28  ;;  %v6678_v25 = vstv %s4278_s18 }
 0x4b1   : > { %v3141_v51 = vpop.f32.mrb[49].mxu0  ;;  %v3182_v10 = vpop.f32.mrb[49].mxu1  ;;  %v6681_v2 = vrot.slane %v4615_v50, %v5694_v28  ;;  %v6684_v39 = vrot.slane %v4479_v60, %v5694_v28  ;;  %v6687_v59 = vrot.slane %v4751_v23, %v5694_v28  ;;  %v6690_v34 = vrot.slane %v4344_v58, %v5694_v28 }
 0x4b2   : > { %v3143_v3 = vpop.f32.mrb[50].mxu0  ;;  %v3184_v20 = vpop.f32.mrb[50].mxu1  ;;  %v6693_v55 = vrot.slane %v4616_v1, %v5694_v28  ;;  %v6696_v29 = vrot.slane %v4480_v57, %v5694_v28  ;;  %v6699_v37 = vrot.slane %v4752_v46, %v5694_v28  ;;  %v6702_v41 = vrot.slane %v4359_v53, %v5694_v28 }
 0x4b3   : > { %v3144_v9 = vpop.f32.mrb[51].mxu0  ;;  %v3185_v47 = vpop.f32.mrb[51].mxu1  ;;  %v6705_v19 = vrot.slane %v4631_v17, %v5694_v28  ;;  %v6708_v50 = vrot.slane %v4495_v7, %v5694_v28  ;;  %v6711_v58 = vrot.slane %v4767_v18, %v5694_v28  ;;  %v6714_v1 = vrot.slane %v4360_v48, %v5694_v28 }
 0x4b4   : > { %v6717_v60 = vrot.slane %v4632_v15, %v5694_v28 }
 0x4b8   : > { %v6667_v45 = vpop.f32.mrb[52].mxu0  ;;  %v6669_v63 = vpop.f32.mrb[52].mxu1 }
 0x4b9   : > { %v6671_v16 = vpop.f32.mrb[53].mxu0  ;;  %v6673_v43 = vpop.f32.mrb[53].mxu1 }
 0x4ba   : > { %v3248_v49 = vpop.f32.mrb[54].mxu0  ;;  %v3289_v62 = vpop.f32.mrb[54].mxu1 }
 0x4bb   : > { %v3249_v33 = vpop.f32.mrb[55].mxu0  ;;  %v3290_v54 = vpop.f32.mrb[55].mxu1 }
 0x4c0   : > { %v3349_v5 = vpop.f32.mrb[56].mxu0  ;;  %v3390_v6 = vpop.f32.mrb[56].mxu1 }
 0x4c1   : > { %v4311_v35 = vcombine.low %v3139_v24, %v3349_v5  ;;  %v4312_v22 = vcombine.high %v3139_v24, %v3349_v5  ;;  %v4583_v30 = vcombine.low %v3180_v38, %v3390_v6  ;;  %v4584_v14 = vcombine.high %v3180_v38, %v3390_v6  ;;  %v3351_v26 = vpop.f32.mrb[57].mxu0  ;;  %v3392_v11 = vpop.f32.mrb[57].mxu1 }
 0x4c2   : > { %v4447_v32 = vcombine.low %v3141_v51, %v3351_v26  ;;  %v4448_v42 = vcombine.high %v3141_v51, %v3351_v26  ;;  %v4719_v0 = vcombine.low %v3182_v10, %v3392_v11  ;;  %v4720_v36 = vcombine.high %v3182_v10, %v3392_v11  ;;  %v3353_v8 = vpop.f32.mrb[58].mxu0  ;;  %v3394_v52 = vpop.f32.mrb[58].mxu1 }
 0x4c3   : > { %v3354_v44 = vpop.f32.mrb[59].mxu0  ;;  %v3395_v56 = vpop.f32.mrb[59].mxu1  ;;  %v4319_v57 = vrot.slane %v4311_v35, %v5665_v13  ;;  %v6721_v53 = vrot.slane %v4312_v22, %v5665_v13  ;;  %v4591_v17 = vrot.slane %v4583_v30, %v5665_v13  ;;  %v6725_v23 = vrot.slane %v4584_v14, %v5665_v13 }
 0x4c4   : > { %v4455_v7 = vrot.slane %v4447_v32, %v5665_v13  ;;  %v6729_v46 = vrot.slane %v4448_v42, %v5665_v13  ;;  %v4727_v48 = vrot.slane %v4719_v0, %v5665_v13  ;;  %v6733_v15 = vrot.slane %v4720_v36, %v5665_v13 }
 0x4c8   : > { %v3454_v18 = vpop.f32.mrb[60].mxu0  ;;  %v3495_v24 = vpop.f32.mrb[60].mxu1 }
 0x4c9   : > { %v4327_v38 = vcombine.low %v6667_v45, %v3454_v18  ;;  %v4328_v51 = vcombine.high %v6667_v45, %v3454_v18  ;;  %v4599_v10 = vcombine.low %v6669_v63, %v3495_v24  ;;  %v4600_v3 = vcombine.high %v6669_v63, %v3495_v24  ;;  %v3456_v20 = vpop.f32.mrb[61].mxu0  ;;  %v3497_v9 = vpop.f32.mrb[61].mxu1 }
 0x4ca   : > { %v4463_v47 = vcombine.low %v6671_v16, %v3456_v20  ;;  %v4464_v49 = vcombine.high %v6671_v16, %v3456_v20  ;;  %v4735_v62 = vcombine.low %v6673_v43, %v3497_v9  ;;  %v4736_v33 = vcombine.high %v6673_v43, %v3497_v9  ;;  %v3458_v54 = vpop.f32.mrb[62].mxu0  ;;  %v3499_v5 = vpop.f32.mrb[62].mxu1 }
 0x4cb   : > { %v4335_v6 = vrot.slane %v4327_v38, %v5665_v13  ;;  %v6745_v45 = vrot.slane %v4328_v51, %v5665_v13  ;;  %v4607_v35 = vrot.slane %v4599_v10, %v5665_v13  ;;  %v6749_v63 = vrot.slane %v4600_v3, %v5665_v13  ;;  %v3459_v22 = vpop.f32.mrb[63].mxu0  ;;  %v3500_v30 = vpop.f32.mrb[63].mxu1 }
 0x4cc   : > { %v4471_v16 = vrot.slane %v4463_v47, %v5665_v13  ;;  %v6753_v14 = vrot.slane %v4464_v49, %v5665_v13  ;;  %v4743_v43 = vrot.slane %v4735_v62, %v5665_v13  ;;  %v6757_v26 = vrot.slane %v4736_v33, %v5665_v13 }
 0x4cd   : > { %v4375_v11 = vcombine.low %v4319_v57, %v4335_v6  ;;  %v4376_v32 = vcombine.high %v4319_v57, %v4335_v6  ;;  %v4391_v42 = vcombine.low %v6721_v53, %v6745_v45  ;;  %v4392_v0 = vcombine.high %v6721_v53, %v6745_v45 }
 0x4ce   : > { %v4647_v36 = vcombine.low %v4591_v17, %v4607_v35  ;;  %v4648_v8 = vcombine.high %v4591_v17, %v4607_v35  ;;  %v4663_v52 = vcombine.low %v6725_v23, %v6749_v63  ;;  %v4664_v44 = vcombine.high %v6725_v23, %v6749_v63 }
 0x4cf   : > { %v4511_v56 = vcombine.low %v4455_v7, %v4471_v16  ;;  %v4512_v13 = vcombine.high %v4455_v7, %v4471_v16  ;;  %v4527_v57 = vcombine.low %v6729_v46, %v6753_v14  ;;  %v4528_v18 = vcombine.high %v6729_v46, %v6753_v14 }
 0x4d0   : > { %v4783_v24 = vcombine.low %v4727_v48, %v4743_v43  ;;  %v4784_v38 = vcombine.high %v4727_v48, %v4743_v43  ;;  %v4799_v17 = vcombine.low %v6733_v15, %v6757_v26  ;;  %v3551_v10 = vpop.f32.mrb[64].mxu0  ;;  %v3592_v3 = vpop.f32.mrb[64].mxu1  ;;  %v4383_v20 = vrot.slane %v4375_v11, %v5694_v28 }
 0x4d1   : > { %v4655_v7 = vrot.slane %v4647_v36, %v5694_v28  ;;  %v3553_v9 = vpop.f32.mrb[65].mxu0  ;;  %v4519_v47 = vrot.slane %v4511_v56, %v5694_v28  ;;  %v3594_v49 = vpop.f32.mrb[65].mxu1  ;;  %v6779_v62 = vrot.slane %v4376_v32, %v5694_v28  ;;  %v6784_v5 = vrot.slane %v4648_v8, %v5694_v28 }
 0x4d2   : > { %v4791_v48 = vrot.slane %v4783_v24, %v5694_v28  ;;  %v3555_v33 = vpop.f32.mrb[66].mxu0  ;;  %v3596_v54 = vpop.f32.mrb[66].mxu1  ;;  %v6787_v6 = vrot.slane %v4512_v13, %v5694_v28  ;;  %v6790_v35 = vrot.slane %v4784_v38, %v5694_v28  ;;  %v4407_v22 = vcombine.low %v6676_v12, %v4383_v20 }
 0x4d3   : > { %v4679_v30 = vcombine.low %v6681_v2, %v4655_v7  ;;  %v4543_v16 = vcombine.low %v6684_v39, %v4519_v47  ;;  %v3556_v43 = vpop.f32.mrb[67].mxu0  ;;  %v3597_v11 = vpop.f32.mrb[67].mxu1  ;;  %v4408_v32 = vcombine.high %v6676_v12, %v4383_v20  ;;  %v4680_v8 = vcombine.high %v6681_v2, %v4655_v7  ;;  %v383_v12 = vld [vmem:[%s6797_s27 + $0x10] sm:$0xff]  ;;  %v382_v20 = vld [vmem:[%s6797_s27 + $0x8] sm:$0xff] }
 0x4d4   : > { %v4815_v36 = vcombine.low %v6687_v59, %v4791_v48  ;;  %v4544_v56 = vcombine.high %v6684_v39, %v4519_v47  ;;  %v4816_v13 = vcombine.high %v6687_v59, %v4791_v48  ;;  %v4823_v24 = vadd.f32 %v4407_v22, %v3551_v10  ;;  %v381_v43 = vld [vmem:[%s6797_s27] sm:$0xff] }
 0x4d5   : > { %v4825_v38 = vadd.f32 %v4679_v30, %v3592_v3  ;;  %v4824_v33 = vadd.f32 %v4543_v16, %v3553_v9  ;;  %v384_v9 = vld [vmem:[%s6797_s27 + $0x18] sm:$0xff]  ;;  %v4546_v16 = vcombine.high %v6696_v29, %v6787_v6  ;;  %v7286_v53 = vcombine.low %v6690_v34, %v6779_v62 }
 0x4d6   : > { %v4826_v11 = vadd.f32 %v4815_v36, %v3594_v49  ;;  %v4856_v10 = vmul.f32 %v6678_v25, %v4823_v24  ;;  %v4818_v36 = vcombine.high %v6699_v37, %v6790_v35  ;;  %v7287_v23 = vcombine.low %v6693_v55, %v6784_v5 }
 0x4d7   : > { %v4858_v3 = vmul.f32 %v6678_v25, %v4825_v38  ;;  %v4857_v7 = vmul.f32 %v6678_v25, %v4824_v33  ;;  %v7288_v14 = vcombine.high %v6611_v27, %v6633_v40 }
 0x4d8   : > { %v4859_v49 = vmul.f32 %v6678_v25, %v4826_v11  ;;  %v3648_v48 = vpop.f32.mrb[68].mxu0  ;;  %v3689_v22 = vpop.f32.mrb[68].mxu1  ;;  %v4888_v24 = vadd.f32 %v4856_v10, %v381_v43  ;;  %v387_v43 = vld [vmem:[%s6797_s27 + $0x30] sm:$0xff] }
 0x4d9   : > { %v4890_v38 = vadd.f32 %v4858_v3, %v383_v12  ;;  %v4889_v33 = vadd.f32 %v4857_v7, %v382_v20  ;;  %v4827_v59 = vadd.f32 %v4408_v32, %v3648_v48  ;;  %v3650_v47 = vpop.f32.mrb[69].mxu0  ;;  %v3691_v11 = vpop.f32.mrb[69].mxu1  ;;  %v4829_v61 = vadd.f32 %v4680_v8, %v3689_v22  ;;  %v386_v12 = vld [vmem:[%s6797_s27 + $0x28] sm:$0xff]  ;;  %v388_v20 = vld [vmem:[%s6797_s27 + $0x38] sm:$0xff] }
 0x4da   : > { %v4891_v39 = vadd.f32 %v4859_v49, %v384_v9  ;;  %v4828_v30 = vadd.f32 %v4544_v56, %v3650_v47  ;;  %v4830_v2 = vadd.f32 %v4816_v13, %v3691_v11  ;;  %v3652_v54 = vpop.f32.mrb[70].mxu0  ;;  %v3693_v51 = vpop.f32.mrb[70].mxu1  ;;  %4920 = vst [vmem:[%s6837_s7] sm:$0xff] %v4888_v24  ;;  %v6856_v56 = vrot.slane %v4663_v52, %v5694_v28 }
 0x4db   : > { %4922 = vst [vmem:[%s6837_s7 + $0x10] sm:$0xff] %v4890_v38  ;;  %4921 = vst [vmem:[%s6837_s7 + $0x8] sm:$0xff] %v4889_v33  ;;  %v4860_v32 = vmul.f32 %v6678_v25, %v4827_v59  ;;  %v3653_v10 = vpop.f32.mrb[71].mxu0  ;;  %v3694_v8 = vpop.f32.mrb[71].mxu1  ;;  %v6850_v51 = vrot.slane %v4391_v42, %v5694_v28  ;;  %v6862_v13 = vrot.slane %v4527_v57, %v5694_v28 }
 0x4dc   : > { %4923 = vst [vmem:[%s6837_s7 + $0x18] sm:$0xff] %v4891_v39  ;;  %v4862_v54 = vmul.f32 %v6678_v25, %v4829_v61  ;;  %v4861_v59 = vmul.f32 %v6678_v25, %v4828_v30  ;;  %v4863_v42 = vmul.f32 %v6678_v25, %v4830_v2  ;;  %v6872_v52 = vrot.slane %v4799_v17, %v5694_v28 }
 0x4dd   : > { %v4892_v3 = vadd.f32 %v4860_v32, %v385_v31  ;;  %v4411_v57 = vcombine.low %v6702_v41, %v6850_v51  ;;  %v4683_v61 = vcombine.low %v6705_v19, %v6856_v56  ;;  %v4547_v39 = vcombine.low %v6708_v50, %v6862_v13 }
 0x4de   : > { %v4894_v7 = vadd.f32 %v4862_v54, %v387_v43  ;;  %v4893_v2 = vadd.f32 %v4861_v59, %v386_v12  ;;  %v4895_v9 = vadd.f32 %v4863_v42, %v388_v20  ;;  %v4819_v47 = vcombine.low %v6711_v58, %v6872_v52  ;;  %v391_v43 = vld [vmem:[%s6797_s27 + $0x50] sm:$0xff]  ;;  %v390_v59 = vld [vmem:[%s6797_s27 + $0x48] sm:$0xff]  ;;  %v392_v42 = vld [vmem:[%s6797_s27 + $0x58] sm:$0xff] }
 0x4df   : > { %4924 = vst [vmem:[%s6837_s7 + $0x20] sm:$0xff] %v4892_v3  ;;  %v4412_v17 = vcombine.high %v6702_v41, %v6850_v51  ;;  %v4684_v31 = vcombine.high %v6705_v19, %v6856_v56  ;;  %v4548_v49 = vcombine.high %v6708_v50, %v6862_v13  ;;  %v4820_v48 = vcombine.high %v6711_v58, %v6872_v52 }
 0x4e0   : > { %4926 = vst [vmem:[%s6837_s7 + $0x30] sm:$0xff] %v4894_v7  ;;  %4925 = vst [vmem:[%s6837_s7 + $0x28] sm:$0xff] %v4893_v2  ;;  %v3745_v22 = vpop.f32.mrb[72].mxu0  ;;  %v3786_v30 = vpop.f32.mrb[72].mxu1  ;;  %v6898_v24 = vrot.slane %v4392_v0, %v5694_v28  ;;  %v6904_v38 = vrot.slane %v4664_v44, %v5694_v28  ;;  %v6910_v33 = vrot.slane %v4528_v18, %v5694_v28  ;;  %v389_v18 = vld [vmem:[%s6797_s27 + $0x40] sm:$0xff] }
 0x4e1   : > { %4927 = vst [vmem:[%s6837_s7 + $0x38] sm:$0xff] %v4895_v9  ;;  %v7285_v11 = vcombine.high %v6733_v15, %v6757_v26  ;;  %v4831_v45 = vadd.f32 %v7286_v53, %v3745_v22  ;;  %v4833_v63 = vadd.f32 %v7287_v23, %v3786_v30  ;;  %v3747_v0 = vpop.f32.mrb[73].mxu0  ;;  %v3788_v46 = vpop.f32.mrb[73].mxu1  ;;  %v6928_v44 = vrot.slane %v7288_v14, %v5694_v28 }
 0x4e2   : > { %v7289_v15 = vcombine.high %v6617_v4, %v6637_v21  ;;  %v7290_v12 = vcombine.low %v6696_v29, %v6787_v6  ;;  %v7291_v10 = vcombine.low %v6699_v37, %v6790_v35  ;;  %v3749_v54 = vpop.f32.mrb[74].mxu0  ;;  %v3790_v27 = vpop.f32.mrb[74].mxu1  ;;  %v4413_v40 = vcombine.low %v6714_v1, %v6898_v24 }
 0x4e3   : > { %v6916_v32 = vrot.slane %v7285_v11, %v5694_v28  ;;  %v4685_v4 = vcombine.low %v6717_v60, %v6904_v38  ;;  %v4866_v21 = vmul.f32 %v6678_v25, %v4833_v63  ;;  %v3750_v3 = vpop.f32.mrb[75].mxu0  ;;  %v3791_v7 = vpop.f32.mrb[75].mxu1  ;;  %v4549_v2 = vcombine.low %v6928_v44, %v6910_v33  ;;  %v393_v27 = vld [vmem:[%s6797_s27 + $0x60] sm:$0xff] }
 0x4e4   : > { %v6934_v26 = vrot.slane %v7289_v15, %v5694_v28  ;;  %v4832_v20 = vadd.f32 %v7290_v12, %v3747_v0  ;;  %v4834_v8 = vadd.f32 %v7291_v10, %v3788_v46  ;;  %v4864_v28 = vmul.f32 %v6678_v25, %v4831_v45  ;;  %v396_v3 = vld [vmem:[%s6797_s27 + $0x78] sm:$0xff] }
 0x4e5   : > { %v4414_v11 = vcombine.high %v6714_v1, %v6898_v24  ;;  %v4686_v53 = vcombine.high %v6717_v60, %v6904_v38  ;;  %v4898_v23 = vadd.f32 %v4866_v21, %v391_v43  ;;  %v4550_v63 = vcombine.high %v6928_v44, %v6910_v33  ;;  %v410_v38 = vld [vmem:[%s6797_s27 + $0xe8] sm:$0xff]  ;;  %v412_v33 = vld [vmem:[%s6797_s27 + $0xf8] sm:$0xff] }
 0x4e6   : > { %v4821_v9 = vcombine.low %v6934_v26, %v6916_v32  ;;  %v4865_v22 = vmul.f32 %v6678_v25, %v4832_v20  ;;  %v4867_v30 = vmul.f32 %v6678_v25, %v4834_v8  ;;  %v4896_v45 = vadd.f32 %v4864_v28, %v389_v18  ;;  %v395_v28 = vld [vmem:[%s6797_s27 + $0x70] sm:$0xff] }
 0x4e7   : > { %v4822_v0 = vcombine.high %v6934_v26, %v6916_v32  ;;  %4930 = vst [vmem:[%s6837_s7 + $0x50] sm:$0xff] %v4898_v23  ;;  %v7292_v18 = vcombine.high %v6690_v34, %v6779_v62  ;;  %v7293_v20 = vcombine.high %v6693_v55, %v6784_v5 }
 0x4e8   : > { %v4897_v46 = vadd.f32 %v4865_v22, %v390_v59  ;;  %v4899_v14 = vadd.f32 %v4867_v30, %v392_v42  ;;  %4928 = vst [vmem:[%s6837_s7 + $0x40] sm:$0xff] %v4896_v45  ;;  %v3842_v15 = vpop.f32.mrb[76].mxu0  ;;  %v3883_v12 = vpop.f32.mrb[76].mxu1  ;;  %v394_v42 = vld [vmem:[%s6797_s27 + $0x68] sm:$0xff] }
 0x4e9   : > { %v4835_v43 = vadd.f32 %v7292_v18, %v3842_v15  ;;  %v4837_v10 = vadd.f32 %v7293_v20, %v3883_v12  ;;  %v3844_v8 = vpop.f32.mrb[77].mxu0  ;;  %v3885_v54 = vpop.f32.mrb[77].mxu1  ;;  %v397_v12 = vld [vmem:[%s6797_s27 + $0x80] sm:$0xff]  ;;  %v399_v18 = vld [vmem:[%s6797_s27 + $0x90] sm:$0xff] }
 0x4ea   : > { %4929 = vst [vmem:[%s6837_s7 + $0x48] sm:$0xff] %v4897_v46  ;;  %4931 = vst [vmem:[%s6837_s7 + $0x58] sm:$0xff] %v4899_v14  ;;  %v4836_v21 = vadd.f32 %v4546_v16, %v3844_v8  ;;  %v4838_v59 = vadd.f32 %v4818_v36, %v3885_v54  ;;  %v3846_v34 = vpop.f32.mrb[78].mxu0  ;;  %v3887_v62 = vpop.f32.mrb[78].mxu1  ;;  %v398_v54 = vld [vmem:[%s6797_s27 + $0x88] sm:$0xff] }
 0x4eb   : > { %v4868_v55 = vmul.f32 %v6678_v25, %v4835_v43  ;;  %v4870_v5 = vmul.f32 %v6678_v25, %v4837_v10  ;;  %v3847_v7 = vpop.f32.mrb[79].mxu0  ;;  %v3888_v22 = vpop.f32.mrb[79].mxu1 }
 0x4ec   : > { %v4869_v29 = vmul.f32 %v6678_v25, %v4836_v21  ;;  %v4871_v37 = vmul.f32 %v6678_v25, %v4838_v59 }
 0x4ed   : > { %v4900_v6 = vadd.f32 %v4868_v55, %v393_v27  ;;  %v4902_v35 = vadd.f32 %v4870_v5, %v395_v28  ;;  %v400_v27 = vld [vmem:[%s6797_s27 + $0x98] sm:$0xff] }
 0x4ee   : > { %v4901_v16 = vadd.f32 %v4869_v29, %v394_v42  ;;  %v4903_v36 = vadd.f32 %v4871_v37, %v396_v3  ;;  %v401_v37 = vld [vmem:[%s6797_s27 + $0xa0] sm:$0xff] }
 0x4ef   : > { %4932 = vst [vmem:[%s6837_s7 + $0x60] sm:$0xff] %v4900_v6  ;;  %4934 = vst [vmem:[%s6837_s7 + $0x70] sm:$0xff] %v4902_v35  ;;  %v403_v6 = vld [vmem:[%s6797_s27 + $0xb0] sm:$0xff] }
 0x4f0   : > { %4933 = vst [vmem:[%s6837_s7 + $0x68] sm:$0xff] %v4901_v16  ;;  %4935 = vst [vmem:[%s6837_s7 + $0x78] sm:$0xff] %v4903_v36  ;;  %v3939_v30 = vpop.f32.mrb[80].mxu0  ;;  %v3980_v45 = vpop.f32.mrb[80].mxu1 }
 0x4f1   : > { %v4839_v23 = vadd.f32 %v4411_v57, %v3939_v30  ;;  %v4841_v46 = vadd.f32 %v4683_v61, %v3980_v45  ;;  %v3941_v14 = vpop.f32.mrb[81].mxu0  ;;  %v3982_v15 = vpop.f32.mrb[81].mxu1 }
 0x4f2   : > { %v4840_v43 = vadd.f32 %v4547_v39, %v3941_v14  ;;  %v4842_v20 = vadd.f32 %v4819_v47, %v3982_v15  ;;  %v3943_v10 = vpop.f32.mrb[82].mxu0  ;;  %v3984_v57 = vpop.f32.mrb[82].mxu1 }
 0x4f3   : > { %v4872_v61 = vmul.f32 %v6678_v25, %v4839_v23  ;;  %v4874_v8 = vmul.f32 %v6678_v25, %v4841_v46  ;;  %v3944_v28 = vpop.f32.mrb[83].mxu0  ;;  %v3985_v21 = vpop.f32.mrb[83].mxu1 }
 0x4f4   : > { %v4873_v39 = vmul.f32 %v6678_v25, %v4840_v43  ;;  %v4875_v59 = vmul.f32 %v6678_v25, %v4842_v20  ;;  %v407_v43 = vld [vmem:[%s6797_s27 + $0xd0] sm:$0xff] }
 0x4f5   : > { %v4904_v47 = vadd.f32 %v4872_v61, %v397_v12  ;;  %v4906_v34 = vadd.f32 %v4874_v8, %v399_v18  ;;  %v405_v18 = vld [vmem:[%s6797_s27 + $0xc0] sm:$0xff]  ;;  %v406_v8 = vld [vmem:[%s6797_s27 + $0xc8] sm:$0xff] }
 0x4f6   : > { %v4905_v62 = vadd.f32 %v4873_v39, %v398_v54  ;;  %v4907_v55 = vadd.f32 %v4875_v59, %v400_v27  ;;  %v408_v54 = vld [vmem:[%s6797_s27 + $0xd8] sm:$0xff] }
 0x4f7   : > { %4936 = vst [vmem:[%s6837_s7 + $0x80] sm:$0xff] %v4904_v47  ;;  %4938 = vst [vmem:[%s6837_s7 + $0x90] sm:$0xff] %v4906_v34 }
 0x4f8   : > { %4937 = vst [vmem:[%s6837_s7 + $0x88] sm:$0xff] %v4905_v62  ;;  %4939 = vst [vmem:[%s6837_s7 + $0x98] sm:$0xff] %v4907_v55  ;;  %v4036_v5 = vpop.f32.mrb[84].mxu0  ;;  %v4077_v42 = vpop.f32.mrb[84].mxu1 }
 0x4f9   : > { %v4843_v3 = vadd.f32 %v4412_v17, %v4036_v5  ;;  %v4845_v7 = vadd.f32 %v4684_v31, %v4077_v42  ;;  %v4038_v22 = vpop.f32.mrb[85].mxu0  ;;  %v4079_v29 = vpop.f32.mrb[85].mxu1  ;;  %v402_v17 = vld [vmem:[%s6797_s27 + $0xa8] sm:$0xff]  ;;  %v404_v31 = vld [vmem:[%s6797_s27 + $0xb8] sm:$0xff] }
 0x4fa   : > { %v4844_v35 = vadd.f32 %v4548_v49, %v4038_v22  ;;  %v4846_v16 = vadd.f32 %v4820_v48, %v4079_v29  ;;  %v4040_v41 = vpop.f32.mrb[86].mxu0  ;;  %v4081_v51 = vpop.f32.mrb[86].mxu1  ;;  %v411_v22 = vld [vmem:[%s6797_s27 + $0xf0] sm:$0xff] }
 0x4fb   : > { %v4876_v19 = vmul.f32 %v6678_v25, %v4843_v3  ;;  %v4878_v56 = vmul.f32 %v6678_v25, %v4845_v7  ;;  %v4041_v36 = vpop.f32.mrb[87].mxu0  ;;  %v4082_v30 = vpop.f32.mrb[87].mxu1  ;;  %v409_v7 = vld [vmem:[%s6797_s27 + $0xe0] sm:$0xff] }
 0x4fc   : > { %v4877_v50 = vmul.f32 %v6678_v25, %v4844_v35  ;;  %v4879_v58 = vmul.f32 %v6678_v25, %v4846_v16 }
 0x4fd   : > { %v4908_v13 = vadd.f32 %v4876_v19, %v401_v37  ;;  %v4910_v52 = vadd.f32 %v4878_v56, %v403_v6 }
 0x4fe   : > { %v4909_v49 = vadd.f32 %v4877_v50, %v402_v17  ;;  %v4911_v48 = vadd.f32 %v4879_v58, %v404_v31 }
 0x4ff   : > { %4940 = vst [vmem:[%s6837_s7 + $0xa0] sm:$0xff] %v4908_v13  ;;  %4942 = vst [vmem:[%s6837_s7 + $0xb0] sm:$0xff] %v4910_v52 }
 0x500   : > { %4941 = vst [vmem:[%s6837_s7 + $0xa8] sm:$0xff] %v4909_v49  ;;  %4943 = vst [vmem:[%s6837_s7 + $0xb8] sm:$0xff] %v4911_v48  ;;  %v4133_v45 = vpop.f32.mrb[88].mxu0  ;;  %v4174_v23 = vpop.f32.mrb[88].mxu1 }
 0x501   : > { %v4847_v46 = vadd.f32 %v4413_v40, %v4133_v45  ;;  %v4849_v14 = vadd.f32 %v4685_v4, %v4174_v23  ;;  %v4135_v15 = vpop.f32.mrb[89].mxu0  ;;  %v4176_v12 = vpop.f32.mrb[89].mxu1 }
 0x502   : > { %v4848_v20 = vadd.f32 %v4549_v2, %v4135_v15  ;;  %v4850_v10 = vadd.f32 %v4821_v9, %v4176_v12  ;;  %v4137_v57 = vpop.f32.mrb[90].mxu0  ;;  %v4178_v40 = vpop.f32.mrb[90].mxu1 }
 0x503   : > { %v4880_v4 = vmul.f32 %v6678_v25, %v4847_v46  ;;  %v4882_v61 = vmul.f32 %v6678_v25, %v4849_v14  ;;  %v4138_v27 = vpop.f32.mrb[91].mxu0  ;;  %v4179_v28 = vpop.f32.mrb[91].mxu1 }
 0x504   : > { %v4881_v2 = vmul.f32 %v6678_v25, %v4848_v20  ;;  %v4883_v21 = vmul.f32 %v6678_v25, %v4850_v10 }
 0x505   : > { %v4912_v9 = vadd.f32 %v4880_v4, %v405_v18  ;;  %v4914_v39 = vadd.f32 %v4882_v61, %v407_v43 }
 0x506   : > { %v4913_v59 = vadd.f32 %v4881_v2, %v406_v8  ;;  %v4915_v47 = vadd.f32 %v4883_v21, %v408_v54 }
 0x507   : > { %4944 = vst [vmem:[%s6837_s7 + $0xc0] sm:$0xff] %v4912_v9  ;;  %4946 = vst [vmem:[%s6837_s7 + $0xd0] sm:$0xff] %v4914_v39 }
 0x508   : > { %4945 = vst [vmem:[%s6837_s7 + $0xc8] sm:$0xff] %v4913_v59  ;;  %4947 = vst [vmem:[%s6837_s7 + $0xd8] sm:$0xff] %v4915_v47  ;;  %v4230_v34 = vpop.f32.mrb[92].mxu0  ;;  %v4271_v62 = vpop.f32.mrb[92].mxu1 }
 0x509   : > { %v4851_v55 = vadd.f32 %v4414_v11, %v4230_v34  ;;  %v4853_v5 = vadd.f32 %v4686_v53, %v4271_v62  ;;  %v4232_v42 = vpop.f32.mrb[93].mxu0  ;;  %v4273_v3 = vpop.f32.mrb[93].mxu1 }
 0x50a   : > { %v4852_v29 = vadd.f32 %v4550_v63, %v4232_v42  ;;  %v4854_v37 = vadd.f32 %v4822_v0, %v4273_v3  ;;  %v4234_v6 = vpop.f32.mrb[94].mxu0  ;;  %v4275_v1 = vpop.f32.mrb[94].mxu1 }
 0x50b   : > { %v4884_v60 = vmul.f32 %v6678_v25, %v4851_v55  ;;  %v4886_v24 = vmul.f32 %v6678_v25, %v4853_v5  ;;  %v4235_v44 = vpop.f32.mrb[95].mxu0  ;;  %v4276_v11 = vpop.f32.mrb[95].mxu1 }
 0x50c   : > { %v4885_v32 = vmul.f32 %v6678_v25, %v4852_v29  ;;  %v4887_v26 = vmul.f32 %v6678_v25, %v4854_v37 }
 0x50d   : > { %v4916_v53 = vadd.f32 %v4884_v60, %v409_v7  ;;  %v4918_v63 = vadd.f32 %v4886_v24, %v411_v22 }
 0x50e   : > { %v4917_v0 = vadd.f32 %v4885_v32, %v410_v38  ;;  %v4919_v35 = vadd.f32 %v4887_v26, %v412_v33 }
 0x50f   : > { %4948 = vst [vmem:[%s6837_s7 + $0xe0] sm:$0xff] %v4916_v53  ;;  %4950 = vst [vmem:[%s6837_s7 + $0xf0] sm:$0xff] %v4918_v63 }
 0x510   : > { %4949 = vst [vmem:[%s6837_s7 + $0xe8] sm:$0xff] %v4917_v0  ;;  %4951 = vst [vmem:[%s6837_s7 + $0xf8] sm:$0xff] %v4919_v35 }
 0x511   : > { %5493 = shalt.err (!%p5490_p3)
}
 0x512   : > { %s5494_s17 = scalar_lea.hbm %s7091_s11, 4096  ;;  %s5498_s24 = scalar_lea.hbm %s7147_s5, 8192 }
 0x513   : > { %p5495_p4 = scmp.ne.s32.totalorder %s7091_s11, %s5494_s17  ;;  %p5499_p9 = scmp.lt.u32.totalorder %s7091_s11, %s7147_s5 }
 0x514   : > { %p5500_p10 = scmp.lt.u32.totalorder %s5498_s24, %s5494_s17  ;;  %p5502_p12 = scmp.lt.u32.totalorder %s5494_s17, %s7091_s11 }
 0x515   : > { %p5496_p7 = pnand %p5495_p4, %p5623_p5 }
 0x516   : > { %p5501_p11 = por %p5500_p10, %p5499_p9 }
 0x517   : > { %p5497_p8 = pneg %p5496_p7 }
 0x518   : > { %p5503_p13 = por %p5502_p12, %p5501_p11 }
 0x51a   : > { %p5504_p0 = pnand %p5503_p13, %p5497_p8 }
 0x51c   : > { %5507 = shalt.err (!%p5504_p0)
}
 0x51d   : > { %s5550_s6 = smov 512   ;;  %s5551_s7 = smov 32  }
 0x51e   : > { %5383 = dma.vmem_to_hbm [thread:$0]  (%p5623_p5), %s7093_s9, 4096, %s7091_s11, %s7101_s12, %s5550_s6, %s5550_s6, %s5551_s7  }
 0x51f PF: > { %p5389_p1 = scmp.ge.s32.totalorder %s5542_s23, 2  ;;  %s4981_s8 = sand.u32 1, %s5530_s20  }
 0x520   : > { %s4982_s0 = scalar_lea.sflag [#allocation4], %s4981_s8 }
 0x521   : > { %p5386_p2 = pnand %p5389_p1, %p5627_p6 }
 0x523   : > { %5525 = dma.done.wait (!%p5386_p2), %s4982_s0, 4096  }
 0x524   : > { %5527 = vsyncadd (!%p5386_p2), %s4982_s0, 4294963200  ;;  %p16_p3 = scmp.ge.s32.totalorder %s5610_s25, 4   ;;  %s7294_s20 = smov %s5534_s21 }
 0x525   : > { %s7295_s21 = smov %s5538_s22  ;;  %s7296_s22 = smov %s5621_s28 }
 0x526   : > { %s7297_s23 = smov %s5610_s25  ;;  %18 = sbr.rel (!%p16_p3) target bundleno = 5 (0x5), region = 84 }
 0x52d   :  { %4987 = vsyncpa [#allocation4], 1 }
 0x52e   :  { %4989 = vsyncpa [#allocation4 + $0x1], 1 }

</bundles_post_ra>
